<compile_context>
chip_gen: v7x
topology: tpu7x:2x2x1
jax: 0.10.0
libtpu: 0.0.40
codegen_flags: <defaults>
</compile_context>

<pallas_src>
import functools

import numpy as np
import jax
import jax.numpy as jnp
from jax import lax
from jax.experimental import pallas as pl
from jax.experimental.pallas import tpu as pltpu


# ----------------------------------------------------------------------------
# Skew helper (wrapper side, tiny): (R, C, B, F) -> (R+C-1, R*B, F) with
#   diag[d, i*B + b] = grid[i, d-i, b], zeros at positions that are off the grid.
# ----------------------------------------------------------------------------
def _skew(grid_x):
    R, C, B, F = grid_x.shape
    padded = jnp.pad(grid_x, ((0, 0), (0, R), (0, 0), (0, 0)))       # (R, C+R, B, F)
    flat = padded.reshape(R * (C + R), B, F)[: R * (C + R - 1)]
    skewed = flat.reshape(R, C + R - 1, B, F)                        # skew[i, i+j] = grid[i, j]
    return jnp.transpose(skewed, (1, 0, 2, 3)).reshape(C + R - 1, R * B, F)


# ----------------------------------------------------------------------------
# The fused kernel: whole forward pass, everything in VMEM.
# ----------------------------------------------------------------------------
def _net_kernel(p1s_ref, wx1_ref, u1u_ref, u1l_ref, b1_ref,
                wx2_ref, u2u_ref, u2l_ref, b2_ref,
                w1_ref, bf1_ref, w2_ref, bf2_ref,
                out_ref,
                xp1_sc, h1_sc,
                *, batch, R1, C1, H1, R2, C2, H2):
    B = batch
    ND1 = R1 + C1 - 1
    RB1 = R1 * B

    # ------------- lstm1: hoisted input projection (one MXU matmul, bias folded in) -------
    xp1_sc[...] = (jnp.dot(p1s_ref[...], wx1_ref[...],
                           preferred_element_type=jnp.float32) + b1_ref[...])

    u1u = u1u_ref[...]                                               # (H1, 5H1)  "up" weights
    u1l = u1l_ref[...]                                               # (H1, 5H1)  "left" weights

    row_iota = lax.broadcasted_iota(jnp.int32, (RB1, H1), 0)        # hoisted masks
    is_row0 = row_iota < B

    h_prev = jnp.zeros((RB1, H1), jnp.float32)
    c_prev = jnp.zeros((RB1, H1), jnp.float32)

    # ------------- lstm1: anti-diagonal wavefront, fully unrolled (ND1 = 15 steps) --------
    for d in range(ND1):
        xp_d = xp1_sc[d * RB1:(d + 1) * RB1, :]                     # aligned (RB1, 5H1) slab
        if d == 0:
            z = xp_d
            c_up = c_prev
            c_left = c_prev
        else:
            # up-predecessor: previous diagonal shifted one grid-row down (zero at row 0);
            # left-predecessor: previous diagonal, same grid-row (zero at col 0 by invariant).
            h_up = jnp.where(is_row0, 0.0, pltpu.roll(h_prev, B, axis=0))
            c_up = jnp.where(is_row0, 0.0, pltpu.roll(c_prev, B, axis=0))
            h_left, c_left = h_prev, c_prev
            z = (xp_d
                 + jnp.dot(h_up, u1u, preferred_element_type=jnp.float32)
                 + jnp.dot(h_left, u1l, preferred_element_type=jnp.float32))

        sg = jax.nn.sigmoid(z[:, :4 * H1])                          # packed 4H gate slab
        g = jnp.tanh(z[:, 4 * H1:])
        ig = sg[:, :H1]
        fu = sg[:, H1:2 * H1]
        fl = sg[:, 2 * H1:3 * H1]
        og = sg[:, 3 * H1:]
        c_new = ig * g + fu * c_up + fl * c_left
        h_new = og * jnp.tanh(c_new)

        h1_sc[d * RB1:(d + 1) * RB1, :] = h_new                     # aligned VMEM slab store

        if d < ND1 - 1:
            # only rows holding a real cell of this diagonal update the carry; the rest
            # stay at their previous (zero) value so boundary reads remain correct.
            lo = max(d - C1 + 1, 0)
            hi = min(d, R1 - 1)
            if lo == 0 and hi == R1 - 1:
                h_prev, c_prev = h_new, c_new
            else:
                keep = (row_iota >= lo * B) & (row_iota < (hi + 1) * B)
                h_prev = jnp.where(keep, h_new, h_prev)
                c_prev = jnp.where(keep, c_new, c_prev)

    # ------------- lstm2: per-cell (4x4 grid), inputs gathered straight from VMEM ---------
    u2u = u2u_ref[...]
    u2l = u2l_ref[...]
    b2 = b2_ref[...]

    def h1_at(i1, j1):                                              # h of lstm1 cell (i1, j1)
        r0 = (i1 + j1) * RB1 + i1 * B
        return h1_sc[r0:r0 + B, :]

    zero2 = jnp.zeros((B, H2), jnp.float32)
    h2 = {}
    c2 = {}
    fc_acc = None
    for i2 in range(R2):
        for j2 in range(C2):
            # input projection: 4 source cells x split weights (no lane-dim concatenate)
            z = b2
            for k, (di, dj) in enumerate(((0, 0), (0, 1), (1, 0), (1, 1))):
                z = z + jnp.dot(h1_at(2 * i2 + di, 2 * j2 + dj), wx2_ref[k],
                                preferred_element_type=jnp.float32)
            h_up = h2.get((i2 - 1, j2))
            h_left = h2.get((i2, j2 - 1))
            if h_up is not None:
                z = z + jnp.dot(h_up, u2u, preferred_element_type=jnp.float32)
            if h_left is not None:
                z = z + jnp.dot(h_left, u2l, preferred_element_type=jnp.float32)

            sg = jax.nn.sigmoid(z[:, :4 * H2])
            g = jnp.tanh(z[:, 4 * H2:])
            ig = sg[:, :H2]
            fu = sg[:, H2:2 * H2]
            fl = sg[:, 2 * H2:3 * H2]
            og = sg[:, 3 * H2:]
            c_new = (ig * g
                     + fu * c2.get((i2 - 1, j2), zero2)
                     + fl * c2.get((i2, j2 - 1), zero2))
            h_new = og * jnp.tanh(c_new)
            h2[(i2, j2)] = h_new
            c2[(i2, j2)] = c_new

            # fold this cell's hidden state straight into fc1 (weights pre-split per cell),
            # so the (B, 320) feature vector is never materialized.
            part = jnp.dot(h_new, w1_ref[i2 * C2 + j2],
                           preferred_element_type=jnp.float32)
            fc_acc = part if fc_acc is None else fc_acc + part

    fc1 = fc_acc + bf1_ref[...]                                      # (B, 500)
    out_ref[...] = (jnp.dot(fc1, w2_ref[...], preferred_element_type=jnp.float32)
                    + bf2_ref[...])                                  # (B, 10)


# ----------------------------------------------------------------------------
# One-time parameter relayout (outside jit): fuse the 5 gate weights, split the
# lstm2 input weights per window position and fc1 weights per grid cell.
# ----------------------------------------------------------------------------
def prepare_params(params):
    def cvt(p):
        wx, uu, ul, b = p
        _, in_sz, hid = wx.shape
        return (jnp.transpose(wx, (1, 0, 2)).reshape(in_sz, 5 * hid),
                jnp.transpose(uu, (1, 0, 2)).reshape(hid, 5 * hid),
                jnp.transpose(ul, (1, 0, 2)).reshape(hid, 5 * hid),
                jnp.transpose(b, (1, 0, 2)).reshape(1, 5 * hid))

    wx1, u1u, u1l, b1 = cvt(params["lstm1"])
    wx2, u2u, u2l, b2 = cvt(params["lstm2"])
    H1 = u1u.shape[0]
    H2 = u2u.shape[0]
    w1, bf1, w2, bf2 = params["fc"]
    n_cells2 = w1.shape[0] // H2
    return dict(
        wx1=wx1, u1u=u1u, u1l=u1l, b1=b1,
        wx2=wx2.reshape(4, H1, 5 * H2),              # split by 2x2 window position
        u2u=u2u, u2l=u2l, b2=b2,
        w1=w1.reshape(n_cells2, H2, w1.shape[1]),    # split by lstm2 grid cell
        bf1=bf1, w2=w2, bf2=bf2)


# ----------------------------------------------------------------------------
# Forward: wrapper only extracts + pre-skews the 8x8 patch grid (15 KiB relayout on
# the input path); everything else runs inside the single fused kernel.
# ----------------------------------------------------------------------------
def net_forward(x, prep):
    B, Him, Wim = x.shape                          # (B, 32, 32)
    H1 = prep["u1u"].shape[0]                      # 10
    H2 = prep["u2u"].shape[0]                      # 20
    gh1, gw1 = Him // 4, Wim // 4                  # 8, 8
    gh2, gw2 = gh1 // 2, gw1 // 2                  # 4, 4
    nd1 = gh1 + gw1 - 1                            # 15
    nout = prep["w2"].shape[1]                     # 10

    p1 = (x.reshape(B, gh1, 4, gw1, 4)
            .transpose(1, 3, 0, 2, 4)
            .reshape(gh1, gw1, B, 16))
    p1s = _skew(p1).reshape(nd1 * gh1 * B, 16)     # (240, 16) anti-diagonal-major patches

    kern = functools.partial(_net_kernel, batch=B, R1=gh1, C1=gw1, H1=H1,
                             R2=gh2, C2=gw2, H2=H2)

    def fullspec(shape):
        n = len(shape)
        return pl.BlockSpec(shape, lambda i, n=n: (0,) * n)

    args = (p1s, prep["wx1"], prep["u1u"], prep["u1l"], prep["b1"],
            prep["wx2"], prep["u2u"], prep["u2l"], prep["b2"],
            prep["w1"], prep["bf1"], prep["w2"], prep["bf2"])

    return pl.pallas_call(
        kern,
        out_shape=jax.ShapeDtypeStruct((B, nout), jnp.float32),
        grid=(1,),
        in_specs=[fullspec(a.shape) for a in args],
        out_specs=fullspec((B, nout)),
        scratch_shapes=[
            pltpu.VMEM((nd1 * gh1 * B, 5 * H1), jnp.float32),   # xp1 (projected, diag-major)
            pltpu.VMEM((nd1 * gh1 * B, H1), jnp.float32),       # lstm1 hidden states
        ],
        compiler_params=pltpu.CompilerParams(dimension_semantics=("arbitrary",)),
    )(*args)


# ----------------------------------------------------------------------------
# Pure-numpy per-cell reference of the same 2-D LSTM formulation (validates the
# wavefront / skew / roll / masking machinery of the kernel).
# ----------------------------------------------------------------------------
def _lstm2d_reference(grid_in, wx, uu, ul, b):
    R, C, Bn, _ = grid_in.shape
    Hh = wx.shape[2]
    h = np.zeros((R, C, Bn, Hh), np.float32)
    c = np.zeros((R, C, Bn, Hh), np.float32)
    zero = np.zeros((Bn, Hh), np.float32)

    def sig(v):
        return 1.0 / (1.0 + np.exp(-v))

    for i in range(R):
        for j in range(C):
            hu = h[i - 1, j] if i > 0 else zero
            hl = h[i, j - 1] if j > 0 else zero
            cu = c[i - 1, j] if i > 0 else zero
            cl = c[i, j - 1] if j > 0 else zero
            zz = [grid_in[i, j] @ wx[g] + hu @ uu[g] + hl @ ul[g] + b[g]
                  for g in range(5)]
            ig, fu, fl, og = sig(zz[0]), sig(zz[1]), sig(zz[2]), sig(zz[3])
            gg = np.tanh(zz[4])
            c[i, j] = ig * gg + fu * cu + fl * cl
            h[i, j] = og * np.tanh(c[i, j])
    return h


def _reference_forward(x, params):
    x = np.asarray(x, np.float32)
    Bn, Him, Wim = x.shape
    gh1, gw1 = Him // 4, Wim // 4
    p1 = (x.reshape(Bn, gh1, 4, gw1, 4)
            .transpose(1, 3, 0, 2, 4)
            .reshape(gh1, gw1, Bn, 16))
    g1 = _lstm2d_reference(p1, *[np.asarray(a, np.float32) for a in params["lstm1"]])
    gh2, gw2 = gh1 // 2, gw1 // 2
    p2 = (g1.reshape(gh2, 2, gw2, 2, Bn, 10)
            .transpose(0, 2, 4, 1, 3, 5)
            .reshape(gh2, gw2, Bn, 40))
    g2 = _lstm2d_reference(p2, *[np.asarray(a, np.float32) for a in params["lstm2"]])
    feat = g2.transpose(2, 0, 1, 3).reshape(Bn, gh2 * gw2 * 20)
    w1, b1, w2, b2 = [np.asarray(a, np.float32) for a in params["fc"]]
    return (feat @ w1 + b1) @ w2 + b2


# ----------------------------------------------------------------------------
# Deterministic synthetic parameter init (PyTorch-style uniform fan-in scaling)
# ----------------------------------------------------------------------------
def init_params(key):
    def u(k, shape, scale):
        return jax.random.uniform(k, shape, jnp.float32, -scale, scale)

    def lstm_p(k, in_sz, hid):
        k1, k2, k3, k4 = jax.random.split(k, 4)
        s = 1.0 / np.sqrt(hid)
        return (u(k1, (5, in_sz, hid), s),
                u(k2, (5, hid, hid), s),
                u(k3, (5, hid, hid), s),
                u(k4, (5, 1, hid), s))

    def linear_p(k, in_sz, out_sz):
        k1, k2 = jax.random.split(k)
        s = 1.0 / np.sqrt(in_sz)
        return (u(k1, (in_sz, out_sz), s), u(k2, (1, out_sz), s))

    k1, k2, k3, k4 = jax.random.split(key, 4)
    return {
        "lstm1": lstm_p(k1, 4 * 4, 10),
        "lstm2": lstm_p(k2, 2 * 2 * 10, 20),
        "fc": linear_p(k3, 4 * 4 * 20, 500) + linear_p(k4, 500, 10),
    }


if __name__ == "__main__":
    key = jax.random.PRNGKey(0)
    kx, kp = jax.random.split(key)
    x = jax.random.normal(kx, (2, 32, 32), dtype=jnp.float32)   # batch=2, 32x32 image
    params = init_params(kp)
    prep = prepare_params(params)        # one-time weight relayout, outside jit

    fwd = jax.jit(net_forward)
    out = jax.block_until_ready(fwd(x, prep))

    assert out.shape == (2, 10) and out.dtype == jnp.float32
    assert bool(jnp.all(jnp.isfinite(out)))

    # validate the fused kernel against a per-cell numpy reference of the same formulation
    ref = _reference_forward(np.asarray(x), params)
    np.testing.assert_allclose(np.asarray(out), ref, rtol=2e-3, atol=2e-3)

    print("KERNEL_OK")
</pallas_src>

<mosaic_0001>
module attributes {stable_mosaic.version = 11 : i64} {
  func.func @_net_kernel(%arg0: i32, %arg1: memref<240x16xf32, #tpu.memory_space<vmem>>, %arg2: memref<16x50xf32, #tpu.memory_space<vmem>>, %arg3: memref<10x50xf32, #tpu.memory_space<vmem>>, %arg4: memref<10x50xf32, #tpu.memory_space<vmem>>, %arg5: memref<1x50xf32, #tpu.memory_space<vmem>>, %arg6: memref<4x10x100xf32, #tpu.memory_space<vmem>>, %arg7: memref<20x100xf32, #tpu.memory_space<vmem>>, %arg8: memref<20x100xf32, #tpu.memory_space<vmem>>, %arg9: memref<1x100xf32, #tpu.memory_space<vmem>>, %arg10: memref<16x20x500xf32, #tpu.memory_space<vmem>>, %arg11: memref<1x500xf32, #tpu.memory_space<vmem>>, %arg12: memref<500x10xf32, #tpu.memory_space<vmem>>, %arg13: memref<1x10xf32, #tpu.memory_space<vmem>>, %arg14: memref<2x10xf32, #tpu.memory_space<vmem>>, %arg15: memref<240x50xf32, #tpu.memory_space<vmem>>, %arg16: memref<240x10xf32, #tpu.memory_space<vmem>>) attributes {dimension_semantics = [#tpu.dimension_semantics<arbitrary>], iteration_bounds = array<i64: 1>, scalar_prefetch = 0 : i64, scratch_operands = 2 : i64, tpu.core_type = #tpu.core_type<tc>, window_params = [{pipeline_mode = #tpu.pipeline_mode<synchronous>, transform_indices = @transform_0, window_bounds = array<i64: 240, 16>}, {pipeline_mode = #tpu.pipeline_mode<synchronous>, transform_indices = @transform_1, window_bounds = array<i64: 16, 50>}, {pipeline_mode = #tpu.pipeline_mode<synchronous>, transform_indices = @transform_2, window_bounds = array<i64: 10, 50>}, {pipeline_mode = #tpu.pipeline_mode<synchronous>, transform_indices = @transform_3, window_bounds = array<i64: 10, 50>}, {pipeline_mode = #tpu.pipeline_mode<synchronous>, transform_indices = @transform_4, window_bounds = array<i64: 1, 50>}, {pipeline_mode = #tpu.pipeline_mode<synchronous>, transform_indices = @transform_5, window_bounds = array<i64: 4, 10, 100>}, {pipeline_mode = #tpu.pipeline_mode<synchronous>, transform_indices = @transform_6, window_bounds = array<i64: 20, 100>}, {pipeline_mode = #tpu.pipeline_mode<synchronous>, transform_indices = @transform_7, window_bounds = array<i64: 20, 100>}, {pipeline_mode = #tpu.pipeline_mode<synchronous>, transform_indices = @transform_8, window_bounds = array<i64: 1, 100>}, {pipeline_mode = #tpu.pipeline_mode<synchronous>, transform_indices = @transform_9, window_bounds = array<i64: 16, 20, 500>}, {pipeline_mode = #tpu.pipeline_mode<synchronous>, transform_indices = @transform_10, window_bounds = array<i64: 1, 500>}, {pipeline_mode = #tpu.pipeline_mode<synchronous>, transform_indices = @transform_11, window_bounds = array<i64: 500, 10>}, {pipeline_mode = #tpu.pipeline_mode<synchronous>, transform_indices = @transform_12, window_bounds = array<i64: 1, 10>}, {pipeline_mode = #tpu.pipeline_mode<synchronous>, transform_indices = @transform_13, window_bounds = array<i64: 2, 10>}]} {
    %c0 = arith.constant 0 : index
    %c0_0 = arith.constant 0 : index
    %0 = vector.load %arg1[%c0, %c0_0] : memref<240x16xf32, #tpu.memory_space<vmem>>, vector<240x16xf32>
    %c0_1 = arith.constant 0 : index
    %c0_2 = arith.constant 0 : index
    %1 = vector.load %arg2[%c0_1, %c0_2] : memref<16x50xf32, #tpu.memory_space<vmem>>, vector<16x50xf32>
    %cst = arith.constant dense<0.000000e+00> : vector<240x50xf32>
    %2 = tpu.matmul %0, %1, %cst {dimension_numbers = #tpu.dot_dimension_numbers<[1], [0], [0], [1], [0, 0, 1, 1], [], []>} : vector<240x16xf32>, vector<16x50xf32>, vector<240x50xf32> -> vector<240x50xf32>
    %c0_3 = arith.constant 0 : index
    %c0_4 = arith.constant 0 : index
    %3 = vector.load %arg5[%c0_3, %c0_4] : memref<1x50xf32, #tpu.memory_space<vmem>>, vector<1x50xf32>
    %4 = vector.broadcast %3 : vector<1x50xf32> to vector<240x50xf32>
    %5 = arith.addf %2, %4 : vector<240x50xf32>
    %c0_5 = arith.constant 0 : index
    %c0_6 = arith.constant 0 : index
    %6 = vector.load %arg15[%c0_5, %c0_6] : memref<240x50xf32, #tpu.memory_space<vmem>>, vector<240x50xf32>
    tpu.vector_store %arg15[%c0_5, %c0_6], %5 {strides = array<i32>} : memref<240x50xf32, #tpu.memory_space<vmem>>, vector<240x50xf32>,
    %c0_7 = arith.constant 0 : index
    %c0_8 = arith.constant 0 : index
    %7 = vector.load %arg3[%c0_7, %c0_8] : memref<10x50xf32, #tpu.memory_space<vmem>>, vector<10x50xf32>
    %c0_9 = arith.constant 0 : index
    %c0_10 = arith.constant 0 : index
    %8 = vector.load %arg4[%c0_9, %c0_10] : memref<10x50xf32, #tpu.memory_space<vmem>>, vector<10x50xf32>
    %9 = tpu.iota {dimensions = array<i32: 0>} : vector<16x10xi32>
    %c2_i32 = arith.constant 2 : i32
    %10 = vector.broadcast %c2_i32 : i32 to vector<16x10xi32>
    %11 = arith.cmpi slt, %9, %10 : vector<16x10xi32>
    %cst_11 = arith.constant 0.000000e+00 : f32
    %12 = vector.broadcast %cst_11 : f32 to vector<16x10xf32>
    %cst_12 = arith.constant 0.000000e+00 : f32
    %13 = vector.broadcast %cst_12 : f32 to vector<16x10xf32>
    %c0_13 = arith.constant 0 : index
    %c0_14 = arith.constant 0 : index
    %14 = vector.load %arg15[%c0_13, %c0_14] : memref<240x50xf32, #tpu.memory_space<vmem>>, vector<16x50xf32>
    %15 = vector.extract_strided_slice %14 {offsets = [0, 0], sizes = [16, 40], strides = [1, 1]} : vector<16x50xf32> to vector<16x40xf32>
    %16 = arith.negf %15 : vector<16x40xf32>
    %17 = math.exp %16 : vector<16x40xf32>
    %cst_15 = arith.constant 1.000000e+00 : f32
    %18 = vector.broadcast %cst_15 : f32 to vector<16x40xf32>
    %19 = arith.addf %18, %17 : vector<16x40xf32>
    %20 = arith.divf %18, %19 : vector<16x40xf32>
    %21 = vector.extract_strided_slice %14 {offsets = [0, 40], sizes = [16, 10], strides = [1, 1]} : vector<16x50xf32> to vector<16x10xf32>
    %22 = math.tanh %21 : vector<16x10xf32>
    %23 = vector.extract_strided_slice %20 {offsets = [0, 0], sizes = [16, 10], strides = [1, 1]} : vector<16x40xf32> to vector<16x10xf32>
    %24 = vector.extract_strided_slice %20 {offsets = [0, 10], sizes = [16, 10], strides = [1, 1]} : vector<16x40xf32> to vector<16x10xf32>
    %25 = vector.extract_strided_slice %20 {offsets = [0, 20], sizes = [16, 10], strides = [1, 1]} : vector<16x40xf32> to vector<16x10xf32>
    %26 = vector.extract_strided_slice %20 {offsets = [0, 30], sizes = [16, 10], strides = [1, 1]} : vector<16x40xf32> to vector<16x10xf32>
    %27 = arith.mulf %23, %22 : vector<16x10xf32>
    %28 = arith.mulf %24, %13 : vector<16x10xf32>
    %29 = arith.addf %27, %28 : vector<16x10xf32>
    %30 = arith.mulf %25, %13 : vector<16x10xf32>
    %31 = arith.addf %29, %30 : vector<16x10xf32>
    %32 = math.tanh %31 : vector<16x10xf32>
    %33 = arith.mulf %26, %32 : vector<16x10xf32>
    %c0_16 = arith.constant 0 : index
    %c0_17 = arith.constant 0 : index
    %34 = vector.load %arg16[%c0_16, %c0_17] : memref<240x10xf32, #tpu.memory_space<vmem>>, vector<16x10xf32>
    tpu.vector_store %arg16[%c0_16, %c0_17], %33 {strides = array<i32>} : memref<240x10xf32, #tpu.memory_space<vmem>>, vector<16x10xf32>,
    %c0_i32 = arith.constant 0 : i32
    %35 = vector.broadcast %c0_i32 : i32 to vector<16x10xi32>
    %36 = arith.cmpi sge, %9, %35 : vector<16x10xi32>
    %c2_i32_18 = arith.constant 2 : i32
    %37 = vector.broadcast %c2_i32_18 : i32 to vector<16x10xi32>
    %38 = arith.cmpi slt, %9, %37 : vector<16x10xi32>
    %39 = arith.andi %36, %38 : vector<16x10xi1>
    %40 = arith.select %39, %33, %12 : vector<16x10xi1>, vector<16x10xf32>
    %41 = arith.select %39, %31, %13 : vector<16x10xi1>, vector<16x10xf32>
    %c16 = arith.constant 16 : index
    %c0_19 = arith.constant 0 : index
    %42 = vector.load %arg15[%c16, %c0_19] : memref<240x50xf32, #tpu.memory_space<vmem>>, vector<16x50xf32>
    %c2_i32_20 = arith.constant 2 : i32
    %43 = tpu.dynamic_rotate %40 by %c2_i32_20 dim 0 : vector<16x10xf32>, i32 -> vector<16x10xf32>
    %cst_21 = arith.constant 0.000000e+00 : f32
    %44 = vector.broadcast %cst_21 : f32 to vector<16x10xf32>
    %45 = arith.select %11, %44, %43 : vector<16x10xi1>, vector<16x10xf32>
    %c2_i32_22 = arith.constant 2 : i32
    %46 = tpu.dynamic_rotate %41 by %c2_i32_22 dim 0 : vector<16x10xf32>, i32 -> vector<16x10xf32>
    %cst_23 = arith.constant 0.000000e+00 : f32
    %47 = vector.broadcast %cst_23 : f32 to vector<16x10xf32>
    %48 = arith.select %11, %47, %46 : vector<16x10xi1>, vector<16x10xf32>
    %cst_24 = arith.constant dense<0.000000e+00> : vector<16x50xf32>
    %49 = tpu.matmul %45, %7, %cst_24 {dimension_numbers = #tpu.dot_dimension_numbers<[1], [0], [0], [1], [0, 0, 1, 1], [], []>} : vector<16x10xf32>, vector<10x50xf32>, vector<16x50xf32> -> vector<16x50xf32>
    %50 = arith.addf %42, %49 : vector<16x50xf32>
    %cst_25 = arith.constant dense<0.000000e+00> : vector<16x50xf32>
    %51 = tpu.matmul %40, %8, %cst_25 {dimension_numbers = #tpu.dot_dimension_numbers<[1], [0], [0], [1], [0, 0, 1, 1], [], []>} : vector<16x10xf32>, vector<10x50xf32>, vector<16x50xf32> -> vector<16x50xf32>
    %52 = arith.addf %50, %51 : vector<16x50xf32>
    %53 = vector.extract_strided_slice %52 {offsets = [0, 0], sizes = [16, 40], strides = [1, 1]} : vector<16x50xf32> to vector<16x40xf32>
    %54 = arith.negf %53 : vector<16x40xf32>
    %55 = math.exp %54 : vector<16x40xf32>
    %cst_26 = arith.constant 1.000000e+00 : f32
    %56 = vector.broadcast %cst_26 : f32 to vector<16x40xf32>
    %57 = arith.addf %56, %55 : vector<16x40xf32>
    %58 = arith.divf %56, %57 : vector<16x40xf32>
    %59 = vector.extract_strided_slice %52 {offsets = [0, 40], sizes = [16, 10], strides = [1, 1]} : vector<16x50xf32> to vector<16x10xf32>
    %60 = math.tanh %59 : vector<16x10xf32>
    %61 = vector.extract_strided_slice %58 {offsets = [0, 0], sizes = [16, 10], strides = [1, 1]} : vector<16x40xf32> to vector<16x10xf32>
    %62 = vector.extract_strided_slice %58 {offsets = [0, 10], sizes = [16, 10], strides = [1, 1]} : vector<16x40xf32> to vector<16x10xf32>
    %63 = vector.extract_strided_slice %58 {offsets = [0, 20], sizes = [16, 10], strides = [1, 1]} : vector<16x40xf32> to vector<16x10xf32>
    %64 = vector.extract_strided_slice %58 {offsets = [0, 30], sizes = [16, 10], strides = [1, 1]} : vector<16x40xf32> to vector<16x10xf32>
    %65 = arith.mulf %61, %60 : vector<16x10xf32>
    %66 = arith.mulf %62, %48 : vector<16x10xf32>
    %67 = arith.addf %65, %66 : vector<16x10xf32>
    %68 = arith.mulf %63, %41 : vector<16x10xf32>
    %69 = arith.addf %67, %68 : vector<16x10xf32>
    %70 = math.tanh %69 : vector<16x10xf32>
    %71 = arith.mulf %64, %70 : vector<16x10xf32>
    %c16_27 = arith.constant 16 : index
    %c0_28 = arith.constant 0 : index
    %72 = vector.load %arg16[%c16_27, %c0_28] : memref<240x10xf32, #tpu.memory_space<vmem>>, vector<16x10xf32>
    tpu.vector_store %arg16[%c16_27, %c0_28], %71 {strides = array<i32>} : memref<240x10xf32, #tpu.memory_space<vmem>>, vector<16x10xf32>,
    %c0_i32_29 = arith.constant 0 : i32
    %73 = vector.broadcast %c0_i32_29 : i32 to vector<16x10xi32>
    %74 = arith.cmpi sge, %9, %73 : vector<16x10xi32>
    %c4_i32 = arith.constant 4 : i32
    %75 = vector.broadcast %c4_i32 : i32 to vector<16x10xi32>
    %76 = arith.cmpi slt, %9, %75 : vector<16x10xi32>
    %77 = arith.andi %74, %76 : vector<16x10xi1>
    %78 = arith.select %77, %71, %40 : vector<16x10xi1>, vector<16x10xf32>
    %79 = arith.select %77, %69, %41 : vector<16x10xi1>, vector<16x10xf32>
    %c32 = arith.constant 32 : index
    %c0_30 = arith.constant 0 : index
    %80 = vector.load %arg15[%c32, %c0_30] : memref<240x50xf32, #tpu.memory_space<vmem>>, vector<16x50xf32>
    %c2_i32_31 = arith.constant 2 : i32
    %81 = tpu.dynamic_rotate %78 by %c2_i32_31 dim 0 : vector<16x10xf32>, i32 -> vector<16x10xf32>
    %cst_32 = arith.constant 0.000000e+00 : f32
    %82 = vector.broadcast %cst_32 : f32 to vector<16x10xf32>
    %83 = arith.select %11, %82, %81 : vector<16x10xi1>, vector<16x10xf32>
    %c2_i32_33 = arith.constant 2 : i32
    %84 = tpu.dynamic_rotate %79 by %c2_i32_33 dim 0 : vector<16x10xf32>, i32 -> vector<16x10xf32>
    %cst_34 = arith.constant 0.000000e+00 : f32
    %85 = vector.broadcast %cst_34 : f32 to vector<16x10xf32>
    %86 = arith.select %11, %85, %84 : vector<16x10xi1>, vector<16x10xf32>
    %cst_35 = arith.constant dense<0.000000e+00> : vector<16x50xf32>
    %87 = tpu.matmul %83, %7, %cst_35 {dimension_numbers = #tpu.dot_dimension_numbers<[1], [0], [0], [1], [0, 0, 1, 1], [], []>} : vector<16x10xf32>, vector<10x50xf32>, vector<16x50xf32> -> vector<16x50xf32>
    %88 = arith.addf %80, %87 : vector<16x50xf32>
    %cst_36 = arith.constant dense<0.000000e+00> : vector<16x50xf32>
    %89 = tpu.matmul %78, %8, %cst_36 {dimension_numbers = #tpu.dot_dimension_numbers<[1], [0], [0], [1], [0, 0, 1, 1], [], []>} : vector<16x10xf32>, vector<10x50xf32>, vector<16x50xf32> -> vector<16x50xf32>
    %90 = arith.addf %88, %89 : vector<16x50xf32>
    %91 = vector.extract_strided_slice %90 {offsets = [0, 0], sizes = [16, 40], strides = [1, 1]} : vector<16x50xf32> to vector<16x40xf32>
    %92 = arith.negf %91 : vector<16x40xf32>
    %93 = math.exp %92 : vector<16x40xf32>
    %cst_37 = arith.constant 1.000000e+00 : f32
    %94 = vector.broadcast %cst_37 : f32 to vector<16x40xf32>
    %95 = arith.addf %94, %93 : vector<16x40xf32>
    %96 = arith.divf %94, %95 : vector<16x40xf32>
    %97 = vector.extract_strided_slice %90 {offsets = [0, 40], sizes = [16, 10], strides = [1, 1]} : vector<16x50xf32> to vector<16x10xf32>
    %98 = math.tanh %97 : vector<16x10xf32>
    %99 = vector.extract_strided_slice %96 {offsets = [0, 0], sizes = [16, 10], strides = [1, 1]} : vector<16x40xf32> to vector<16x10xf32>
    %100 = vector.extract_strided_slice %96 {offsets = [0, 10], sizes = [16, 10], strides = [1, 1]} : vector<16x40xf32> to vector<16x10xf32>
    %101 = vector.extract_strided_slice %96 {offsets = [0, 20], sizes = [16, 10], strides = [1, 1]} : vector<16x40xf32> to vector<16x10xf32>
    %102 = vector.extract_strided_slice %96 {offsets = [0, 30], sizes = [16, 10], strides = [1, 1]} : vector<16x40xf32> to vector<16x10xf32>
    %103 = arith.mulf %99, %98 : vector<16x10xf32>
    %104 = arith.mulf %100, %86 : vector<16x10xf32>
    %105 = arith.addf %103, %104 : vector<16x10xf32>
    %106 = arith.mulf %101, %79 : vector<16x10xf32>
    %107 = arith.addf %105, %106 : vector<16x10xf32>
    %108 = math.tanh %107 : vector<16x10xf32>
    %109 = arith.mulf %102, %108 : vector<16x10xf32>
    %c32_38 = arith.constant 32 : index
    %c0_39 = arith.constant 0 : index
    %110 = vector.load %arg16[%c32_38, %c0_39] : memref<240x10xf32, #tpu.memory_space<vmem>>, vector<16x10xf32>
    tpu.vector_store %arg16[%c32_38, %c0_39], %109 {strides = array<i32>} : memref<240x10xf32, #tpu.memory_space<vmem>>, vector<16x10xf32>,
    %c0_i32_40 = arith.constant 0 : i32
    %111 = vector.broadcast %c0_i32_40 : i32 to vector<16x10xi32>
    %112 = arith.cmpi sge, %9, %111 : vector<16x10xi32>
    %c6_i32 = arith.constant 6 : i32
    %113 = vector.broadcast %c6_i32 : i32 to vector<16x10xi32>
    %114 = arith.cmpi slt, %9, %113 : vector<16x10xi32>
    %115 = arith.andi %112, %114 : vector<16x10xi1>
    %116 = arith.select %115, %109, %78 : vector<16x10xi1>, vector<16x10xf32>
    %117 = arith.select %115, %107, %79 : vector<16x10xi1>, vector<16x10xf32>
    %c48 = arith.constant 48 : index
    %c0_41 = arith.constant 0 : index
    %118 = vector.load %arg15[%c48, %c0_41] : memref<240x50xf32, #tpu.memory_space<vmem>>, vector<16x50xf32>
    %c2_i32_42 = arith.constant 2 : i32
    %119 = tpu.dynamic_rotate %116 by %c2_i32_42 dim 0 : vector<16x10xf32>, i32 -> vector<16x10xf32>
    %cst_43 = arith.constant 0.000000e+00 : f32
    %120 = vector.broadcast %cst_43 : f32 to vector<16x10xf32>
    %121 = arith.select %11, %120, %119 : vector<16x10xi1>, vector<16x10xf32>
    %c2_i32_44 = arith.constant 2 : i32
    %122 = tpu.dynamic_rotate %117 by %c2_i32_44 dim 0 : vector<16x10xf32>, i32 -> vector<16x10xf32>
    %cst_45 = arith.constant 0.000000e+00 : f32
    %123 = vector.broadcast %cst_45 : f32 to vector<16x10xf32>
    %124 = arith.select %11, %123, %122 : vector<16x10xi1>, vector<16x10xf32>
    %cst_46 = arith.constant dense<0.000000e+00> : vector<16x50xf32>
    %125 = tpu.matmul %121, %7, %cst_46 {dimension_numbers = #tpu.dot_dimension_numbers<[1], [0], [0], [1], [0, 0, 1, 1], [], []>} : vector<16x10xf32>, vector<10x50xf32>, vector<16x50xf32> -> vector<16x50xf32>
    %126 = arith.addf %118, %125 : vector<16x50xf32>
    %cst_47 = arith.constant dense<0.000000e+00> : vector<16x50xf32>
    %127 = tpu.matmul %116, %8, %cst_47 {dimension_numbers = #tpu.dot_dimension_numbers<[1], [0], [0], [1], [0, 0, 1, 1], [], []>} : vector<16x10xf32>, vector<10x50xf32>, vector<16x50xf32> -> vector<16x50xf32>
    %128 = arith.addf %126, %127 : vector<16x50xf32>
    %129 = vector.extract_strided_slice %128 {offsets = [0, 0], sizes = [16, 40], strides = [1, 1]} : vector<16x50xf32> to vector<16x40xf32>
    %130 = arith.negf %129 : vector<16x40xf32>
    %131 = math.exp %130 : vector<16x40xf32>
    %cst_48 = arith.constant 1.000000e+00 : f32
    %132 = vector.broadcast %cst_48 : f32 to vector<16x40xf32>
    %133 = arith.addf %132, %131 : vector<16x40xf32>
    %134 = arith.divf %132, %133 : vector<16x40xf32>
    %135 = vector.extract_strided_slice %128 {offsets = [0, 40], sizes = [16, 10], strides = [1, 1]} : vector<16x50xf32> to vector<16x10xf32>
    %136 = math.tanh %135 : vector<16x10xf32>
    %137 = vector.extract_strided_slice %134 {offsets = [0, 0], sizes = [16, 10], strides = [1, 1]} : vector<16x40xf32> to vector<16x10xf32>
    %138 = vector.extract_strided_slice %134 {offsets = [0, 10], sizes = [16, 10], strides = [1, 1]} : vector<16x40xf32> to vector<16x10xf32>
    %139 = vector.extract_strided_slice %134 {offsets = [0, 20], sizes = [16, 10], strides = [1, 1]} : vector<16x40xf32> to vector<16x10xf32>
    %140 = vector.extract_strided_slice %134 {offsets = [0, 30], sizes = [16, 10], strides = [1, 1]} : vector<16x40xf32> to vector<16x10xf32>
    %141 = arith.mulf %137, %136 : vector<16x10xf32>
    %142 = arith.mulf %138, %124 : vector<16x10xf32>
    %143 = arith.addf %141, %142 : vector<16x10xf32>
    %144 = arith.mulf %139, %117 : vector<16x10xf32>
    %145 = arith.addf %143, %144 : vector<16x10xf32>
    %146 = math.tanh %145 : vector<16x10xf32>
    %147 = arith.mulf %140, %146 : vector<16x10xf32>
    %c48_49 = arith.constant 48 : index
    %c0_50 = arith.constant 0 : index
    %148 = vector.load %arg16[%c48_49, %c0_50] : memref<240x10xf32, #tpu.memory_space<vmem>>, vector<16x10xf32>
    tpu.vector_store %arg16[%c48_49, %c0_50], %147 {strides = array<i32>} : memref<240x10xf32, #tpu.memory_space<vmem>>, vector<16x10xf32>,
    %c0_i32_51 = arith.constant 0 : i32
    %149 = vector.broadcast %c0_i32_51 : i32 to vector<16x10xi32>
    %150 = arith.cmpi sge, %9, %149 : vector<16x10xi32>
    %c8_i32 = arith.constant 8 : i32
    %151 = vector.broadcast %c8_i32 : i32 to vector<16x10xi32>
    %152 = arith.cmpi slt, %9, %151 : vector<16x10xi32>
    %153 = arith.andi %150, %152 : vector<16x10xi1>
    %154 = arith.select %153, %147, %116 : vector<16x10xi1>, vector<16x10xf32>
    %155 = arith.select %153, %145, %117 : vector<16x10xi1>, vector<16x10xf32>
    %c64 = arith.constant 64 : index
    %c0_52 = arith.constant 0 : index
    %156 = vector.load %arg15[%c64, %c0_52] : memref<240x50xf32, #tpu.memory_space<vmem>>, vector<16x50xf32>
    %c2_i32_53 = arith.constant 2 : i32
    %157 = tpu.dynamic_rotate %154 by %c2_i32_53 dim 0 : vector<16x10xf32>, i32 -> vector<16x10xf32>
    %cst_54 = arith.constant 0.000000e+00 : f32
    %158 = vector.broadcast %cst_54 : f32 to vector<16x10xf32>
    %159 = arith.select %11, %158, %157 : vector<16x10xi1>, vector<16x10xf32>
    %c2_i32_55 = arith.constant 2 : i32
    %160 = tpu.dynamic_rotate %155 by %c2_i32_55 dim 0 : vector<16x10xf32>, i32 -> vector<16x10xf32>
    %cst_56 = arith.constant 0.000000e+00 : f32
    %161 = vector.broadcast %cst_56 : f32 to vector<16x10xf32>
    %162 = arith.select %11, %161, %160 : vector<16x10xi1>, vector<16x10xf32>
    %cst_57 = arith.constant dense<0.000000e+00> : vector<16x50xf32>
    %163 = tpu.matmul %159, %7, %cst_57 {dimension_numbers = #tpu.dot_dimension_numbers<[1], [0], [0], [1], [0, 0, 1, 1], [], []>} : vector<16x10xf32>, vector<10x50xf32>, vector<16x50xf32> -> vector<16x50xf32>
    %164 = arith.addf %156, %163 : vector<16x50xf32>
    %cst_58 = arith.constant dense<0.000000e+00> : vector<16x50xf32>
    %165 = tpu.matmul %154, %8, %cst_58 {dimension_numbers = #tpu.dot_dimension_numbers<[1], [0], [0], [1], [0, 0, 1, 1], [], []>} : vector<16x10xf32>, vector<10x50xf32>, vector<16x50xf32> -> vector<16x50xf32>
    %166 = arith.addf %164, %165 : vector<16x50xf32>
    %167 = vector.extract_strided_slice %166 {offsets = [0, 0], sizes = [16, 40], strides = [1, 1]} : vector<16x50xf32> to vector<16x40xf32>
    %168 = arith.negf %167 : vector<16x40xf32>
    %169 = math.exp %168 : vector<16x40xf32>
    %cst_59 = arith.constant 1.000000e+00 : f32
    %170 = vector.broadcast %cst_59 : f32 to vector<16x40xf32>
    %171 = arith.addf %170, %169 : vector<16x40xf32>
    %172 = arith.divf %170, %171 : vector<16x40xf32>
    %173 = vector.extract_strided_slice %166 {offsets = [0, 40], sizes = [16, 10], strides = [1, 1]} : vector<16x50xf32> to vector<16x10xf32>
    %174 = math.tanh %173 : vector<16x10xf32>
    %175 = vector.extract_strided_slice %172 {offsets = [0, 0], sizes = [16, 10], strides = [1, 1]} : vector<16x40xf32> to vector<16x10xf32>
    %176 = vector.extract_strided_slice %172 {offsets = [0, 10], sizes = [16, 10], strides = [1, 1]} : vector<16x40xf32> to vector<16x10xf32>
    %177 = vector.extract_strided_slice %172 {offsets = [0, 20], sizes = [16, 10], strides = [1, 1]} : vector<16x40xf32> to vector<16x10xf32>
    %178 = vector.extract_strided_slice %172 {offsets = [0, 30], sizes = [16, 10], strides = [1, 1]} : vector<16x40xf32> to vector<16x10xf32>
    %179 = arith.mulf %175, %174 : vector<16x10xf32>
    %180 = arith.mulf %176, %162 : vector<16x10xf32>
    %181 = arith.addf %179, %180 : vector<16x10xf32>
    %182 = arith.mulf %177, %155 : vector<16x10xf32>
    %183 = arith.addf %181, %182 : vector<16x10xf32>
    %184 = math.tanh %183 : vector<16x10xf32>
    %185 = arith.mulf %178, %184 : vector<16x10xf32>
    %c64_60 = arith.constant 64 : index
    %c0_61 = arith.constant 0 : index
    %186 = vector.load %arg16[%c64_60, %c0_61] : memref<240x10xf32, #tpu.memory_space<vmem>>, vector<16x10xf32>
    tpu.vector_store %arg16[%c64_60, %c0_61], %185 {strides = array<i32>} : memref<240x10xf32, #tpu.memory_space<vmem>>, vector<16x10xf32>,
    %c0_i32_62 = arith.constant 0 : i32
    %187 = vector.broadcast %c0_i32_62 : i32 to vector<16x10xi32>
    %188 = arith.cmpi sge, %9, %187 : vector<16x10xi32>
    %c10_i32 = arith.constant 10 : i32
    %189 = vector.broadcast %c10_i32 : i32 to vector<16x10xi32>
    %190 = arith.cmpi slt, %9, %189 : vector<16x10xi32>
    %191 = arith.andi %188, %190 : vector<16x10xi1>
    %192 = arith.select %191, %185, %154 : vector<16x10xi1>, vector<16x10xf32>
    %193 = arith.select %191, %183, %155 : vector<16x10xi1>, vector<16x10xf32>
    %c80 = arith.constant 80 : index
    %c0_63 = arith.constant 0 : index
    %194 = vector.load %arg15[%c80, %c0_63] : memref<240x50xf32, #tpu.memory_space<vmem>>, vector<16x50xf32>
    %c2_i32_64 = arith.constant 2 : i32
    %195 = tpu.dynamic_rotate %192 by %c2_i32_64 dim 0 : vector<16x10xf32>, i32 -> vector<16x10xf32>
    %cst_65 = arith.constant 0.000000e+00 : f32
    %196 = vector.broadcast %cst_65 : f32 to vector<16x10xf32>
    %197 = arith.select %11, %196, %195 : vector<16x10xi1>, vector<16x10xf32>
    %c2_i32_66 = arith.constant 2 : i32
    %198 = tpu.dynamic_rotate %193 by %c2_i32_66 dim 0 : vector<16x10xf32>, i32 -> vector<16x10xf32>
    %cst_67 = arith.constant 0.000000e+00 : f32
    %199 = vector.broadcast %cst_67 : f32 to vector<16x10xf32>
    %200 = arith.select %11, %199, %198 : vector<16x10xi1>, vector<16x10xf32>
    %cst_68 = arith.constant dense<0.000000e+00> : vector<16x50xf32>
    %201 = tpu.matmul %197, %7, %cst_68 {dimension_numbers = #tpu.dot_dimension_numbers<[1], [0], [0], [1], [0, 0, 1, 1], [], []>} : vector<16x10xf32>, vector<10x50xf32>, vector<16x50xf32> -> vector<16x50xf32>
    %202 = arith.addf %194, %201 : vector<16x50xf32>
    %cst_69 = arith.constant dense<0.000000e+00> : vector<16x50xf32>
    %203 = tpu.matmul %192, %8, %cst_69 {dimension_numbers = #tpu.dot_dimension_numbers<[1], [0], [0], [1], [0, 0, 1, 1], [], []>} : vector<16x10xf32>, vector<10x50xf32>, vector<16x50xf32> -> vector<16x50xf32>
    %204 = arith.addf %202, %203 : vector<16x50xf32>
    %205 = vector.extract_strided_slice %204 {offsets = [0, 0], sizes = [16, 40], strides = [1, 1]} : vector<16x50xf32> to vector<16x40xf32>
    %206 = arith.negf %205 : vector<16x40xf32>
    %207 = math.exp %206 : vector<16x40xf32>
    %cst_70 = arith.constant 1.000000e+00 : f32
    %208 = vector.broadcast %cst_70 : f32 to vector<16x40xf32>
    %209 = arith.addf %208, %207 : vector<16x40xf32>
    %210 = arith.divf %208, %209 : vector<16x40xf32>
    %211 = vector.extract_strided_slice %204 {offsets = [0, 40], sizes = [16, 10], strides = [1, 1]} : vector<16x50xf32> to vector<16x10xf32>
    %212 = math.tanh %211 : vector<16x10xf32>
    %213 = vector.extract_strided_slice %210 {offsets = [0, 0], sizes = [16, 10], strides = [1, 1]} : vector<16x40xf32> to vector<16x10xf32>
    %214 = vector.extract_strided_slice %210 {offsets = [0, 10], sizes = [16, 10], strides = [1, 1]} : vector<16x40xf32> to vector<16x10xf32>
    %215 = vector.extract_strided_slice %210 {offsets = [0, 20], sizes = [16, 10], strides = [1, 1]} : vector<16x40xf32> to vector<16x10xf32>
    %216 = vector.extract_strided_slice %210 {offsets = [0, 30], sizes = [16, 10], strides = [1, 1]} : vector<16x40xf32> to vector<16x10xf32>
    %217 = arith.mulf %213, %212 : vector<16x10xf32>
    %218 = arith.mulf %214, %200 : vector<16x10xf32>
    %219 = arith.addf %217, %218 : vector<16x10xf32>
    %220 = arith.mulf %215, %193 : vector<16x10xf32>
    %221 = arith.addf %219, %220 : vector<16x10xf32>
    %222 = math.tanh %221 : vector<16x10xf32>
    %223 = arith.mulf %216, %222 : vector<16x10xf32>
    %c80_71 = arith.constant 80 : index
    %c0_72 = arith.constant 0 : index
    %224 = vector.load %arg16[%c80_71, %c0_72] : memref<240x10xf32, #tpu.memory_space<vmem>>, vector<16x10xf32>
    tpu.vector_store %arg16[%c80_71, %c0_72], %223 {strides = array<i32>} : memref<240x10xf32, #tpu.memory_space<vmem>>, vector<16x10xf32>,
    %c0_i32_73 = arith.constant 0 : i32
    %225 = vector.broadcast %c0_i32_73 : i32 to vector<16x10xi32>
    %226 = arith.cmpi sge, %9, %225 : vector<16x10xi32>
    %c12_i32 = arith.constant 12 : i32
    %227 = vector.broadcast %c12_i32 : i32 to vector<16x10xi32>
    %228 = arith.cmpi slt, %9, %227 : vector<16x10xi32>
    %229 = arith.andi %226, %228 : vector<16x10xi1>
    %230 = arith.select %229, %223, %192 : vector<16x10xi1>, vector<16x10xf32>
    %231 = arith.select %229, %221, %193 : vector<16x10xi1>, vector<16x10xf32>
    %c96 = arith.constant 96 : index
    %c0_74 = arith.constant 0 : index
    %232 = vector.load %arg15[%c96, %c0_74] : memref<240x50xf32, #tpu.memory_space<vmem>>, vector<16x50xf32>
    %c2_i32_75 = arith.constant 2 : i32
    %233 = tpu.dynamic_rotate %230 by %c2_i32_75 dim 0 : vector<16x10xf32>, i32 -> vector<16x10xf32>
    %cst_76 = arith.constant 0.000000e+00 : f32
    %234 = vector.broadcast %cst_76 : f32 to vector<16x10xf32>
    %235 = arith.select %11, %234, %233 : vector<16x10xi1>, vector<16x10xf32>
    %c2_i32_77 = arith.constant 2 : i32
    %236 = tpu.dynamic_rotate %231 by %c2_i32_77 dim 0 : vector<16x10xf32>, i32 -> vector<16x10xf32>
    %cst_78 = arith.constant 0.000000e+00 : f32
    %237 = vector.broadcast %cst_78 : f32 to vector<16x10xf32>
    %238 = arith.select %11, %237, %236 : vector<16x10xi1>, vector<16x10xf32>
    %cst_79 = arith.constant dense<0.000000e+00> : vector<16x50xf32>
    %239 = tpu.matmul %235, %7, %cst_79 {dimension_numbers = #tpu.dot_dimension_numbers<[1], [0], [0], [1], [0, 0, 1, 1], [], []>} : vector<16x10xf32>, vector<10x50xf32>, vector<16x50xf32> -> vector<16x50xf32>
    %240 = arith.addf %232, %239 : vector<16x50xf32>
    %cst_80 = arith.constant dense<0.000000e+00> : vector<16x50xf32>
    %241 = tpu.matmul %230, %8, %cst_80 {dimension_numbers = #tpu.dot_dimension_numbers<[1], [0], [0], [1], [0, 0, 1, 1], [], []>} : vector<16x10xf32>, vector<10x50xf32>, vector<16x50xf32> -> vector<16x50xf32>
    %242 = arith.addf %240, %241 : vector<16x50xf32>
    %243 = vector.extract_strided_slice %242 {offsets = [0, 0], sizes = [16, 40], strides = [1, 1]} : vector<16x50xf32> to vector<16x40xf32>
    %244 = arith.negf %243 : vector<16x40xf32>
    %245 = math.exp %244 : vector<16x40xf32>
    %cst_81 = arith.constant 1.000000e+00 : f32
    %246 = vector.broadcast %cst_81 : f32 to vector<16x40xf32>
    %247 = arith.addf %246, %245 : vector<16x40xf32>
    %248 = arith.divf %246, %247 : vector<16x40xf32>
    %249 = vector.extract_strided_slice %242 {offsets = [0, 40], sizes = [16, 10], strides = [1, 1]} : vector<16x50xf32> to vector<16x10xf32>
    %250 = math.tanh %249 : vector<16x10xf32>
    %251 = vector.extract_strided_slice %248 {offsets = [0, 0], sizes = [16, 10], strides = [1, 1]} : vector<16x40xf32> to vector<16x10xf32>
    %252 = vector.extract_strided_slice %248 {offsets = [0, 10], sizes = [16, 10], strides = [1, 1]} : vector<16x40xf32> to vector<16x10xf32>
    %253 = vector.extract_strided_slice %248 {offsets = [0, 20], sizes = [16, 10], strides = [1, 1]} : vector<16x40xf32> to vector<16x10xf32>
    %254 = vector.extract_strided_slice %248 {offsets = [0, 30], sizes = [16, 10], strides = [1, 1]} : vector<16x40xf32> to vector<16x10xf32>
    %255 = arith.mulf %251, %250 : vector<16x10xf32>
    %256 = arith.mulf %252, %238 : vector<16x10xf32>
    %257 = arith.addf %255, %256 : vector<16x10xf32>
    %258 = arith.mulf %253, %231 : vector<16x10xf32>
    %259 = arith.addf %257, %258 : vector<16x10xf32>
    %260 = math.tanh %259 : vector<16x10xf32>
    %261 = arith.mulf %254, %260 : vector<16x10xf32>
    %c96_82 = arith.constant 96 : index
    %c0_83 = arith.constant 0 : index
    %262 = vector.load %arg16[%c96_82, %c0_83] : memref<240x10xf32, #tpu.memory_space<vmem>>, vector<16x10xf32>
    tpu.vector_store %arg16[%c96_82, %c0_83], %261 {strides = array<i32>} : memref<240x10xf32, #tpu.memory_space<vmem>>, vector<16x10xf32>,
    %c0_i32_84 = arith.constant 0 : i32
    %263 = vector.broadcast %c0_i32_84 : i32 to vector<16x10xi32>
    %264 = arith.cmpi sge, %9, %263 : vector<16x10xi32>
    %c14_i32 = arith.constant 14 : i32
    %265 = vector.broadcast %c14_i32 : i32 to vector<16x10xi32>
    %266 = arith.cmpi slt, %9, %265 : vector<16x10xi32>
    %267 = arith.andi %264, %266 : vector<16x10xi1>
    %268 = arith.select %267, %261, %230 : vector<16x10xi1>, vector<16x10xf32>
    %269 = arith.select %267, %259, %231 : vector<16x10xi1>, vector<16x10xf32>
    %c112 = arith.constant 112 : index
    %c0_85 = arith.constant 0 : index
    %270 = vector.load %arg15[%c112, %c0_85] : memref<240x50xf32, #tpu.memory_space<vmem>>, vector<16x50xf32>
    %c2_i32_86 = arith.constant 2 : i32
    %271 = tpu.dynamic_rotate %268 by %c2_i32_86 dim 0 : vector<16x10xf32>, i32 -> vector<16x10xf32>
    %cst_87 = arith.constant 0.000000e+00 : f32
    %272 = vector.broadcast %cst_87 : f32 to vector<16x10xf32>
    %273 = arith.select %11, %272, %271 : vector<16x10xi1>, vector<16x10xf32>
    %c2_i32_88 = arith.constant 2 : i32
    %274 = tpu.dynamic_rotate %269 by %c2_i32_88 dim 0 : vector<16x10xf32>, i32 -> vector<16x10xf32>
    %cst_89 = arith.constant 0.000000e+00 : f32
    %275 = vector.broadcast %cst_89 : f32 to vector<16x10xf32>
    %276 = arith.select %11, %275, %274 : vector<16x10xi1>, vector<16x10xf32>
    %cst_90 = arith.constant dense<0.000000e+00> : vector<16x50xf32>
    %277 = tpu.matmul %273, %7, %cst_90 {dimension_numbers = #tpu.dot_dimension_numbers<[1], [0], [0], [1], [0, 0, 1, 1], [], []>} : vector<16x10xf32>, vector<10x50xf32>, vector<16x50xf32> -> vector<16x50xf32>
    %278 = arith.addf %270, %277 : vector<16x50xf32>
    %cst_91 = arith.constant dense<0.000000e+00> : vector<16x50xf32>
    %279 = tpu.matmul %268, %8, %cst_91 {dimension_numbers = #tpu.dot_dimension_numbers<[1], [0], [0], [1], [0, 0, 1, 1], [], []>} : vector<16x10xf32>, vector<10x50xf32>, vector<16x50xf32> -> vector<16x50xf32>
    %280 = arith.addf %278, %279 : vector<16x50xf32>
    %281 = vector.extract_strided_slice %280 {offsets = [0, 0], sizes = [16, 40], strides = [1, 1]} : vector<16x50xf32> to vector<16x40xf32>
    %282 = arith.negf %281 : vector<16x40xf32>
    %283 = math.exp %282 : vector<16x40xf32>
    %cst_92 = arith.constant 1.000000e+00 : f32
    %284 = vector.broadcast %cst_92 : f32 to vector<16x40xf32>
    %285 = arith.addf %284, %283 : vector<16x40xf32>
    %286 = arith.divf %284, %285 : vector<16x40xf32>
    %287 = vector.extract_strided_slice %280 {offsets = [0, 40], sizes = [16, 10], strides = [1, 1]} : vector<16x50xf32> to vector<16x10xf32>
    %288 = math.tanh %287 : vector<16x10xf32>
    %289 = vector.extract_strided_slice %286 {offsets = [0, 0], sizes = [16, 10], strides = [1, 1]} : vector<16x40xf32> to vector<16x10xf32>
    %290 = vector.extract_strided_slice %286 {offsets = [0, 10], sizes = [16, 10], strides = [1, 1]} : vector<16x40xf32> to vector<16x10xf32>
    %291 = vector.extract_strided_slice %286 {offsets = [0, 20], sizes = [16, 10], strides = [1, 1]} : vector<16x40xf32> to vector<16x10xf32>
    %292 = vector.extract_strided_slice %286 {offsets = [0, 30], sizes = [16, 10], strides = [1, 1]} : vector<16x40xf32> to vector<16x10xf32>
    %293 = arith.mulf %289, %288 : vector<16x10xf32>
    %294 = arith.mulf %290, %276 : vector<16x10xf32>
    %295 = arith.addf %293, %294 : vector<16x10xf32>
    %296 = arith.mulf %291, %269 : vector<16x10xf32>
    %297 = arith.addf %295, %296 : vector<16x10xf32>
    %298 = math.tanh %297 : vector<16x10xf32>
    %299 = arith.mulf %292, %298 : vector<16x10xf32>
    %c112_93 = arith.constant 112 : index
    %c0_94 = arith.constant 0 : index
    %300 = vector.load %arg16[%c112_93, %c0_94] : memref<240x10xf32, #tpu.memory_space<vmem>>, vector<16x10xf32>
    tpu.vector_store %arg16[%c112_93, %c0_94], %299 {strides = array<i32>} : memref<240x10xf32, #tpu.memory_space<vmem>>, vector<16x10xf32>,
    %c128 = arith.constant 128 : index
    %c0_95 = arith.constant 0 : index
    %301 = vector.load %arg15[%c128, %c0_95] : memref<240x50xf32, #tpu.memory_space<vmem>>, vector<16x50xf32>
    %c2_i32_96 = arith.constant 2 : i32
    %302 = tpu.dynamic_rotate %299 by %c2_i32_96 dim 0 : vector<16x10xf32>, i32 -> vector<16x10xf32>
    %cst_97 = arith.constant 0.000000e+00 : f32
    %303 = vector.broadcast %cst_97 : f32 to vector<16x10xf32>
    %304 = arith.select %11, %303, %302 : vector<16x10xi1>, vector<16x10xf32>
    %c2_i32_98 = arith.constant 2 : i32
    %305 = tpu.dynamic_rotate %297 by %c2_i32_98 dim 0 : vector<16x10xf32>, i32 -> vector<16x10xf32>
    %cst_99 = arith.constant 0.000000e+00 : f32
    %306 = vector.broadcast %cst_99 : f32 to vector<16x10xf32>
    %307 = arith.select %11, %306, %305 : vector<16x10xi1>, vector<16x10xf32>
    %cst_100 = arith.constant dense<0.000000e+00> : vector<16x50xf32>
    %308 = tpu.matmul %304, %7, %cst_100 {dimension_numbers = #tpu.dot_dimension_numbers<[1], [0], [0], [1], [0, 0, 1, 1], [], []>} : vector<16x10xf32>, vector<10x50xf32>, vector<16x50xf32> -> vector<16x50xf32>
    %309 = arith.addf %301, %308 : vector<16x50xf32>
    %cst_101 = arith.constant dense<0.000000e+00> : vector<16x50xf32>
    %310 = tpu.matmul %299, %8, %cst_101 {dimension_numbers = #tpu.dot_dimension_numbers<[1], [0], [0], [1], [0, 0, 1, 1], [], []>} : vector<16x10xf32>, vector<10x50xf32>, vector<16x50xf32> -> vector<16x50xf32>
    %311 = arith.addf %309, %310 : vector<16x50xf32>
    %312 = vector.extract_strided_slice %311 {offsets = [0, 0], sizes = [16, 40], strides = [1, 1]} : vector<16x50xf32> to vector<16x40xf32>
    %313 = arith.negf %312 : vector<16x40xf32>
    %314 = math.exp %313 : vector<16x40xf32>
    %cst_102 = arith.constant 1.000000e+00 : f32
    %315 = vector.broadcast %cst_102 : f32 to vector<16x40xf32>
    %316 = arith.addf %315, %314 : vector<16x40xf32>
    %317 = arith.divf %315, %316 : vector<16x40xf32>
    %318 = vector.extract_strided_slice %311 {offsets = [0, 40], sizes = [16, 10], strides = [1, 1]} : vector<16x50xf32> to vector<16x10xf32>
    %319 = math.tanh %318 : vector<16x10xf32>
    %320 = vector.extract_strided_slice %317 {offsets = [0, 0], sizes = [16, 10], strides = [1, 1]} : vector<16x40xf32> to vector<16x10xf32>
    %321 = vector.extract_strided_slice %317 {offsets = [0, 10], sizes = [16, 10], strides = [1, 1]} : vector<16x40xf32> to vector<16x10xf32>
    %322 = vector.extract_strided_slice %317 {offsets = [0, 20], sizes = [16, 10], strides = [1, 1]} : vector<16x40xf32> to vector<16x10xf32>
    %323 = vector.extract_strided_slice %317 {offsets = [0, 30], sizes = [16, 10], strides = [1, 1]} : vector<16x40xf32> to vector<16x10xf32>
    %324 = arith.mulf %320, %319 : vector<16x10xf32>
    %325 = arith.mulf %321, %307 : vector<16x10xf32>
    %326 = arith.addf %324, %325 : vector<16x10xf32>
    %327 = arith.mulf %322, %297 : vector<16x10xf32>
    %328 = arith.addf %326, %327 : vector<16x10xf32>
    %329 = math.tanh %328 : vector<16x10xf32>
    %330 = arith.mulf %323, %329 : vector<16x10xf32>
    %c128_103 = arith.constant 128 : index
    %c0_104 = arith.constant 0 : index
    %331 = vector.load %arg16[%c128_103, %c0_104] : memref<240x10xf32, #tpu.memory_space<vmem>>, vector<16x10xf32>
    tpu.vector_store %arg16[%c128_103, %c0_104], %330 {strides = array<i32>} : memref<240x10xf32, #tpu.memory_space<vmem>>, vector<16x10xf32>,
    %c2_i32_105 = arith.constant 2 : i32
    %332 = vector.broadcast %c2_i32_105 : i32 to vector<16x10xi32>
    %333 = arith.cmpi sge, %9, %332 : vector<16x10xi32>
    %c16_i32 = arith.constant 16 : i32
    %334 = vector.broadcast %c16_i32 : i32 to vector<16x10xi32>
    %335 = arith.cmpi slt, %9, %334 : vector<16x10xi32>
    %336 = arith.andi %333, %335 : vector<16x10xi1>
    %337 = arith.select %336, %330, %299 : vector<16x10xi1>, vector<16x10xf32>
    %338 = arith.select %336, %328, %297 : vector<16x10xi1>, vector<16x10xf32>
    %c144 = arith.constant 144 : index
    %c0_106 = arith.constant 0 : index
    %339 = vector.load %arg15[%c144, %c0_106] : memref<240x50xf32, #tpu.memory_space<vmem>>, vector<16x50xf32>
    %c2_i32_107 = arith.constant 2 : i32
    %340 = tpu.dynamic_rotate %337 by %c2_i32_107 dim 0 : vector<16x10xf32>, i32 -> vector<16x10xf32>
    %cst_108 = arith.constant 0.000000e+00 : f32
    %341 = vector.broadcast %cst_108 : f32 to vector<16x10xf32>
    %342 = arith.select %11, %341, %340 : vector<16x10xi1>, vector<16x10xf32>
    %c2_i32_109 = arith.constant 2 : i32
    %343 = tpu.dynamic_rotate %338 by %c2_i32_109 dim 0 : vector<16x10xf32>, i32 -> vector<16x10xf32>
    %cst_110 = arith.constant 0.000000e+00 : f32
    %344 = vector.broadcast %cst_110 : f32 to vector<16x10xf32>
    %345 = arith.select %11, %344, %343 : vector<16x10xi1>, vector<16x10xf32>
    %cst_111 = arith.constant dense<0.000000e+00> : vector<16x50xf32>
    %346 = tpu.matmul %342, %7, %cst_111 {dimension_numbers = #tpu.dot_dimension_numbers<[1], [0], [0], [1], [0, 0, 1, 1], [], []>} : vector<16x10xf32>, vector<10x50xf32>, vector<16x50xf32> -> vector<16x50xf32>
    %347 = arith.addf %339, %346 : vector<16x50xf32>
    %cst_112 = arith.constant dense<0.000000e+00> : vector<16x50xf32>
    %348 = tpu.matmul %337, %8, %cst_112 {dimension_numbers = #tpu.dot_dimension_numbers<[1], [0], [0], [1], [0, 0, 1, 1], [], []>} : vector<16x10xf32>, vector<10x50xf32>, vector<16x50xf32> -> vector<16x50xf32>
    %349 = arith.addf %347, %348 : vector<16x50xf32>
    %350 = vector.extract_strided_slice %349 {offsets = [0, 0], sizes = [16, 40], strides = [1, 1]} : vector<16x50xf32> to vector<16x40xf32>
    %351 = arith.negf %350 : vector<16x40xf32>
    %352 = math.exp %351 : vector<16x40xf32>
    %cst_113 = arith.constant 1.000000e+00 : f32
    %353 = vector.broadcast %cst_113 : f32 to vector<16x40xf32>
    %354 = arith.addf %353, %352 : vector<16x40xf32>
    %355 = arith.divf %353, %354 : vector<16x40xf32>
    %356 = vector.extract_strided_slice %349 {offsets = [0, 40], sizes = [16, 10], strides = [1, 1]} : vector<16x50xf32> to vector<16x10xf32>
    %357 = math.tanh %356 : vector<16x10xf32>
    %358 = vector.extract_strided_slice %355 {offsets = [0, 0], sizes = [16, 10], strides = [1, 1]} : vector<16x40xf32> to vector<16x10xf32>
    %359 = vector.extract_strided_slice %355 {offsets = [0, 10], sizes = [16, 10], strides = [1, 1]} : vector<16x40xf32> to vector<16x10xf32>
    %360 = vector.extract_strided_slice %355 {offsets = [0, 20], sizes = [16, 10], strides = [1, 1]} : vector<16x40xf32> to vector<16x10xf32>
    %361 = vector.extract_strided_slice %355 {offsets = [0, 30], sizes = [16, 10], strides = [1, 1]} : vector<16x40xf32> to vector<16x10xf32>
    %362 = arith.mulf %358, %357 : vector<16x10xf32>
    %363 = arith.mulf %359, %345 : vector<16x10xf32>
    %364 = arith.addf %362, %363 : vector<16x10xf32>
    %365 = arith.mulf %360, %338 : vector<16x10xf32>
    %366 = arith.addf %364, %365 : vector<16x10xf32>
    %367 = math.tanh %366 : vector<16x10xf32>
    %368 = arith.mulf %361, %367 : vector<16x10xf32>
    %c144_114 = arith.constant 144 : index
    %c0_115 = arith.constant 0 : index
    %369 = vector.load %arg16[%c144_114, %c0_115] : memref<240x10xf32, #tpu.memory_space<vmem>>, vector<16x10xf32>
    tpu.vector_store %arg16[%c144_114, %c0_115], %368 {strides = array<i32>} : memref<240x10xf32, #tpu.memory_space<vmem>>, vector<16x10xf32>,
    %c4_i32_116 = arith.constant 4 : i32
    %370 = vector.broadcast %c4_i32_116 : i32 to vector<16x10xi32>
    %371 = arith.cmpi sge, %9, %370 : vector<16x10xi32>
    %c16_i32_117 = arith.constant 16 : i32
    %372 = vector.broadcast %c16_i32_117 : i32 to vector<16x10xi32>
    %373 = arith.cmpi slt, %9, %372 : vector<16x10xi32>
    %374 = arith.andi %371, %373 : vector<16x10xi1>
    %375 = arith.select %374, %368, %337 : vector<16x10xi1>, vector<16x10xf32>
    %376 = arith.select %374, %366, %338 : vector<16x10xi1>, vector<16x10xf32>
    %c160 = arith.constant 160 : index
    %c0_118 = arith.constant 0 : index
    %377 = vector.load %arg15[%c160, %c0_118] : memref<240x50xf32, #tpu.memory_space<vmem>>, vector<16x50xf32>
    %c2_i32_119 = arith.constant 2 : i32
    %378 = tpu.dynamic_rotate %375 by %c2_i32_119 dim 0 : vector<16x10xf32>, i32 -> vector<16x10xf32>
    %cst_120 = arith.constant 0.000000e+00 : f32
    %379 = vector.broadcast %cst_120 : f32 to vector<16x10xf32>
    %380 = arith.select %11, %379, %378 : vector<16x10xi1>, vector<16x10xf32>
    %c2_i32_121 = arith.constant 2 : i32
    %381 = tpu.dynamic_rotate %376 by %c2_i32_121 dim 0 : vector<16x10xf32>, i32 -> vector<16x10xf32>
    %cst_122 = arith.constant 0.000000e+00 : f32
    %382 = vector.broadcast %cst_122 : f32 to vector<16x10xf32>
    %383 = arith.select %11, %382, %381 : vector<16x10xi1>, vector<16x10xf32>
    %cst_123 = arith.constant dense<0.000000e+00> : vector<16x50xf32>
    %384 = tpu.matmul %380, %7, %cst_123 {dimension_numbers = #tpu.dot_dimension_numbers<[1], [0], [0], [1], [0, 0, 1, 1], [], []>} : vector<16x10xf32>, vector<10x50xf32>, vector<16x50xf32> -> vector<16x50xf32>
    %385 = arith.addf %377, %384 : vector<16x50xf32>
    %cst_124 = arith.constant dense<0.000000e+00> : vector<16x50xf32>
    %386 = tpu.matmul %375, %8, %cst_124 {dimension_numbers = #tpu.dot_dimension_numbers<[1], [0], [0], [1], [0, 0, 1, 1], [], []>} : vector<16x10xf32>, vector<10x50xf32>, vector<16x50xf32> -> vector<16x50xf32>
    %387 = arith.addf %385, %386 : vector<16x50xf32>
    %388 = vector.extract_strided_slice %387 {offsets = [0, 0], sizes = [16, 40], strides = [1, 1]} : vector<16x50xf32> to vector<16x40xf32>
    %389 = arith.negf %388 : vector<16x40xf32>
    %390 = math.exp %389 : vector<16x40xf32>
    %cst_125 = arith.constant 1.000000e+00 : f32
    %391 = vector.broadcast %cst_125 : f32 to vector<16x40xf32>
    %392 = arith.addf %391, %390 : vector<16x40xf32>
    %393 = arith.divf %391, %392 : vector<16x40xf32>
    %394 = vector.extract_strided_slice %387 {offsets = [0, 40], sizes = [16, 10], strides = [1, 1]} : vector<16x50xf32> to vector<16x10xf32>
    %395 = math.tanh %394 : vector<16x10xf32>
    %396 = vector.extract_strided_slice %393 {offsets = [0, 0], sizes = [16, 10], strides = [1, 1]} : vector<16x40xf32> to vector<16x10xf32>
    %397 = vector.extract_strided_slice %393 {offsets = [0, 10], sizes = [16, 10], strides = [1, 1]} : vector<16x40xf32> to vector<16x10xf32>
    %398 = vector.extract_strided_slice %393 {offsets = [0, 20], sizes = [16, 10], strides = [1, 1]} : vector<16x40xf32> to vector<16x10xf32>
    %399 = vector.extract_strided_slice %393 {offsets = [0, 30], sizes = [16, 10], strides = [1, 1]} : vector<16x40xf32> to vector<16x10xf32>
    %400 = arith.mulf %396, %395 : vector<16x10xf32>
    %401 = arith.mulf %397, %383 : vector<16x10xf32>
    %402 = arith.addf %400, %401 : vector<16x10xf32>
    %403 = arith.mulf %398, %376 : vector<16x10xf32>
    %404 = arith.addf %402, %403 : vector<16x10xf32>
    %405 = math.tanh %404 : vector<16x10xf32>
    %406 = arith.mulf %399, %405 : vector<16x10xf32>
    %c160_126 = arith.constant 160 : index
    %c0_127 = arith.constant 0 : index
    %407 = vector.load %arg16[%c160_126, %c0_127] : memref<240x10xf32, #tpu.memory_space<vmem>>, vector<16x10xf32>
    tpu.vector_store %arg16[%c160_126, %c0_127], %406 {strides = array<i32>} : memref<240x10xf32, #tpu.memory_space<vmem>>, vector<16x10xf32>,
    %c6_i32_128 = arith.constant 6 : i32
    %408 = vector.broadcast %c6_i32_128 : i32 to vector<16x10xi32>
    %409 = arith.cmpi sge, %9, %408 : vector<16x10xi32>
    %c16_i32_129 = arith.constant 16 : i32
    %410 = vector.broadcast %c16_i32_129 : i32 to vector<16x10xi32>
    %411 = arith.cmpi slt, %9, %410 : vector<16x10xi32>
    %412 = arith.andi %409, %411 : vector<16x10xi1>
    %413 = arith.select %412, %406, %375 : vector<16x10xi1>, vector<16x10xf32>
    %414 = arith.select %412, %404, %376 : vector<16x10xi1>, vector<16x10xf32>
    %c176 = arith.constant 176 : index
    %c0_130 = arith.constant 0 : index
    %415 = vector.load %arg15[%c176, %c0_130] : memref<240x50xf32, #tpu.memory_space<vmem>>, vector<16x50xf32>
    %c2_i32_131 = arith.constant 2 : i32
    %416 = tpu.dynamic_rotate %413 by %c2_i32_131 dim 0 : vector<16x10xf32>, i32 -> vector<16x10xf32>
    %cst_132 = arith.constant 0.000000e+00 : f32
    %417 = vector.broadcast %cst_132 : f32 to vector<16x10xf32>
    %418 = arith.select %11, %417, %416 : vector<16x10xi1>, vector<16x10xf32>
    %c2_i32_133 = arith.constant 2 : i32
    %419 = tpu.dynamic_rotate %414 by %c2_i32_133 dim 0 : vector<16x10xf32>, i32 -> vector<16x10xf32>
    %cst_134 = arith.constant 0.000000e+00 : f32
    %420 = vector.broadcast %cst_134 : f32 to vector<16x10xf32>
    %421 = arith.select %11, %420, %419 : vector<16x10xi1>, vector<16x10xf32>
    %cst_135 = arith.constant dense<0.000000e+00> : vector<16x50xf32>
    %422 = tpu.matmul %418, %7, %cst_135 {dimension_numbers = #tpu.dot_dimension_numbers<[1], [0], [0], [1], [0, 0, 1, 1], [], []>} : vector<16x10xf32>, vector<10x50xf32>, vector<16x50xf32> -> vector<16x50xf32>
    %423 = arith.addf %415, %422 : vector<16x50xf32>
    %cst_136 = arith.constant dense<0.000000e+00> : vector<16x50xf32>
    %424 = tpu.matmul %413, %8, %cst_136 {dimension_numbers = #tpu.dot_dimension_numbers<[1], [0], [0], [1], [0, 0, 1, 1], [], []>} : vector<16x10xf32>, vector<10x50xf32>, vector<16x50xf32> -> vector<16x50xf32>
    %425 = arith.addf %423, %424 : vector<16x50xf32>
    %426 = vector.extract_strided_slice %425 {offsets = [0, 0], sizes = [16, 40], strides = [1, 1]} : vector<16x50xf32> to vector<16x40xf32>
    %427 = arith.negf %426 : vector<16x40xf32>
    %428 = math.exp %427 : vector<16x40xf32>
    %cst_137 = arith.constant 1.000000e+00 : f32
    %429 = vector.broadcast %cst_137 : f32 to vector<16x40xf32>
    %430 = arith.addf %429, %428 : vector<16x40xf32>
    %431 = arith.divf %429, %430 : vector<16x40xf32>
    %432 = vector.extract_strided_slice %425 {offsets = [0, 40], sizes = [16, 10], strides = [1, 1]} : vector<16x50xf32> to vector<16x10xf32>
    %433 = math.tanh %432 : vector<16x10xf32>
    %434 = vector.extract_strided_slice %431 {offsets = [0, 0], sizes = [16, 10], strides = [1, 1]} : vector<16x40xf32> to vector<16x10xf32>
    %435 = vector.extract_strided_slice %431 {offsets = [0, 10], sizes = [16, 10], strides = [1, 1]} : vector<16x40xf32> to vector<16x10xf32>
    %436 = vector.extract_strided_slice %431 {offsets = [0, 20], sizes = [16, 10], strides = [1, 1]} : vector<16x40xf32> to vector<16x10xf32>
    %437 = vector.extract_strided_slice %431 {offsets = [0, 30], sizes = [16, 10], strides = [1, 1]} : vector<16x40xf32> to vector<16x10xf32>
    %438 = arith.mulf %434, %433 : vector<16x10xf32>
    %439 = arith.mulf %435, %421 : vector<16x10xf32>
    %440 = arith.addf %438, %439 : vector<16x10xf32>
    %441 = arith.mulf %436, %414 : vector<16x10xf32>
    %442 = arith.addf %440, %441 : vector<16x10xf32>
    %443 = math.tanh %442 : vector<16x10xf32>
    %444 = arith.mulf %437, %443 : vector<16x10xf32>
    %c176_138 = arith.constant 176 : index
    %c0_139 = arith.constant 0 : index
    %445 = vector.load %arg16[%c176_138, %c0_139] : memref<240x10xf32, #tpu.memory_space<vmem>>, vector<16x10xf32>
    tpu.vector_store %arg16[%c176_138, %c0_139], %444 {strides = array<i32>} : memref<240x10xf32, #tpu.memory_space<vmem>>, vector<16x10xf32>,
    %c8_i32_140 = arith.constant 8 : i32
    %446 = vector.broadcast %c8_i32_140 : i32 to vector<16x10xi32>
    %447 = arith.cmpi sge, %9, %446 : vector<16x10xi32>
    %c16_i32_141 = arith.constant 16 : i32
    %448 = vector.broadcast %c16_i32_141 : i32 to vector<16x10xi32>
    %449 = arith.cmpi slt, %9, %448 : vector<16x10xi32>
    %450 = arith.andi %447, %449 : vector<16x10xi1>
    %451 = arith.select %450, %444, %413 : vector<16x10xi1>, vector<16x10xf32>
    %452 = arith.select %450, %442, %414 : vector<16x10xi1>, vector<16x10xf32>
    %c192 = arith.constant 192 : index
    %c0_142 = arith.constant 0 : index
    %453 = vector.load %arg15[%c192, %c0_142] : memref<240x50xf32, #tpu.memory_space<vmem>>, vector<16x50xf32>
    %c2_i32_143 = arith.constant 2 : i32
    %454 = tpu.dynamic_rotate %451 by %c2_i32_143 dim 0 : vector<16x10xf32>, i32 -> vector<16x10xf32>
    %cst_144 = arith.constant 0.000000e+00 : f32
    %455 = vector.broadcast %cst_144 : f32 to vector<16x10xf32>
    %456 = arith.select %11, %455, %454 : vector<16x10xi1>, vector<16x10xf32>
    %c2_i32_145 = arith.constant 2 : i32
    %457 = tpu.dynamic_rotate %452 by %c2_i32_145 dim 0 : vector<16x10xf32>, i32 -> vector<16x10xf32>
    %cst_146 = arith.constant 0.000000e+00 : f32
    %458 = vector.broadcast %cst_146 : f32 to vector<16x10xf32>
    %459 = arith.select %11, %458, %457 : vector<16x10xi1>, vector<16x10xf32>
    %cst_147 = arith.constant dense<0.000000e+00> : vector<16x50xf32>
    %460 = tpu.matmul %456, %7, %cst_147 {dimension_numbers = #tpu.dot_dimension_numbers<[1], [0], [0], [1], [0, 0, 1, 1], [], []>} : vector<16x10xf32>, vector<10x50xf32>, vector<16x50xf32> -> vector<16x50xf32>
    %461 = arith.addf %453, %460 : vector<16x50xf32>
    %cst_148 = arith.constant dense<0.000000e+00> : vector<16x50xf32>
    %462 = tpu.matmul %451, %8, %cst_148 {dimension_numbers = #tpu.dot_dimension_numbers<[1], [0], [0], [1], [0, 0, 1, 1], [], []>} : vector<16x10xf32>, vector<10x50xf32>, vector<16x50xf32> -> vector<16x50xf32>
    %463 = arith.addf %461, %462 : vector<16x50xf32>
    %464 = vector.extract_strided_slice %463 {offsets = [0, 0], sizes = [16, 40], strides = [1, 1]} : vector<16x50xf32> to vector<16x40xf32>
    %465 = arith.negf %464 : vector<16x40xf32>
    %466 = math.exp %465 : vector<16x40xf32>
    %cst_149 = arith.constant 1.000000e+00 : f32
    %467 = vector.broadcast %cst_149 : f32 to vector<16x40xf32>
    %468 = arith.addf %467, %466 : vector<16x40xf32>
    %469 = arith.divf %467, %468 : vector<16x40xf32>
    %470 = vector.extract_strided_slice %463 {offsets = [0, 40], sizes = [16, 10], strides = [1, 1]} : vector<16x50xf32> to vector<16x10xf32>
    %471 = math.tanh %470 : vector<16x10xf32>
    %472 = vector.extract_strided_slice %469 {offsets = [0, 0], sizes = [16, 10], strides = [1, 1]} : vector<16x40xf32> to vector<16x10xf32>
    %473 = vector.extract_strided_slice %469 {offsets = [0, 10], sizes = [16, 10], strides = [1, 1]} : vector<16x40xf32> to vector<16x10xf32>
    %474 = vector.extract_strided_slice %469 {offsets = [0, 20], sizes = [16, 10], strides = [1, 1]} : vector<16x40xf32> to vector<16x10xf32>
    %475 = vector.extract_strided_slice %469 {offsets = [0, 30], sizes = [16, 10], strides = [1, 1]} : vector<16x40xf32> to vector<16x10xf32>
    %476 = arith.mulf %472, %471 : vector<16x10xf32>
    %477 = arith.mulf %473, %459 : vector<16x10xf32>
    %478 = arith.addf %476, %477 : vector<16x10xf32>
    %479 = arith.mulf %474, %452 : vector<16x10xf32>
    %480 = arith.addf %478, %479 : vector<16x10xf32>
    %481 = math.tanh %480 : vector<16x10xf32>
    %482 = arith.mulf %475, %481 : vector<16x10xf32>
    %c192_150 = arith.constant 192 : index
    %c0_151 = arith.constant 0 : index
    %483 = vector.load %arg16[%c192_150, %c0_151] : memref<240x10xf32, #tpu.memory_space<vmem>>, vector<16x10xf32>
    tpu.vector_store %arg16[%c192_150, %c0_151], %482 {strides = array<i32>} : memref<240x10xf32, #tpu.memory_space<vmem>>, vector<16x10xf32>,
    %c10_i32_152 = arith.constant 10 : i32
    %484 = vector.broadcast %c10_i32_152 : i32 to vector<16x10xi32>
    %485 = arith.cmpi sge, %9, %484 : vector<16x10xi32>
    %c16_i32_153 = arith.constant 16 : i32
    %486 = vector.broadcast %c16_i32_153 : i32 to vector<16x10xi32>
    %487 = arith.cmpi slt, %9, %486 : vector<16x10xi32>
    %488 = arith.andi %485, %487 : vector<16x10xi1>
    %489 = arith.select %488, %482, %451 : vector<16x10xi1>, vector<16x10xf32>
    %490 = arith.select %488, %480, %452 : vector<16x10xi1>, vector<16x10xf32>
    %c208 = arith.constant 208 : index
    %c0_154 = arith.constant 0 : index
    %491 = vector.load %arg15[%c208, %c0_154] : memref<240x50xf32, #tpu.memory_space<vmem>>, vector<16x50xf32>
    %c2_i32_155 = arith.constant 2 : i32
    %492 = tpu.dynamic_rotate %489 by %c2_i32_155 dim 0 : vector<16x10xf32>, i32 -> vector<16x10xf32>
    %cst_156 = arith.constant 0.000000e+00 : f32
    %493 = vector.broadcast %cst_156 : f32 to vector<16x10xf32>
    %494 = arith.select %11, %493, %492 : vector<16x10xi1>, vector<16x10xf32>
    %c2_i32_157 = arith.constant 2 : i32
    %495 = tpu.dynamic_rotate %490 by %c2_i32_157 dim 0 : vector<16x10xf32>, i32 -> vector<16x10xf32>
    %cst_158 = arith.constant 0.000000e+00 : f32
    %496 = vector.broadcast %cst_158 : f32 to vector<16x10xf32>
    %497 = arith.select %11, %496, %495 : vector<16x10xi1>, vector<16x10xf32>
    %cst_159 = arith.constant dense<0.000000e+00> : vector<16x50xf32>
    %498 = tpu.matmul %494, %7, %cst_159 {dimension_numbers = #tpu.dot_dimension_numbers<[1], [0], [0], [1], [0, 0, 1, 1], [], []>} : vector<16x10xf32>, vector<10x50xf32>, vector<16x50xf32> -> vector<16x50xf32>
    %499 = arith.addf %491, %498 : vector<16x50xf32>
    %cst_160 = arith.constant dense<0.000000e+00> : vector<16x50xf32>
    %500 = tpu.matmul %489, %8, %cst_160 {dimension_numbers = #tpu.dot_dimension_numbers<[1], [0], [0], [1], [0, 0, 1, 1], [], []>} : vector<16x10xf32>, vector<10x50xf32>, vector<16x50xf32> -> vector<16x50xf32>
    %501 = arith.addf %499, %500 : vector<16x50xf32>
    %502 = vector.extract_strided_slice %501 {offsets = [0, 0], sizes = [16, 40], strides = [1, 1]} : vector<16x50xf32> to vector<16x40xf32>
    %503 = arith.negf %502 : vector<16x40xf32>
    %504 = math.exp %503 : vector<16x40xf32>
    %cst_161 = arith.constant 1.000000e+00 : f32
    %505 = vector.broadcast %cst_161 : f32 to vector<16x40xf32>
    %506 = arith.addf %505, %504 : vector<16x40xf32>
    %507 = arith.divf %505, %506 : vector<16x40xf32>
    %508 = vector.extract_strided_slice %501 {offsets = [0, 40], sizes = [16, 10], strides = [1, 1]} : vector<16x50xf32> to vector<16x10xf32>
    %509 = math.tanh %508 : vector<16x10xf32>
    %510 = vector.extract_strided_slice %507 {offsets = [0, 0], sizes = [16, 10], strides = [1, 1]} : vector<16x40xf32> to vector<16x10xf32>
    %511 = vector.extract_strided_slice %507 {offsets = [0, 10], sizes = [16, 10], strides = [1, 1]} : vector<16x40xf32> to vector<16x10xf32>
    %512 = vector.extract_strided_slice %507 {offsets = [0, 20], sizes = [16, 10], strides = [1, 1]} : vector<16x40xf32> to vector<16x10xf32>
    %513 = vector.extract_strided_slice %507 {offsets = [0, 30], sizes = [16, 10], strides = [1, 1]} : vector<16x40xf32> to vector<16x10xf32>
    %514 = arith.mulf %510, %509 : vector<16x10xf32>
    %515 = arith.mulf %511, %497 : vector<16x10xf32>
    %516 = arith.addf %514, %515 : vector<16x10xf32>
    %517 = arith.mulf %512, %490 : vector<16x10xf32>
    %518 = arith.addf %516, %517 : vector<16x10xf32>
    %519 = math.tanh %518 : vector<16x10xf32>
    %520 = arith.mulf %513, %519 : vector<16x10xf32>
    %c208_162 = arith.constant 208 : index
    %c0_163 = arith.constant 0 : index
    %521 = vector.load %arg16[%c208_162, %c0_163] : memref<240x10xf32, #tpu.memory_space<vmem>>, vector<16x10xf32>
    tpu.vector_store %arg16[%c208_162, %c0_163], %520 {strides = array<i32>} : memref<240x10xf32, #tpu.memory_space<vmem>>, vector<16x10xf32>,
    %c12_i32_164 = arith.constant 12 : i32
    %522 = vector.broadcast %c12_i32_164 : i32 to vector<16x10xi32>
    %523 = arith.cmpi sge, %9, %522 : vector<16x10xi32>
    %c16_i32_165 = arith.constant 16 : i32
    %524 = vector.broadcast %c16_i32_165 : i32 to vector<16x10xi32>
    %525 = arith.cmpi slt, %9, %524 : vector<16x10xi32>
    %526 = arith.andi %523, %525 : vector<16x10xi1>
    %527 = arith.select %526, %520, %489 : vector<16x10xi1>, vector<16x10xf32>
    %528 = arith.select %526, %518, %490 : vector<16x10xi1>, vector<16x10xf32>
    %c224 = arith.constant 224 : index
    %c0_166 = arith.constant 0 : index
    %529 = vector.load %arg15[%c224, %c0_166] : memref<240x50xf32, #tpu.memory_space<vmem>>, vector<16x50xf32>
    %c2_i32_167 = arith.constant 2 : i32
    %530 = tpu.dynamic_rotate %527 by %c2_i32_167 dim 0 : vector<16x10xf32>, i32 -> vector<16x10xf32>
    %cst_168 = arith.constant 0.000000e+00 : f32
    %531 = vector.broadcast %cst_168 : f32 to vector<16x10xf32>
    %532 = arith.select %11, %531, %530 : vector<16x10xi1>, vector<16x10xf32>
    %c2_i32_169 = arith.constant 2 : i32
    %533 = tpu.dynamic_rotate %528 by %c2_i32_169 dim 0 : vector<16x10xf32>, i32 -> vector<16x10xf32>
    %cst_170 = arith.constant 0.000000e+00 : f32
    %534 = vector.broadcast %cst_170 : f32 to vector<16x10xf32>
    %535 = arith.select %11, %534, %533 : vector<16x10xi1>, vector<16x10xf32>
    %cst_171 = arith.constant dense<0.000000e+00> : vector<16x50xf32>
    %536 = tpu.matmul %532, %7, %cst_171 {dimension_numbers = #tpu.dot_dimension_numbers<[1], [0], [0], [1], [0, 0, 1, 1], [], []>} : vector<16x10xf32>, vector<10x50xf32>, vector<16x50xf32> -> vector<16x50xf32>
    %537 = arith.addf %529, %536 : vector<16x50xf32>
    %cst_172 = arith.constant dense<0.000000e+00> : vector<16x50xf32>
    %538 = tpu.matmul %527, %8, %cst_172 {dimension_numbers = #tpu.dot_dimension_numbers<[1], [0], [0], [1], [0, 0, 1, 1], [], []>} : vector<16x10xf32>, vector<10x50xf32>, vector<16x50xf32> -> vector<16x50xf32>
    %539 = arith.addf %537, %538 : vector<16x50xf32>
    %540 = vector.extract_strided_slice %539 {offsets = [0, 0], sizes = [16, 40], strides = [1, 1]} : vector<16x50xf32> to vector<16x40xf32>
    %541 = arith.negf %540 : vector<16x40xf32>
    %542 = math.exp %541 : vector<16x40xf32>
    %cst_173 = arith.constant 1.000000e+00 : f32
    %543 = vector.broadcast %cst_173 : f32 to vector<16x40xf32>
    %544 = arith.addf %543, %542 : vector<16x40xf32>
    %545 = arith.divf %543, %544 : vector<16x40xf32>
    %546 = vector.extract_strided_slice %539 {offsets = [0, 40], sizes = [16, 10], strides = [1, 1]} : vector<16x50xf32> to vector<16x10xf32>
    %547 = math.tanh %546 : vector<16x10xf32>
    %548 = vector.extract_strided_slice %545 {offsets = [0, 0], sizes = [16, 10], strides = [1, 1]} : vector<16x40xf32> to vector<16x10xf32>
    %549 = vector.extract_strided_slice %545 {offsets = [0, 10], sizes = [16, 10], strides = [1, 1]} : vector<16x40xf32> to vector<16x10xf32>
    %550 = vector.extract_strided_slice %545 {offsets = [0, 20], sizes = [16, 10], strides = [1, 1]} : vector<16x40xf32> to vector<16x10xf32>
    %551 = vector.extract_strided_slice %545 {offsets = [0, 30], sizes = [16, 10], strides = [1, 1]} : vector<16x40xf32> to vector<16x10xf32>
    %552 = arith.mulf %548, %547 : vector<16x10xf32>
    %553 = arith.mulf %549, %535 : vector<16x10xf32>
    %554 = arith.addf %552, %553 : vector<16x10xf32>
    %555 = arith.mulf %550, %528 : vector<16x10xf32>
    %556 = arith.addf %554, %555 : vector<16x10xf32>
    %557 = math.tanh %556 : vector<16x10xf32>
    %558 = arith.mulf %551, %557 : vector<16x10xf32>
    %c224_174 = arith.constant 224 : index
    %c0_175 = arith.constant 0 : index
    %559 = vector.load %arg16[%c224_174, %c0_175] : memref<240x10xf32, #tpu.memory_space<vmem>>, vector<16x10xf32>
    tpu.vector_store %arg16[%c224_174, %c0_175], %558 {strides = array<i32>} : memref<240x10xf32, #tpu.memory_space<vmem>>, vector<16x10xf32>,
    %c0_176 = arith.constant 0 : index
    %c0_177 = arith.constant 0 : index
    %560 = vector.load %arg7[%c0_176, %c0_177] : memref<20x100xf32, #tpu.memory_space<vmem>>, vector<20x100xf32>
    %c0_178 = arith.constant 0 : index
    %c0_179 = arith.constant 0 : index
    %561 = vector.load %arg8[%c0_178, %c0_179] : memref<20x100xf32, #tpu.memory_space<vmem>>, vector<20x100xf32>
    %c0_180 = arith.constant 0 : index
    %c0_181 = arith.constant 0 : index
    %562 = vector.load %arg9[%c0_180, %c0_181] : memref<1x100xf32, #tpu.memory_space<vmem>>, vector<1x100xf32>
    %cst_182 = arith.constant 0.000000e+00 : f32
    %563 = vector.broadcast %cst_182 : f32 to vector<2x20xf32>
    %c0_183 = arith.constant 0 : index
    %c0_184 = arith.constant 0 : index
    %564 = vector.load %arg16[%c0_183, %c0_184] : memref<240x10xf32, #tpu.memory_space<vmem>>, vector<2x10xf32>
    %c0_185 = arith.constant 0 : index
    %c0_186 = arith.constant 0 : index
    %c0_187 = arith.constant 0 : index
    %565 = vector.load %arg6[%c0_185, %c0_186, %c0_187] : memref<4x10x100xf32, #tpu.memory_space<vmem>>, vector<1x10x100xf32>
    %566 = vector.shape_cast %565 : vector<1x10x100xf32> to vector<10x100xf32>
    %cst_188 = arith.constant dense<0.000000e+00> : vector<2x100xf32>
    %567 = tpu.matmul %564, %566, %cst_188 {dimension_numbers = #tpu.dot_dimension_numbers<[1], [0], [0], [1], [0, 0, 1, 1], [], []>} : vector<2x10xf32>, vector<10x100xf32>, vector<2x100xf32> -> vector<2x100xf32>
    %568 = vector.broadcast %562 : vector<1x100xf32> to vector<2x100xf32>
    %569 = arith.addf %568, %567 : vector<2x100xf32>
    %c16_189 = arith.constant 16 : index
    %c0_190 = arith.constant 0 : index
    %570 = vector.load %arg16[%c16_189, %c0_190] : memref<240x10xf32, #tpu.memory_space<vmem>>, vector<2x10xf32>
    %c1 = arith.constant 1 : index
    %c0_191 = arith.constant 0 : index
    %c0_192 = arith.constant 0 : index
    %571 = vector.load %arg6[%c1, %c0_191, %c0_192] : memref<4x10x100xf32, #tpu.memory_space<vmem>>, vector<1x10x100xf32>
    %572 = vector.shape_cast %571 : vector<1x10x100xf32> to vector<10x100xf32>
    %cst_193 = arith.constant dense<0.000000e+00> : vector<2x100xf32>
    %573 = tpu.matmul %570, %572, %cst_193 {dimension_numbers = #tpu.dot_dimension_numbers<[1], [0], [0], [1], [0, 0, 1, 1], [], []>} : vector<2x10xf32>, vector<10x100xf32>, vector<2x100xf32> -> vector<2x100xf32>
    %574 = arith.addf %569, %573 : vector<2x100xf32>
    %c18 = arith.constant 18 : index
    %c0_194 = arith.constant 0 : index
    %575 = vector.load %arg16[%c18, %c0_194] : memref<240x10xf32, #tpu.memory_space<vmem>>, vector<2x10xf32>
    %c2 = arith.constant 2 : index
    %c0_195 = arith.constant 0 : index
    %c0_196 = arith.constant 0 : index
    %576 = vector.load %arg6[%c2, %c0_195, %c0_196] : memref<4x10x100xf32, #tpu.memory_space<vmem>>, vector<1x10x100xf32>
    %577 = vector.shape_cast %576 : vector<1x10x100xf32> to vector<10x100xf32>
    %cst_197 = arith.constant dense<0.000000e+00> : vector<2x100xf32>
    %578 = tpu.matmul %575, %577, %cst_197 {dimension_numbers = #tpu.dot_dimension_numbers<[1], [0], [0], [1], [0, 0, 1, 1], [], []>} : vector<2x10xf32>, vector<10x100xf32>, vector<2x100xf32> -> vector<2x100xf32>
    %579 = arith.addf %574, %578 : vector<2x100xf32>
    %c34 = arith.constant 34 : index
    %c0_198 = arith.constant 0 : index
    %580 = vector.load %arg16[%c34, %c0_198] : memref<240x10xf32, #tpu.memory_space<vmem>>, vector<2x10xf32>
    %c3 = arith.constant 3 : index
    %c0_199 = arith.constant 0 : index
    %c0_200 = arith.constant 0 : index
    %581 = vector.load %arg6[%c3, %c0_199, %c0_200] : memref<4x10x100xf32, #tpu.memory_space<vmem>>, vector<1x10x100xf32>
    %582 = vector.shape_cast %581 : vector<1x10x100xf32> to vector<10x100xf32>
    %cst_201 = arith.constant dense<0.000000e+00> : vector<2x100xf32>
    %583 = tpu.matmul %580, %582, %cst_201 {dimension_numbers = #tpu.dot_dimension_numbers<[1], [0], [0], [1], [0, 0, 1, 1], [], []>} : vector<2x10xf32>, vector<10x100xf32>, vector<2x100xf32> -> vector<2x100xf32>
    %584 = arith.addf %579, %583 : vector<2x100xf32>
    %585 = vector.extract_strided_slice %584 {offsets = [0, 0], sizes = [2, 80], strides = [1, 1]} : vector<2x100xf32> to vector<2x80xf32>
    %586 = arith.negf %585 : vector<2x80xf32>
    %587 = math.exp %586 : vector<2x80xf32>
    %cst_202 = arith.constant 1.000000e+00 : f32
    %588 = vector.broadcast %cst_202 : f32 to vector<2x80xf32>
    %589 = arith.addf %588, %587 : vector<2x80xf32>
    %590 = arith.divf %588, %589 : vector<2x80xf32>
    %591 = vector.extract_strided_slice %584 {offsets = [0, 80], sizes = [2, 20], strides = [1, 1]} : vector<2x100xf32> to vector<2x20xf32>
    %592 = math.tanh %591 : vector<2x20xf32>
    %593 = vector.extract_strided_slice %590 {offsets = [0, 0], sizes = [2, 20], strides = [1, 1]} : vector<2x80xf32> to vector<2x20xf32>
    %594 = vector.extract_strided_slice %590 {offsets = [0, 20], sizes = [2, 20], strides = [1, 1]} : vector<2x80xf32> to vector<2x20xf32>
    %595 = vector.extract_strided_slice %590 {offsets = [0, 40], sizes = [2, 20], strides = [1, 1]} : vector<2x80xf32> to vector<2x20xf32>
    %596 = vector.extract_strided_slice %590 {offsets = [0, 60], sizes = [2, 20], strides = [1, 1]} : vector<2x80xf32> to vector<2x20xf32>
    %597 = arith.mulf %593, %592 : vector<2x20xf32>
    %598 = arith.mulf %594, %563 : vector<2x20xf32>
    %599 = arith.addf %597, %598 : vector<2x20xf32>
    %600 = arith.mulf %595, %563 : vector<2x20xf32>
    %601 = arith.addf %599, %600 : vector<2x20xf32>
    %602 = math.tanh %601 : vector<2x20xf32>
    %603 = arith.mulf %596, %602 : vector<2x20xf32>
    %c0_203 = arith.constant 0 : index
    %c0_204 = arith.constant 0 : index
    %c0_205 = arith.constant 0 : index
    %604 = vector.load %arg10[%c0_203, %c0_204, %c0_205] : memref<16x20x500xf32, #tpu.memory_space<vmem>>, vector<1x20x500xf32>
    %605 = vector.shape_cast %604 : vector<1x20x500xf32> to vector<20x500xf32>
    %cst_206 = arith.constant dense<0.000000e+00> : vector<2x500xf32>
    %606 = tpu.matmul %603, %605, %cst_206 {dimension_numbers = #tpu.dot_dimension_numbers<[1], [0], [0], [1], [0, 0, 1, 1], [], []>} : vector<2x20xf32>, vector<20x500xf32>, vector<2x500xf32> -> vector<2x500xf32>
    %c32_207 = arith.constant 32 : index
    %c0_208 = arith.constant 0 : index
    %607 = vector.load %arg16[%c32_207, %c0_208] : memref<240x10xf32, #tpu.memory_space<vmem>>, vector<2x10xf32>
    %c0_209 = arith.constant 0 : index
    %c0_210 = arith.constant 0 : index
    %c0_211 = arith.constant 0 : index
    %608 = vector.load %arg6[%c0_209, %c0_210, %c0_211] : memref<4x10x100xf32, #tpu.memory_space<vmem>>, vector<1x10x100xf32>
    %609 = vector.shape_cast %608 : vector<1x10x100xf32> to vector<10x100xf32>
    %cst_212 = arith.constant dense<0.000000e+00> : vector<2x100xf32>
    %610 = tpu.matmul %607, %609, %cst_212 {dimension_numbers = #tpu.dot_dimension_numbers<[1], [0], [0], [1], [0, 0, 1, 1], [], []>} : vector<2x10xf32>, vector<10x100xf32>, vector<2x100xf32> -> vector<2x100xf32>
    %611 = vector.broadcast %562 : vector<1x100xf32> to vector<2x100xf32>
    %612 = arith.addf %611, %610 : vector<2x100xf32>
    %c48_213 = arith.constant 48 : index
    %c0_214 = arith.constant 0 : index
    %613 = vector.load %arg16[%c48_213, %c0_214] : memref<240x10xf32, #tpu.memory_space<vmem>>, vector<2x10xf32>
    %c1_215 = arith.constant 1 : index
    %c0_216 = arith.constant 0 : index
    %c0_217 = arith.constant 0 : index
    %614 = vector.load %arg6[%c1_215, %c0_216, %c0_217] : memref<4x10x100xf32, #tpu.memory_space<vmem>>, vector<1x10x100xf32>
    %615 = vector.shape_cast %614 : vector<1x10x100xf32> to vector<10x100xf32>
    %cst_218 = arith.constant dense<0.000000e+00> : vector<2x100xf32>
    %616 = tpu.matmul %613, %615, %cst_218 {dimension_numbers = #tpu.dot_dimension_numbers<[1], [0], [0], [1], [0, 0, 1, 1], [], []>} : vector<2x10xf32>, vector<10x100xf32>, vector<2x100xf32> -> vector<2x100xf32>
    %617 = arith.addf %612, %616 : vector<2x100xf32>
    %c50 = arith.constant 50 : index
    %c0_219 = arith.constant 0 : index
    %618 = vector.load %arg16[%c50, %c0_219] : memref<240x10xf32, #tpu.memory_space<vmem>>, vector<2x10xf32>
    %c2_220 = arith.constant 2 : index
    %c0_221 = arith.constant 0 : index
    %c0_222 = arith.constant 0 : index
    %619 = vector.load %arg6[%c2_220, %c0_221, %c0_222] : memref<4x10x100xf32, #tpu.memory_space<vmem>>, vector<1x10x100xf32>
    %620 = vector.shape_cast %619 : vector<1x10x100xf32> to vector<10x100xf32>
    %cst_223 = arith.constant dense<0.000000e+00> : vector<2x100xf32>
    %621 = tpu.matmul %618, %620, %cst_223 {dimension_numbers = #tpu.dot_dimension_numbers<[1], [0], [0], [1], [0, 0, 1, 1], [], []>} : vector<2x10xf32>, vector<10x100xf32>, vector<2x100xf32> -> vector<2x100xf32>
    %622 = arith.addf %617, %621 : vector<2x100xf32>
    %c66 = arith.constant 66 : index
    %c0_224 = arith.constant 0 : index
    %623 = vector.load %arg16[%c66, %c0_224] : memref<240x10xf32, #tpu.memory_space<vmem>>, vector<2x10xf32>
    %c3_225 = arith.constant 3 : index
    %c0_226 = arith.constant 0 : index
    %c0_227 = arith.constant 0 : index
    %624 = vector.load %arg6[%c3_225, %c0_226, %c0_227] : memref<4x10x100xf32, #tpu.memory_space<vmem>>, vector<1x10x100xf32>
    %625 = vector.shape_cast %624 : vector<1x10x100xf32> to vector<10x100xf32>
    %cst_228 = arith.constant dense<0.000000e+00> : vector<2x100xf32>
    %626 = tpu.matmul %623, %625, %cst_228 {dimension_numbers = #tpu.dot_dimension_numbers<[1], [0], [0], [1], [0, 0, 1, 1], [], []>} : vector<2x10xf32>, vector<10x100xf32>, vector<2x100xf32> -> vector<2x100xf32>
    %627 = arith.addf %622, %626 : vector<2x100xf32>
    %cst_229 = arith.constant dense<0.000000e+00> : vector<2x100xf32>
    %628 = tpu.matmul %603, %561, %cst_229 {dimension_numbers = #tpu.dot_dimension_numbers<[1], [0], [0], [1], [0, 0, 1, 1], [], []>} : vector<2x20xf32>, vector<20x100xf32>, vector<2x100xf32> -> vector<2x100xf32>
    %629 = arith.addf %627, %628 : vector<2x100xf32>
    %630 = vector.extract_strided_slice %629 {offsets = [0, 0], sizes = [2, 80], strides = [1, 1]} : vector<2x100xf32> to vector<2x80xf32>
    %631 = arith.negf %630 : vector<2x80xf32>
    %632 = math.exp %631 : vector<2x80xf32>
    %cst_230 = arith.constant 1.000000e+00 : f32
    %633 = vector.broadcast %cst_230 : f32 to vector<2x80xf32>
    %634 = arith.addf %633, %632 : vector<2x80xf32>
    %635 = arith.divf %633, %634 : vector<2x80xf32>
    %636 = vector.extract_strided_slice %629 {offsets = [0, 80], sizes = [2, 20], strides = [1, 1]} : vector<2x100xf32> to vector<2x20xf32>
    %637 = math.tanh %636 : vector<2x20xf32>
    %638 = vector.extract_strided_slice %635 {offsets = [0, 0], sizes = [2, 20], strides = [1, 1]} : vector<2x80xf32> to vector<2x20xf32>
    %639 = vector.extract_strided_slice %635 {offsets = [0, 20], sizes = [2, 20], strides = [1, 1]} : vector<2x80xf32> to vector<2x20xf32>
    %640 = vector.extract_strided_slice %635 {offsets = [0, 40], sizes = [2, 20], strides = [1, 1]} : vector<2x80xf32> to vector<2x20xf32>
    %641 = vector.extract_strided_slice %635 {offsets = [0, 60], sizes = [2, 20], strides = [1, 1]} : vector<2x80xf32> to vector<2x20xf32>
    %642 = arith.mulf %638, %637 : vector<2x20xf32>
    %643 = arith.mulf %639, %563 : vector<2x20xf32>
    %644 = arith.addf %642, %643 : vector<2x20xf32>
    %645 = arith.mulf %640, %601 : vector<2x20xf32>
    %646 = arith.addf %644, %645 : vector<2x20xf32>
    %647 = math.tanh %646 : vector<2x20xf32>
    %648 = arith.mulf %641, %647 : vector<2x20xf32>
    %c1_231 = arith.constant 1 : index
    %c0_232 = arith.constant 0 : index
    %c0_233 = arith.constant 0 : index
    %649 = vector.load %arg10[%c1_231, %c0_232, %c0_233] : memref<16x20x500xf32, #tpu.memory_space<vmem>>, vector<1x20x500xf32>
    %650 = vector.shape_cast %649 : vector<1x20x500xf32> to vector<20x500xf32>
    %cst_234 = arith.constant dense<0.000000e+00> : vector<2x500xf32>
    %651 = tpu.matmul %648, %650, %cst_234 {dimension_numbers = #tpu.dot_dimension_numbers<[1], [0], [0], [1], [0, 0, 1, 1], [], []>} : vector<2x20xf32>, vector<20x500xf32>, vector<2x500xf32> -> vector<2x500xf32>
    %652 = arith.addf %606, %651 : vector<2x500xf32>
    %c64_235 = arith.constant 64 : index
    %c0_236 = arith.constant 0 : index
    %653 = vector.load %arg16[%c64_235, %c0_236] : memref<240x10xf32, #tpu.memory_space<vmem>>, vector<2x10xf32>
    %c0_237 = arith.constant 0 : index
    %c0_238 = arith.constant 0 : index
    %c0_239 = arith.constant 0 : index
    %654 = vector.load %arg6[%c0_237, %c0_238, %c0_239] : memref<4x10x100xf32, #tpu.memory_space<vmem>>, vector<1x10x100xf32>
    %655 = vector.shape_cast %654 : vector<1x10x100xf32> to vector<10x100xf32>
    %cst_240 = arith.constant dense<0.000000e+00> : vector<2x100xf32>
    %656 = tpu.matmul %653, %655, %cst_240 {dimension_numbers = #tpu.dot_dimension_numbers<[1], [0], [0], [1], [0, 0, 1, 1], [], []>} : vector<2x10xf32>, vector<10x100xf32>, vector<2x100xf32> -> vector<2x100xf32>
    %657 = vector.broadcast %562 : vector<1x100xf32> to vector<2x100xf32>
    %658 = arith.addf %657, %656 : vector<2x100xf32>
    %c80_241 = arith.constant 80 : index
    %c0_242 = arith.constant 0 : index
    %659 = vector.load %arg16[%c80_241, %c0_242] : memref<240x10xf32, #tpu.memory_space<vmem>>, vector<2x10xf32>
    %c1_243 = arith.constant 1 : index
    %c0_244 = arith.constant 0 : index
    %c0_245 = arith.constant 0 : index
    %660 = vector.load %arg6[%c1_243, %c0_244, %c0_245] : memref<4x10x100xf32, #tpu.memory_space<vmem>>, vector<1x10x100xf32>
    %661 = vector.shape_cast %660 : vector<1x10x100xf32> to vector<10x100xf32>
    %cst_246 = arith.constant dense<0.000000e+00> : vector<2x100xf32>
    %662 = tpu.matmul %659, %661, %cst_246 {dimension_numbers = #tpu.dot_dimension_numbers<[1], [0], [0], [1], [0, 0, 1, 1], [], []>} : vector<2x10xf32>, vector<10x100xf32>, vector<2x100xf32> -> vector<2x100xf32>
    %663 = arith.addf %658, %662 : vector<2x100xf32>
    %c82 = arith.constant 82 : index
    %c0_247 = arith.constant 0 : index
    %664 = vector.load %arg16[%c82, %c0_247] : memref<240x10xf32, #tpu.memory_space<vmem>>, vector<2x10xf32>
    %c2_248 = arith.constant 2 : index
    %c0_249 = arith.constant 0 : index
    %c0_250 = arith.constant 0 : index
    %665 = vector.load %arg6[%c2_248, %c0_249, %c0_250] : memref<4x10x100xf32, #tpu.memory_space<vmem>>, vector<1x10x100xf32>
    %666 = vector.shape_cast %665 : vector<1x10x100xf32> to vector<10x100xf32>
    %cst_251 = arith.constant dense<0.000000e+00> : vector<2x100xf32>
    %667 = tpu.matmul %664, %666, %cst_251 {dimension_numbers = #tpu.dot_dimension_numbers<[1], [0], [0], [1], [0, 0, 1, 1], [], []>} : vector<2x10xf32>, vector<10x100xf32>, vector<2x100xf32> -> vector<2x100xf32>
    %668 = arith.addf %663, %667 : vector<2x100xf32>
    %c98 = arith.constant 98 : index
    %c0_252 = arith.constant 0 : index
    %669 = vector.load %arg16[%c98, %c0_252] : memref<240x10xf32, #tpu.memory_space<vmem>>, vector<2x10xf32>
    %c3_253 = arith.constant 3 : index
    %c0_254 = arith.constant 0 : index
    %c0_255 = arith.constant 0 : index
    %670 = vector.load %arg6[%c3_253, %c0_254, %c0_255] : memref<4x10x100xf32, #tpu.memory_space<vmem>>, vector<1x10x100xf32>
    %671 = vector.shape_cast %670 : vector<1x10x100xf32> to vector<10x100xf32>
    %cst_256 = arith.constant dense<0.000000e+00> : vector<2x100xf32>
    %672 = tpu.matmul %669, %671, %cst_256 {dimension_numbers = #tpu.dot_dimension_numbers<[1], [0], [0], [1], [0, 0, 1, 1], [], []>} : vector<2x10xf32>, vector<10x100xf32>, vector<2x100xf32> -> vector<2x100xf32>
    %673 = arith.addf %668, %672 : vector<2x100xf32>
    %cst_257 = arith.constant dense<0.000000e+00> : vector<2x100xf32>
    %674 = tpu.matmul %648, %561, %cst_257 {dimension_numbers = #tpu.dot_dimension_numbers<[1], [0], [0], [1], [0, 0, 1, 1], [], []>} : vector<2x20xf32>, vector<20x100xf32>, vector<2x100xf32> -> vector<2x100xf32>
    %675 = arith.addf %673, %674 : vector<2x100xf32>
    %676 = vector.extract_strided_slice %675 {offsets = [0, 0], sizes = [2, 80], strides = [1, 1]} : vector<2x100xf32> to vector<2x80xf32>
    %677 = arith.negf %676 : vector<2x80xf32>
    %678 = math.exp %677 : vector<2x80xf32>
    %cst_258 = arith.constant 1.000000e+00 : f32
    %679 = vector.broadcast %cst_258 : f32 to vector<2x80xf32>
    %680 = arith.addf %679, %678 : vector<2x80xf32>
    %681 = arith.divf %679, %680 : vector<2x80xf32>
    %682 = vector.extract_strided_slice %675 {offsets = [0, 80], sizes = [2, 20], strides = [1, 1]} : vector<2x100xf32> to vector<2x20xf32>
    %683 = math.tanh %682 : vector<2x20xf32>
    %684 = vector.extract_strided_slice %681 {offsets = [0, 0], sizes = [2, 20], strides = [1, 1]} : vector<2x80xf32> to vector<2x20xf32>
    %685 = vector.extract_strided_slice %681 {offsets = [0, 20], sizes = [2, 20], strides = [1, 1]} : vector<2x80xf32> to vector<2x20xf32>
    %686 = vector.extract_strided_slice %681 {offsets = [0, 40], sizes = [2, 20], strides = [1, 1]} : vector<2x80xf32> to vector<2x20xf32>
    %687 = vector.extract_strided_slice %681 {offsets = [0, 60], sizes = [2, 20], strides = [1, 1]} : vector<2x80xf32> to vector<2x20xf32>
    %688 = arith.mulf %684, %683 : vector<2x20xf32>
    %689 = arith.mulf %685, %563 : vector<2x20xf32>
    %690 = arith.addf %688, %689 : vector<2x20xf32>
    %691 = arith.mulf %686, %646 : vector<2x20xf32>
    %692 = arith.addf %690, %691 : vector<2x20xf32>
    %693 = math.tanh %692 : vector<2x20xf32>
    %694 = arith.mulf %687, %693 : vector<2x20xf32>
    %c2_259 = arith.constant 2 : index
    %c0_260 = arith.constant 0 : index
    %c0_261 = arith.constant 0 : index
    %695 = vector.load %arg10[%c2_259, %c0_260, %c0_261] : memref<16x20x500xf32, #tpu.memory_space<vmem>>, vector<1x20x500xf32>
    %696 = vector.shape_cast %695 : vector<1x20x500xf32> to vector<20x500xf32>
    %cst_262 = arith.constant dense<0.000000e+00> : vector<2x500xf32>
    %697 = tpu.matmul %694, %696, %cst_262 {dimension_numbers = #tpu.dot_dimension_numbers<[1], [0], [0], [1], [0, 0, 1, 1], [], []>} : vector<2x20xf32>, vector<20x500xf32>, vector<2x500xf32> -> vector<2x500xf32>
    %698 = arith.addf %652, %697 : vector<2x500xf32>
    %c96_263 = arith.constant 96 : index
    %c0_264 = arith.constant 0 : index
    %699 = vector.load %arg16[%c96_263, %c0_264] : memref<240x10xf32, #tpu.memory_space<vmem>>, vector<2x10xf32>
    %c0_265 = arith.constant 0 : index
    %c0_266 = arith.constant 0 : index
    %c0_267 = arith.constant 0 : index
    %700 = vector.load %arg6[%c0_265, %c0_266, %c0_267] : memref<4x10x100xf32, #tpu.memory_space<vmem>>, vector<1x10x100xf32>
    %701 = vector.shape_cast %700 : vector<1x10x100xf32> to vector<10x100xf32>
    %cst_268 = arith.constant dense<0.000000e+00> : vector<2x100xf32>
    %702 = tpu.matmul %699, %701, %cst_268 {dimension_numbers = #tpu.dot_dimension_numbers<[1], [0], [0], [1], [0, 0, 1, 1], [], []>} : vector<2x10xf32>, vector<10x100xf32>, vector<2x100xf32> -> vector<2x100xf32>
    %703 = vector.broadcast %562 : vector<1x100xf32> to vector<2x100xf32>
    %704 = arith.addf %703, %702 : vector<2x100xf32>
    %c112_269 = arith.constant 112 : index
    %c0_270 = arith.constant 0 : index
    %705 = vector.load %arg16[%c112_269, %c0_270] : memref<240x10xf32, #tpu.memory_space<vmem>>, vector<2x10xf32>
    %c1_271 = arith.constant 1 : index
    %c0_272 = arith.constant 0 : index
    %c0_273 = arith.constant 0 : index
    %706 = vector.load %arg6[%c1_271, %c0_272, %c0_273] : memref<4x10x100xf32, #tpu.memory_space<vmem>>, vector<1x10x100xf32>
    %707 = vector.shape_cast %706 : vector<1x10x100xf32> to vector<10x100xf32>
    %cst_274 = arith.constant dense<0.000000e+00> : vector<2x100xf32>
    %708 = tpu.matmul %705, %707, %cst_274 {dimension_numbers = #tpu.dot_dimension_numbers<[1], [0], [0], [1], [0, 0, 1, 1], [], []>} : vector<2x10xf32>, vector<10x100xf32>, vector<2x100xf32> -> vector<2x100xf32>
    %709 = arith.addf %704, %708 : vector<2x100xf32>
    %c114 = arith.constant 114 : index
    %c0_275 = arith.constant 0 : index
    %710 = vector.load %arg16[%c114, %c0_275] : memref<240x10xf32, #tpu.memory_space<vmem>>, vector<2x10xf32>
    %c2_276 = arith.constant 2 : index
    %c0_277 = arith.constant 0 : index
    %c0_278 = arith.constant 0 : index
    %711 = vector.load %arg6[%c2_276, %c0_277, %c0_278] : memref<4x10x100xf32, #tpu.memory_space<vmem>>, vector<1x10x100xf32>
    %712 = vector.shape_cast %711 : vector<1x10x100xf32> to vector<10x100xf32>
    %cst_279 = arith.constant dense<0.000000e+00> : vector<2x100xf32>
    %713 = tpu.matmul %710, %712, %cst_279 {dimension_numbers = #tpu.dot_dimension_numbers<[1], [0], [0], [1], [0, 0, 1, 1], [], []>} : vector<2x10xf32>, vector<10x100xf32>, vector<2x100xf32> -> vector<2x100xf32>
    %714 = arith.addf %709, %713 : vector<2x100xf32>
    %c130 = arith.constant 130 : index
    %c0_280 = arith.constant 0 : index
    %715 = vector.load %arg16[%c130, %c0_280] : memref<240x10xf32, #tpu.memory_space<vmem>>, vector<2x10xf32>
    %c3_281 = arith.constant 3 : index
    %c0_282 = arith.constant 0 : index
    %c0_283 = arith.constant 0 : index
    %716 = vector.load %arg6[%c3_281, %c0_282, %c0_283] : memref<4x10x100xf32, #tpu.memory_space<vmem>>, vector<1x10x100xf32>
    %717 = vector.shape_cast %716 : vector<1x10x100xf32> to vector<10x100xf32>
    %cst_284 = arith.constant dense<0.000000e+00> : vector<2x100xf32>
    %718 = tpu.matmul %715, %717, %cst_284 {dimension_numbers = #tpu.dot_dimension_numbers<[1], [0], [0], [1], [0, 0, 1, 1], [], []>} : vector<2x10xf32>, vector<10x100xf32>, vector<2x100xf32> -> vector<2x100xf32>
    %719 = arith.addf %714, %718 : vector<2x100xf32>
    %cst_285 = arith.constant dense<0.000000e+00> : vector<2x100xf32>
    %720 = tpu.matmul %694, %561, %cst_285 {dimension_numbers = #tpu.dot_dimension_numbers<[1], [0], [0], [1], [0, 0, 1, 1], [], []>} : vector<2x20xf32>, vector<20x100xf32>, vector<2x100xf32> -> vector<2x100xf32>
    %721 = arith.addf %719, %720 : vector<2x100xf32>
    %722 = vector.extract_strided_slice %721 {offsets = [0, 0], sizes = [2, 80], strides = [1, 1]} : vector<2x100xf32> to vector<2x80xf32>
    %723 = arith.negf %722 : vector<2x80xf32>
    %724 = math.exp %723 : vector<2x80xf32>
    %cst_286 = arith.constant 1.000000e+00 : f32
    %725 = vector.broadcast %cst_286 : f32 to vector<2x80xf32>
    %726 = arith.addf %725, %724 : vector<2x80xf32>
    %727 = arith.divf %725, %726 : vector<2x80xf32>
    %728 = vector.extract_strided_slice %721 {offsets = [0, 80], sizes = [2, 20], strides = [1, 1]} : vector<2x100xf32> to vector<2x20xf32>
    %729 = math.tanh %728 : vector<2x20xf32>
    %730 = vector.extract_strided_slice %727 {offsets = [0, 0], sizes = [2, 20], strides = [1, 1]} : vector<2x80xf32> to vector<2x20xf32>
    %731 = vector.extract_strided_slice %727 {offsets = [0, 20], sizes = [2, 20], strides = [1, 1]} : vector<2x80xf32> to vector<2x20xf32>
    %732 = vector.extract_strided_slice %727 {offsets = [0, 40], sizes = [2, 20], strides = [1, 1]} : vector<2x80xf32> to vector<2x20xf32>
    %733 = vector.extract_strided_slice %727 {offsets = [0, 60], sizes = [2, 20], strides = [1, 1]} : vector<2x80xf32> to vector<2x20xf32>
    %734 = arith.mulf %730, %729 : vector<2x20xf32>
    %735 = arith.mulf %731, %563 : vector<2x20xf32>
    %736 = arith.addf %734, %735 : vector<2x20xf32>
    %737 = arith.mulf %732, %692 : vector<2x20xf32>
    %738 = arith.addf %736, %737 : vector<2x20xf32>
    %739 = math.tanh %738 : vector<2x20xf32>
    %740 = arith.mulf %733, %739 : vector<2x20xf32>
    %c3_287 = arith.constant 3 : index
    %c0_288 = arith.constant 0 : index
    %c0_289 = arith.constant 0 : index
    %741 = vector.load %arg10[%c3_287, %c0_288, %c0_289] : memref<16x20x500xf32, #tpu.memory_space<vmem>>, vector<1x20x500xf32>
    %742 = vector.shape_cast %741 : vector<1x20x500xf32> to vector<20x500xf32>
    %cst_290 = arith.constant dense<0.000000e+00> : vector<2x500xf32>
    %743 = tpu.matmul %740, %742, %cst_290 {dimension_numbers = #tpu.dot_dimension_numbers<[1], [0], [0], [1], [0, 0, 1, 1], [], []>} : vector<2x20xf32>, vector<20x500xf32>, vector<2x500xf32> -> vector<2x500xf32>
    %744 = arith.addf %698, %743 : vector<2x500xf32>
    %c36 = arith.constant 36 : index
    %c0_291 = arith.constant 0 : index
    %745 = vector.load %arg16[%c36, %c0_291] : memref<240x10xf32, #tpu.memory_space<vmem>>, vector<2x10xf32>
    %c0_292 = arith.constant 0 : index
    %c0_293 = arith.constant 0 : index
    %c0_294 = arith.constant 0 : index
    %746 = vector.load %arg6[%c0_292, %c0_293, %c0_294] : memref<4x10x100xf32, #tpu.memory_space<vmem>>, vector<1x10x100xf32>
    %747 = vector.shape_cast %746 : vector<1x10x100xf32> to vector<10x100xf32>
    %cst_295 = arith.constant dense<0.000000e+00> : vector<2x100xf32>
    %748 = tpu.matmul %745, %747, %cst_295 {dimension_numbers = #tpu.dot_dimension_numbers<[1], [0], [0], [1], [0, 0, 1, 1], [], []>} : vector<2x10xf32>, vector<10x100xf32>, vector<2x100xf32> -> vector<2x100xf32>
    %749 = vector.broadcast %562 : vector<1x100xf32> to vector<2x100xf32>
    %750 = arith.addf %749, %748 : vector<2x100xf32>
    %c52 = arith.constant 52 : index
    %c0_296 = arith.constant 0 : index
    %751 = vector.load %arg16[%c52, %c0_296] : memref<240x10xf32, #tpu.memory_space<vmem>>, vector<2x10xf32>
    %c1_297 = arith.constant 1 : index
    %c0_298 = arith.constant 0 : index
    %c0_299 = arith.constant 0 : index
    %752 = vector.load %arg6[%c1_297, %c0_298, %c0_299] : memref<4x10x100xf32, #tpu.memory_space<vmem>>, vector<1x10x100xf32>
    %753 = vector.shape_cast %752 : vector<1x10x100xf32> to vector<10x100xf32>
    %cst_300 = arith.constant dense<0.000000e+00> : vector<2x100xf32>
    %754 = tpu.matmul %751, %753, %cst_300 {dimension_numbers = #tpu.dot_dimension_numbers<[1], [0], [0], [1], [0, 0, 1, 1], [], []>} : vector<2x10xf32>, vector<10x100xf32>, vector<2x100xf32> -> vector<2x100xf32>
    %755 = arith.addf %750, %754 : vector<2x100xf32>
    %c54 = arith.constant 54 : index
    %c0_301 = arith.constant 0 : index
    %756 = vector.load %arg16[%c54, %c0_301] : memref<240x10xf32, #tpu.memory_space<vmem>>, vector<2x10xf32>
    %c2_302 = arith.constant 2 : index
    %c0_303 = arith.constant 0 : index
    %c0_304 = arith.constant 0 : index
    %757 = vector.load %arg6[%c2_302, %c0_303, %c0_304] : memref<4x10x100xf32, #tpu.memory_space<vmem>>, vector<1x10x100xf32>
    %758 = vector.shape_cast %757 : vector<1x10x100xf32> to vector<10x100xf32>
    %cst_305 = arith.constant dense<0.000000e+00> : vector<2x100xf32>
    %759 = tpu.matmul %756, %758, %cst_305 {dimension_numbers = #tpu.dot_dimension_numbers<[1], [0], [0], [1], [0, 0, 1, 1], [], []>} : vector<2x10xf32>, vector<10x100xf32>, vector<2x100xf32> -> vector<2x100xf32>
    %760 = arith.addf %755, %759 : vector<2x100xf32>
    %c70 = arith.constant 70 : index
    %c0_306 = arith.constant 0 : index
    %761 = vector.load %arg16[%c70, %c0_306] : memref<240x10xf32, #tpu.memory_space<vmem>>, vector<2x10xf32>
    %c3_307 = arith.constant 3 : index
    %c0_308 = arith.constant 0 : index
    %c0_309 = arith.constant 0 : index
    %762 = vector.load %arg6[%c3_307, %c0_308, %c0_309] : memref<4x10x100xf32, #tpu.memory_space<vmem>>, vector<1x10x100xf32>
    %763 = vector.shape_cast %762 : vector<1x10x100xf32> to vector<10x100xf32>
    %cst_310 = arith.constant dense<0.000000e+00> : vector<2x100xf32>
    %764 = tpu.matmul %761, %763, %cst_310 {dimension_numbers = #tpu.dot_dimension_numbers<[1], [0], [0], [1], [0, 0, 1, 1], [], []>} : vector<2x10xf32>, vector<10x100xf32>, vector<2x100xf32> -> vector<2x100xf32>
    %765 = arith.addf %760, %764 : vector<2x100xf32>
    %cst_311 = arith.constant dense<0.000000e+00> : vector<2x100xf32>
    %766 = tpu.matmul %603, %560, %cst_311 {dimension_numbers = #tpu.dot_dimension_numbers<[1], [0], [0], [1], [0, 0, 1, 1], [], []>} : vector<2x20xf32>, vector<20x100xf32>, vector<2x100xf32> -> vector<2x100xf32>
    %767 = arith.addf %765, %766 : vector<2x100xf32>
    %768 = vector.extract_strided_slice %767 {offsets = [0, 0], sizes = [2, 80], strides = [1, 1]} : vector<2x100xf32> to vector<2x80xf32>
    %769 = arith.negf %768 : vector<2x80xf32>
    %770 = math.exp %769 : vector<2x80xf32>
    %cst_312 = arith.constant 1.000000e+00 : f32
    %771 = vector.broadcast %cst_312 : f32 to vector<2x80xf32>
    %772 = arith.addf %771, %770 : vector<2x80xf32>
    %773 = arith.divf %771, %772 : vector<2x80xf32>
    %774 = vector.extract_strided_slice %767 {offsets = [0, 80], sizes = [2, 20], strides = [1, 1]} : vector<2x100xf32> to vector<2x20xf32>
    %775 = math.tanh %774 : vector<2x20xf32>
    %776 = vector.extract_strided_slice %773 {offsets = [0, 0], sizes = [2, 20], strides = [1, 1]} : vector<2x80xf32> to vector<2x20xf32>
    %777 = vector.extract_strided_slice %773 {offsets = [0, 20], sizes = [2, 20], strides = [1, 1]} : vector<2x80xf32> to vector<2x20xf32>
    %778 = vector.extract_strided_slice %773 {offsets = [0, 40], sizes = [2, 20], strides = [1, 1]} : vector<2x80xf32> to vector<2x20xf32>
    %779 = vector.extract_strided_slice %773 {offsets = [0, 60], sizes = [2, 20], strides = [1, 1]} : vector<2x80xf32> to vector<2x20xf32>
    %780 = arith.mulf %776, %775 : vector<2x20xf32>
    %781 = arith.mulf %777, %601 : vector<2x20xf32>
    %782 = arith.addf %780, %781 : vector<2x20xf32>
    %783 = arith.mulf %778, %563 : vector<2x20xf32>
    %784 = arith.addf %782, %783 : vector<2x20xf32>
    %785 = math.tanh %784 : vector<2x20xf32>
    %786 = arith.mulf %779, %785 : vector<2x20xf32>
    %c4 = arith.constant 4 : index
    %c0_313 = arith.constant 0 : index
    %c0_314 = arith.constant 0 : index
    %787 = vector.load %arg10[%c4, %c0_313, %c0_314] : memref<16x20x500xf32, #tpu.memory_space<vmem>>, vector<1x20x500xf32>
    %788 = vector.shape_cast %787 : vector<1x20x500xf32> to vector<20x500xf32>
    %cst_315 = arith.constant dense<0.000000e+00> : vector<2x500xf32>
    %789 = tpu.matmul %786, %788, %cst_315 {dimension_numbers = #tpu.dot_dimension_numbers<[1], [0], [0], [1], [0, 0, 1, 1], [], []>} : vector<2x20xf32>, vector<20x500xf32>, vector<2x500xf32> -> vector<2x500xf32>
    %790 = arith.addf %744, %789 : vector<2x500xf32>
    %c68 = arith.constant 68 : index
    %c0_316 = arith.constant 0 : index
    %791 = vector.load %arg16[%c68, %c0_316] : memref<240x10xf32, #tpu.memory_space<vmem>>, vector<2x10xf32>
    %c0_317 = arith.constant 0 : index
    %c0_318 = arith.constant 0 : index
    %c0_319 = arith.constant 0 : index
    %792 = vector.load %arg6[%c0_317, %c0_318, %c0_319] : memref<4x10x100xf32, #tpu.memory_space<vmem>>, vector<1x10x100xf32>
    %793 = vector.shape_cast %792 : vector<1x10x100xf32> to vector<10x100xf32>
    %cst_320 = arith.constant dense<0.000000e+00> : vector<2x100xf32>
    %794 = tpu.matmul %791, %793, %cst_320 {dimension_numbers = #tpu.dot_dimension_numbers<[1], [0], [0], [1], [0, 0, 1, 1], [], []>} : vector<2x10xf32>, vector<10x100xf32>, vector<2x100xf32> -> vector<2x100xf32>
    %795 = vector.broadcast %562 : vector<1x100xf32> to vector<2x100xf32>
    %796 = arith.addf %795, %794 : vector<2x100xf32>
    %c84 = arith.constant 84 : index
    %c0_321 = arith.constant 0 : index
    %797 = vector.load %arg16[%c84, %c0_321] : memref<240x10xf32, #tpu.memory_space<vmem>>, vector<2x10xf32>
    %c1_322 = arith.constant 1 : index
    %c0_323 = arith.constant 0 : index
    %c0_324 = arith.constant 0 : index
    %798 = vector.load %arg6[%c1_322, %c0_323, %c0_324] : memref<4x10x100xf32, #tpu.memory_space<vmem>>, vector<1x10x100xf32>
    %799 = vector.shape_cast %798 : vector<1x10x100xf32> to vector<10x100xf32>
    %cst_325 = arith.constant dense<0.000000e+00> : vector<2x100xf32>
    %800 = tpu.matmul %797, %799, %cst_325 {dimension_numbers = #tpu.dot_dimension_numbers<[1], [0], [0], [1], [0, 0, 1, 1], [], []>} : vector<2x10xf32>, vector<10x100xf32>, vector<2x100xf32> -> vector<2x100xf32>
    %801 = arith.addf %796, %800 : vector<2x100xf32>
    %c86 = arith.constant 86 : index
    %c0_326 = arith.constant 0 : index
    %802 = vector.load %arg16[%c86, %c0_326] : memref<240x10xf32, #tpu.memory_space<vmem>>, vector<2x10xf32>
    %c2_327 = arith.constant 2 : index
    %c0_328 = arith.constant 0 : index
    %c0_329 = arith.constant 0 : index
    %803 = vector.load %arg6[%c2_327, %c0_328, %c0_329] : memref<4x10x100xf32, #tpu.memory_space<vmem>>, vector<1x10x100xf32>
    %804 = vector.shape_cast %803 : vector<1x10x100xf32> to vector<10x100xf32>
    %cst_330 = arith.constant dense<0.000000e+00> : vector<2x100xf32>
    %805 = tpu.matmul %802, %804, %cst_330 {dimension_numbers = #tpu.dot_dimension_numbers<[1], [0], [0], [1], [0, 0, 1, 1], [], []>} : vector<2x10xf32>, vector<10x100xf32>, vector<2x100xf32> -> vector<2x100xf32>
    %806 = arith.addf %801, %805 : vector<2x100xf32>
    %c102 = arith.constant 102 : index
    %c0_331 = arith.constant 0 : index
    %807 = vector.load %arg16[%c102, %c0_331] : memref<240x10xf32, #tpu.memory_space<vmem>>, vector<2x10xf32>
    %c3_332 = arith.constant 3 : index
    %c0_333 = arith.constant 0 : index
    %c0_334 = arith.constant 0 : index
    %808 = vector.load %arg6[%c3_332, %c0_333, %c0_334] : memref<4x10x100xf32, #tpu.memory_space<vmem>>, vector<1x10x100xf32>
    %809 = vector.shape_cast %808 : vector<1x10x100xf32> to vector<10x100xf32>
    %cst_335 = arith.constant dense<0.000000e+00> : vector<2x100xf32>
    %810 = tpu.matmul %807, %809, %cst_335 {dimension_numbers = #tpu.dot_dimension_numbers<[1], [0], [0], [1], [0, 0, 1, 1], [], []>} : vector<2x10xf32>, vector<10x100xf32>, vector<2x100xf32> -> vector<2x100xf32>
    %811 = arith.addf %806, %810 : vector<2x100xf32>
    %cst_336 = arith.constant dense<0.000000e+00> : vector<2x100xf32>
    %812 = tpu.matmul %648, %560, %cst_336 {dimension_numbers = #tpu.dot_dimension_numbers<[1], [0], [0], [1], [0, 0, 1, 1], [], []>} : vector<2x20xf32>, vector<20x100xf32>, vector<2x100xf32> -> vector<2x100xf32>
    %813 = arith.addf %811, %812 : vector<2x100xf32>
    %cst_337 = arith.constant dense<0.000000e+00> : vector<2x100xf32>
    %814 = tpu.matmul %786, %561, %cst_337 {dimension_numbers = #tpu.dot_dimension_numbers<[1], [0], [0], [1], [0, 0, 1, 1], [], []>} : vector<2x20xf32>, vector<20x100xf32>, vector<2x100xf32> -> vector<2x100xf32>
    %815 = arith.addf %813, %814 : vector<2x100xf32>
    %816 = vector.extract_strided_slice %815 {offsets = [0, 0], sizes = [2, 80], strides = [1, 1]} : vector<2x100xf32> to vector<2x80xf32>
    %817 = arith.negf %816 : vector<2x80xf32>
    %818 = math.exp %817 : vector<2x80xf32>
    %cst_338 = arith.constant 1.000000e+00 : f32
    %819 = vector.broadcast %cst_338 : f32 to vector<2x80xf32>
    %820 = arith.addf %819, %818 : vector<2x80xf32>
    %821 = arith.divf %819, %820 : vector<2x80xf32>
    %822 = vector.extract_strided_slice %815 {offsets = [0, 80], sizes = [2, 20], strides = [1, 1]} : vector<2x100xf32> to vector<2x20xf32>
    %823 = math.tanh %822 : vector<2x20xf32>
    %824 = vector.extract_strided_slice %821 {offsets = [0, 0], sizes = [2, 20], strides = [1, 1]} : vector<2x80xf32> to vector<2x20xf32>
    %825 = vector.extract_strided_slice %821 {offsets = [0, 20], sizes = [2, 20], strides = [1, 1]} : vector<2x80xf32> to vector<2x20xf32>
    %826 = vector.extract_strided_slice %821 {offsets = [0, 40], sizes = [2, 20], strides = [1, 1]} : vector<2x80xf32> to vector<2x20xf32>
    %827 = vector.extract_strided_slice %821 {offsets = [0, 60], sizes = [2, 20], strides = [1, 1]} : vector<2x80xf32> to vector<2x20xf32>
    %828 = arith.mulf %824, %823 : vector<2x20xf32>
    %829 = arith.mulf %825, %646 : vector<2x20xf32>
    %830 = arith.addf %828, %829 : vector<2x20xf32>
    %831 = arith.mulf %826, %784 : vector<2x20xf32>
    %832 = arith.addf %830, %831 : vector<2x20xf32>
    %833 = math.tanh %832 : vector<2x20xf32>
    %834 = arith.mulf %827, %833 : vector<2x20xf32>
    %c5 = arith.constant 5 : index
    %c0_339 = arith.constant 0 : index
    %c0_340 = arith.constant 0 : index
    %835 = vector.load %arg10[%c5, %c0_339, %c0_340] : memref<16x20x500xf32, #tpu.memory_space<vmem>>, vector<1x20x500xf32>
    %836 = vector.shape_cast %835 : vector<1x20x500xf32> to vector<20x500xf32>
    %cst_341 = arith.constant dense<0.000000e+00> : vector<2x500xf32>
    %837 = tpu.matmul %834, %836, %cst_341 {dimension_numbers = #tpu.dot_dimension_numbers<[1], [0], [0], [1], [0, 0, 1, 1], [], []>} : vector<2x20xf32>, vector<20x500xf32>, vector<2x500xf32> -> vector<2x500xf32>
    %838 = arith.addf %790, %837 : vector<2x500xf32>
    %c100 = arith.constant 100 : index
    %c0_342 = arith.constant 0 : index
    %839 = vector.load %arg16[%c100, %c0_342] : memref<240x10xf32, #tpu.memory_space<vmem>>, vector<2x10xf32>
    %c0_343 = arith.constant 0 : index
    %c0_344 = arith.constant 0 : index
    %c0_345 = arith.constant 0 : index
    %840 = vector.load %arg6[%c0_343, %c0_344, %c0_345] : memref<4x10x100xf32, #tpu.memory_space<vmem>>, vector<1x10x100xf32>
    %841 = vector.shape_cast %840 : vector<1x10x100xf32> to vector<10x100xf32>
    %cst_346 = arith.constant dense<0.000000e+00> : vector<2x100xf32>
    %842 = tpu.matmul %839, %841, %cst_346 {dimension_numbers = #tpu.dot_dimension_numbers<[1], [0], [0], [1], [0, 0, 1, 1], [], []>} : vector<2x10xf32>, vector<10x100xf32>, vector<2x100xf32> -> vector<2x100xf32>
    %843 = vector.broadcast %562 : vector<1x100xf32> to vector<2x100xf32>
    %844 = arith.addf %843, %842 : vector<2x100xf32>
    %c116 = arith.constant 116 : index
    %c0_347 = arith.constant 0 : index
    %845 = vector.load %arg16[%c116, %c0_347] : memref<240x10xf32, #tpu.memory_space<vmem>>, vector<2x10xf32>
    %c1_348 = arith.constant 1 : index
    %c0_349 = arith.constant 0 : index
    %c0_350 = arith.constant 0 : index
    %846 = vector.load %arg6[%c1_348, %c0_349, %c0_350] : memref<4x10x100xf32, #tpu.memory_space<vmem>>, vector<1x10x100xf32>
    %847 = vector.shape_cast %846 : vector<1x10x100xf32> to vector<10x100xf32>
    %cst_351 = arith.constant dense<0.000000e+00> : vector<2x100xf32>
    %848 = tpu.matmul %845, %847, %cst_351 {dimension_numbers = #tpu.dot_dimension_numbers<[1], [0], [0], [1], [0, 0, 1, 1], [], []>} : vector<2x10xf32>, vector<10x100xf32>, vector<2x100xf32> -> vector<2x100xf32>
    %849 = arith.addf %844, %848 : vector<2x100xf32>
    %c118 = arith.constant 118 : index
    %c0_352 = arith.constant 0 : index
    %850 = vector.load %arg16[%c118, %c0_352] : memref<240x10xf32, #tpu.memory_space<vmem>>, vector<2x10xf32>
    %c2_353 = arith.constant 2 : index
    %c0_354 = arith.constant 0 : index
    %c0_355 = arith.constant 0 : index
    %851 = vector.load %arg6[%c2_353, %c0_354, %c0_355] : memref<4x10x100xf32, #tpu.memory_space<vmem>>, vector<1x10x100xf32>
    %852 = vector.shape_cast %851 : vector<1x10x100xf32> to vector<10x100xf32>
    %cst_356 = arith.constant dense<0.000000e+00> : vector<2x100xf32>
    %853 = tpu.matmul %850, %852, %cst_356 {dimension_numbers = #tpu.dot_dimension_numbers<[1], [0], [0], [1], [0, 0, 1, 1], [], []>} : vector<2x10xf32>, vector<10x100xf32>, vector<2x100xf32> -> vector<2x100xf32>
    %854 = arith.addf %849, %853 : vector<2x100xf32>
    %c134 = arith.constant 134 : index
    %c0_357 = arith.constant 0 : index
    %855 = vector.load %arg16[%c134, %c0_357] : memref<240x10xf32, #tpu.memory_space<vmem>>, vector<2x10xf32>
    %c3_358 = arith.constant 3 : index
    %c0_359 = arith.constant 0 : index
    %c0_360 = arith.constant 0 : index
    %856 = vector.load %arg6[%c3_358, %c0_359, %c0_360] : memref<4x10x100xf32, #tpu.memory_space<vmem>>, vector<1x10x100xf32>
    %857 = vector.shape_cast %856 : vector<1x10x100xf32> to vector<10x100xf32>
    %cst_361 = arith.constant dense<0.000000e+00> : vector<2x100xf32>
    %858 = tpu.matmul %855, %857, %cst_361 {dimension_numbers = #tpu.dot_dimension_numbers<[1], [0], [0], [1], [0, 0, 1, 1], [], []>} : vector<2x10xf32>, vector<10x100xf32>, vector<2x100xf32> -> vector<2x100xf32>
    %859 = arith.addf %854, %858 : vector<2x100xf32>
    %cst_362 = arith.constant dense<0.000000e+00> : vector<2x100xf32>
    %860 = tpu.matmul %694, %560, %cst_362 {dimension_numbers = #tpu.dot_dimension_numbers<[1], [0], [0], [1], [0, 0, 1, 1], [], []>} : vector<2x20xf32>, vector<20x100xf32>, vector<2x100xf32> -> vector<2x100xf32>
    %861 = arith.addf %859, %860 : vector<2x100xf32>
    %cst_363 = arith.constant dense<0.000000e+00> : vector<2x100xf32>
    %862 = tpu.matmul %834, %561, %cst_363 {dimension_numbers = #tpu.dot_dimension_numbers<[1], [0], [0], [1], [0, 0, 1, 1], [], []>} : vector<2x20xf32>, vector<20x100xf32>, vector<2x100xf32> -> vector<2x100xf32>
    %863 = arith.addf %861, %862 : vector<2x100xf32>
    %864 = vector.extract_strided_slice %863 {offsets = [0, 0], sizes = [2, 80], strides = [1, 1]} : vector<2x100xf32> to vector<2x80xf32>
    %865 = arith.negf %864 : vector<2x80xf32>
    %866 = math.exp %865 : vector<2x80xf32>
    %cst_364 = arith.constant 1.000000e+00 : f32
    %867 = vector.broadcast %cst_364 : f32 to vector<2x80xf32>
    %868 = arith.addf %867, %866 : vector<2x80xf32>
    %869 = arith.divf %867, %868 : vector<2x80xf32>
    %870 = vector.extract_strided_slice %863 {offsets = [0, 80], sizes = [2, 20], strides = [1, 1]} : vector<2x100xf32> to vector<2x20xf32>
    %871 = math.tanh %870 : vector<2x20xf32>
    %872 = vector.extract_strided_slice %869 {offsets = [0, 0], sizes = [2, 20], strides = [1, 1]} : vector<2x80xf32> to vector<2x20xf32>
    %873 = vector.extract_strided_slice %869 {offsets = [0, 20], sizes = [2, 20], strides = [1, 1]} : vector<2x80xf32> to vector<2x20xf32>
    %874 = vector.extract_strided_slice %869 {offsets = [0, 40], sizes = [2, 20], strides = [1, 1]} : vector<2x80xf32> to vector<2x20xf32>
    %875 = vector.extract_strided_slice %869 {offsets = [0, 60], sizes = [2, 20], strides = [1, 1]} : vector<2x80xf32> to vector<2x20xf32>
    %876 = arith.mulf %872, %871 : vector<2x20xf32>
    %877 = arith.mulf %873, %692 : vector<2x20xf32>
    %878 = arith.addf %876, %877 : vector<2x20xf32>
    %879 = arith.mulf %874, %832 : vector<2x20xf32>
    %880 = arith.addf %878, %879 : vector<2x20xf32>
    %881 = math.tanh %880 : vector<2x20xf32>
    %882 = arith.mulf %875, %881 : vector<2x20xf32>
    %c6 = arith.constant 6 : index
    %c0_365 = arith.constant 0 : index
    %c0_366 = arith.constant 0 : index
    %883 = vector.load %arg10[%c6, %c0_365, %c0_366] : memref<16x20x500xf32, #tpu.memory_space<vmem>>, vector<1x20x500xf32>
    %884 = vector.shape_cast %883 : vector<1x20x500xf32> to vector<20x500xf32>
    %cst_367 = arith.constant dense<0.000000e+00> : vector<2x500xf32>
    %885 = tpu.matmul %882, %884, %cst_367 {dimension_numbers = #tpu.dot_dimension_numbers<[1], [0], [0], [1], [0, 0, 1, 1], [], []>} : vector<2x20xf32>, vector<20x500xf32>, vector<2x500xf32> -> vector<2x500xf32>
    %886 = arith.addf %838, %885 : vector<2x500xf32>
    %c132 = arith.constant 132 : index
    %c0_368 = arith.constant 0 : index
    %887 = vector.load %arg16[%c132, %c0_368] : memref<240x10xf32, #tpu.memory_space<vmem>>, vector<2x10xf32>
    %c0_369 = arith.constant 0 : index
    %c0_370 = arith.constant 0 : index
    %c0_371 = arith.constant 0 : index
    %888 = vector.load %arg6[%c0_369, %c0_370, %c0_371] : memref<4x10x100xf32, #tpu.memory_space<vmem>>, vector<1x10x100xf32>
    %889 = vector.shape_cast %888 : vector<1x10x100xf32> to vector<10x100xf32>
    %cst_372 = arith.constant dense<0.000000e+00> : vector<2x100xf32>
    %890 = tpu.matmul %887, %889, %cst_372 {dimension_numbers = #tpu.dot_dimension_numbers<[1], [0], [0], [1], [0, 0, 1, 1], [], []>} : vector<2x10xf32>, vector<10x100xf32>, vector<2x100xf32> -> vector<2x100xf32>
    %891 = vector.broadcast %562 : vector<1x100xf32> to vector<2x100xf32>
    %892 = arith.addf %891, %890 : vector<2x100xf32>
    %c148 = arith.constant 148 : index
    %c0_373 = arith.constant 0 : index
    %893 = vector.load %arg16[%c148, %c0_373] : memref<240x10xf32, #tpu.memory_space<vmem>>, vector<2x10xf32>
    %c1_374 = arith.constant 1 : index
    %c0_375 = arith.constant 0 : index
    %c0_376 = arith.constant 0 : index
    %894 = vector.load %arg6[%c1_374, %c0_375, %c0_376] : memref<4x10x100xf32, #tpu.memory_space<vmem>>, vector<1x10x100xf32>
    %895 = vector.shape_cast %894 : vector<1x10x100xf32> to vector<10x100xf32>
    %cst_377 = arith.constant dense<0.000000e+00> : vector<2x100xf32>
    %896 = tpu.matmul %893, %895, %cst_377 {dimension_numbers = #tpu.dot_dimension_numbers<[1], [0], [0], [1], [0, 0, 1, 1], [], []>} : vector<2x10xf32>, vector<10x100xf32>, vector<2x100xf32> -> vector<2x100xf32>
    %897 = arith.addf %892, %896 : vector<2x100xf32>
    %c150 = arith.constant 150 : index
    %c0_378 = arith.constant 0 : index
    %898 = vector.load %arg16[%c150, %c0_378] : memref<240x10xf32, #tpu.memory_space<vmem>>, vector<2x10xf32>
    %c2_379 = arith.constant 2 : index
    %c0_380 = arith.constant 0 : index
    %c0_381 = arith.constant 0 : index
    %899 = vector.load %arg6[%c2_379, %c0_380, %c0_381] : memref<4x10x100xf32, #tpu.memory_space<vmem>>, vector<1x10x100xf32>
    %900 = vector.shape_cast %899 : vector<1x10x100xf32> to vector<10x100xf32>
    %cst_382 = arith.constant dense<0.000000e+00> : vector<2x100xf32>
    %901 = tpu.matmul %898, %900, %cst_382 {dimension_numbers = #tpu.dot_dimension_numbers<[1], [0], [0], [1], [0, 0, 1, 1], [], []>} : vector<2x10xf32>, vector<10x100xf32>, vector<2x100xf32> -> vector<2x100xf32>
    %902 = arith.addf %897, %901 : vector<2x100xf32>
    %c166 = arith.constant 166 : index
    %c0_383 = arith.constant 0 : index
    %903 = vector.load %arg16[%c166, %c0_383] : memref<240x10xf32, #tpu.memory_space<vmem>>, vector<2x10xf32>
    %c3_384 = arith.constant 3 : index
    %c0_385 = arith.constant 0 : index
    %c0_386 = arith.constant 0 : index
    %904 = vector.load %arg6[%c3_384, %c0_385, %c0_386] : memref<4x10x100xf32, #tpu.memory_space<vmem>>, vector<1x10x100xf32>
    %905 = vector.shape_cast %904 : vector<1x10x100xf32> to vector<10x100xf32>
    %cst_387 = arith.constant dense<0.000000e+00> : vector<2x100xf32>
    %906 = tpu.matmul %903, %905, %cst_387 {dimension_numbers = #tpu.dot_dimension_numbers<[1], [0], [0], [1], [0, 0, 1, 1], [], []>} : vector<2x10xf32>, vector<10x100xf32>, vector<2x100xf32> -> vector<2x100xf32>
    %907 = arith.addf %902, %906 : vector<2x100xf32>
    %cst_388 = arith.constant dense<0.000000e+00> : vector<2x100xf32>
    %908 = tpu.matmul %740, %560, %cst_388 {dimension_numbers = #tpu.dot_dimension_numbers<[1], [0], [0], [1], [0, 0, 1, 1], [], []>} : vector<2x20xf32>, vector<20x100xf32>, vector<2x100xf32> -> vector<2x100xf32>
    %909 = arith.addf %907, %908 : vector<2x100xf32>
    %cst_389 = arith.constant dense<0.000000e+00> : vector<2x100xf32>
    %910 = tpu.matmul %882, %561, %cst_389 {dimension_numbers = #tpu.dot_dimension_numbers<[1], [0], [0], [1], [0, 0, 1, 1], [], []>} : vector<2x20xf32>, vector<20x100xf32>, vector<2x100xf32> -> vector<2x100xf32>
    %911 = arith.addf %909, %910 : vector<2x100xf32>
    %912 = vector.extract_strided_slice %911 {offsets = [0, 0], sizes = [2, 80], strides = [1, 1]} : vector<2x100xf32> to vector<2x80xf32>
    %913 = arith.negf %912 : vector<2x80xf32>
    %914 = math.exp %913 : vector<2x80xf32>
    %cst_390 = arith.constant 1.000000e+00 : f32
    %915 = vector.broadcast %cst_390 : f32 to vector<2x80xf32>
    %916 = arith.addf %915, %914 : vector<2x80xf32>
    %917 = arith.divf %915, %916 : vector<2x80xf32>
    %918 = vector.extract_strided_slice %911 {offsets = [0, 80], sizes = [2, 20], strides = [1, 1]} : vector<2x100xf32> to vector<2x20xf32>
    %919 = math.tanh %918 : vector<2x20xf32>
    %920 = vector.extract_strided_slice %917 {offsets = [0, 0], sizes = [2, 20], strides = [1, 1]} : vector<2x80xf32> to vector<2x20xf32>
    %921 = vector.extract_strided_slice %917 {offsets = [0, 20], sizes = [2, 20], strides = [1, 1]} : vector<2x80xf32> to vector<2x20xf32>
    %922 = vector.extract_strided_slice %917 {offsets = [0, 40], sizes = [2, 20], strides = [1, 1]} : vector<2x80xf32> to vector<2x20xf32>
    %923 = vector.extract_strided_slice %917 {offsets = [0, 60], sizes = [2, 20], strides = [1, 1]} : vector<2x80xf32> to vector<2x20xf32>
    %924 = arith.mulf %920, %919 : vector<2x20xf32>
    %925 = arith.mulf %921, %738 : vector<2x20xf32>
    %926 = arith.addf %924, %925 : vector<2x20xf32>
    %927 = arith.mulf %922, %880 : vector<2x20xf32>
    %928 = arith.addf %926, %927 : vector<2x20xf32>
    %929 = math.tanh %928 : vector<2x20xf32>
    %930 = arith.mulf %923, %929 : vector<2x20xf32>
    %c7 = arith.constant 7 : index
    %c0_391 = arith.constant 0 : index
    %c0_392 = arith.constant 0 : index
    %931 = vector.load %arg10[%c7, %c0_391, %c0_392] : memref<16x20x500xf32, #tpu.memory_space<vmem>>, vector<1x20x500xf32>
    %932 = vector.shape_cast %931 : vector<1x20x500xf32> to vector<20x500xf32>
    %cst_393 = arith.constant dense<0.000000e+00> : vector<2x500xf32>
    %933 = tpu.matmul %930, %932, %cst_393 {dimension_numbers = #tpu.dot_dimension_numbers<[1], [0], [0], [1], [0, 0, 1, 1], [], []>} : vector<2x20xf32>, vector<20x500xf32>, vector<2x500xf32> -> vector<2x500xf32>
    %934 = arith.addf %886, %933 : vector<2x500xf32>
    %c72 = arith.constant 72 : index
    %c0_394 = arith.constant 0 : index
    %935 = vector.load %arg16[%c72, %c0_394] : memref<240x10xf32, #tpu.memory_space<vmem>>, vector<2x10xf32>
    %c0_395 = arith.constant 0 : index
    %c0_396 = arith.constant 0 : index
    %c0_397 = arith.constant 0 : index
    %936 = vector.load %arg6[%c0_395, %c0_396, %c0_397] : memref<4x10x100xf32, #tpu.memory_space<vmem>>, vector<1x10x100xf32>
    %937 = vector.shape_cast %936 : vector<1x10x100xf32> to vector<10x100xf32>
    %cst_398 = arith.constant dense<0.000000e+00> : vector<2x100xf32>
    %938 = tpu.matmul %935, %937, %cst_398 {dimension_numbers = #tpu.dot_dimension_numbers<[1], [0], [0], [1], [0, 0, 1, 1], [], []>} : vector<2x10xf32>, vector<10x100xf32>, vector<2x100xf32> -> vector<2x100xf32>
    %939 = vector.broadcast %562 : vector<1x100xf32> to vector<2x100xf32>
    %940 = arith.addf %939, %938 : vector<2x100xf32>
    %c88 = arith.constant 88 : index
    %c0_399 = arith.constant 0 : index
    %941 = vector.load %arg16[%c88, %c0_399] : memref<240x10xf32, #tpu.memory_space<vmem>>, vector<2x10xf32>
    %c1_400 = arith.constant 1 : index
    %c0_401 = arith.constant 0 : index
    %c0_402 = arith.constant 0 : index
    %942 = vector.load %arg6[%c1_400, %c0_401, %c0_402] : memref<4x10x100xf32, #tpu.memory_space<vmem>>, vector<1x10x100xf32>
    %943 = vector.shape_cast %942 : vector<1x10x100xf32> to vector<10x100xf32>
    %cst_403 = arith.constant dense<0.000000e+00> : vector<2x100xf32>
    %944 = tpu.matmul %941, %943, %cst_403 {dimension_numbers = #tpu.dot_dimension_numbers<[1], [0], [0], [1], [0, 0, 1, 1], [], []>} : vector<2x10xf32>, vector<10x100xf32>, vector<2x100xf32> -> vector<2x100xf32>
    %945 = arith.addf %940, %944 : vector<2x100xf32>
    %c90 = arith.constant 90 : index
    %c0_404 = arith.constant 0 : index
    %946 = vector.load %arg16[%c90, %c0_404] : memref<240x10xf32, #tpu.memory_space<vmem>>, vector<2x10xf32>
    %c2_405 = arith.constant 2 : index
    %c0_406 = arith.constant 0 : index
    %c0_407 = arith.constant 0 : index
    %947 = vector.load %arg6[%c2_405, %c0_406, %c0_407] : memref<4x10x100xf32, #tpu.memory_space<vmem>>, vector<1x10x100xf32>
    %948 = vector.shape_cast %947 : vector<1x10x100xf32> to vector<10x100xf32>
    %cst_408 = arith.constant dense<0.000000e+00> : vector<2x100xf32>
    %949 = tpu.matmul %946, %948, %cst_408 {dimension_numbers = #tpu.dot_dimension_numbers<[1], [0], [0], [1], [0, 0, 1, 1], [], []>} : vector<2x10xf32>, vector<10x100xf32>, vector<2x100xf32> -> vector<2x100xf32>
    %950 = arith.addf %945, %949 : vector<2x100xf32>
    %c106 = arith.constant 106 : index
    %c0_409 = arith.constant 0 : index
    %951 = vector.load %arg16[%c106, %c0_409] : memref<240x10xf32, #tpu.memory_space<vmem>>, vector<2x10xf32>
    %c3_410 = arith.constant 3 : index
    %c0_411 = arith.constant 0 : index
    %c0_412 = arith.constant 0 : index
    %952 = vector.load %arg6[%c3_410, %c0_411, %c0_412] : memref<4x10x100xf32, #tpu.memory_space<vmem>>, vector<1x10x100xf32>
    %953 = vector.shape_cast %952 : vector<1x10x100xf32> to vector<10x100xf32>
    %cst_413 = arith.constant dense<0.000000e+00> : vector<2x100xf32>
    %954 = tpu.matmul %951, %953, %cst_413 {dimension_numbers = #tpu.dot_dimension_numbers<[1], [0], [0], [1], [0, 0, 1, 1], [], []>} : vector<2x10xf32>, vector<10x100xf32>, vector<2x100xf32> -> vector<2x100xf32>
    %955 = arith.addf %950, %954 : vector<2x100xf32>
    %cst_414 = arith.constant dense<0.000000e+00> : vector<2x100xf32>
    %956 = tpu.matmul %786, %560, %cst_414 {dimension_numbers = #tpu.dot_dimension_numbers<[1], [0], [0], [1], [0, 0, 1, 1], [], []>} : vector<2x20xf32>, vector<20x100xf32>, vector<2x100xf32> -> vector<2x100xf32>
    %957 = arith.addf %955, %956 : vector<2x100xf32>
    %958 = vector.extract_strided_slice %957 {offsets = [0, 0], sizes = [2, 80], strides = [1, 1]} : vector<2x100xf32> to vector<2x80xf32>
    %959 = arith.negf %958 : vector<2x80xf32>
    %960 = math.exp %959 : vector<2x80xf32>
    %cst_415 = arith.constant 1.000000e+00 : f32
    %961 = vector.broadcast %cst_415 : f32 to vector<2x80xf32>
    %962 = arith.addf %961, %960 : vector<2x80xf32>
    %963 = arith.divf %961, %962 : vector<2x80xf32>
    %964 = vector.extract_strided_slice %957 {offsets = [0, 80], sizes = [2, 20], strides = [1, 1]} : vector<2x100xf32> to vector<2x20xf32>
    %965 = math.tanh %964 : vector<2x20xf32>
    %966 = vector.extract_strided_slice %963 {offsets = [0, 0], sizes = [2, 20], strides = [1, 1]} : vector<2x80xf32> to vector<2x20xf32>
    %967 = vector.extract_strided_slice %963 {offsets = [0, 20], sizes = [2, 20], strides = [1, 1]} : vector<2x80xf32> to vector<2x20xf32>
    %968 = vector.extract_strided_slice %963 {offsets = [0, 40], sizes = [2, 20], strides = [1, 1]} : vector<2x80xf32> to vector<2x20xf32>
    %969 = vector.extract_strided_slice %963 {offsets = [0, 60], sizes = [2, 20], strides = [1, 1]} : vector<2x80xf32> to vector<2x20xf32>
    %970 = arith.mulf %966, %965 : vector<2x20xf32>
    %971 = arith.mulf %967, %784 : vector<2x20xf32>
    %972 = arith.addf %970, %971 : vector<2x20xf32>
    %973 = arith.mulf %968, %563 : vector<2x20xf32>
    %974 = arith.addf %972, %973 : vector<2x20xf32>
    %975 = math.tanh %974 : vector<2x20xf32>
    %976 = arith.mulf %969, %975 : vector<2x20xf32>
    %c8 = arith.constant 8 : index
    %c0_416 = arith.constant 0 : index
    %c0_417 = arith.constant 0 : index
    %977 = vector.load %arg10[%c8, %c0_416, %c0_417] : memref<16x20x500xf32, #tpu.memory_space<vmem>>, vector<1x20x500xf32>
    %978 = vector.shape_cast %977 : vector<1x20x500xf32> to vector<20x500xf32>
    %cst_418 = arith.constant dense<0.000000e+00> : vector<2x500xf32>
    %979 = tpu.matmul %976, %978, %cst_418 {dimension_numbers = #tpu.dot_dimension_numbers<[1], [0], [0], [1], [0, 0, 1, 1], [], []>} : vector<2x20xf32>, vector<20x500xf32>, vector<2x500xf32> -> vector<2x500xf32>
    %980 = arith.addf %934, %979 : vector<2x500xf32>
    %c104 = arith.constant 104 : index
    %c0_419 = arith.constant 0 : index
    %981 = vector.load %arg16[%c104, %c0_419] : memref<240x10xf32, #tpu.memory_space<vmem>>, vector<2x10xf32>
    %c0_420 = arith.constant 0 : index
    %c0_421 = arith.constant 0 : index
    %c0_422 = arith.constant 0 : index
    %982 = vector.load %arg6[%c0_420, %c0_421, %c0_422] : memref<4x10x100xf32, #tpu.memory_space<vmem>>, vector<1x10x100xf32>
    %983 = vector.shape_cast %982 : vector<1x10x100xf32> to vector<10x100xf32>
    %cst_423 = arith.constant dense<0.000000e+00> : vector<2x100xf32>
    %984 = tpu.matmul %981, %983, %cst_423 {dimension_numbers = #tpu.dot_dimension_numbers<[1], [0], [0], [1], [0, 0, 1, 1], [], []>} : vector<2x10xf32>, vector<10x100xf32>, vector<2x100xf32> -> vector<2x100xf32>
    %985 = vector.broadcast %562 : vector<1x100xf32> to vector<2x100xf32>
    %986 = arith.addf %985, %984 : vector<2x100xf32>
    %c120 = arith.constant 120 : index
    %c0_424 = arith.constant 0 : index
    %987 = vector.load %arg16[%c120, %c0_424] : memref<240x10xf32, #tpu.memory_space<vmem>>, vector<2x10xf32>
    %c1_425 = arith.constant 1 : index
    %c0_426 = arith.constant 0 : index
    %c0_427 = arith.constant 0 : index
    %988 = vector.load %arg6[%c1_425, %c0_426, %c0_427] : memref<4x10x100xf32, #tpu.memory_space<vmem>>, vector<1x10x100xf32>
    %989 = vector.shape_cast %988 : vector<1x10x100xf32> to vector<10x100xf32>
    %cst_428 = arith.constant dense<0.000000e+00> : vector<2x100xf32>
    %990 = tpu.matmul %987, %989, %cst_428 {dimension_numbers = #tpu.dot_dimension_numbers<[1], [0], [0], [1], [0, 0, 1, 1], [], []>} : vector<2x10xf32>, vector<10x100xf32>, vector<2x100xf32> -> vector<2x100xf32>
    %991 = arith.addf %986, %990 : vector<2x100xf32>
    %c122 = arith.constant 122 : index
    %c0_429 = arith.constant 0 : index
    %992 = vector.load %arg16[%c122, %c0_429] : memref<240x10xf32, #tpu.memory_space<vmem>>, vector<2x10xf32>
    %c2_430 = arith.constant 2 : index
    %c0_431 = arith.constant 0 : index
    %c0_432 = arith.constant 0 : index
    %993 = vector.load %arg6[%c2_430, %c0_431, %c0_432] : memref<4x10x100xf32, #tpu.memory_space<vmem>>, vector<1x10x100xf32>
    %994 = vector.shape_cast %993 : vector<1x10x100xf32> to vector<10x100xf32>
    %cst_433 = arith.constant dense<0.000000e+00> : vector<2x100xf32>
    %995 = tpu.matmul %992, %994, %cst_433 {dimension_numbers = #tpu.dot_dimension_numbers<[1], [0], [0], [1], [0, 0, 1, 1], [], []>} : vector<2x10xf32>, vector<10x100xf32>, vector<2x100xf32> -> vector<2x100xf32>
    %996 = arith.addf %991, %995 : vector<2x100xf32>
    %c138 = arith.constant 138 : index
    %c0_434 = arith.constant 0 : index
    %997 = vector.load %arg16[%c138, %c0_434] : memref<240x10xf32, #tpu.memory_space<vmem>>, vector<2x10xf32>
    %c3_435 = arith.constant 3 : index
    %c0_436 = arith.constant 0 : index
    %c0_437 = arith.constant 0 : index
    %998 = vector.load %arg6[%c3_435, %c0_436, %c0_437] : memref<4x10x100xf32, #tpu.memory_space<vmem>>, vector<1x10x100xf32>
    %999 = vector.shape_cast %998 : vector<1x10x100xf32> to vector<10x100xf32>
    %cst_438 = arith.constant dense<0.000000e+00> : vector<2x100xf32>
    %1000 = tpu.matmul %997, %999, %cst_438 {dimension_numbers = #tpu.dot_dimension_numbers<[1], [0], [0], [1], [0, 0, 1, 1], [], []>} : vector<2x10xf32>, vector<10x100xf32>, vector<2x100xf32> -> vector<2x100xf32>
    %1001 = arith.addf %996, %1000 : vector<2x100xf32>
    %cst_439 = arith.constant dense<0.000000e+00> : vector<2x100xf32>
    %1002 = tpu.matmul %834, %560, %cst_439 {dimension_numbers = #tpu.dot_dimension_numbers<[1], [0], [0], [1], [0, 0, 1, 1], [], []>} : vector<2x20xf32>, vector<20x100xf32>, vector<2x100xf32> -> vector<2x100xf32>
    %1003 = arith.addf %1001, %1002 : vector<2x100xf32>
    %cst_440 = arith.constant dense<0.000000e+00> : vector<2x100xf32>
    %1004 = tpu.matmul %976, %561, %cst_440 {dimension_numbers = #tpu.dot_dimension_numbers<[1], [0], [0], [1], [0, 0, 1, 1], [], []>} : vector<2x20xf32>, vector<20x100xf32>, vector<2x100xf32> -> vector<2x100xf32>
    %1005 = arith.addf %1003, %1004 : vector<2x100xf32>
    %1006 = vector.extract_strided_slice %1005 {offsets = [0, 0], sizes = [2, 80], strides = [1, 1]} : vector<2x100xf32> to vector<2x80xf32>
    %1007 = arith.negf %1006 : vector<2x80xf32>
    %1008 = math.exp %1007 : vector<2x80xf32>
    %cst_441 = arith.constant 1.000000e+00 : f32
    %1009 = vector.broadcast %cst_441 : f32 to vector<2x80xf32>
    %1010 = arith.addf %1009, %1008 : vector<2x80xf32>
    %1011 = arith.divf %1009, %1010 : vector<2x80xf32>
    %1012 = vector.extract_strided_slice %1005 {offsets = [0, 80], sizes = [2, 20], strides = [1, 1]} : vector<2x100xf32> to vector<2x20xf32>
    %1013 = math.tanh %1012 : vector<2x20xf32>
    %1014 = vector.extract_strided_slice %1011 {offsets = [0, 0], sizes = [2, 20], strides = [1, 1]} : vector<2x80xf32> to vector<2x20xf32>
    %1015 = vector.extract_strided_slice %1011 {offsets = [0, 20], sizes = [2, 20], strides = [1, 1]} : vector<2x80xf32> to vector<2x20xf32>
    %1016 = vector.extract_strided_slice %1011 {offsets = [0, 40], sizes = [2, 20], strides = [1, 1]} : vector<2x80xf32> to vector<2x20xf32>
    %1017 = vector.extract_strided_slice %1011 {offsets = [0, 60], sizes = [2, 20], strides = [1, 1]} : vector<2x80xf32> to vector<2x20xf32>
    %1018 = arith.mulf %1014, %1013 : vector<2x20xf32>
    %1019 = arith.mulf %1015, %832 : vector<2x20xf32>
    %1020 = arith.addf %1018, %1019 : vector<2x20xf32>
    %1021 = arith.mulf %1016, %974 : vector<2x20xf32>
    %1022 = arith.addf %1020, %1021 : vector<2x20xf32>
    %1023 = math.tanh %1022 : vector<2x20xf32>
    %1024 = arith.mulf %1017, %1023 : vector<2x20xf32>
    %c9 = arith.constant 9 : index
    %c0_442 = arith.constant 0 : index
    %c0_443 = arith.constant 0 : index
    %1025 = vector.load %arg10[%c9, %c0_442, %c0_443] : memref<16x20x500xf32, #tpu.memory_space<vmem>>, vector<1x20x500xf32>
    %1026 = vector.shape_cast %1025 : vector<1x20x500xf32> to vector<20x500xf32>
    %cst_444 = arith.constant dense<0.000000e+00> : vector<2x500xf32>
    %1027 = tpu.matmul %1024, %1026, %cst_444 {dimension_numbers = #tpu.dot_dimension_numbers<[1], [0], [0], [1], [0, 0, 1, 1], [], []>} : vector<2x20xf32>, vector<20x500xf32>, vector<2x500xf32> -> vector<2x500xf32>
    %1028 = arith.addf %980, %1027 : vector<2x500xf32>
    %c136 = arith.constant 136 : index
    %c0_445 = arith.constant 0 : index
    %1029 = vector.load %arg16[%c136, %c0_445] : memref<240x10xf32, #tpu.memory_space<vmem>>, vector<2x10xf32>
    %c0_446 = arith.constant 0 : index
    %c0_447 = arith.constant 0 : index
    %c0_448 = arith.constant 0 : index
    %1030 = vector.load %arg6[%c0_446, %c0_447, %c0_448] : memref<4x10x100xf32, #tpu.memory_space<vmem>>, vector<1x10x100xf32>
    %1031 = vector.shape_cast %1030 : vector<1x10x100xf32> to vector<10x100xf32>
    %cst_449 = arith.constant dense<0.000000e+00> : vector<2x100xf32>
    %1032 = tpu.matmul %1029, %1031, %cst_449 {dimension_numbers = #tpu.dot_dimension_numbers<[1], [0], [0], [1], [0, 0, 1, 1], [], []>} : vector<2x10xf32>, vector<10x100xf32>, vector<2x100xf32> -> vector<2x100xf32>
    %1033 = vector.broadcast %562 : vector<1x100xf32> to vector<2x100xf32>
    %1034 = arith.addf %1033, %1032 : vector<2x100xf32>
    %c152 = arith.constant 152 : index
    %c0_450 = arith.constant 0 : index
    %1035 = vector.load %arg16[%c152, %c0_450] : memref<240x10xf32, #tpu.memory_space<vmem>>, vector<2x10xf32>
    %c1_451 = arith.constant 1 : index
    %c0_452 = arith.constant 0 : index
    %c0_453 = arith.constant 0 : index
    %1036 = vector.load %arg6[%c1_451, %c0_452, %c0_453] : memref<4x10x100xf32, #tpu.memory_space<vmem>>, vector<1x10x100xf32>
    %1037 = vector.shape_cast %1036 : vector<1x10x100xf32> to vector<10x100xf32>
    %cst_454 = arith.constant dense<0.000000e+00> : vector<2x100xf32>
    %1038 = tpu.matmul %1035, %1037, %cst_454 {dimension_numbers = #tpu.dot_dimension_numbers<[1], [0], [0], [1], [0, 0, 1, 1], [], []>} : vector<2x10xf32>, vector<10x100xf32>, vector<2x100xf32> -> vector<2x100xf32>
    %1039 = arith.addf %1034, %1038 : vector<2x100xf32>
    %c154 = arith.constant 154 : index
    %c0_455 = arith.constant 0 : index
    %1040 = vector.load %arg16[%c154, %c0_455] : memref<240x10xf32, #tpu.memory_space<vmem>>, vector<2x10xf32>
    %c2_456 = arith.constant 2 : index
    %c0_457 = arith.constant 0 : index
    %c0_458 = arith.constant 0 : index
    %1041 = vector.load %arg6[%c2_456, %c0_457, %c0_458] : memref<4x10x100xf32, #tpu.memory_space<vmem>>, vector<1x10x100xf32>
    %1042 = vector.shape_cast %1041 : vector<1x10x100xf32> to vector<10x100xf32>
    %cst_459 = arith.constant dense<0.000000e+00> : vector<2x100xf32>
    %1043 = tpu.matmul %1040, %1042, %cst_459 {dimension_numbers = #tpu.dot_dimension_numbers<[1], [0], [0], [1], [0, 0, 1, 1], [], []>} : vector<2x10xf32>, vector<10x100xf32>, vector<2x100xf32> -> vector<2x100xf32>
    %1044 = arith.addf %1039, %1043 : vector<2x100xf32>
    %c170 = arith.constant 170 : index
    %c0_460 = arith.constant 0 : index
    %1045 = vector.load %arg16[%c170, %c0_460] : memref<240x10xf32, #tpu.memory_space<vmem>>, vector<2x10xf32>
    %c3_461 = arith.constant 3 : index
    %c0_462 = arith.constant 0 : index
    %c0_463 = arith.constant 0 : index
    %1046 = vector.load %arg6[%c3_461, %c0_462, %c0_463] : memref<4x10x100xf32, #tpu.memory_space<vmem>>, vector<1x10x100xf32>
    %1047 = vector.shape_cast %1046 : vector<1x10x100xf32> to vector<10x100xf32>
    %cst_464 = arith.constant dense<0.000000e+00> : vector<2x100xf32>
    %1048 = tpu.matmul %1045, %1047, %cst_464 {dimension_numbers = #tpu.dot_dimension_numbers<[1], [0], [0], [1], [0, 0, 1, 1], [], []>} : vector<2x10xf32>, vector<10x100xf32>, vector<2x100xf32> -> vector<2x100xf32>
    %1049 = arith.addf %1044, %1048 : vector<2x100xf32>
    %cst_465 = arith.constant dense<0.000000e+00> : vector<2x100xf32>
    %1050 = tpu.matmul %882, %560, %cst_465 {dimension_numbers = #tpu.dot_dimension_numbers<[1], [0], [0], [1], [0, 0, 1, 1], [], []>} : vector<2x20xf32>, vector<20x100xf32>, vector<2x100xf32> -> vector<2x100xf32>
    %1051 = arith.addf %1049, %1050 : vector<2x100xf32>
    %cst_466 = arith.constant dense<0.000000e+00> : vector<2x100xf32>
    %1052 = tpu.matmul %1024, %561, %cst_466 {dimension_numbers = #tpu.dot_dimension_numbers<[1], [0], [0], [1], [0, 0, 1, 1], [], []>} : vector<2x20xf32>, vector<20x100xf32>, vector<2x100xf32> -> vector<2x100xf32>
    %1053 = arith.addf %1051, %1052 : vector<2x100xf32>
    %1054 = vector.extract_strided_slice %1053 {offsets = [0, 0], sizes = [2, 80], strides = [1, 1]} : vector<2x100xf32> to vector<2x80xf32>
    %1055 = arith.negf %1054 : vector<2x80xf32>
    %1056 = math.exp %1055 : vector<2x80xf32>
    %cst_467 = arith.constant 1.000000e+00 : f32
    %1057 = vector.broadcast %cst_467 : f32 to vector<2x80xf32>
    %1058 = arith.addf %1057, %1056 : vector<2x80xf32>
    %1059 = arith.divf %1057, %1058 : vector<2x80xf32>
    %1060 = vector.extract_strided_slice %1053 {offsets = [0, 80], sizes = [2, 20], strides = [1, 1]} : vector<2x100xf32> to vector<2x20xf32>
    %1061 = math.tanh %1060 : vector<2x20xf32>
    %1062 = vector.extract_strided_slice %1059 {offsets = [0, 0], sizes = [2, 20], strides = [1, 1]} : vector<2x80xf32> to vector<2x20xf32>
    %1063 = vector.extract_strided_slice %1059 {offsets = [0, 20], sizes = [2, 20], strides = [1, 1]} : vector<2x80xf32> to vector<2x20xf32>
    %1064 = vector.extract_strided_slice %1059 {offsets = [0, 40], sizes = [2, 20], strides = [1, 1]} : vector<2x80xf32> to vector<2x20xf32>
    %1065 = vector.extract_strided_slice %1059 {offsets = [0, 60], sizes = [2, 20], strides = [1, 1]} : vector<2x80xf32> to vector<2x20xf32>
    %1066 = arith.mulf %1062, %1061 : vector<2x20xf32>
    %1067 = arith.mulf %1063, %880 : vector<2x20xf32>
    %1068 = arith.addf %1066, %1067 : vector<2x20xf32>
    %1069 = arith.mulf %1064, %1022 : vector<2x20xf32>
    %1070 = arith.addf %1068, %1069 : vector<2x20xf32>
    %1071 = math.tanh %1070 : vector<2x20xf32>
    %1072 = arith.mulf %1065, %1071 : vector<2x20xf32>
    %c10 = arith.constant 10 : index
    %c0_468 = arith.constant 0 : index
    %c0_469 = arith.constant 0 : index
    %1073 = vector.load %arg10[%c10, %c0_468, %c0_469] : memref<16x20x500xf32, #tpu.memory_space<vmem>>, vector<1x20x500xf32>
    %1074 = vector.shape_cast %1073 : vector<1x20x500xf32> to vector<20x500xf32>
    %cst_470 = arith.constant dense<0.000000e+00> : vector<2x500xf32>
    %1075 = tpu.matmul %1072, %1074, %cst_470 {dimension_numbers = #tpu.dot_dimension_numbers<[1], [0], [0], [1], [0, 0, 1, 1], [], []>} : vector<2x20xf32>, vector<20x500xf32>, vector<2x500xf32> -> vector<2x500xf32>
    %1076 = arith.addf %1028, %1075 : vector<2x500xf32>
    %c168 = arith.constant 168 : index
    %c0_471 = arith.constant 0 : index
    %1077 = vector.load %arg16[%c168, %c0_471] : memref<240x10xf32, #tpu.memory_space<vmem>>, vector<2x10xf32>
    %c0_472 = arith.constant 0 : index
    %c0_473 = arith.constant 0 : index
    %c0_474 = arith.constant 0 : index
    %1078 = vector.load %arg6[%c0_472, %c0_473, %c0_474] : memref<4x10x100xf32, #tpu.memory_space<vmem>>, vector<1x10x100xf32>
    %1079 = vector.shape_cast %1078 : vector<1x10x100xf32> to vector<10x100xf32>
    %cst_475 = arith.constant dense<0.000000e+00> : vector<2x100xf32>
    %1080 = tpu.matmul %1077, %1079, %cst_475 {dimension_numbers = #tpu.dot_dimension_numbers<[1], [0], [0], [1], [0, 0, 1, 1], [], []>} : vector<2x10xf32>, vector<10x100xf32>, vector<2x100xf32> -> vector<2x100xf32>
    %1081 = vector.broadcast %562 : vector<1x100xf32> to vector<2x100xf32>
    %1082 = arith.addf %1081, %1080 : vector<2x100xf32>
    %c184 = arith.constant 184 : index
    %c0_476 = arith.constant 0 : index
    %1083 = vector.load %arg16[%c184, %c0_476] : memref<240x10xf32, #tpu.memory_space<vmem>>, vector<2x10xf32>
    %c1_477 = arith.constant 1 : index
    %c0_478 = arith.constant 0 : index
    %c0_479 = arith.constant 0 : index
    %1084 = vector.load %arg6[%c1_477, %c0_478, %c0_479] : memref<4x10x100xf32, #tpu.memory_space<vmem>>, vector<1x10x100xf32>
    %1085 = vector.shape_cast %1084 : vector<1x10x100xf32> to vector<10x100xf32>
    %cst_480 = arith.constant dense<0.000000e+00> : vector<2x100xf32>
    %1086 = tpu.matmul %1083, %1085, %cst_480 {dimension_numbers = #tpu.dot_dimension_numbers<[1], [0], [0], [1], [0, 0, 1, 1], [], []>} : vector<2x10xf32>, vector<10x100xf32>, vector<2x100xf32> -> vector<2x100xf32>
    %1087 = arith.addf %1082, %1086 : vector<2x100xf32>
    %c186 = arith.constant 186 : index
    %c0_481 = arith.constant 0 : index
    %1088 = vector.load %arg16[%c186, %c0_481] : memref<240x10xf32, #tpu.memory_space<vmem>>, vector<2x10xf32>
    %c2_482 = arith.constant 2 : index
    %c0_483 = arith.constant 0 : index
    %c0_484 = arith.constant 0 : index
    %1089 = vector.load %arg6[%c2_482, %c0_483, %c0_484] : memref<4x10x100xf32, #tpu.memory_space<vmem>>, vector<1x10x100xf32>
    %1090 = vector.shape_cast %1089 : vector<1x10x100xf32> to vector<10x100xf32>
    %cst_485 = arith.constant dense<0.000000e+00> : vector<2x100xf32>
    %1091 = tpu.matmul %1088, %1090, %cst_485 {dimension_numbers = #tpu.dot_dimension_numbers<[1], [0], [0], [1], [0, 0, 1, 1], [], []>} : vector<2x10xf32>, vector<10x100xf32>, vector<2x100xf32> -> vector<2x100xf32>
    %1092 = arith.addf %1087, %1091 : vector<2x100xf32>
    %c202 = arith.constant 202 : index
    %c0_486 = arith.constant 0 : index
    %1093 = vector.load %arg16[%c202, %c0_486] : memref<240x10xf32, #tpu.memory_space<vmem>>, vector<2x10xf32>
    %c3_487 = arith.constant 3 : index
    %c0_488 = arith.constant 0 : index
    %c0_489 = arith.constant 0 : index
    %1094 = vector.load %arg6[%c3_487, %c0_488, %c0_489] : memref<4x10x100xf32, #tpu.memory_space<vmem>>, vector<1x10x100xf32>
    %1095 = vector.shape_cast %1094 : vector<1x10x100xf32> to vector<10x100xf32>
    %cst_490 = arith.constant dense<0.000000e+00> : vector<2x100xf32>
    %1096 = tpu.matmul %1093, %1095, %cst_490 {dimension_numbers = #tpu.dot_dimension_numbers<[1], [0], [0], [1], [0, 0, 1, 1], [], []>} : vector<2x10xf32>, vector<10x100xf32>, vector<2x100xf32> -> vector<2x100xf32>
    %1097 = arith.addf %1092, %1096 : vector<2x100xf32>
    %cst_491 = arith.constant dense<0.000000e+00> : vector<2x100xf32>
    %1098 = tpu.matmul %930, %560, %cst_491 {dimension_numbers = #tpu.dot_dimension_numbers<[1], [0], [0], [1], [0, 0, 1, 1], [], []>} : vector<2x20xf32>, vector<20x100xf32>, vector<2x100xf32> -> vector<2x100xf32>
    %1099 = arith.addf %1097, %1098 : vector<2x100xf32>
    %cst_492 = arith.constant dense<0.000000e+00> : vector<2x100xf32>
    %1100 = tpu.matmul %1072, %561, %cst_492 {dimension_numbers = #tpu.dot_dimension_numbers<[1], [0], [0], [1], [0, 0, 1, 1], [], []>} : vector<2x20xf32>, vector<20x100xf32>, vector<2x100xf32> -> vector<2x100xf32>
    %1101 = arith.addf %1099, %1100 : vector<2x100xf32>
    %1102 = vector.extract_strided_slice %1101 {offsets = [0, 0], sizes = [2, 80], strides = [1, 1]} : vector<2x100xf32> to vector<2x80xf32>
    %1103 = arith.negf %1102 : vector<2x80xf32>
    %1104 = math.exp %1103 : vector<2x80xf32>
    %cst_493 = arith.constant 1.000000e+00 : f32
    %1105 = vector.broadcast %cst_493 : f32 to vector<2x80xf32>
    %1106 = arith.addf %1105, %1104 : vector<2x80xf32>
    %1107 = arith.divf %1105, %1106 : vector<2x80xf32>
    %1108 = vector.extract_strided_slice %1101 {offsets = [0, 80], sizes = [2, 20], strides = [1, 1]} : vector<2x100xf32> to vector<2x20xf32>
    %1109 = math.tanh %1108 : vector<2x20xf32>
    %1110 = vector.extract_strided_slice %1107 {offsets = [0, 0], sizes = [2, 20], strides = [1, 1]} : vector<2x80xf32> to vector<2x20xf32>
    %1111 = vector.extract_strided_slice %1107 {offsets = [0, 20], sizes = [2, 20], strides = [1, 1]} : vector<2x80xf32> to vector<2x20xf32>
    %1112 = vector.extract_strided_slice %1107 {offsets = [0, 40], sizes = [2, 20], strides = [1, 1]} : vector<2x80xf32> to vector<2x20xf32>
    %1113 = vector.extract_strided_slice %1107 {offsets = [0, 60], sizes = [2, 20], strides = [1, 1]} : vector<2x80xf32> to vector<2x20xf32>
    %1114 = arith.mulf %1110, %1109 : vector<2x20xf32>
    %1115 = arith.mulf %1111, %928 : vector<2x20xf32>
    %1116 = arith.addf %1114, %1115 : vector<2x20xf32>
    %1117 = arith.mulf %1112, %1070 : vector<2x20xf32>
    %1118 = arith.addf %1116, %1117 : vector<2x20xf32>
    %1119 = math.tanh %1118 : vector<2x20xf32>
    %1120 = arith.mulf %1113, %1119 : vector<2x20xf32>
    %c11 = arith.constant 11 : index
    %c0_494 = arith.constant 0 : index
    %c0_495 = arith.constant 0 : index
    %1121 = vector.load %arg10[%c11, %c0_494, %c0_495] : memref<16x20x500xf32, #tpu.memory_space<vmem>>, vector<1x20x500xf32>
    %1122 = vector.shape_cast %1121 : vector<1x20x500xf32> to vector<20x500xf32>
    %cst_496 = arith.constant dense<0.000000e+00> : vector<2x500xf32>
    %1123 = tpu.matmul %1120, %1122, %cst_496 {dimension_numbers = #tpu.dot_dimension_numbers<[1], [0], [0], [1], [0, 0, 1, 1], [], []>} : vector<2x20xf32>, vector<20x500xf32>, vector<2x500xf32> -> vector<2x500xf32>
    %1124 = arith.addf %1076, %1123 : vector<2x500xf32>
    %c108 = arith.constant 108 : index
    %c0_497 = arith.constant 0 : index
    %1125 = vector.load %arg16[%c108, %c0_497] : memref<240x10xf32, #tpu.memory_space<vmem>>, vector<2x10xf32>
    %c0_498 = arith.constant 0 : index
    %c0_499 = arith.constant 0 : index
    %c0_500 = arith.constant 0 : index
    %1126 = vector.load %arg6[%c0_498, %c0_499, %c0_500] : memref<4x10x100xf32, #tpu.memory_space<vmem>>, vector<1x10x100xf32>
    %1127 = vector.shape_cast %1126 : vector<1x10x100xf32> to vector<10x100xf32>
    %cst_501 = arith.constant dense<0.000000e+00> : vector<2x100xf32>
    %1128 = tpu.matmul %1125, %1127, %cst_501 {dimension_numbers = #tpu.dot_dimension_numbers<[1], [0], [0], [1], [0, 0, 1, 1], [], []>} : vector<2x10xf32>, vector<10x100xf32>, vector<2x100xf32> -> vector<2x100xf32>
    %1129 = vector.broadcast %562 : vector<1x100xf32> to vector<2x100xf32>
    %1130 = arith.addf %1129, %1128 : vector<2x100xf32>
    %c124 = arith.constant 124 : index
    %c0_502 = arith.constant 0 : index
    %1131 = vector.load %arg16[%c124, %c0_502] : memref<240x10xf32, #tpu.memory_space<vmem>>, vector<2x10xf32>
    %c1_503 = arith.constant 1 : index
    %c0_504 = arith.constant 0 : index
    %c0_505 = arith.constant 0 : index
    %1132 = vector.load %arg6[%c1_503, %c0_504, %c0_505] : memref<4x10x100xf32, #tpu.memory_space<vmem>>, vector<1x10x100xf32>
    %1133 = vector.shape_cast %1132 : vector<1x10x100xf32> to vector<10x100xf32>
    %cst_506 = arith.constant dense<0.000000e+00> : vector<2x100xf32>
    %1134 = tpu.matmul %1131, %1133, %cst_506 {dimension_numbers = #tpu.dot_dimension_numbers<[1], [0], [0], [1], [0, 0, 1, 1], [], []>} : vector<2x10xf32>, vector<10x100xf32>, vector<2x100xf32> -> vector<2x100xf32>
    %1135 = arith.addf %1130, %1134 : vector<2x100xf32>
    %c126 = arith.constant 126 : index
    %c0_507 = arith.constant 0 : index
    %1136 = vector.load %arg16[%c126, %c0_507] : memref<240x10xf32, #tpu.memory_space<vmem>>, vector<2x10xf32>
    %c2_508 = arith.constant 2 : index
    %c0_509 = arith.constant 0 : index
    %c0_510 = arith.constant 0 : index
    %1137 = vector.load %arg6[%c2_508, %c0_509, %c0_510] : memref<4x10x100xf32, #tpu.memory_space<vmem>>, vector<1x10x100xf32>
    %1138 = vector.shape_cast %1137 : vector<1x10x100xf32> to vector<10x100xf32>
    %cst_511 = arith.constant dense<0.000000e+00> : vector<2x100xf32>
    %1139 = tpu.matmul %1136, %1138, %cst_511 {dimension_numbers = #tpu.dot_dimension_numbers<[1], [0], [0], [1], [0, 0, 1, 1], [], []>} : vector<2x10xf32>, vector<10x100xf32>, vector<2x100xf32> -> vector<2x100xf32>
    %1140 = arith.addf %1135, %1139 : vector<2x100xf32>
    %c142 = arith.constant 142 : index
    %c0_512 = arith.constant 0 : index
    %1141 = vector.load %arg16[%c142, %c0_512] : memref<240x10xf32, #tpu.memory_space<vmem>>, vector<2x10xf32>
    %c3_513 = arith.constant 3 : index
    %c0_514 = arith.constant 0 : index
    %c0_515 = arith.constant 0 : index
    %1142 = vector.load %arg6[%c3_513, %c0_514, %c0_515] : memref<4x10x100xf32, #tpu.memory_space<vmem>>, vector<1x10x100xf32>
    %1143 = vector.shape_cast %1142 : vector<1x10x100xf32> to vector<10x100xf32>
    %cst_516 = arith.constant dense<0.000000e+00> : vector<2x100xf32>
    %1144 = tpu.matmul %1141, %1143, %cst_516 {dimension_numbers = #tpu.dot_dimension_numbers<[1], [0], [0], [1], [0, 0, 1, 1], [], []>} : vector<2x10xf32>, vector<10x100xf32>, vector<2x100xf32> -> vector<2x100xf32>
    %1145 = arith.addf %1140, %1144 : vector<2x100xf32>
    %cst_517 = arith.constant dense<0.000000e+00> : vector<2x100xf32>
    %1146 = tpu.matmul %976, %560, %cst_517 {dimension_numbers = #tpu.dot_dimension_numbers<[1], [0], [0], [1], [0, 0, 1, 1], [], []>} : vector<2x20xf32>, vector<20x100xf32>, vector<2x100xf32> -> vector<2x100xf32>
    %1147 = arith.addf %1145, %1146 : vector<2x100xf32>
    %1148 = vector.extract_strided_slice %1147 {offsets = [0, 0], sizes = [2, 80], strides = [1, 1]} : vector<2x100xf32> to vector<2x80xf32>
    %1149 = arith.negf %1148 : vector<2x80xf32>
    %1150 = math.exp %1149 : vector<2x80xf32>
    %cst_518 = arith.constant 1.000000e+00 : f32
    %1151 = vector.broadcast %cst_518 : f32 to vector<2x80xf32>
    %1152 = arith.addf %1151, %1150 : vector<2x80xf32>
    %1153 = arith.divf %1151, %1152 : vector<2x80xf32>
    %1154 = vector.extract_strided_slice %1147 {offsets = [0, 80], sizes = [2, 20], strides = [1, 1]} : vector<2x100xf32> to vector<2x20xf32>
    %1155 = math.tanh %1154 : vector<2x20xf32>
    %1156 = vector.extract_strided_slice %1153 {offsets = [0, 0], sizes = [2, 20], strides = [1, 1]} : vector<2x80xf32> to vector<2x20xf32>
    %1157 = vector.extract_strided_slice %1153 {offsets = [0, 20], sizes = [2, 20], strides = [1, 1]} : vector<2x80xf32> to vector<2x20xf32>
    %1158 = vector.extract_strided_slice %1153 {offsets = [0, 40], sizes = [2, 20], strides = [1, 1]} : vector<2x80xf32> to vector<2x20xf32>
    %1159 = vector.extract_strided_slice %1153 {offsets = [0, 60], sizes = [2, 20], strides = [1, 1]} : vector<2x80xf32> to vector<2x20xf32>
    %1160 = arith.mulf %1156, %1155 : vector<2x20xf32>
    %1161 = arith.mulf %1157, %974 : vector<2x20xf32>
    %1162 = arith.addf %1160, %1161 : vector<2x20xf32>
    %1163 = arith.mulf %1158, %563 : vector<2x20xf32>
    %1164 = arith.addf %1162, %1163 : vector<2x20xf32>
    %1165 = math.tanh %1164 : vector<2x20xf32>
    %1166 = arith.mulf %1159, %1165 : vector<2x20xf32>
    %c12 = arith.constant 12 : index
    %c0_519 = arith.constant 0 : index
    %c0_520 = arith.constant 0 : index
    %1167 = vector.load %arg10[%c12, %c0_519, %c0_520] : memref<16x20x500xf32, #tpu.memory_space<vmem>>, vector<1x20x500xf32>
    %1168 = vector.shape_cast %1167 : vector<1x20x500xf32> to vector<20x500xf32>
    %cst_521 = arith.constant dense<0.000000e+00> : vector<2x500xf32>
    %1169 = tpu.matmul %1166, %1168, %cst_521 {dimension_numbers = #tpu.dot_dimension_numbers<[1], [0], [0], [1], [0, 0, 1, 1], [], []>} : vector<2x20xf32>, vector<20x500xf32>, vector<2x500xf32> -> vector<2x500xf32>
    %1170 = arith.addf %1124, %1169 : vector<2x500xf32>
    %c140 = arith.constant 140 : index
    %c0_522 = arith.constant 0 : index
    %1171 = vector.load %arg16[%c140, %c0_522] : memref<240x10xf32, #tpu.memory_space<vmem>>, vector<2x10xf32>
    %c0_523 = arith.constant 0 : index
    %c0_524 = arith.constant 0 : index
    %c0_525 = arith.constant 0 : index
    %1172 = vector.load %arg6[%c0_523, %c0_524, %c0_525] : memref<4x10x100xf32, #tpu.memory_space<vmem>>, vector<1x10x100xf32>
    %1173 = vector.shape_cast %1172 : vector<1x10x100xf32> to vector<10x100xf32>
    %cst_526 = arith.constant dense<0.000000e+00> : vector<2x100xf32>
    %1174 = tpu.matmul %1171, %1173, %cst_526 {dimension_numbers = #tpu.dot_dimension_numbers<[1], [0], [0], [1], [0, 0, 1, 1], [], []>} : vector<2x10xf32>, vector<10x100xf32>, vector<2x100xf32> -> vector<2x100xf32>
    %1175 = vector.broadcast %562 : vector<1x100xf32> to vector<2x100xf32>
    %1176 = arith.addf %1175, %1174 : vector<2x100xf32>
    %c156 = arith.constant 156 : index
    %c0_527 = arith.constant 0 : index
    %1177 = vector.load %arg16[%c156, %c0_527] : memref<240x10xf32, #tpu.memory_space<vmem>>, vector<2x10xf32>
    %c1_528 = arith.constant 1 : index
    %c0_529 = arith.constant 0 : index
    %c0_530 = arith.constant 0 : index
    %1178 = vector.load %arg6[%c1_528, %c0_529, %c0_530] : memref<4x10x100xf32, #tpu.memory_space<vmem>>, vector<1x10x100xf32>
    %1179 = vector.shape_cast %1178 : vector<1x10x100xf32> to vector<10x100xf32>
    %cst_531 = arith.constant dense<0.000000e+00> : vector<2x100xf32>
    %1180 = tpu.matmul %1177, %1179, %cst_531 {dimension_numbers = #tpu.dot_dimension_numbers<[1], [0], [0], [1], [0, 0, 1, 1], [], []>} : vector<2x10xf32>, vector<10x100xf32>, vector<2x100xf32> -> vector<2x100xf32>
    %1181 = arith.addf %1176, %1180 : vector<2x100xf32>
    %c158 = arith.constant 158 : index
    %c0_532 = arith.constant 0 : index
    %1182 = vector.load %arg16[%c158, %c0_532] : memref<240x10xf32, #tpu.memory_space<vmem>>, vector<2x10xf32>
    %c2_533 = arith.constant 2 : index
    %c0_534 = arith.constant 0 : index
    %c0_535 = arith.constant 0 : index
    %1183 = vector.load %arg6[%c2_533, %c0_534, %c0_535] : memref<4x10x100xf32, #tpu.memory_space<vmem>>, vector<1x10x100xf32>
    %1184 = vector.shape_cast %1183 : vector<1x10x100xf32> to vector<10x100xf32>
    %cst_536 = arith.constant dense<0.000000e+00> : vector<2x100xf32>
    %1185 = tpu.matmul %1182, %1184, %cst_536 {dimension_numbers = #tpu.dot_dimension_numbers<[1], [0], [0], [1], [0, 0, 1, 1], [], []>} : vector<2x10xf32>, vector<10x100xf32>, vector<2x100xf32> -> vector<2x100xf32>
    %1186 = arith.addf %1181, %1185 : vector<2x100xf32>
    %c174 = arith.constant 174 : index
    %c0_537 = arith.constant 0 : index
    %1187 = vector.load %arg16[%c174, %c0_537] : memref<240x10xf32, #tpu.memory_space<vmem>>, vector<2x10xf32>
    %c3_538 = arith.constant 3 : index
    %c0_539 = arith.constant 0 : index
    %c0_540 = arith.constant 0 : index
    %1188 = vector.load %arg6[%c3_538, %c0_539, %c0_540] : memref<4x10x100xf32, #tpu.memory_space<vmem>>, vector<1x10x100xf32>
    %1189 = vector.shape_cast %1188 : vector<1x10x100xf32> to vector<10x100xf32>
    %cst_541 = arith.constant dense<0.000000e+00> : vector<2x100xf32>
    %1190 = tpu.matmul %1187, %1189, %cst_541 {dimension_numbers = #tpu.dot_dimension_numbers<[1], [0], [0], [1], [0, 0, 1, 1], [], []>} : vector<2x10xf32>, vector<10x100xf32>, vector<2x100xf32> -> vector<2x100xf32>
    %1191 = arith.addf %1186, %1190 : vector<2x100xf32>
    %cst_542 = arith.constant dense<0.000000e+00> : vector<2x100xf32>
    %1192 = tpu.matmul %1024, %560, %cst_542 {dimension_numbers = #tpu.dot_dimension_numbers<[1], [0], [0], [1], [0, 0, 1, 1], [], []>} : vector<2x20xf32>, vector<20x100xf32>, vector<2x100xf32> -> vector<2x100xf32>
    %1193 = arith.addf %1191, %1192 : vector<2x100xf32>
    %cst_543 = arith.constant dense<0.000000e+00> : vector<2x100xf32>
    %1194 = tpu.matmul %1166, %561, %cst_543 {dimension_numbers = #tpu.dot_dimension_numbers<[1], [0], [0], [1], [0, 0, 1, 1], [], []>} : vector<2x20xf32>, vector<20x100xf32>, vector<2x100xf32> -> vector<2x100xf32>
    %1195 = arith.addf %1193, %1194 : vector<2x100xf32>
    %1196 = vector.extract_strided_slice %1195 {offsets = [0, 0], sizes = [2, 80], strides = [1, 1]} : vector<2x100xf32> to vector<2x80xf32>
    %1197 = arith.negf %1196 : vector<2x80xf32>
    %1198 = math.exp %1197 : vector<2x80xf32>
    %cst_544 = arith.constant 1.000000e+00 : f32
    %1199 = vector.broadcast %cst_544 : f32 to vector<2x80xf32>
    %1200 = arith.addf %1199, %1198 : vector<2x80xf32>
    %1201 = arith.divf %1199, %1200 : vector<2x80xf32>
    %1202 = vector.extract_strided_slice %1195 {offsets = [0, 80], sizes = [2, 20], strides = [1, 1]} : vector<2x100xf32> to vector<2x20xf32>
    %1203 = math.tanh %1202 : vector<2x20xf32>
    %1204 = vector.extract_strided_slice %1201 {offsets = [0, 0], sizes = [2, 20], strides = [1, 1]} : vector<2x80xf32> to vector<2x20xf32>
    %1205 = vector.extract_strided_slice %1201 {offsets = [0, 20], sizes = [2, 20], strides = [1, 1]} : vector<2x80xf32> to vector<2x20xf32>
    %1206 = vector.extract_strided_slice %1201 {offsets = [0, 40], sizes = [2, 20], strides = [1, 1]} : vector<2x80xf32> to vector<2x20xf32>
    %1207 = vector.extract_strided_slice %1201 {offsets = [0, 60], sizes = [2, 20], strides = [1, 1]} : vector<2x80xf32> to vector<2x20xf32>
    %1208 = arith.mulf %1204, %1203 : vector<2x20xf32>
    %1209 = arith.mulf %1205, %1022 : vector<2x20xf32>
    %1210 = arith.addf %1208, %1209 : vector<2x20xf32>
    %1211 = arith.mulf %1206, %1164 : vector<2x20xf32>
    %1212 = arith.addf %1210, %1211 : vector<2x20xf32>
    %1213 = math.tanh %1212 : vector<2x20xf32>
    %1214 = arith.mulf %1207, %1213 : vector<2x20xf32>
    %c13 = arith.constant 13 : index
    %c0_545 = arith.constant 0 : index
    %c0_546 = arith.constant 0 : index
    %1215 = vector.load %arg10[%c13, %c0_545, %c0_546] : memref<16x20x500xf32, #tpu.memory_space<vmem>>, vector<1x20x500xf32>
    %1216 = vector.shape_cast %1215 : vector<1x20x500xf32> to vector<20x500xf32>
    %cst_547 = arith.constant dense<0.000000e+00> : vector<2x500xf32>
    %1217 = tpu.matmul %1214, %1216, %cst_547 {dimension_numbers = #tpu.dot_dimension_numbers<[1], [0], [0], [1], [0, 0, 1, 1], [], []>} : vector<2x20xf32>, vector<20x500xf32>, vector<2x500xf32> -> vector<2x500xf32>
    %1218 = arith.addf %1170, %1217 : vector<2x500xf32>
    %c172 = arith.constant 172 : index
    %c0_548 = arith.constant 0 : index
    %1219 = vector.load %arg16[%c172, %c0_548] : memref<240x10xf32, #tpu.memory_space<vmem>>, vector<2x10xf32>
    %c0_549 = arith.constant 0 : index
    %c0_550 = arith.constant 0 : index
    %c0_551 = arith.constant 0 : index
    %1220 = vector.load %arg6[%c0_549, %c0_550, %c0_551] : memref<4x10x100xf32, #tpu.memory_space<vmem>>, vector<1x10x100xf32>
    %1221 = vector.shape_cast %1220 : vector<1x10x100xf32> to vector<10x100xf32>
    %cst_552 = arith.constant dense<0.000000e+00> : vector<2x100xf32>
    %1222 = tpu.matmul %1219, %1221, %cst_552 {dimension_numbers = #tpu.dot_dimension_numbers<[1], [0], [0], [1], [0, 0, 1, 1], [], []>} : vector<2x10xf32>, vector<10x100xf32>, vector<2x100xf32> -> vector<2x100xf32>
    %1223 = vector.broadcast %562 : vector<1x100xf32> to vector<2x100xf32>
    %1224 = arith.addf %1223, %1222 : vector<2x100xf32>
    %c188 = arith.constant 188 : index
    %c0_553 = arith.constant 0 : index
    %1225 = vector.load %arg16[%c188, %c0_553] : memref<240x10xf32, #tpu.memory_space<vmem>>, vector<2x10xf32>
    %c1_554 = arith.constant 1 : index
    %c0_555 = arith.constant 0 : index
    %c0_556 = arith.constant 0 : index
    %1226 = vector.load %arg6[%c1_554, %c0_555, %c0_556] : memref<4x10x100xf32, #tpu.memory_space<vmem>>, vector<1x10x100xf32>
    %1227 = vector.shape_cast %1226 : vector<1x10x100xf32> to vector<10x100xf32>
    %cst_557 = arith.constant dense<0.000000e+00> : vector<2x100xf32>
    %1228 = tpu.matmul %1225, %1227, %cst_557 {dimension_numbers = #tpu.dot_dimension_numbers<[1], [0], [0], [1], [0, 0, 1, 1], [], []>} : vector<2x10xf32>, vector<10x100xf32>, vector<2x100xf32> -> vector<2x100xf32>
    %1229 = arith.addf %1224, %1228 : vector<2x100xf32>
    %c190 = arith.constant 190 : index
    %c0_558 = arith.constant 0 : index
    %1230 = vector.load %arg16[%c190, %c0_558] : memref<240x10xf32, #tpu.memory_space<vmem>>, vector<2x10xf32>
    %c2_559 = arith.constant 2 : index
    %c0_560 = arith.constant 0 : index
    %c0_561 = arith.constant 0 : index
    %1231 = vector.load %arg6[%c2_559, %c0_560, %c0_561] : memref<4x10x100xf32, #tpu.memory_space<vmem>>, vector<1x10x100xf32>
    %1232 = vector.shape_cast %1231 : vector<1x10x100xf32> to vector<10x100xf32>
    %cst_562 = arith.constant dense<0.000000e+00> : vector<2x100xf32>
    %1233 = tpu.matmul %1230, %1232, %cst_562 {dimension_numbers = #tpu.dot_dimension_numbers<[1], [0], [0], [1], [0, 0, 1, 1], [], []>} : vector<2x10xf32>, vector<10x100xf32>, vector<2x100xf32> -> vector<2x100xf32>
    %1234 = arith.addf %1229, %1233 : vector<2x100xf32>
    %c206 = arith.constant 206 : index
    %c0_563 = arith.constant 0 : index
    %1235 = vector.load %arg16[%c206, %c0_563] : memref<240x10xf32, #tpu.memory_space<vmem>>, vector<2x10xf32>
    %c3_564 = arith.constant 3 : index
    %c0_565 = arith.constant 0 : index
    %c0_566 = arith.constant 0 : index
    %1236 = vector.load %arg6[%c3_564, %c0_565, %c0_566] : memref<4x10x100xf32, #tpu.memory_space<vmem>>, vector<1x10x100xf32>
    %1237 = vector.shape_cast %1236 : vector<1x10x100xf32> to vector<10x100xf32>
    %cst_567 = arith.constant dense<0.000000e+00> : vector<2x100xf32>
    %1238 = tpu.matmul %1235, %1237, %cst_567 {dimension_numbers = #tpu.dot_dimension_numbers<[1], [0], [0], [1], [0, 0, 1, 1], [], []>} : vector<2x10xf32>, vector<10x100xf32>, vector<2x100xf32> -> vector<2x100xf32>
    %1239 = arith.addf %1234, %1238 : vector<2x100xf32>
    %cst_568 = arith.constant dense<0.000000e+00> : vector<2x100xf32>
    %1240 = tpu.matmul %1072, %560, %cst_568 {dimension_numbers = #tpu.dot_dimension_numbers<[1], [0], [0], [1], [0, 0, 1, 1], [], []>} : vector<2x20xf32>, vector<20x100xf32>, vector<2x100xf32> -> vector<2x100xf32>
    %1241 = arith.addf %1239, %1240 : vector<2x100xf32>
    %cst_569 = arith.constant dense<0.000000e+00> : vector<2x100xf32>
    %1242 = tpu.matmul %1214, %561, %cst_569 {dimension_numbers = #tpu.dot_dimension_numbers<[1], [0], [0], [1], [0, 0, 1, 1], [], []>} : vector<2x20xf32>, vector<20x100xf32>, vector<2x100xf32> -> vector<2x100xf32>
    %1243 = arith.addf %1241, %1242 : vector<2x100xf32>
    %1244 = vector.extract_strided_slice %1243 {offsets = [0, 0], sizes = [2, 80], strides = [1, 1]} : vector<2x100xf32> to vector<2x80xf32>
    %1245 = arith.negf %1244 : vector<2x80xf32>
    %1246 = math.exp %1245 : vector<2x80xf32>
    %cst_570 = arith.constant 1.000000e+00 : f32
    %1247 = vector.broadcast %cst_570 : f32 to vector<2x80xf32>
    %1248 = arith.addf %1247, %1246 : vector<2x80xf32>
    %1249 = arith.divf %1247, %1248 : vector<2x80xf32>
    %1250 = vector.extract_strided_slice %1243 {offsets = [0, 80], sizes = [2, 20], strides = [1, 1]} : vector<2x100xf32> to vector<2x20xf32>
    %1251 = math.tanh %1250 : vector<2x20xf32>
    %1252 = vector.extract_strided_slice %1249 {offsets = [0, 0], sizes = [2, 20], strides = [1, 1]} : vector<2x80xf32> to vector<2x20xf32>
    %1253 = vector.extract_strided_slice %1249 {offsets = [0, 20], sizes = [2, 20], strides = [1, 1]} : vector<2x80xf32> to vector<2x20xf32>
    %1254 = vector.extract_strided_slice %1249 {offsets = [0, 40], sizes = [2, 20], strides = [1, 1]} : vector<2x80xf32> to vector<2x20xf32>
    %1255 = vector.extract_strided_slice %1249 {offsets = [0, 60], sizes = [2, 20], strides = [1, 1]} : vector<2x80xf32> to vector<2x20xf32>
    %1256 = arith.mulf %1252, %1251 : vector<2x20xf32>
    %1257 = arith.mulf %1253, %1070 : vector<2x20xf32>
    %1258 = arith.addf %1256, %1257 : vector<2x20xf32>
    %1259 = arith.mulf %1254, %1212 : vector<2x20xf32>
    %1260 = arith.addf %1258, %1259 : vector<2x20xf32>
    %1261 = math.tanh %1260 : vector<2x20xf32>
    %1262 = arith.mulf %1255, %1261 : vector<2x20xf32>
    %c14 = arith.constant 14 : index
    %c0_571 = arith.constant 0 : index
    %c0_572 = arith.constant 0 : index
    %1263 = vector.load %arg10[%c14, %c0_571, %c0_572] : memref<16x20x500xf32, #tpu.memory_space<vmem>>, vector<1x20x500xf32>
    %1264 = vector.shape_cast %1263 : vector<1x20x500xf32> to vector<20x500xf32>
    %cst_573 = arith.constant dense<0.000000e+00> : vector<2x500xf32>
    %1265 = tpu.matmul %1262, %1264, %cst_573 {dimension_numbers = #tpu.dot_dimension_numbers<[1], [0], [0], [1], [0, 0, 1, 1], [], []>} : vector<2x20xf32>, vector<20x500xf32>, vector<2x500xf32> -> vector<2x500xf32>
    %1266 = arith.addf %1218, %1265 : vector<2x500xf32>
    %c204 = arith.constant 204 : index
    %c0_574 = arith.constant 0 : index
    %1267 = vector.load %arg16[%c204, %c0_574] : memref<240x10xf32, #tpu.memory_space<vmem>>, vector<2x10xf32>
    %c0_575 = arith.constant 0 : index
    %c0_576 = arith.constant 0 : index
    %c0_577 = arith.constant 0 : index
    %1268 = vector.load %arg6[%c0_575, %c0_576, %c0_577] : memref<4x10x100xf32, #tpu.memory_space<vmem>>, vector<1x10x100xf32>
    %1269 = vector.shape_cast %1268 : vector<1x10x100xf32> to vector<10x100xf32>
    %cst_578 = arith.constant dense<0.000000e+00> : vector<2x100xf32>
    %1270 = tpu.matmul %1267, %1269, %cst_578 {dimension_numbers = #tpu.dot_dimension_numbers<[1], [0], [0], [1], [0, 0, 1, 1], [], []>} : vector<2x10xf32>, vector<10x100xf32>, vector<2x100xf32> -> vector<2x100xf32>
    %1271 = vector.broadcast %562 : vector<1x100xf32> to vector<2x100xf32>
    %1272 = arith.addf %1271, %1270 : vector<2x100xf32>
    %c220 = arith.constant 220 : index
    %c0_579 = arith.constant 0 : index
    %1273 = vector.load %arg16[%c220, %c0_579] : memref<240x10xf32, #tpu.memory_space<vmem>>, vector<2x10xf32>
    %c1_580 = arith.constant 1 : index
    %c0_581 = arith.constant 0 : index
    %c0_582 = arith.constant 0 : index
    %1274 = vector.load %arg6[%c1_580, %c0_581, %c0_582] : memref<4x10x100xf32, #tpu.memory_space<vmem>>, vector<1x10x100xf32>
    %1275 = vector.shape_cast %1274 : vector<1x10x100xf32> to vector<10x100xf32>
    %cst_583 = arith.constant dense<0.000000e+00> : vector<2x100xf32>
    %1276 = tpu.matmul %1273, %1275, %cst_583 {dimension_numbers = #tpu.dot_dimension_numbers<[1], [0], [0], [1], [0, 0, 1, 1], [], []>} : vector<2x10xf32>, vector<10x100xf32>, vector<2x100xf32> -> vector<2x100xf32>
    %1277 = arith.addf %1272, %1276 : vector<2x100xf32>
    %c222 = arith.constant 222 : index
    %c0_584 = arith.constant 0 : index
    %1278 = vector.load %arg16[%c222, %c0_584] : memref<240x10xf32, #tpu.memory_space<vmem>>, vector<2x10xf32>
    %c2_585 = arith.constant 2 : index
    %c0_586 = arith.constant 0 : index
    %c0_587 = arith.constant 0 : index
    %1279 = vector.load %arg6[%c2_585, %c0_586, %c0_587] : memref<4x10x100xf32, #tpu.memory_space<vmem>>, vector<1x10x100xf32>
    %1280 = vector.shape_cast %1279 : vector<1x10x100xf32> to vector<10x100xf32>
    %cst_588 = arith.constant dense<0.000000e+00> : vector<2x100xf32>
    %1281 = tpu.matmul %1278, %1280, %cst_588 {dimension_numbers = #tpu.dot_dimension_numbers<[1], [0], [0], [1], [0, 0, 1, 1], [], []>} : vector<2x10xf32>, vector<10x100xf32>, vector<2x100xf32> -> vector<2x100xf32>
    %1282 = arith.addf %1277, %1281 : vector<2x100xf32>
    %c238 = arith.constant 238 : index
    %c0_589 = arith.constant 0 : index
    %1283 = vector.load %arg16[%c238, %c0_589] : memref<240x10xf32, #tpu.memory_space<vmem>>, vector<2x10xf32>
    %c3_590 = arith.constant 3 : index
    %c0_591 = arith.constant 0 : index
    %c0_592 = arith.constant 0 : index
    %1284 = vector.load %arg6[%c3_590, %c0_591, %c0_592] : memref<4x10x100xf32, #tpu.memory_space<vmem>>, vector<1x10x100xf32>
    %1285 = vector.shape_cast %1284 : vector<1x10x100xf32> to vector<10x100xf32>
    %cst_593 = arith.constant dense<0.000000e+00> : vector<2x100xf32>
    %1286 = tpu.matmul %1283, %1285, %cst_593 {dimension_numbers = #tpu.dot_dimension_numbers<[1], [0], [0], [1], [0, 0, 1, 1], [], []>} : vector<2x10xf32>, vector<10x100xf32>, vector<2x100xf32> -> vector<2x100xf32>
    %1287 = arith.addf %1282, %1286 : vector<2x100xf32>
    %cst_594 = arith.constant dense<0.000000e+00> : vector<2x100xf32>
    %1288 = tpu.matmul %1120, %560, %cst_594 {dimension_numbers = #tpu.dot_dimension_numbers<[1], [0], [0], [1], [0, 0, 1, 1], [], []>} : vector<2x20xf32>, vector<20x100xf32>, vector<2x100xf32> -> vector<2x100xf32>
    %1289 = arith.addf %1287, %1288 : vector<2x100xf32>
    %cst_595 = arith.constant dense<0.000000e+00> : vector<2x100xf32>
    %1290 = tpu.matmul %1262, %561, %cst_595 {dimension_numbers = #tpu.dot_dimension_numbers<[1], [0], [0], [1], [0, 0, 1, 1], [], []>} : vector<2x20xf32>, vector<20x100xf32>, vector<2x100xf32> -> vector<2x100xf32>
    %1291 = arith.addf %1289, %1290 : vector<2x100xf32>
    %1292 = vector.extract_strided_slice %1291 {offsets = [0, 0], sizes = [2, 80], strides = [1, 1]} : vector<2x100xf32> to vector<2x80xf32>
    %1293 = arith.negf %1292 : vector<2x80xf32>
    %1294 = math.exp %1293 : vector<2x80xf32>
    %cst_596 = arith.constant 1.000000e+00 : f32
    %1295 = vector.broadcast %cst_596 : f32 to vector<2x80xf32>
    %1296 = arith.addf %1295, %1294 : vector<2x80xf32>
    %1297 = arith.divf %1295, %1296 : vector<2x80xf32>
    %1298 = vector.extract_strided_slice %1291 {offsets = [0, 80], sizes = [2, 20], strides = [1, 1]} : vector<2x100xf32> to vector<2x20xf32>
    %1299 = math.tanh %1298 : vector<2x20xf32>
    %1300 = vector.extract_strided_slice %1297 {offsets = [0, 0], sizes = [2, 20], strides = [1, 1]} : vector<2x80xf32> to vector<2x20xf32>
    %1301 = vector.extract_strided_slice %1297 {offsets = [0, 20], sizes = [2, 20], strides = [1, 1]} : vector<2x80xf32> to vector<2x20xf32>
    %1302 = vector.extract_strided_slice %1297 {offsets = [0, 40], sizes = [2, 20], strides = [1, 1]} : vector<2x80xf32> to vector<2x20xf32>
    %1303 = vector.extract_strided_slice %1297 {offsets = [0, 60], sizes = [2, 20], strides = [1, 1]} : vector<2x80xf32> to vector<2x20xf32>
    %1304 = arith.mulf %1300, %1299 : vector<2x20xf32>
    %1305 = arith.mulf %1301, %1118 : vector<2x20xf32>
    %1306 = arith.addf %1304, %1305 : vector<2x20xf32>
    %1307 = arith.mulf %1302, %1260 : vector<2x20xf32>
    %1308 = arith.addf %1306, %1307 : vector<2x20xf32>
    %1309 = math.tanh %1308 : vector<2x20xf32>
    %1310 = arith.mulf %1303, %1309 : vector<2x20xf32>
    %c15 = arith.constant 15 : index
    %c0_597 = arith.constant 0 : index
    %c0_598 = arith.constant 0 : index
    %1311 = vector.load %arg10[%c15, %c0_597, %c0_598] : memref<16x20x500xf32, #tpu.memory_space<vmem>>, vector<1x20x500xf32>
    %1312 = vector.shape_cast %1311 : vector<1x20x500xf32> to vector<20x500xf32>
    %cst_599 = arith.constant dense<0.000000e+00> : vector<2x500xf32>
    %1313 = tpu.matmul %1310, %1312, %cst_599 {dimension_numbers = #tpu.dot_dimension_numbers<[1], [0], [0], [1], [0, 0, 1, 1], [], []>} : vector<2x20xf32>, vector<20x500xf32>, vector<2x500xf32> -> vector<2x500xf32>
    %1314 = arith.addf %1266, %1313 : vector<2x500xf32>
    %c0_600 = arith.constant 0 : index
    %c0_601 = arith.constant 0 : index
    %1315 = vector.load %arg11[%c0_600, %c0_601] : memref<1x500xf32, #tpu.memory_space<vmem>>, vector<1x500xf32>
    %1316 = vector.broadcast %1315 : vector<1x500xf32> to vector<2x500xf32>
    %1317 = arith.addf %1314, %1316 : vector<2x500xf32>
    %c0_602 = arith.constant 0 : index
    %c0_603 = arith.constant 0 : index
    %1318 = vector.load %arg12[%c0_602, %c0_603] : memref<500x10xf32, #tpu.memory_space<vmem>>, vector<500x10xf32>
    %cst_604 = arith.constant dense<0.000000e+00> : vector<2x10xf32>
    %1319 = tpu.matmul %1317, %1318, %cst_604 {dimension_numbers = #tpu.dot_dimension_numbers<[1], [0], [0], [1], [0, 0, 1, 1], [], []>} : vector<2x500xf32>, vector<500x10xf32>, vector<2x10xf32> -> vector<2x10xf32>
    %c0_605 = arith.constant 0 : index
    %c0_606 = arith.constant 0 : index
    %1320 = vector.load %arg13[%c0_605, %c0_606] : memref<1x10xf32, #tpu.memory_space<vmem>>, vector<1x10xf32>
    %1321 = vector.broadcast %1320 : vector<1x10xf32> to vector<2x10xf32>
    %1322 = arith.addf %1319, %1321 : vector<2x10xf32>
    %c0_607 = arith.constant 0 : index
    %c0_608 = arith.constant 0 : index
    %1323 = vector.load %arg14[%c0_607, %c0_608] : memref<2x10xf32, #tpu.memory_space<vmem>>, vector<2x10xf32>
    tpu.vector_store %arg14[%c0_607, %c0_608], %1322 {strides = array<i32>} : memref<2x10xf32, #tpu.memory_space<vmem>>, vector<2x10xf32>,
    return
  }
  func.func @transform_0(%arg0: i32) -> (i32, i32) {
    %c0_i32 = arith.constant 0 : i32
    %c0_i32_0 = arith.constant 0 : i32
    %c0_i32_1 = arith.constant 0 : i32
    return %c0_i32, %c0_i32_0 : i32, i32
  }
  func.func @transform_1(%arg0: i32) -> (i32, i32) {
    %c0_i32 = arith.constant 0 : i32
    %c0_i32_0 = arith.constant 0 : i32
    %c0_i32_1 = arith.constant 0 : i32
    return %c0_i32, %c0_i32_0 : i32, i32
  }
  func.func @transform_2(%arg0: i32) -> (i32, i32) {
    %c0_i32 = arith.constant 0 : i32
    %c0_i32_0 = arith.constant 0 : i32
    %c0_i32_1 = arith.constant 0 : i32
    return %c0_i32, %c0_i32_0 : i32, i32
  }
  func.func @transform_3(%arg0: i32) -> (i32, i32) {
    %c0_i32 = arith.constant 0 : i32
    %c0_i32_0 = arith.constant 0 : i32
    %c0_i32_1 = arith.constant 0 : i32
    return %c0_i32, %c0_i32_0 : i32, i32
  }
  func.func @transform_4(%arg0: i32) -> (i32, i32) {
    %c0_i32 = arith.constant 0 : i32
    %c0_i32_0 = arith.constant 0 : i32
    %c0_i32_1 = arith.constant 0 : i32
    return %c0_i32, %c0_i32_0 : i32, i32
  }
  func.func @transform_5(%arg0: i32) -> (i32, i32, i32) {
    %c0_i32 = arith.constant 0 : i32
    %c0_i32_0 = arith.constant 0 : i32
    %c0_i32_1 = arith.constant 0 : i32
    %c0_i32_2 = arith.constant 0 : i32
    return %c0_i32, %c0_i32_0, %c0_i32_1 : i32, i32, i32
  }
  func.func @transform_6(%arg0: i32) -> (i32, i32) {
    %c0_i32 = arith.constant 0 : i32
    %c0_i32_0 = arith.constant 0 : i32
    %c0_i32_1 = arith.constant 0 : i32
    return %c0_i32, %c0_i32_0 : i32, i32
  }
  func.func @transform_7(%arg0: i32) -> (i32, i32) {
    %c0_i32 = arith.constant 0 : i32
    %c0_i32_0 = arith.constant 0 : i32
    %c0_i32_1 = arith.constant 0 : i32
    return %c0_i32, %c0_i32_0 : i32, i32
  }
  func.func @transform_8(%arg0: i32) -> (i32, i32) {
    %c0_i32 = arith.constant 0 : i32
    %c0_i32_0 = arith.constant 0 : i32
    %c0_i32_1 = arith.constant 0 : i32
    return %c0_i32, %c0_i32_0 : i32, i32
  }
  func.func @transform_9(%arg0: i32) -> (i32, i32, i32) {
    %c0_i32 = arith.constant 0 : i32
    %c0_i32_0 = arith.constant 0 : i32
    %c0_i32_1 = arith.constant 0 : i32
    %c0_i32_2 = arith.constant 0 : i32
    return %c0_i32, %c0_i32_0, %c0_i32_1 : i32, i32, i32
  }
  func.func @transform_10(%arg0: i32) -> (i32, i32) {
    %c0_i32 = arith.constant 0 : i32
    %c0_i32_0 = arith.constant 0 : i32
    %c0_i32_1 = arith.constant 0 : i32
    return %c0_i32, %c0_i32_0 : i32, i32
  }
  func.func @transform_11(%arg0: i32) -> (i32, i32) {
    %c0_i32 = arith.constant 0 : i32
    %c0_i32_0 = arith.constant 0 : i32
    %c0_i32_1 = arith.constant 0 : i32
    return %c0_i32, %c0_i32_0 : i32, i32
  }
  func.func @transform_12(%arg0: i32) -> (i32, i32) {
    %c0_i32 = arith.constant 0 : i32
    %c0_i32_0 = arith.constant 0 : i32
    %c0_i32_1 = arith.constant 0 : i32
    return %c0_i32, %c0_i32_0 : i32, i32
  }
  func.func @transform_13(%arg0: i32) -> (i32, i32) {
    %c0_i32 = arith.constant 0 : i32
    %c0_i32_0 = arith.constant 0 : i32
    %c0_i32_1 = arith.constant 0 : i32
    return %c0_i32, %c0_i32_0 : i32, i32
  }
}

</mosaic_0001>

<bundles_post_ra>
// kernel: net_forward.1
= control target key start
LH: loop header
LB: loop body
LE: loop exit
PB: predicated region body
PF: predicated region fallthrough
CT: control target
= control target key end

     0   :  { %vm84_vm0 = vcmask 130048   ;;  %s21261_s0 = inlined_call_operand.vmem [shape: f32[240,16], index: 0, kind: input, shape index: {}]   ;;  %s21262_s1 = inlined_call_operand.vmem [shape: f32[16,50], index: 1, kind: input, shape index: {}]   ;;  %s21263_s2 = inlined_call_operand.vmem [shape: f32[10,50], index: 2, kind: input, shape index: {}]   ;;  %s21264_s3 = inlined_call_operand.vmem [shape: f32[10,50], index: 3, kind: input, shape index: {}]   ;;  %s21265_s4 = inlined_call_operand.vmem [shape: f32[1,50], index: 4, kind: input, shape index: {}]   ;;  %s21266_s5 = inlined_call_operand.vmem [shape: f32[4,10,100], index: 5, kind: input, shape index: {}]   ;;  %s21267_s6 = inlined_call_operand.vmem [shape: f32[20,100], index: 6, kind: input, shape index: {}]   ;;  %s21268_s7 = inlined_call_operand.vmem [shape: f32[20,100], index: 7, kind: input, shape index: {}]   ;;  %s21269_s8 = inlined_call_operand.vmem [shape: f32[1,100], index: 8, kind: input, shape index: {}]   ;;  %s21270_s9 = inlined_call_operand.vmem [shape: f32[16,20,500], index: 9, kind: input, shape index: {}]   ;;  %s21271_s10 = inlined_call_operand.vmem [shape: f32[1,500], index: 10, kind: input, shape index: {}]   ;;  %s21272_s11 = inlined_call_operand.vmem [shape: f32[500,10], index: 11, kind: input, shape index: {}]   ;;  %s21273_s12 = inlined_call_operand.vmem [shape: f32[1,10], index: 12, kind: input, shape index: {}]   ;;  %s21274_s13 = inlined_call_operand.hbm [shape: f32[2,10], index: 13, kind: output, shape index: {}]  }
   0x1   :  { %v75_v0 = vld [vmem:[%s21262_s1] sm:$0xff]  ;;  %v76_v1 = vld [vmem:[%s21262_s1 + $0x8] sm:$0xff] }
   0x2   :  { %v45_v2 = vld [vmem:[%s21261_s0] sm:$0xff]  ;;  %v16590_v3 = vpack.c.bf16 %v76_v1, %v75_v0 }
   0x3   :  { %15685 = vmatprep.mubr.msk.f32.mxu0 %vm84_vm0, %v45_v2 }
   0x4   :  { %18 = vsyncpa [#allocation5], 0  ;;  %16591 = vmatprep.subr.bf16.mxu0 %v16590_v3  ;;  %17295 = vmatprep.subr.bf16.mxu1 %v16590_v3  ;;  %v46_v4 = vld [vmem:[%s21261_s0 + $0x8] sm:$0xff]  ;;  %v18096_v5 = vld [vmem:[%s21265_s4] ss:$0 sm:$0xff]  ;;  %vm390_vm1 = vcmask 408576   ;;  %v425_v29 = vlaneseq }
   0x5   :  { %16593 = vmatpush3.bf16.msra.mxu0 %v16590_v3  ;;  %17296 = vmatpush3.bf16.msra.mxu1 %v16590_v3  ;;  %s17993_s17 = smov 88   ;;  %s17994_s18 = smov 108   ;;  %v61_v23 = vld [vmem:[%s21261_s0 + $0x80] sm:$0xff]  ;;  %v62_v24 = vld [vmem:[%s21261_s0 + $0x88] sm:$0xff]  ;;  %vm535_vm2 = vcmask 1041408   ;;  %vm17996_vm3 = vmmov 1  }
   0x6   :  { %s17995_s19 = smov 118   ;;  %v421_v25 = vld [vmem:[%s21263_s2] sm:$0xff]  ;;  %15709 = vmatprep.mubr.msk.f32.mxu1 %vm84_vm0, %v61_v23  ;;  %v422_v26 = vld [vmem:[%s21263_s2 + $0x8] sm:$0x3]  ;;  %vm18122_vm4 = vmpackc.low %vm535_vm2, %vm17996_vm3  ;;  %s17997_s1 = smov 30   ;;  %v18146_v34 = vshrl.u32 %v425_v29, 7 }
   0x7   :  { %v63_v28 = vld [vmem:[%s21261_s0 + $0x90] sm:$0xff]  ;;  %v18130_v30 = vpack.c.bf16 %v422_v26, %v421_v25  ;;  %v64_v31 = vld [vmem:[%s21261_s0 + $0x98] sm:$0xff]  ;;  %v65_v32 = vld [vmem:[%s21261_s0 + $0xa0] sm:$0xff]  ;;  %v17998_v37 = vmov 0.0   ;;  %s17999_s23 = smov 98   ;;  %s18000_s28 = smov 20  }
   0x8   :  { %15686 = vmatmul.mubr.msk.f32.vlgmr.msra.gmra.mrb[0].mxu0 %vm84_vm0, %v46_v4  ;;  %15710 = vmatmul.mubr.msk.f32.vlgmr.msra.gmra.mrb[0].mxu1 %vm84_vm0, %v62_v24  ;;  %v66_v35 = vld [vmem:[%s21261_s0 + $0xa8] sm:$0xff]  ;;  %v67_v36 = vld [vmem:[%s21261_s0 + $0xb0] sm:$0xff]  ;;  %vm428_vm5 = vcmp.lt.s32.totalorder %v18146_v34, 2  ;;  %v68_v38 = vld [vmem:[%s21261_s0 + $0xb8] sm:$0xff]  ;;  %v18219_v53 = vrot.slane %v17998_v37, 6  ;;  %vm496_vm6 = vcmask 80896  }
   0x9   :  { %15712 = vmatprep.mubr.msk.f32.mxu1 %vm84_vm0, %v63_v28  ;;  %16596 = vmatprep.subr.msk.bf16.mxu1 %vm18122_vm4, %v18130_v30  ;;  %v69_v39 = vld [vmem:[%s21261_s0 + $0xc0] sm:$0xff]  ;;  %v70_v41 = vld [vmem:[%s21261_s0 + $0xc8] sm:$0xff]  ;;  %v71_v42 = vld [vmem:[%s21261_s0 + $0xd0] sm:$0xff]  ;;  %vm786_vm7 = vcmp.lt.s32.totalorder %v18146_v34, 4  ;;  %vm1066_vm8 = vcmp.lt.s32.totalorder %v18146_v34, 6  ;;  %vm2730_vm12 = vcmp.ge.s32.totalorder %v18146_v34, 2 }
   0xa   :  { %16599 = vmatpush3.bf16.msk.msra.mxu1 %vm18122_vm4, %v18130_v30  ;;  %v72_v43 = vld [vmem:[%s21261_s0 + $0xd8] sm:$0xff]  ;;  %v73_v44 = vld [vmem:[%s21261_s0 + $0xe0] sm:$0xff]  ;;  %v74_v45 = vld [vmem:[%s21261_s0 + $0xe8] sm:$0xff]  ;;  %vm3012_vm13 = vcmp.ge.s32.totalorder %v18146_v34, 4  ;;  %vm3292_vm14 = vcmp.ge.s32.totalorder %v18146_v34, 6  ;;  %s18004_s16 = smov 48  }
   0xb   :  { %v47_v46 = vld [vmem:[%s21261_s0 + $0x10] sm:$0xff]  ;;  %v48_v47 = vld [vmem:[%s21261_s0 + $0x18] sm:$0xff]  ;;  %v423_v48 = vld [vmem:[%s21264_s3] sm:$0xff]  ;;  %s18005_s20 = smov 60   ;;  %s18006_s21 = smov 40   ;;  %vm5094_vm2 = vcmask 1043456  }
   0xc   :  { %15713 = vmatmul.mubr.msk.f32.gmra.mrb[2].mxu1 %vm84_vm0, %v64_v31  ;;  %15688 = vmatprep.mubr.msk.f32.mxu0 %vm84_vm0, %v47_v46  ;;  %v424_v49 = vld [vmem:[%s21264_s3 + $0x8] sm:$0x3]  ;;  %s18001_s3 = smov 10   ;;  %s18007_s22 = smov 68   ;;  %vm5091_vm3 = vcmask 162816  }
   0xd   :  { %15715 = vmatprep.mubr.msk.f32.mxu1 %vm84_vm0, %v65_v32  ;;  %15689 = vmatmul.mubr.msk.f32.gmra.mrb[2].mxu0 %vm84_vm0, %v48_v47  ;;  %v18209_v50 = vpack.c.bf16 %v424_v49, %v423_v48  ;;  %v17968_v27 = vld [vmem:[%s21267_s6 + $0x10] sm:$0xf] }
   0xf   :  { %16602 = vmatprep.subr.msk.bf16.mxu1 %vm18122_vm4, %v18209_v50  ;;  %16698 = vmatprep.subr.msk.bf16.mxu0 %vm18122_vm4, %v18209_v50 }
  0x10   :  { %15716 = vmatmul.mubr.msk.f32.gmra.mrb[4].mxu1 %vm84_vm0, %v66_v35  ;;  %16701 = vmatpush3.bf16.msk.msra.mxu0 %vm18122_vm4, %v18209_v50 }
  0x11   :  { %15718 = vmatprep.mubr.msk.f32.mxu1 %vm84_vm0, %v67_v36  ;;  %16716 = vmatprep.subr.msk.bf16.mxu0 %vm18122_vm4, %v18130_v30 }
  0x14   :  { %15719 = vmatmul.mubr.msk.f32.gmra.mrb[6].mxu1 %vm84_vm0, %v68_v38 }
  0x15   :  { %15721 = vmatprep.mubr.msk.f32.mxu1 %vm84_vm0, %v69_v39 }
  0x18   :  { %15722 = vmatmul.mubr.msk.f32.gmra.mrb[8].mxu1 %vm84_vm0, %v70_v41 }
  0x19   :  { %15724 = vmatprep.mubr.msk.f32.mxu1 %vm84_vm0, %v71_v42 }
  0x1c   :  { %15725 = vmatmul.mubr.msk.f32.gmra.mrb[10].mxu1 %vm84_vm0, %v72_v43 }
  0x1d   :  { %15727 = vmatprep.mubr.msk.f32.mxu1 %vm84_vm0, %v73_v44 }
  0x20   :  { %15728 = vmatmul.mubr.msk.f32.gmra.mrb[12].mxu1 %vm84_vm0, %v74_v45 }
  0xdb   :  { %v15687_v6 = vpop.f32.mrb[0].mxu0  ;;  %v15711_v58 = vpop.f32.mrb[0].mxu1 }
  0xdc   :  { %v247_v7 = vadd.f32 %v15687_v6, %v18096_v5  ;;  %v241_v8 = vpop.f32.mrb[1].mxu0  ;;  %v327_v59 = vadd.f32 %v15711_v58, %v18096_v5  ;;  %v321_v60 = vpop.f32.mrb[1].mxu1 }
  0xdd   :  { %v242_v9 = vadd.f32 %v18096_v5, %v241_v8  ;;  %v322_v61 = vadd.f32 %v18096_v5, %v321_v60 }
  0xde   :  { %392 = vst.msk [vmem:[#allocation2 + $0x8] sm:$0xff] %vm390_vm1, %v247_v7  ;;  %408 = vst.msk [vmem:[#allocation2 + $0x88] sm:$0xff] %vm390_vm1, %v327_v59 }
  0xdf   :  { %391 = vst.msk [vmem:[#allocation2] sm:$0xff] %vm390_vm1, %v242_v9  ;;  %407 = vst.msk [vmem:[#allocation2 + $0x80] sm:$0xff] %vm390_vm1, %v322_v61  ;;  %v15714_v62 = vpop.f32.mrb[2].mxu1 }
  0xe0   :  { %v337_v63 = vadd.f32 %v15714_v62, %v18096_v5  ;;  %v331_v0 = vpop.f32.mrb[3].mxu1  ;;  %v15690_v32 = vpop.f32.mrb[2].mxu0 }
  0xe1   :  { %v332_v1 = vadd.f32 %v18096_v5, %v331_v0  ;;  %v251_v35 = vpop.f32.mrb[3].mxu0 }
  0xe2   :  { %410 = vst.msk [vmem:[#allocation2 + $0x98] sm:$0xff] %vm390_vm1, %v337_v63  ;;  %v252_v36 = vadd.f32 %v18096_v5, %v251_v35 }
  0xe3   :  { %409 = vst.msk [vmem:[#allocation2 + $0x90] sm:$0xff] %vm390_vm1, %v332_v1  ;;  %v15717_v2 = vpop.f32.mrb[4].mxu1  ;;  %v49_v1 = vld [vmem:[%s21261_s0 + $0x20] sm:$0xff] }
  0xe4   :  { %v347_v3 = vadd.f32 %v15717_v2, %v18096_v5  ;;  %v341_v4 = vpop.f32.mrb[5].mxu1  ;;  %393 = vst.msk [vmem:[#allocation2 + $0x10] sm:$0xff] %vm390_vm1, %v252_v36  ;;  %v50_v2 = vld [vmem:[%s21261_s0 + $0x28] sm:$0xff]  ;;  %15691 = vmatprep.mubr.msk.f32.mxu0 %vm84_vm0, %v49_v1 }
  0xe5   :  { %v342_v6 = vadd.f32 %v18096_v5, %v341_v4  ;;  %15692 = vmatmul.mubr.msk.f32.gmra.mrb[4].mxu0 %vm84_vm0, %v50_v2 }
  0xe6   :  { %v430_v10 = vld [vmem:[#allocation2] sm:$0xff]  ;;  %412 = vst.msk [vmem:[#allocation2 + $0xa8] sm:$0xff] %vm390_vm1, %v347_v3 }
  0xe7   :  { %17594 = vtanh.f32 %v430_v10  ;;  %v14622_v11 = vmul.f32 -1.442695, %v430_v10  ;;  %411 = vst.msk [vmem:[#allocation2 + $0xa0] sm:$0xff] %vm390_vm1, %v342_v6  ;;  %v15720_v7 = vpop.f32.mrb[6].mxu1 }
  0xe8   :  { %v357_v8 = vadd.f32 %v15720_v7, %v18096_v5  ;;  %v351_v9 = vpop.f32.mrb[7].mxu1 }
  0xe9   :  { %17596 = vpow2.f32 %v14622_v11  ;;  %v352_v10 = vadd.f32 %v18096_v5, %v351_v9 }
  0xea   :  { %414 = vst.msk [vmem:[#allocation2 + $0xb8] sm:$0xff] %vm390_vm1, %v357_v8 }
  0xeb   :  { %413 = vst.msk [vmem:[#allocation2 + $0xb0] sm:$0xff] %vm390_vm1, %v352_v10  ;;  %v15723_v11 = vpop.f32.mrb[8].mxu1  ;;  %v507_v38 = vld [vmem:[#allocation2 + $0x10] sm:$0xff] }
  0xf1   :  { %v17595_v12 = vpop.eup %17594 }
  0xf2   :  { %448 = vrot.lane.b32.xlu0 %v17595_v12, %s17993_s17  ;;  %v367_v12 = vadd.f32 %v15723_v11, %v18096_v5 }
  0xf3   :  { %v17597_v13 = vpop.eup %17596 }
  0xf4   :  { %v438_v14 = vadd.f32 1.0, %v17597_v13  ;;  %v361_v13 = vpop.f32.mrb[9].mxu1  ;;  %416 = vst.msk [vmem:[#allocation2 + $0xc8] sm:$0xff] %vm390_vm1, %v367_v12 }
  0xf6   :  { %17598 = vrcp.f32 %v438_v14  ;;  %v362_v14 = vadd.f32 %v18096_v5, %v361_v13 }
  0xf8   :  { %415 = vst.msk [vmem:[#allocation2 + $0xc0] sm:$0xff] %vm390_vm1, %v362_v14 }
 0x100   :  { %v18103_v15 = vpop.eup %17598 }
 0x101   :  { %v456_v16 = vmul.f32 0.0, %v18103_v15 }
 0x103   :  { %468 = vrot.lane.b32.xlu1 %v456_v16, %s17994_s18  ;;  %460 = vrot.lane.b32.xlu0 %v456_v16, %s17995_s19 }
 0x164   :  { %v449_v17 = vpop.permute.xlu0 %448 }
 0x165   :  { %v454_v18 = vmul.f32 %v18103_v15, %v449_v17 }
 0x175   :  { %v461_v19 = vpop.permute.xlu0 %460  ;;  %v469_v21 = vpop.permute.xlu1 %468 }
 0x176   :  { %v466_v20 = vadd.f32 %v461_v19, %v454_v18 }
 0x178   :  { %v474_v22 = vadd.f32 %v469_v21, %v466_v20 }
 0x17a   :  { %17600 = vtanh.f32 %v474_v22  ;;  %v18169_v40 = vsel %vm428_vm5, %v474_v22, 0.0 }
 0x17b   :  { %v523_v51 = vrot.slane %v18169_v40, 6 }
 0x17d   :  { %v526_v56 = vsel %vm428_vm5, %v18219_v53, %v523_v51 }
 0x17e   :  { %v527_v57 = vsel %vm428_vm5, 0.0, %v526_v56 }
 0x184   :  { %v17601_v33 = vpop.eup %17600 }
 0x185   :  { %480 = vrot.lane.b32.xlu1 %v17601_v33, %s17997_s1  ;;  %v257_v33 = vadd.f32 %v15690_v32, %v18096_v5 }
 0x187   :  { %394 = vst.msk [vmem:[#allocation2 + $0x18] sm:$0xff] %vm390_vm1, %v257_v33 }
 0x189   :  { %513 = vrot.lane.b32.xlu1 %v17998_v37, %s17999_s23 }
 0x18d   :  { %746 = vrot.lane.b32.xlu1 %v18169_v40, %s18000_s28 }
 0x1f7   :  { %v481_v52 = vpop.permute.xlu1 %480 }
 0x1f8   :  { %v18225_v54 = vmul.f32 %v18103_v15, %v481_v52  ;;  %v15726_v15 = vpop.f32.mrb[10].mxu1 }
 0x1f9   :  { %v377_v16 = vadd.f32 %v15726_v15, %v18096_v5  ;;  %v371_v17 = vpop.f32.mrb[11].mxu1 }
 0x1fa   :  { %v18233_v55 = vsel %vm428_vm5, %v18225_v54, 0.0  ;;  %v372_v18 = vadd.f32 %v18096_v5, %v371_v17  ;;  %v15729_v26 = vpop.f32.mrb[12].mxu1 }
 0x1fb   :  { %511 = vrot.lane.b32.xlu0 %v18233_v55, %s17999_s23  ;;  %v514_v19 = vpop.permute.xlu1 %513  ;;  %418 = vst.msk [vmem:[#allocation2 + $0xd8] sm:$0xff] %vm390_vm1, %v377_v16  ;;  %v387_v28 = vadd.f32 %v15729_v26, %v18096_v5  ;;  %v381_v29 = vpop.f32.mrb[13].mxu1 }
 0x1fc   :  { %v518_v20 = vrot.slane %v514_v19, 6  ;;  %417 = vst.msk [vmem:[#allocation2 + $0xd0] sm:$0xff] %vm390_vm1, %v372_v18  ;;  %v382_v31 = vadd.f32 %v18096_v5, %v381_v29  ;;  %v15693_v16 = vpop.f32.mrb[4].mxu0 }
 0x1fd   :  { %420 = vst.msk [vmem:[#allocation2 + $0xe8] sm:$0xff] %vm390_vm1, %v387_v28  ;;  %v267_v17 = vadd.f32 %v15693_v16, %v18096_v5  ;;  %v261_v18 = vpop.f32.mrb[5].mxu0 }
 0x1fe   :  { %419 = vst.msk [vmem:[#allocation2 + $0xe0] sm:$0xff] %vm390_vm1, %v382_v31 }
 0x1ff   :  { %726 = vrot.lane.b32.xlu0 %v527_v57, %s18001_s3  ;;  %v747_v48 = vpop.permute.xlu1 %746  ;;  %396 = vst.msk [vmem:[#allocation2 + $0x28] sm:$0xff] %vm390_vm1, %v267_v17 }
 0x26d   :  { %v512_v21 = vpop.permute.xlu0 %511 }
 0x26e   :  { %v517_v22 = vrot.slane %v512_v21, 6 }
 0x270   :  { %v520_v23 = vsel %vm428_vm5, %v518_v20, %v517_v22  ;;  %v519_v25 = vsel %vm428_vm5, %v517_v22, %v518_v20 }
 0x271   :  { %v521_v24 = vsel %vm428_vm5, 0.0, %v520_v23  ;;  %v727_v49 = vpop.permute.xlu0 %726 }
 0x272   :  { %15734 = vmatprep.mubr.msk.f32.mxu1 %vm496_vm6, %v521_v24 }
 0x273   :  { %15735 = vmatmul.mubr.msk.f32.vlgmr.msra.gmra.mrb[14].mxu1 %vm496_vm6, %v519_v25 }
 0x274   :  { %16605 = vmatpush3.bf16.msk.msra.mxu1 %vm18122_vm4, %v18209_v50  ;;  %15741 = vmatprep.mubr.msk.f32.mxu1 %vm496_vm6, %v512_v21 }
 0x275   :  { %16608 = vmatprep.subr.msk.bf16.mxu1 %vm18122_vm4, %v18130_v30 }
 0x27b   :  { %15742 = vmatmul.mubr.msk.f32.vlgmr.msra.gmra.mrb[14].mxu1 %vm496_vm6, %v514_v19  ;;  %v262_v19 = vadd.f32 %v18096_v5, %v261_v18 }
 0x27c   :  { %16611 = vmatpush3.bf16.msk.msra.mxu1 %vm18122_vm4, %v18130_v30 }
 0x27d   :  { %16614 = vmatprep.subr.msk.bf16.mxu1 %vm18122_vm4, %v18209_v50  ;;  %395 = vst.msk [vmem:[#allocation2 + $0x20] sm:$0xff] %vm390_vm1, %v262_v19 }
 0x284   :  { %v794_v20 = vld [vmem:[#allocation2 + $0x20] sm:$0xff] }
 0x34e   :  { %v18299_v39 = vpop.f32.mrb[14].mxu1 }
 0x34f   :  { %v689_v41 = vpop.f32.mrb[15].mxu1 }
 0x350   :  { %v17298_v42 = vadd.f32 %v689_v41, %v507_v38 }
 0x352   :  { %v14630_v43 = vmul.f32 -1.442695, %v17298_v42  ;;  %17602 = vtanh.f32 %v17298_v42 }
 0x354   :  { %17604 = vpow2.f32 %v14630_v43 }
 0x35c   :  { %v17603_v44 = vpop.eup %17602 }
 0x35d   :  { %716 = vrot.lane.b32.xlu0 %v17603_v44, %s17993_s17 }
 0x35e   :  { %v17605_v45 = vpop.eup %17604 }
 0x35f   :  { %v706_v46 = vadd.f32 1.0, %v17605_v45 }
 0x361   :  { %17606 = vrcp.f32 %v706_v46 }
 0x36b   :  { %v17607_v47 = vpop.eup %17606 }
 0x36c   :  { %v732_v52 = vmul.f32 %v17607_v47, %v727_v49  ;;  %v752_v56 = vmul.f32 %v17607_v47, %v747_v48  ;;  %v52_v48 = vld [vmem:[%s21261_s0 + $0x38] sm:$0xff] }
 0x36e   :  { %736 = vrot.lane.b32.xlu1 %v732_v52, %s17995_s19  ;;  %756 = vrot.lane.b32.xlu0 %v752_v56, %s17994_s18 }
 0x3cf   :  { %v717_v57 = vpop.permute.xlu0 %716 }
 0x3d0   :  { %v722_v58 = vmul.f32 %v17607_v47, %v717_v57 }
 0x3e0   :  { %v737_v59 = vpop.permute.xlu1 %736  ;;  %v757_v61 = vpop.permute.xlu0 %756 }
 0x3e1   :  { %v742_v60 = vadd.f32 %v737_v59, %v722_v58 }
 0x3e3   :  { %v762_v62 = vadd.f32 %v757_v61, %v742_v60 }
 0x3e5   :  { %17608 = vtanh.f32 %v762_v62  ;;  %v18309_v0 = vsel %vm786_vm7, %v762_v62, %v18169_v40 }
 0x3e6   :  { %v21277_v3 = vrot.slane %v18309_v0, 6 }
 0x3e8   :  { %v813_v8 = vsel %vm428_vm5, %v18219_v53, %v21277_v3 }
 0x3e9   :  { %v814_v9 = vsel %vm428_vm5, 0.0, %v813_v8 }
 0x3ef   :  { %v17609_v63 = vpop.eup %17608 }
 0x3f0   :  { %768 = vrot.lane.b32.xlu1 %v17609_v63, %s17997_s1 }
 0x3f4   :  { %800 = vrot.lane.b32.xlu1 %v17998_v37, %s17999_s23 }
 0x3f8   :  { %1026 = vrot.lane.b32.xlu1 %v18309_v0, %s18000_s28 }
 0x462   :  { %v769_v4 = vpop.permute.xlu1 %768 }
 0x463   :  { %v18322_v6 = vmul.f32 %v17607_v47, %v769_v4  ;;  %v51_v47 = vld [vmem:[%s21261_s0 + $0x30] sm:$0xff] }
 0x464   :  { %15694 = vmatprep.mubr.msk.f32.mxu0 %vm84_vm0, %v51_v47 }
 0x465   :  { %v18326_v7 = vsel %vm786_vm7, %v18322_v6, %v18233_v55  ;;  %15695 = vmatmul.mubr.msk.f32.gmra.mrb[6].mxu0 %vm84_vm0, %v52_v48 }
 0x466   :  { %798 = vrot.lane.b32.xlu0 %v18326_v7, %s17999_s23  ;;  %v801_v10 = vpop.permute.xlu1 %800 }
 0x467   :  { %v805_v11 = vrot.slane %v801_v10, 6 }
 0x46a   :  { %1006 = vrot.lane.b32.xlu0 %v814_v9, %s18001_s3  ;;  %v1027_v31 = vpop.permute.xlu1 %1026 }
 0x4d8   :  { %v799_v12 = vpop.permute.xlu0 %798 }
 0x4d9   :  { %v804_v13 = vrot.slane %v799_v12, 6 }
 0x4db   :  { %v807_v55 = vsel %vm428_vm5, %v805_v11, %v804_v13  ;;  %v806_v15 = vsel %vm428_vm5, %v804_v13, %v805_v11 }
 0x4dc   :  { %v808_v14 = vsel %vm428_vm5, 0.0, %v807_v55  ;;  %v1007_v32 = vpop.permute.xlu0 %1006 }
 0x4dd   :  { %15748 = vmatprep.mubr.msk.f32.mxu1 %vm496_vm6, %v808_v14 }
 0x4de   :  { %15749 = vmatmul.mubr.msk.f32.vlgmr.msra.gmra.mrb[16].mxu1 %vm496_vm6, %v806_v15 }
 0x4df   :  { %16617 = vmatpush3.bf16.msk.msra.mxu1 %vm18122_vm4, %v18209_v50  ;;  %15755 = vmatprep.mubr.msk.f32.mxu1 %vm496_vm6, %v799_v12 }
 0x4e0   :  { %16620 = vmatprep.subr.msk.bf16.mxu1 %vm18122_vm4, %v18130_v30 }
 0x4e6   :  { %15756 = vmatmul.mubr.msk.f32.vlgmr.msra.gmra.mrb[16].mxu1 %vm496_vm6, %v801_v10 }
 0x4e7   :  { %16623 = vmatpush3.bf16.msk.msra.mxu1 %vm18122_vm4, %v18130_v30 }
 0x4e8   :  { %16626 = vmatprep.subr.msk.bf16.mxu1 %vm18122_vm4, %v18209_v50 }
 0x5b9   :  { %v18364_v21 = vpop.f32.mrb[16].mxu1 }
 0x5ba   :  { %v969_v22 = vpop.f32.mrb[17].mxu1 }
 0x5bb   :  { %v17300_v23 = vadd.f32 %v969_v22, %v794_v20 }
 0x5bd   :  { %v14638_v24 = vmul.f32 -1.442695, %v17300_v23  ;;  %17610 = vtanh.f32 %v17300_v23 }
 0x5bf   :  { %17612 = vpow2.f32 %v14638_v24 }
 0x5c7   :  { %v17611_v25 = vpop.eup %17610 }
 0x5c8   :  { %996 = vrot.lane.b32.xlu0 %v17611_v25, %s17993_s17 }
 0x5c9   :  { %v17613_v26 = vpop.eup %17612 }
 0x5ca   :  { %v986_v28 = vadd.f32 1.0, %v17613_v26 }
 0x5cc   :  { %17614 = vrcp.f32 %v986_v28 }
 0x5d6   :  { %v17615_v29 = vpop.eup %17614 }
 0x5d7   :  { %v1012_v33 = vmul.f32 %v17615_v29, %v1007_v32  ;;  %v1032_v35 = vmul.f32 %v17615_v29, %v1027_v31 }
 0x5d9   :  { %1016 = vrot.lane.b32.xlu1 %v1012_v33, %s17995_s19  ;;  %1036 = vrot.lane.b32.xlu0 %v1032_v35, %s17994_s18 }
 0x63a   :  { %v997_v36 = vpop.permute.xlu0 %996 }
 0x63b   :  { %v1002_v38 = vmul.f32 %v17615_v29, %v997_v36 }
 0x64b   :  { %v1017_v41 = vpop.permute.xlu1 %1016  ;;  %v1037_v43 = vpop.permute.xlu0 %1036 }
 0x64c   :  { %v1022_v42 = vadd.f32 %v1017_v41, %v1002_v38  ;;  %v53_v38 = vld [vmem:[%s21261_s0 + $0x40] sm:$0xff]  ;;  %v54_v41 = vld [vmem:[%s21261_s0 + $0x48] sm:$0xff] }
 0x64d   :  { %15697 = vmatprep.mubr.msk.f32.mxu0 %vm84_vm0, %v53_v38 }
 0x64e   :  { %v1042_v44 = vadd.f32 %v1037_v43, %v1022_v42  ;;  %15698 = vmatmul.mubr.msk.f32.gmra.mrb[8].mxu0 %vm84_vm0, %v54_v41 }
 0x650   :  { %17616 = vtanh.f32 %v1042_v44  ;;  %v18374_v46 = vsel %vm1066_vm8, %v1042_v44, %v18309_v0 }
 0x651   :  { %v1090_v49 = vrot.slane %v18374_v46, 6 }
 0x653   :  { %v1093_v58 = vsel %vm428_vm5, %v18219_v53, %v1090_v49 }
 0x654   :  { %v1094_v59 = vsel %vm428_vm5, 0.0, %v1093_v58 }
 0x65a   :  { %v17617_v45 = vpop.eup %17616 }
 0x65b   :  { %1048 = vrot.lane.b32.xlu1 %v17617_v45, %s17997_s1 }
 0x65f   :  { %1080 = vrot.lane.b32.xlu1 %v17998_v37, %s17999_s23 }
 0x663   :  { %1306 = vrot.lane.b32.xlu1 %v18374_v46, %s18000_s28  ;;  %v508_v46 = vld [vmem:[#allocation2 + $0x18] sm:$0xff] }
 0x6cd   :  { %v1049_v52 = vpop.permute.xlu1 %1048 }
 0x6ce   :  { %v18387_v56 = vmul.f32 %v17615_v29, %v1049_v52 }
 0x6d0   :  { %v1070_v57 = vsel %vm1066_vm8, %v18387_v56, %v18326_v7  ;;  %v15696_v7 = vpop.f32.mrb[6].mxu0 }
 0x6d1   :  { %1078 = vrot.lane.b32.xlu0 %v1070_v57, %s17999_s23  ;;  %v1081_v60 = vpop.permute.xlu1 %1080  ;;  %v277_v8 = vadd.f32 %v15696_v7, %v18096_v5  ;;  %v271_v9 = vpop.f32.mrb[7].mxu0 }
 0x6d2   :  { %v1085_v61 = vrot.slane %v1081_v60, 6  ;;  %v272_v10 = vadd.f32 %v18096_v5, %v271_v9 }
 0x6d3   :  { %398 = vst.msk [vmem:[#allocation2 + $0x38] sm:$0xff] %vm390_vm1, %v277_v8 }
 0x6d4   :  { %397 = vst.msk [vmem:[#allocation2 + $0x30] sm:$0xff] %vm390_vm1, %v272_v10 }
 0x6d5   :  { %1286 = vrot.lane.b32.xlu0 %v1094_v59, %s18001_s3  ;;  %v1307_v19 = vpop.permute.xlu1 %1306 }
 0x6db   :  { %v1074_v11 = vld [vmem:[#allocation2 + $0x30] sm:$0xff] }
 0x743   :  { %v1079_v62 = vpop.permute.xlu0 %1078 }
 0x744   :  { %v1084_v63 = vrot.slane %v1079_v62, 6 }
 0x746   :  { %v1087_v1 = vsel %vm428_vm5, %v1085_v61, %v1084_v63  ;;  %v1086_v4 = vsel %vm428_vm5, %v1084_v63, %v1085_v61 }
 0x747   :  { %v1088_v2 = vsel %vm428_vm5, 0.0, %v1087_v1  ;;  %v1287_v20 = vpop.permute.xlu0 %1286 }
 0x748   :  { %15762 = vmatprep.mubr.msk.f32.mxu1 %vm496_vm6, %v1088_v2 }
 0x749   :  { %15763 = vmatmul.mubr.msk.f32.vlgmr.msra.gmra.mrb[18].mxu1 %vm496_vm6, %v1086_v4 }
 0x74a   :  { %16629 = vmatpush3.bf16.msk.msra.mxu1 %vm18122_vm4, %v18209_v50  ;;  %15769 = vmatprep.mubr.msk.f32.mxu1 %vm496_vm6, %v1079_v62 }
 0x74b   :  { %16632 = vmatprep.subr.msk.bf16.mxu1 %vm18122_vm4, %v18130_v30 }
 0x751   :  { %15770 = vmatmul.mubr.msk.f32.vlgmr.msra.gmra.mrb[18].mxu1 %vm496_vm6, %v1081_v60  ;;  %v15699_v60 = vpop.f32.mrb[8].mxu0 }
 0x752   :  { %16635 = vmatpush3.bf16.msk.msra.mxu1 %vm18122_vm4, %v18130_v30  ;;  %v287_v61 = vadd.f32 %v15699_v60, %v18096_v5  ;;  %v281_v62 = vpop.f32.mrb[9].mxu0  ;;  %v56_v60 = vld [vmem:[%s21261_s0 + $0x58] sm:$0xff] }
 0x753   :  { %16638 = vmatprep.subr.msk.bf16.mxu1 %vm18122_vm4, %v18209_v50  ;;  %v282_v63 = vadd.f32 %v18096_v5, %v281_v62 }
 0x754   :  { %400 = vst.msk [vmem:[#allocation2 + $0x48] sm:$0xff] %vm390_vm1, %v287_v61 }
 0x755   :  { %399 = vst.msk [vmem:[#allocation2 + $0x40] sm:$0xff] %vm390_vm1, %v282_v63 }
 0x75b   :  { %v1355_v1 = vld [vmem:[#allocation2 + $0x48] sm:$0xff] }
 0x75c   :  { %v1354_v2 = vld [vmem:[#allocation2 + $0x40] sm:$0xff] }
 0x824   :  { %v18426_v12 = vpop.f32.mrb[18].mxu1 }
 0x825   :  { %v1249_v13 = vpop.f32.mrb[19].mxu1 }
 0x826   :  { %v17302_v55 = vadd.f32 %v1249_v13, %v1074_v11 }
 0x828   :  { %v14646_v14 = vmul.f32 -1.442695, %v17302_v55  ;;  %17618 = vtanh.f32 %v17302_v55 }
 0x82a   :  { %17620 = vpow2.f32 %v14646_v14 }
 0x832   :  { %v17619_v15 = vpop.eup %17618 }
 0x833   :  { %1276 = vrot.lane.b32.xlu0 %v17619_v15, %s17993_s17 }
 0x834   :  { %v17621_v16 = vpop.eup %17620 }
 0x835   :  { %v1266_v17 = vadd.f32 1.0, %v17621_v16 }
 0x837   :  { %17622 = vrcp.f32 %v1266_v17 }
 0x841   :  { %v17623_v18 = vpop.eup %17622 }
 0x842   :  { %v1292_v22 = vmul.f32 %v17623_v18, %v1287_v20  ;;  %v1312_v23 = vmul.f32 %v17623_v18, %v1307_v19 }
 0x844   :  { %1296 = vrot.lane.b32.xlu1 %v1292_v22, %s17995_s19  ;;  %1316 = vrot.lane.b32.xlu0 %v1312_v23, %s17994_s18 }
 0x8a5   :  { %v1277_v24 = vpop.permute.xlu0 %1276 }
 0x8a6   :  { %v1282_v25 = vmul.f32 %v17623_v18, %v1277_v24 }
 0x8b6   :  { %v1297_v26 = vpop.permute.xlu1 %1296  ;;  %v1317_v29 = vpop.permute.xlu0 %1316 }
 0x8b7   :  { %v1302_v28 = vadd.f32 %v1297_v26, %v1282_v25 }
 0x8b9   :  { %v1322_v31 = vadd.f32 %v1317_v29, %v1302_v28 }
 0x8bb   :  { %17624 = vtanh.f32 %v1322_v31  ;;  %v1370_v33 = vrot.slane %v1322_v31, 6 }
 0x8bd   :  { %v1373_v35 = vsel %vm428_vm5, %v18219_v53, %v1370_v33  ;;  %v1372_v44 = vsel %vm428_vm5, %v1370_v33, %v18219_v53 }
 0x8be   :  { %v1374_v36 = vsel %vm428_vm5, 0.0, %v1373_v35 }
 0x8c5   :  { %v17625_v32 = vpop.eup %17624 }
 0x8c6   :  { %1328 = vrot.lane.b32.xlu1 %v17625_v32, %s17997_s1 }
 0x8ca   :  { %1360 = vrot.lane.b32.xlu1 %v17998_v37, %s17999_s23 }
 0x8ce   :  { %1566 = vrot.lane.b32.xlu1 %v1374_v36, %s18001_s3 }
 0x8d2   :  { %1586 = vrot.lane.b32.xlu1 %v1322_v31, %s18000_s28 }
 0x938   :  { %v1329_v42 = vpop.permute.xlu1 %1328 }
 0x939   :  { %v18449_v43 = vmul.f32 %v17623_v18, %v1329_v42 }
 0x93b   :  { %1358 = vrot.lane.b32.xlu0 %v18449_v43, %s17999_s23 }
 0x93c   :  { %v1361_v45 = vpop.permute.xlu1 %1360 }
 0x93d   :  { %v1365_v47 = vrot.slane %v1361_v45, 6 }
 0x93f   :  { %1568 = vrot.lane.b32.xlu0 %v1372_v44, %s18001_s3 }
 0x940   :  { %v1567_v19 = vpop.permute.xlu1 %1566 }
 0x943   :  { %1588 = vrot.lane.b32.xlu0 %v17998_v37, %s18000_s28 }
 0x944   :  { %v1587_v26 = vpop.permute.xlu1 %1586 }
 0x9ad   :  { %v1359_v48 = vpop.permute.xlu0 %1358 }
 0x9ae   :  { %v1364_v52 = vrot.slane %v1359_v48, 6 }
 0x9b0   :  { %v1367_v57 = vsel %vm428_vm5, %v1365_v47, %v1364_v52  ;;  %v1366_v59 = vsel %vm428_vm5, %v1364_v52, %v1365_v47 }
 0x9b1   :  { %v1368_v58 = vsel %vm428_vm5, 0.0, %v1367_v57  ;;  %v1569_v18 = vpop.permute.xlu0 %1568 }
 0x9b2   :  { %15776 = vmatprep.mubr.msk.f32.mxu1 %vm496_vm6, %v1368_v58  ;;  %v18494_v58 = vadd.s32 8, %v18146_v34 }
 0x9b3   :  { %15777 = vmatmul.mubr.msk.f32.vlgmr.msra.gmra.mrb[20].mxu1 %vm496_vm6, %v1366_v59  ;;  %v55_v59 = vld [vmem:[%s21261_s0 + $0x50] sm:$0xff] }
 0x9b4   :  { %16641 = vmatpush3.bf16.msk.msra.mxu1 %vm18122_vm4, %v18209_v50  ;;  %15783 = vmatprep.mubr.msk.f32.mxu1 %vm496_vm6, %v1359_v48  ;;  %vm1627_vm9 = vcmp.lt.s32.totalorder %v18494_v58, 10  ;;  %vm1907_vm10 = vcmp.lt.s32.totalorder %v18494_v58, 12  ;;  %vm2187_vm11 = vcmp.lt.s32.totalorder %v18494_v58, 14  ;;  %vm3853_vm15 = vcmp.ge.s32.totalorder %v18494_v58, 10 }
 0x9b5   :  { %16644 = vmatprep.subr.msk.bf16.mxu1 %vm18122_vm4, %v18130_v30  ;;  %v1589_v24 = vpop.permute.xlu0 %1588  ;;  %15700 = vmatprep.mubr.msk.f32.mxu0 %vm84_vm0, %v55_v59 }
 0x9b6   :  { %15701 = vmatmul.mubr.msk.f32.gmra.mrb[10].mxu0 %vm84_vm0, %v56_v60 }
 0x9bb   :  { %15784 = vmatmul.mubr.msk.f32.vlgmr.msra.gmra.mrb[20].mxu1 %vm496_vm6, %v1361_v45 }
 0x9bc   :  { %16647 = vmatpush3.bf16.msk.msra.mxu1 %vm18122_vm4, %v18130_v30 }
 0x9bd   :  { %16650 = vmatprep.subr.msk.bf16.mxu1 %vm18122_vm4, %v18209_v50 }
 0xa8e   :  { %v15785_v4 = vpop.f32.mrb[20].mxu1 }
 0xa8f   :  { %v17303_v7 = vadd.f32 %v15785_v4, %v1355_v1  ;;  %v1529_v8 = vpop.f32.mrb[21].mxu1 }
 0xa90   :  { %v17304_v9 = vadd.f32 %v1529_v8, %v1354_v2 }
 0xa91   :  { %v14655_v10 = vmul.f32 -1.442695, %v17303_v7  ;;  %17626 = vtanh.f32 %v17303_v7 }
 0xa92   :  { %v14654_v11 = vmul.f32 -1.442695, %v17304_v9  ;;  %17628 = vtanh.f32 %v17304_v9 }
 0xa93   :  { %17630 = vpow2.f32 %v14655_v10 }
 0xa94   :  { %17632 = vpow2.f32 %v14654_v11 }
 0xa9b   :  { %v17627_v13 = vpop.eup %17626 }
 0xa9c   :  { %v17629_v55 = vpop.eup %17628  ;;  %1558 = vrot.lane.b32.xlu0 %v17627_v13, %s17993_s17 }
 0xa9d   :  { %v17631_v14 = vpop.eup %17630  ;;  %1556 = vrot.lane.b32.xlu1 %v17629_v55, %s17993_s17 }
 0xa9e   :  { %v17633_v15 = vpop.eup %17632  ;;  %v1547_v16 = vadd.f32 1.0, %v17631_v14 }
 0xa9f   :  { %v1546_v17 = vadd.f32 1.0, %v17633_v15 }
 0xaa0   :  { %17634 = vrcp.f32 %v1547_v16 }
 0xaa1   :  { %17636 = vrcp.f32 %v1546_v17 }
 0xaaa   :  { %v17635_v20 = vpop.eup %17634 }
 0xaab   :  { %v17637_v22 = vpop.eup %17636  ;;  %v1573_v23 = vmul.f32 %v17635_v20, %v1569_v18  ;;  %v1593_v28 = vmul.f32 %v17635_v20, %v1589_v24 }
 0xaac   :  { %v1572_v25 = vmul.f32 %v17637_v22, %v1567_v19  ;;  %v1592_v29 = vmul.f32 %v17637_v22, %v1587_v26  ;;  %v15702_v19 = vpop.f32.mrb[10].mxu0 }
 0xaad   :  { %1578 = vrot.lane.b32.xlu0 %v1573_v23, %s17995_s19 }
 0xaae   :  { %1576 = vrot.lane.b32.xlu1 %v1572_v25, %s17995_s19 }
 0xab1   :  { %1598 = vrot.lane.b32.xlu0 %v1593_v28, %s17994_s18 }
 0xab2   :  { %1596 = vrot.lane.b32.xlu1 %v1592_v29, %s17994_s18 }
 0xb0e   :  { %v1559_v31 = vpop.permute.xlu0 %1558 }
 0xb0f   :  { %v1557_v32 = vpop.permute.xlu1 %1556  ;;  %v1563_v35 = vmul.f32 %v17635_v20, %v1559_v31 }
 0xb10   :  { %v1562_v38 = vmul.f32 %v17637_v22, %v1557_v32 }
 0xb1f   :  { %v1579_v33 = vpop.permute.xlu0 %1578 }
 0xb20   :  { %v1577_v36 = vpop.permute.xlu1 %1576  ;;  %v1583_v41 = vadd.f32 %v1579_v33, %v1563_v35 }
 0xb21   :  { %v1582_v42 = vadd.f32 %v1577_v36, %v1562_v38 }
 0xb23   :  { %v1599_v44 = vpop.permute.xlu0 %1598 }
 0xb24   :  { %v1603_v45 = vadd.f32 %v1599_v44, %v1583_v41  ;;  %v1597_v47 = vpop.permute.xlu1 %1596 }
 0xb25   :  { %v1602_v48 = vadd.f32 %v1597_v47, %v1582_v42 }
 0xb26   :  { %17638 = vtanh.f32 %v1603_v45  ;;  %v18505_v61 = vsel %vm1627_vm9, %v1603_v45, 0.0 }
 0xb27   :  { %17640 = vtanh.f32 %v1602_v48  ;;  %v1650_v62 = vrot.slane %v1602_v48, 6  ;;  %v1651_v1 = vrot.slane %v18505_v61, 6 }
 0xb29   :  { %v1653_v9 = vsel %vm428_vm5, %v1651_v1, %v1650_v62  ;;  %v1652_v11 = vsel %vm428_vm5, %v1650_v62, %v1651_v1 }
 0xb2a   :  { %v1654_v10 = vsel %vm428_vm5, 0.0, %v1653_v9 }
 0xb30   :  { %v17639_v52 = vpop.eup %17638 }
 0xb31   :  { %v17641_v57 = vpop.eup %17640  ;;  %1610 = vrot.lane.b32.xlu0 %v17639_v52, %s17997_s1 }
 0xb32   :  { %1608 = vrot.lane.b32.xlu1 %v17641_v57, %s17997_s1 }
 0xba3   :  { %v1611_v63 = vpop.permute.xlu0 %1610 }
 0xba4   :  { %v18508_v2 = vmul.f32 %v17635_v20, %v1611_v63  ;;  %v1609_v4 = vpop.permute.xlu1 %1608  ;;  %v297_v20 = vadd.f32 %v15702_v19, %v18096_v5 }
 0xba5   :  { %v18510_v7 = vmul.f32 %v17637_v22, %v1609_v4  ;;  %v291_v22 = vpop.f32.mrb[11].mxu0 }
 0xba6   :  { %v18513_v8 = vsel %vm1627_vm9, %v18508_v2, 0.0  ;;  %v292_v23 = vadd.f32 %v18096_v5, %v291_v22  ;;  %402 = vst.msk [vmem:[#allocation2 + $0x58] sm:$0xff] %vm390_vm1, %v297_v20  ;;  %v57_v22 = vld [vmem:[%s21261_s0 + $0x60] sm:$0xff] }
 0xba7   :  { %1640 = vrot.lane.b32.xlu1 %v18513_v8, %s17999_s23  ;;  %1638 = vrot.lane.b32.xlu0 %v18510_v7, %s17999_s23 }
 0xba8   :  { %401 = vst.msk [vmem:[#allocation2 + $0x50] sm:$0xff] %vm390_vm1, %v292_v23  ;;  %v58_v23 = vld [vmem:[%s21261_s0 + $0x68] sm:$0xff]  ;;  %15703 = vmatprep.mubr.msk.f32.mxu0 %vm84_vm0, %v57_v22 }
 0xba9   :  { %15704 = vmatmul.mubr.msk.f32.gmra.mrb[12].mxu0 %vm84_vm0, %v58_v23 }
 0xbab   :  { %1846 = vrot.lane.b32.xlu1 %v1654_v10, %s18001_s3  ;;  %1848 = vrot.lane.b32.xlu0 %v1652_v11, %s18001_s3 }
 0xbad   :  { %v1635_v24 = vld [vmem:[#allocation2 + $0x58] sm:$0xff] }
 0xbaf   :  { %1866 = vrot.lane.b32.xlu1 %v1602_v48, %s18000_s28  ;;  %1868 = vrot.lane.b32.xlu0 %v18505_v61, %s18000_s28  ;;  %v1634_v25 = vld [vmem:[#allocation2 + $0x50] sm:$0xff] }
 0xc19   :  { %v1639_v13 = vpop.permute.xlu0 %1638  ;;  %v1641_v55 = vpop.permute.xlu1 %1640 }
 0xc1a   :  { %v1644_v14 = vrot.slane %v1639_v13, 6  ;;  %v1645_v15 = vrot.slane %v1641_v55, 6 }
 0xc1c   :  { %v1647_v16 = vsel %vm428_vm5, %v1645_v15, %v1644_v14  ;;  %v1646_v18 = vsel %vm428_vm5, %v1644_v14, %v1645_v15 }
 0xc1d   :  { %v1648_v17 = vsel %vm428_vm5, 0.0, %v1647_v16  ;;  %v1849_v44 = vpop.permute.xlu0 %1848  ;;  %v1847_v45 = vpop.permute.xlu1 %1846 }
 0xc1e   :  { %15790 = vmatprep.mubr.msk.f32.mxu1 %vm496_vm6, %v1648_v17 }
 0xc1f   :  { %15791 = vmatmul.mubr.msk.f32.vlgmr.msra.gmra.mrb[22].mxu1 %vm496_vm6, %v1646_v18 }
 0xc20   :  { %16653 = vmatpush3.bf16.msk.msra.mxu1 %vm18122_vm4, %v18209_v50  ;;  %15797 = vmatprep.mubr.msk.f32.mxu1 %vm496_vm6, %v1639_v13 }
 0xc21   :  { %16656 = vmatprep.subr.msk.bf16.mxu1 %vm18122_vm4, %v18130_v30  ;;  %v1869_v59 = vpop.permute.xlu0 %1868  ;;  %v1867_v60 = vpop.permute.xlu1 %1866 }
 0xc27   :  { %15798 = vmatmul.mubr.msk.f32.vlgmr.msra.gmra.mrb[22].mxu1 %vm496_vm6, %v1641_v55 }
 0xc28   :  { %16659 = vmatpush3.bf16.msk.msra.mxu1 %vm18122_vm4, %v18130_v30 }
 0xc29   :  { %16662 = vmatprep.subr.msk.bf16.mxu1 %vm18122_vm4, %v18209_v50 }
 0xcfa   :  { %v15799_v26 = vpop.f32.mrb[22].mxu1 }
 0xcfb   :  { %v17305_v28 = vadd.f32 %v15799_v26, %v1635_v24  ;;  %v1809_v29 = vpop.f32.mrb[23].mxu1 }
 0xcfc   :  { %v17306_v31 = vadd.f32 %v1809_v29, %v1634_v25 }
 0xcfd   :  { %v14663_v32 = vmul.f32 -1.442695, %v17305_v28  ;;  %17642 = vtanh.f32 %v17305_v28 }
 0xcfe   :  { %v14662_v33 = vmul.f32 -1.442695, %v17306_v31  ;;  %17644 = vtanh.f32 %v17306_v31 }
 0xcff   :  { %17646 = vpow2.f32 %v14663_v32 }
 0xd00   :  { %17648 = vpow2.f32 %v14662_v33 }
 0xd07   :  { %v17643_v35 = vpop.eup %17642 }
 0xd08   :  { %v17645_v36 = vpop.eup %17644  ;;  %1838 = vrot.lane.b32.xlu0 %v17643_v35, %s17993_s17 }
 0xd09   :  { %v17647_v5 = vpop.eup %17646  ;;  %1836 = vrot.lane.b32.xlu1 %v17645_v36, %s17993_s17 }
 0xd0a   :  { %v17649_v38 = vpop.eup %17648  ;;  %v1827_v41 = vadd.f32 1.0, %v17647_v5 }
 0xd0b   :  { %v1826_v42 = vadd.f32 1.0, %v17649_v38 }
 0xd0c   :  { %17650 = vrcp.f32 %v1827_v41 }
 0xd0d   :  { %17652 = vrcp.f32 %v1826_v42 }
 0xd16   :  { %v17651_v47 = vpop.eup %17650 }
 0xd17   :  { %v17653_v48 = vpop.eup %17652  ;;  %v1853_v52 = vmul.f32 %v17651_v47, %v1849_v44  ;;  %v1873_v62 = vmul.f32 %v17651_v47, %v1869_v59 }
 0xd18   :  { %v1852_v57 = vmul.f32 %v17653_v48, %v1847_v45  ;;  %v1872_v63 = vmul.f32 %v17653_v48, %v1867_v60 }
 0xd19   :  { %1858 = vrot.lane.b32.xlu0 %v1853_v52, %s17995_s19 }
 0xd1a   :  { %1856 = vrot.lane.b32.xlu1 %v1852_v57, %s17995_s19 }
 0xd1d   :  { %1878 = vrot.lane.b32.xlu0 %v1873_v62, %s17994_s18 }
 0xd1e   :  { %1876 = vrot.lane.b32.xlu1 %v1872_v63, %s17994_s18 }
 0xd7a   :  { %v1839_v1 = vpop.permute.xlu0 %1838 }
 0xd7b   :  { %v1837_v4 = vpop.permute.xlu1 %1836  ;;  %v1843_v10 = vmul.f32 %v17651_v47, %v1839_v1 }
 0xd7c   :  { %v1842_v13 = vmul.f32 %v17653_v48, %v1837_v4 }
 0xd8b   :  { %v1859_v9 = vpop.permute.xlu0 %1858 }
 0xd8c   :  { %v1857_v11 = vpop.permute.xlu1 %1856  ;;  %v1863_v55 = vadd.f32 %v1859_v9, %v1843_v10 }
 0xd8d   :  { %v1862_v14 = vadd.f32 %v1857_v11, %v1842_v13 }
 0xd8f   :  { %v1879_v15 = vpop.permute.xlu0 %1878 }
 0xd90   :  { %v1883_v16 = vadd.f32 %v1879_v15, %v1863_v55  ;;  %v1877_v17 = vpop.permute.xlu1 %1876 }
 0xd91   :  { %v1882_v18 = vadd.f32 %v1877_v17, %v1862_v14 }
 0xd92   :  { %17654 = vtanh.f32 %v1883_v16  ;;  %v18574_v24 = vsel %vm1907_vm10, %v1883_v16, %v18505_v61 }
 0xd93   :  { %17656 = vtanh.f32 %v1882_v18  ;;  %v1930_v25 = vrot.slane %v1882_v18, 6  ;;  %v1931_v28 = vrot.slane %v18574_v24, 6 }
 0xd95   :  { %v1933_v61 = vsel %vm428_vm5, %v1931_v28, %v1930_v25  ;;  %v1932_v36 = vsel %vm428_vm5, %v1930_v25, %v1931_v28 }
 0xd96   :  { %v1934_v35 = vsel %vm428_vm5, 0.0, %v1933_v61 }
 0xd9c   :  { %v17655_v19 = vpop.eup %17654 }
 0xd9d   :  { %v17657_v20 = vpop.eup %17656  ;;  %1890 = vrot.lane.b32.xlu0 %v17655_v19, %s17997_s1 }
 0xd9e   :  { %1888 = vrot.lane.b32.xlu1 %v17657_v20, %s17997_s1 }
 0xe0f   :  { %v1891_v26 = vpop.permute.xlu0 %1890 }
 0xe10   :  { %v18577_v29 = vmul.f32 %v17651_v47, %v1891_v26  ;;  %v1889_v31 = vpop.permute.xlu1 %1888  ;;  %v15705_v47 = vpop.f32.mrb[12].mxu0 }
 0xe11   :  { %v18579_v32 = vmul.f32 %v17653_v48, %v1889_v31  ;;  %v18625_v48 = vld [vmem:[%s21265_s4] ss:$0 sm:$0xff]  ;;  %v301_v57 = vpop.f32.mrb[13].mxu0 }
 0xe12   :  { %v18583_v33 = vsel %vm1907_vm10, %v18577_v29, %v18513_v8  ;;  %v307_v52 = vadd.f32 %v18625_v48, %v15705_v47  ;;  %v302_v59 = vadd.f32 %v18625_v48, %v301_v57 }
 0xe13   :  { %1920 = vrot.lane.b32.xlu1 %v18583_v33, %s17999_s23  ;;  %1918 = vrot.lane.b32.xlu0 %v18579_v32, %s17999_s23 }
 0xe14   :  { %404 = vst.msk [vmem:[#allocation2 + $0x68] sm:$0xff] %vm390_vm1, %v307_v52  ;;  %403 = vst.msk [vmem:[#allocation2 + $0x60] sm:$0xff] %vm390_vm1, %v302_v59 }
 0xe17   :  { %2126 = vrot.lane.b32.xlu1 %v1934_v35, %s18001_s3  ;;  %2128 = vrot.lane.b32.xlu0 %v1932_v36, %s18001_s3 }
 0xe1b   :  { %2146 = vrot.lane.b32.xlu1 %v1882_v18, %s18000_s28  ;;  %2148 = vrot.lane.b32.xlu0 %v18574_v24, %s18000_s28  ;;  %v1915_v60 = vld [vmem:[#allocation2 + $0x68] sm:$0xff]  ;;  %v1914_v62 = vld [vmem:[#allocation2 + $0x60] sm:$0xff] }
 0xe85   :  { %v1919_v8 = vpop.permute.xlu0 %1918  ;;  %v1921_v5 = vpop.permute.xlu1 %1920 }
 0xe86   :  { %v1924_v38 = vrot.slane %v1919_v8, 6  ;;  %v1925_v41 = vrot.slane %v1921_v5, 6 }
 0xe88   :  { %v1927_v42 = vsel %vm428_vm5, %v1925_v41, %v1924_v38  ;;  %v1926_v45 = vsel %vm428_vm5, %v1924_v38, %v1925_v41 }
 0xe89   :  { %v1928_v44 = vsel %vm428_vm5, 0.0, %v1927_v42  ;;  %v2129_v18 = vpop.permute.xlu0 %2128  ;;  %v2127_v19 = vpop.permute.xlu1 %2126 }
 0xe8a   :  { %15804 = vmatprep.mubr.msk.f32.mxu1 %vm496_vm6, %v1928_v44 }
 0xe8b   :  { %15805 = vmatmul.mubr.msk.f32.vlgmr.msra.gmra.mrb[24].mxu1 %vm496_vm6, %v1926_v45 }
 0xe8c   :  { %16665 = vmatpush3.bf16.msk.msra.mxu1 %vm18122_vm4, %v18209_v50  ;;  %15811 = vmatprep.mubr.msk.f32.mxu1 %vm496_vm6, %v1919_v8 }
 0xe8d   :  { %16668 = vmatprep.subr.msk.bf16.mxu1 %vm18122_vm4, %v18130_v30  ;;  %v2149_v26 = vpop.permute.xlu0 %2148  ;;  %v2147_v28 = vpop.permute.xlu1 %2146 }
 0xe93   :  { %15812 = vmatmul.mubr.msk.f32.vlgmr.msra.gmra.mrb[24].mxu1 %vm496_vm6, %v1921_v5 }
 0xe94   :  { %16671 = vmatpush3.bf16.msk.msra.mxu1 %vm18122_vm4, %v18130_v30 }
 0xe95   :  { %16674 = vmatprep.subr.msk.bf16.mxu1 %vm18122_vm4, %v18209_v50 }
 0xf66   :  { %v15813_v63 = vpop.f32.mrb[24].mxu1 }
 0xf67   :  { %v17307_v1 = vadd.f32 %v15813_v63, %v1915_v60  ;;  %v2089_v4 = vpop.f32.mrb[25].mxu1  ;;  %v60_v63 = vld [vmem:[%s21261_s0 + $0x78] sm:$0xff] }
 0xf68   :  { %v17308_v9 = vadd.f32 %v2089_v4, %v1914_v62  ;;  %v59_v62 = vld [vmem:[%s21261_s0 + $0x70] sm:$0xff] }
 0xf69   :  { %v14671_v10 = vmul.f32 -1.442695, %v17307_v1  ;;  %17658 = vtanh.f32 %v17307_v1  ;;  %15706 = vmatprep.mubr.msk.f32.mxu0 %vm84_vm0, %v59_v62 }
 0xf6a   :  { %v14670_v11 = vmul.f32 -1.442695, %v17308_v9  ;;  %17660 = vtanh.f32 %v17308_v9  ;;  %15707 = vmatmul.mubr.msk.f32.gmra.mrb[14].mxu0 %vm84_vm0, %v60_v63  ;;  %vm18003_vm0 = vmmov 0  }
 0xf6b   :  { %17662 = vpow2.f32 %v14671_v10 }
 0xf6c   :  { %17664 = vpow2.f32 %v14670_v11 }
 0xf73   :  { %v17659_v13 = vpop.eup %17658 }
 0xf74   :  { %v17661_v55 = vpop.eup %17660  ;;  %2118 = vrot.lane.b32.xlu0 %v17659_v13, %s17993_s17 }
 0xf75   :  { %v17663_v14 = vpop.eup %17662  ;;  %2116 = vrot.lane.b32.xlu1 %v17661_v55, %s17993_s17 }
 0xf76   :  { %v17665_v15 = vpop.eup %17664  ;;  %v2107_v16 = vadd.f32 1.0, %v17663_v14 }
 0xf77   :  { %v2106_v17 = vadd.f32 1.0, %v17665_v15 }
 0xf78   :  { %17666 = vrcp.f32 %v2107_v16 }
 0xf79   :  { %17668 = vrcp.f32 %v2106_v17 }
 0xf82   :  { %v17667_v20 = vpop.eup %17666 }
 0xf83   :  { %v17669_v22 = vpop.eup %17668  ;;  %v2133_v23 = vmul.f32 %v17667_v20, %v2129_v18  ;;  %v2153_v31 = vmul.f32 %v17667_v20, %v2149_v26 }
 0xf84   :  { %v2132_v25 = vmul.f32 %v17669_v22, %v2127_v19  ;;  %v2152_v61 = vmul.f32 %v17669_v22, %v2147_v28 }
 0xf85   :  { %2138 = vrot.lane.b32.xlu0 %v2133_v23, %s17995_s19 }
 0xf86   :  { %2136 = vrot.lane.b32.xlu1 %v2132_v25, %s17995_s19 }
 0xf89   :  { %2158 = vrot.lane.b32.xlu0 %v2153_v31, %s17994_s18 }
 0xf8a   :  { %2156 = vrot.lane.b32.xlu1 %v2152_v61, %s17994_s18 }
 0xfe6   :  { %v2119_v35 = vpop.permute.xlu0 %2118 }
 0xfe7   :  { %v2117_v36 = vpop.permute.xlu1 %2116  ;;  %v2123_v5 = vmul.f32 %v17667_v20, %v2119_v35 }
 0xfe8   :  { %v2122_v41 = vmul.f32 %v17669_v22, %v2117_v36 }
 0xff7   :  { %v2139_v8 = vpop.permute.xlu0 %2138 }
 0xff8   :  { %v2137_v38 = vpop.permute.xlu1 %2136  ;;  %v2143_v42 = vadd.f32 %v2139_v8, %v2123_v5 }
 0xff9   :  { %v2142_v44 = vadd.f32 %v2137_v38, %v2122_v41 }
 0xffb   :  { %v2159_v45 = vpop.permute.xlu0 %2158 }
 0xffc   :  { %v2163_v47 = vadd.f32 %v2159_v45, %v2143_v42  ;;  %v2157_v52 = vpop.permute.xlu1 %2156 }
 0xffd   :  { %v2162_v57 = vadd.f32 %v2157_v52, %v2142_v44 }
 0xffe   :  { %17670 = vtanh.f32 %v2163_v47  ;;  %v2193_v1 = vsel %vm2187_vm11, %v2163_v47, %v18574_v24 }
 0xfff   :  { %17672 = vtanh.f32 %v2162_v57  ;;  %v2210_v9 = vrot.slane %v2162_v57, 6  ;;  %v2211_v10 = vrot.slane %v2193_v1, 6 }
0x1001   :  { %v2213_v15 = vsel %vm428_vm5, %v2211_v10, %v2210_v9  ;;  %v2212_v24 = vsel %vm428_vm5, %v2210_v9, %v2211_v10 }
0x1002   :  { %v2214_v16 = vsel %vm428_vm5, 0.0, %v2213_v15 }
0x1008   :  { %v17671_v59 = vpop.eup %17670 }
0x1009   :  { %v17673_v60 = vpop.eup %17672  ;;  %2170 = vrot.lane.b32.xlu0 %v17671_v59, %s17997_s1 }
0x100a   :  { %2168 = vrot.lane.b32.xlu1 %v17673_v60, %s17997_s1 }
0x103d   :  { %v15708_v25 = vpop.f32.mrb[14].mxu0 }
0x103e   :  { %v317_v26 = vadd.f32 %v18625_v48, %v15708_v25  ;;  %v311_v28 = vpop.f32.mrb[15].mxu0 }
0x103f   :  { %v312_v31 = vadd.f32 %v18625_v48, %v311_v28 }
0x1040   :  { %406 = vst.msk [vmem:[#allocation2 + $0x78] sm:$0xff] %vm390_vm1, %v317_v26 }
0x1041   :  { %405 = vst.msk [vmem:[#allocation2 + $0x70] sm:$0xff] %vm390_vm1, %v312_v31  ;;  %vm4133_vm1 = vcmp.ge.s32.totalorder %v18494_v58, 12 }
0x1047   :  { %v2195_v61 = vld [vmem:[#allocation2 + $0x78] sm:$0xff] }
0x1048   :  { %v2194_v35 = vld [vmem:[#allocation2 + $0x70] sm:$0xff] }
0x107b   :  { %v2171_v4 = vpop.permute.xlu0 %2170 }
0x107c   :  { %v18649_v11 = vmul.f32 %v17667_v20, %v2171_v4  ;;  %v2169_v13 = vpop.permute.xlu1 %2168 }
0x107d   :  { %v18651_v55 = vmul.f32 %v17669_v22, %v2169_v13 }
0x107e   :  { %v2191_v14 = vsel %vm2187_vm11, %v18649_v11, %v18583_v33 }
0x107f   :  { %2200 = vrot.lane.b32.xlu1 %v2191_v14, %s17999_s23  ;;  %2198 = vrot.lane.b32.xlu0 %v18651_v55, %s17999_s23 }
0x1083   :  { %2408 = vrot.lane.b32.xlu1 %v2212_v24, %s18001_s3  ;;  %2406 = vrot.lane.b32.xlu0 %v2214_v16, %s18001_s3 }
0x1087   :  { %2428 = vrot.lane.b32.xlu1 %v2193_v1, %s18000_s28  ;;  %2426 = vrot.lane.b32.xlu0 %v2162_v57, %s18000_s28 }
0x10f1   :  { %v2199_v33 = vpop.permute.xlu0 %2198  ;;  %v2201_v17 = vpop.permute.xlu1 %2200 }
0x10f2   :  { %v2204_v18 = vrot.slane %v2199_v33, 6  ;;  %v2205_v19 = vrot.slane %v2201_v17, 6 }
0x10f4   :  { %v2207_v20 = vsel %vm428_vm5, %v2205_v19, %v2204_v18  ;;  %v2206_v23 = vsel %vm428_vm5, %v2204_v18, %v2205_v19 }
0x10f5   :  { %v2208_v22 = vsel %vm428_vm5, 0.0, %v2207_v20  ;;  %v2409_v59 = vpop.permute.xlu1 %2408  ;;  %v2407_v60 = vpop.permute.xlu0 %2406 }
0x10f6   :  { %15818 = vmatprep.mubr.msk.f32.mxu1 %vm496_vm6, %v2208_v22 }
0x10f7   :  { %15819 = vmatmul.mubr.msk.f32.vlgmr.msra.gmra.mrb[26].mxu1 %vm496_vm6, %v2206_v23 }
0x10f8   :  { %16677 = vmatpush3.bf16.msk.msra.mxu1 %vm18122_vm4, %v18209_v50  ;;  %15825 = vmatprep.mubr.msk.f32.mxu1 %vm496_vm6, %v2199_v33 }
0x10f9   :  { %16680 = vmatprep.subr.msk.bf16.mxu1 %vm18122_vm4, %v18130_v30  ;;  %v2429_v9 = vpop.permute.xlu1 %2428  ;;  %v2427_v10 = vpop.permute.xlu0 %2426 }
0x10ff   :  { %15826 = vmatmul.mubr.msk.f32.vlgmr.msra.gmra.mrb[26].mxu1 %vm496_vm6, %v2201_v17 }
0x1100   :  { %16683 = vmatpush3.bf16.msk.msra.mxu1 %vm18122_vm4, %v18130_v30 }
0x1101   :  { %16686 = vmatprep.subr.msk.bf16.mxu1 %vm18122_vm4, %v18209_v50 }
0x11d2   :  { %v15827_v36 = vpop.f32.mrb[26].mxu1 }
0x11d3   :  { %v17309_v8 = vadd.f32 %v15827_v36, %v2195_v61  ;;  %v2369_v5 = vpop.f32.mrb[27].mxu1 }
0x11d4   :  { %v17310_v38 = vadd.f32 %v2369_v5, %v2194_v35 }
0x11d5   :  { %v14679_v41 = vmul.f32 -1.442695, %v17309_v8  ;;  %17674 = vtanh.f32 %v17309_v8 }
0x11d6   :  { %v14678_v42 = vmul.f32 -1.442695, %v17310_v38  ;;  %17676 = vtanh.f32 %v17310_v38 }
0x11d7   :  { %17678 = vpow2.f32 %v14679_v41 }
0x11d8   :  { %17680 = vpow2.f32 %v14678_v42 }
0x11df   :  { %v17675_v44 = vpop.eup %17674 }
0x11e0   :  { %v17677_v45 = vpop.eup %17676  ;;  %2398 = vrot.lane.b32.xlu1 %v17675_v44, %s17993_s17 }
0x11e1   :  { %v17679_v48 = vpop.eup %17678  ;;  %2396 = vrot.lane.b32.xlu0 %v17677_v45, %s17993_s17 }
0x11e2   :  { %v17681_v47 = vpop.eup %17680  ;;  %v2387_v52 = vadd.f32 1.0, %v17679_v48 }
0x11e3   :  { %v2386_v57 = vadd.f32 1.0, %v17681_v47 }
0x11e4   :  { %17682 = vrcp.f32 %v2387_v52 }
0x11e5   :  { %17684 = vrcp.f32 %v2386_v57 }
0x11ee   :  { %v17683_v62 = vpop.eup %17682 }
0x11ef   :  { %v17685_v63 = vpop.eup %17684  ;;  %v2413_v1 = vmul.f32 %v17683_v62, %v2409_v59  ;;  %v2433_v13 = vmul.f32 %v17683_v62, %v2429_v9 }
0x11f0   :  { %v2412_v4 = vmul.f32 %v17685_v63, %v2407_v60  ;;  %v2432_v14 = vmul.f32 %v17685_v63, %v2427_v10 }
0x11f1   :  { %2418 = vrot.lane.b32.xlu1 %v2413_v1, %s17995_s19 }
0x11f2   :  { %2416 = vrot.lane.b32.xlu0 %v2412_v4, %s17995_s19  ;;  %v2466_v4 = vld [vmem:[#allocation2 + $0x80] sm:$0xff] }
0x11f5   :  { %2438 = vrot.lane.b32.xlu1 %v2433_v13, %s17994_s18 }
0x11f6   :  { %2436 = vrot.lane.b32.xlu0 %v2432_v14, %s17994_s18 }
0x1252   :  { %v2399_v15 = vpop.permute.xlu1 %2398 }
0x1253   :  { %v2397_v24 = vpop.permute.xlu0 %2396  ;;  %v2403_v33 = vmul.f32 %v17683_v62, %v2399_v15 }
0x1254   :  { %v2402_v18 = vmul.f32 %v17685_v63, %v2397_v24 }
0x1263   :  { %v2419_v16 = vpop.permute.xlu1 %2418 }
0x1264   :  { %v2417_v17 = vpop.permute.xlu0 %2416  ;;  %v2423_v19 = vadd.f32 %v2419_v16, %v2403_v33 }
0x1265   :  { %v2422_v20 = vadd.f32 %v2417_v17, %v2402_v18 }
0x1267   :  { %v2439_v22 = vpop.permute.xlu1 %2438 }
0x1268   :  { %v2443_v23 = vadd.f32 %v2439_v22, %v2423_v19  ;;  %v2437_v25 = vpop.permute.xlu0 %2436 }
0x1269   :  { %v18700_v26 = vadd.f32 %v2437_v25, %v2422_v20 }
0x126a   :  { %17686 = vtanh.f32 %v2443_v23  ;;  %v2475_v36 = vrot.slane %v2443_v23, 6 }
0x126b   :  { %17688 = vtanh.f32 %v18700_v26  ;;  %v2474_v35 = vrot.slane %v18700_v26, 6 }
0x126d   :  { %v2477_v41 = vsel %vm428_vm5, %v2475_v36, %v2474_v35  ;;  %v2476_v42 = vsel %vm428_vm5, %v2474_v35, %v2475_v36 }
0x126e   :  { %v2478_v44 = vsel %vm428_vm5, 0.0, %v2477_v41 }
0x1274   :  { %v17687_v28 = vpop.eup %17686 }
0x1275   :  { %v17689_v31 = vpop.eup %17688  ;;  %2450 = vrot.lane.b32.xlu1 %v17687_v28, %s17997_s1 }
0x1276   :  { %2448 = vrot.lane.b32.xlu0 %v17689_v31, %s17997_s1 }
0x12e7   :  { %v2451_v61 = vpop.permute.xlu1 %2450 }
0x12e8   :  { %v2455_v8 = vmul.f32 %v17683_v62, %v2451_v61  ;;  %v2449_v5 = vpop.permute.xlu0 %2448  ;;  %v2467_v62 = vld [vmem:[#allocation2 + $0x88] sm:$0xff] }
0x12e9   :  { %v18706_v38 = vmul.f32 %v17685_v63, %v2449_v5 }
0x12ea   :  { %2460 = vrot.lane.b32.xlu1 %v2455_v8, %s17999_s23 }
0x12eb   :  { %2458 = vrot.lane.b32.xlu0 %v18706_v38, %s17999_s23 }
0x12ee   :  { %2672 = vrot.lane.b32.xlu1 %v2476_v42, %s18001_s3 }
0x12ef   :  { %2670 = vrot.lane.b32.xlu0 %v2478_v44, %s18001_s3 }
0x12f2   :  { %2692 = vrot.lane.b32.xlu1 %v2443_v23, %s18000_s28 }
0x12f3   :  { %2690 = vrot.lane.b32.xlu0 %v18700_v26, %s18000_s28 }
0x135c   :  { %v2461_v45 = vpop.permute.xlu1 %2460 }
0x135d   :  { %2465 = vst.msk [vmem:[#allocation3 + $0x78] sm:$0xff] %vm496_vm6, %v2461_v45  ;;  %v2469_v48 = vrot.slane %v2461_v45, 6  ;;  %v2459_v47 = vpop.permute.xlu0 %2458 }
0x135e   :  { %2464 = vst.msk [vmem:[#allocation3 + $0x70] sm:$0xff] %vm496_vm6, %v2459_v47  ;;  %v2468_v52 = vrot.slane %v2459_v47, 6 }
0x1360   :  { %v2471_v57 = vsel %vm428_vm5, %v2469_v48, %v2468_v52  ;;  %v2470_v60 = vsel %vm428_vm5, %v2468_v52, %v2469_v48  ;;  %v2673_v19 = vpop.permute.xlu1 %2672 }
0x1361   :  { %v2472_v59 = vsel %vm428_vm5, 0.0, %v2471_v57  ;;  %v2671_v20 = vpop.permute.xlu0 %2670 }
0x1362   :  { %15832 = vmatprep.mubr.msk.f32.mxu1 %vm496_vm6, %v2472_v59 }
0x1363   :  { %15833 = vmatmul.mubr.msk.f32.vlgmr.msra.gmra.mrb[28].mxu1 %vm496_vm6, %v2470_v60 }
0x1364   :  { %16689 = vmatpush3.bf16.msk.msra.mxu1 %vm18122_vm4, %v18209_v50  ;;  %15839 = vmatprep.mubr.msk.f32.mxu1 %vm496_vm6, %v2459_v47  ;;  %v2693_v31 = vpop.permute.xlu1 %2692 }
0x1365   :  { %16692 = vmatprep.subr.msk.bf16.mxu1 %vm18122_vm4, %v18130_v30  ;;  %v2691_v61 = vpop.permute.xlu0 %2690 }
0x136b   :  { %15840 = vmatmul.mubr.msk.f32.vlgmr.msra.gmra.mrb[28].mxu1 %vm496_vm6, %v2461_v45 }
0x136c   :  { %16695 = vmatpush3.bf16.msk.msra.mxu1 %vm18122_vm4, %v18130_v30 }
0x136d   :  { %16704 = vmatprep.subr.msk.bf16.mxu1 %vm18122_vm4, %v18130_v30 }
0x143e   :  { %v15841_v63 = vpop.f32.mrb[28].mxu1 }
0x143f   :  { %v17311_v1 = vadd.f32 %v15841_v63, %v2467_v62  ;;  %v2633_v9 = vpop.f32.mrb[29].mxu1 }
0x1440   :  { %v17312_v10 = vadd.f32 %v2633_v9, %v2466_v4 }
0x1441   :  { %v14687_v13 = vmul.f32 -1.442695, %v17311_v1  ;;  %17690 = vtanh.f32 %v17311_v1 }
0x1442   :  { %v14686_v14 = vmul.f32 -1.442695, %v17312_v10  ;;  %17692 = vtanh.f32 %v17312_v10 }
0x1443   :  { %17694 = vpow2.f32 %v14687_v13 }
0x1444   :  { %17696 = vpow2.f32 %v14686_v14 }
0x144b   :  { %v17691_v15 = vpop.eup %17690 }
0x144c   :  { %v17693_v24 = vpop.eup %17692  ;;  %2662 = vrot.lane.b32.xlu1 %v17691_v15, %s17993_s17 }
0x144d   :  { %v17695_v16 = vpop.eup %17694  ;;  %2660 = vrot.lane.b32.xlu0 %v17693_v24, %s17993_s17 }
0x144e   :  { %v17697_v33 = vpop.eup %17696  ;;  %v2651_v17 = vadd.f32 1.0, %v17695_v16 }
0x144f   :  { %v2650_v18 = vadd.f32 1.0, %v17697_v33 }
0x1450   :  { %17698 = vrcp.f32 %v2651_v17 }
0x1451   :  { %17700 = vrcp.f32 %v2650_v18 }
0x145a   :  { %v17699_v22 = vpop.eup %17698 }
0x145b   :  { %v17701_v23 = vpop.eup %17700  ;;  %v2677_v25 = vmul.f32 %v17699_v22, %v2673_v19  ;;  %v2697_v35 = vmul.f32 %v17699_v22, %v2693_v31  ;;  %v2741_v31 = vld [vmem:[#allocation2 + $0x98] sm:$0xff] }
0x145c   :  { %v2676_v28 = vmul.f32 %v17701_v23, %v2671_v20  ;;  %v2696_v36 = vmul.f32 %v17701_v23, %v2691_v61 }
0x145d   :  { %2682 = vrot.lane.b32.xlu1 %v2677_v25, %s17995_s19 }
0x145e   :  { %2680 = vrot.lane.b32.xlu0 %v2676_v28, %s17995_s19 }
0x1461   :  { %2702 = vrot.lane.b32.xlu1 %v2697_v35, %s17994_s18 }
0x1462   :  { %2700 = vrot.lane.b32.xlu0 %v2696_v36, %s17994_s18  ;;  %v2740_v36 = vld [vmem:[#allocation2 + $0x90] sm:$0xff] }
0x14be   :  { %v2663_v8 = vpop.permute.xlu1 %2662 }
0x14bf   :  { %v2661_v5 = vpop.permute.xlu0 %2660  ;;  %v2667_v42 = vmul.f32 %v17699_v22, %v2663_v8 }
0x14c0   :  { %v2666_v45 = vmul.f32 %v17701_v23, %v2661_v5 }
0x14cf   :  { %v2683_v41 = vpop.permute.xlu1 %2682 }
0x14d0   :  { %v2681_v44 = vpop.permute.xlu0 %2680  ;;  %v2687_v48 = vadd.f32 %v2683_v41, %v2667_v42 }
0x14d1   :  { %v2686_v47 = vadd.f32 %v2681_v44, %v2666_v45 }
0x14d3   :  { %v2703_v52 = vpop.permute.xlu1 %2702 }
0x14d4   :  { %v2707_v57 = vadd.f32 %v2703_v52, %v2687_v48  ;;  %v2701_v59 = vpop.permute.xlu0 %2700 }
0x14d5   :  { %v2706_v60 = vadd.f32 %v2701_v59, %v2686_v47 }
0x14d6   :  { %17702 = vtanh.f32 %v2707_v57  ;;  %v2757_v15 = vrot.slane %v2707_v57, 6 }
0x14d7   :  { %17704 = vtanh.f32 %v2706_v60  ;;  %v18756_v1 = vsel %vm2730_vm12, %v2706_v60, %v18700_v26 }
0x14d8   :  { %v2756_v13 = vrot.slane %v18756_v1, 6 }
0x14da   :  { %v2759_v26 = vsel %vm428_vm5, %v2757_v15, %v2756_v13  ;;  %v2758_v16 = vsel %vm428_vm5, %v2756_v13, %v2757_v15 }
0x14db   :  { %v2760_v33 = vsel %vm428_vm5, 0.0, %v2759_v26 }
0x14e0   :  { %v17703_v62 = vpop.eup %17702 }
0x14e1   :  { %v17705_v63 = vpop.eup %17704  ;;  %2714 = vrot.lane.b32.xlu1 %v17703_v62, %s17997_s1 }
0x14e2   :  { %2712 = vrot.lane.b32.xlu0 %v17705_v63, %s17997_s1 }
0x1553   :  { %v2715_v4 = vpop.permute.xlu1 %2714 }
0x1554   :  { %v18758_v9 = vmul.f32 %v17699_v22, %v2715_v4  ;;  %v2713_v10 = vpop.permute.xlu0 %2712 }
0x1555   :  { %v18761_v14 = vmul.f32 %v17701_v23, %v2713_v10 }
0x1556   :  { %2746 = vrot.lane.b32.xlu1 %v18758_v9, %s17999_s23 }
0x1557   :  { %v18767_v24 = vsel %vm2730_vm12, %v18761_v14, %v18706_v38 }
0x1558   :  { %2744 = vrot.lane.b32.xlu0 %v18767_v24, %s17999_s23 }
0x155a   :  { %2954 = vrot.lane.b32.xlu1 %v2758_v16, %s18001_s3 }
0x155c   :  { %2952 = vrot.lane.b32.xlu0 %v2760_v33, %s18001_s3 }
0x155e   :  { %2974 = vrot.lane.b32.xlu1 %v2707_v57, %s18000_s28 }
0x1560   :  { %2972 = vrot.lane.b32.xlu0 %v18756_v1, %s18000_s28 }
0x15c8   :  { %v2747_v38 = vpop.permute.xlu1 %2746 }
0x15c9   :  { %v2751_v18 = vrot.slane %v2747_v38, 6 }
0x15ca   :  { %v2745_v17 = vpop.permute.xlu0 %2744 }
0x15cb   :  { %v2750_v19 = vrot.slane %v2745_v17, 6  ;;  %15853 = vmatprep.mubr.msk.f32.mxu0 %vm496_vm6, %v2745_v17 }
0x15cc   :  { %15854 = vmatmul.mubr.msk.f32.vlgmr.msra.gmra.mrb[16].mxu0 %vm496_vm6, %v2747_v38  ;;  %v2955_v62 = vpop.permute.xlu1 %2954 }
0x15cd   :  { %v2753_v20 = vsel %vm428_vm5, %v2751_v18, %v2750_v19  ;;  %16719 = vmatpush3.bf16.msk.msra.mxu0 %vm18122_vm4, %v18130_v30  ;;  %v2752_v23 = vsel %vm428_vm5, %v2750_v19, %v2751_v18 }
0x15ce   :  { %v2754_v22 = vsel %vm428_vm5, 0.0, %v2753_v20  ;;  %16722 = vmatprep.subr.msk.bf16.mxu0 %vm18122_vm4, %v18209_v50  ;;  %v2953_v63 = vpop.permute.xlu0 %2952 }
0x15cf   :  { %15846 = vmatprep.mubr.msk.f32.mxu1 %vm496_vm6, %v2754_v22 }
0x15d0   :  { %15847 = vmatmul.mubr.msk.f32.vlgmr.msra.gmra.mrb[30].mxu1 %vm496_vm6, %v2752_v23  ;;  %v2975_v26 = vpop.permute.xlu1 %2974 }
0x15d1   :  { %16707 = vmatpush3.bf16.msk.msra.mxu1 %vm18122_vm4, %v18130_v30 }
0x15d2   :  { %16710 = vmatprep.subr.msk.bf16.mxu1 %vm18122_vm4, %v18209_v50  ;;  %v2973_v16 = vpop.permute.xlu0 %2972 }
0x169f   :  { %v15855_v25 = vpop.f32.mrb[16].mxu0 }
0x16a0   :  { %v2915_v28 = vpop.f32.mrb[17].mxu0 }
0x16a3   :  { %v15848_v61 = vpop.f32.mrb[30].mxu1 }
0x16a4   :  { %v2844_v35 = vadd.f32 %v15848_v61, %v2741_v31  ;;  %v2834_v8 = vpop.f32.mrb[31].mxu1 }
0x16a5   :  { %v2843_v5 = vadd.f32 %v2834_v8, %v2740_v36 }
0x16a6   :  { %v2925_v41 = vadd.f32 %v15855_v25, %v2844_v35 }
0x16a7   :  { %v2924_v42 = vadd.f32 %v2915_v28, %v2843_v5 }
0x16a8   :  { %v14695_v44 = vmul.f32 -1.442695, %v2925_v41  ;;  %17706 = vtanh.f32 %v2925_v41 }
0x16a9   :  { %v14694_v45 = vmul.f32 -1.442695, %v2924_v42  ;;  %17708 = vtanh.f32 %v2924_v42 }
0x16aa   :  { %17710 = vpow2.f32 %v14695_v44 }
0x16ab   :  { %17712 = vpow2.f32 %v14694_v45 }
0x16b2   :  { %v17707_v48 = vpop.eup %17706 }
0x16b3   :  { %v17709_v47 = vpop.eup %17708  ;;  %2944 = vrot.lane.b32.xlu1 %v17707_v48, %s17993_s17 }
0x16b4   :  { %v17711_v52 = vpop.eup %17710  ;;  %2942 = vrot.lane.b32.xlu0 %v17709_v47, %s17993_s17 }
0x16b5   :  { %v17713_v57 = vpop.eup %17712  ;;  %v2933_v59 = vadd.f32 1.0, %v17711_v52 }
0x16b6   :  { %v2932_v60 = vadd.f32 1.0, %v17713_v57 }
0x16b7   :  { %17714 = vrcp.f32 %v2933_v59 }
0x16b8   :  { %17716 = vrcp.f32 %v2932_v60 }
0x16c1   :  { %v17715_v4 = vpop.eup %17714 }
0x16c2   :  { %v17717_v10 = vpop.eup %17716  ;;  %v2959_v13 = vmul.f32 %v17715_v4, %v2955_v62  ;;  %v2979_v33 = vmul.f32 %v17715_v4, %v2975_v26  ;;  %v3021_v26 = vld [vmem:[#allocation2 + $0xa8] sm:$0xff] }
0x16c3   :  { %v2958_v15 = vmul.f32 %v17717_v10, %v2953_v63  ;;  %v2978_v38 = vmul.f32 %v17717_v10, %v2973_v16 }
0x16c4   :  { %2964 = vrot.lane.b32.xlu1 %v2959_v13, %s17995_s19 }
0x16c5   :  { %2962 = vrot.lane.b32.xlu0 %v2958_v15, %s17995_s19 }
0x16c8   :  { %2984 = vrot.lane.b32.xlu1 %v2979_v33, %s17994_s18 }
0x16c9   :  { %2982 = vrot.lane.b32.xlu0 %v2978_v38, %s17994_s18  ;;  %v3020_v38 = vld [vmem:[#allocation2 + $0xa0] sm:$0xff] }
0x1725   :  { %v2945_v17 = vpop.permute.xlu1 %2944 }
0x1726   :  { %v2943_v18 = vpop.permute.xlu0 %2942  ;;  %v2949_v20 = vmul.f32 %v17715_v4, %v2945_v17 }
0x1727   :  { %v2948_v23 = vmul.f32 %v17717_v10, %v2943_v18 }
0x1736   :  { %v2965_v19 = vpop.permute.xlu1 %2964 }
0x1737   :  { %v2963_v22 = vpop.permute.xlu0 %2962  ;;  %v2969_v25 = vadd.f32 %v2965_v19, %v2949_v20 }
0x1738   :  { %v2968_v28 = vadd.f32 %v2963_v22, %v2948_v23 }
0x173a   :  { %v2985_v31 = vpop.permute.xlu1 %2984 }
0x173b   :  { %v2989_v61 = vadd.f32 %v2985_v31, %v2969_v25  ;;  %v2983_v35 = vpop.permute.xlu0 %2982 }
0x173c   :  { %v2988_v36 = vadd.f32 %v2983_v35, %v2968_v28 }
0x173d   :  { %17718 = vtanh.f32 %v2989_v61  ;;  %v3037_v52 = vrot.slane %v2989_v61, 6 }
0x173e   :  { %17720 = vtanh.f32 %v2988_v36  ;;  %v18814_v41 = vsel %vm3012_vm13, %v2988_v36, %v18756_v1 }
0x173f   :  { %v3036_v48 = vrot.slane %v18814_v41, 6 }
0x1741   :  { %v3039_v1 = vsel %vm428_vm5, %v3037_v52, %v3036_v48  ;;  %v3038_v59 = vsel %vm428_vm5, %v3036_v48, %v3037_v52 }
0x1742   :  { %v3040_v60 = vsel %vm428_vm5, 0.0, %v3039_v1 }
0x1747   :  { %v17719_v8 = vpop.eup %17718 }
0x1748   :  { %v17721_v5 = vpop.eup %17720  ;;  %2996 = vrot.lane.b32.xlu1 %v17719_v8, %s17997_s1 }
0x1749   :  { %2994 = vrot.lane.b32.xlu0 %v17721_v5, %s17997_s1 }
0x17ba   :  { %v2997_v42 = vpop.permute.xlu1 %2996 }
0x17bb   :  { %v18816_v44 = vmul.f32 %v17715_v4, %v2997_v42  ;;  %v2995_v45 = vpop.permute.xlu0 %2994 }
0x17bc   :  { %v18819_v47 = vmul.f32 %v17717_v10, %v2995_v45 }
0x17bd   :  { %3026 = vrot.lane.b32.xlu1 %v18816_v44, %s17999_s23 }
0x17be   :  { %v18825_v57 = vsel %vm3012_vm13, %v18819_v47, %v18767_v24 }
0x17bf   :  { %3024 = vrot.lane.b32.xlu0 %v18825_v57, %s17999_s23 }
0x17c1   :  { %3234 = vrot.lane.b32.xlu1 %v3038_v59, %s18001_s3 }
0x17c3   :  { %3232 = vrot.lane.b32.xlu0 %v3040_v60, %s18001_s3 }
0x17c5   :  { %3254 = vrot.lane.b32.xlu1 %v2989_v61, %s18000_s28 }
0x17c7   :  { %3252 = vrot.lane.b32.xlu0 %v18814_v41, %s18000_s28 }
0x182f   :  { %v3027_v24 = vpop.permute.xlu1 %3026 }
0x1830   :  { %v3031_v63 = vrot.slane %v3027_v24, 6 }
0x1831   :  { %v3025_v62 = vpop.permute.xlu0 %3024 }
0x1832   :  { %v3030_v4 = vrot.slane %v3025_v62, 6 }
0x1833   :  { %v3235_v35 = vpop.permute.xlu1 %3234 }
0x1834   :  { %v3033_v10 = vsel %vm428_vm5, %v3031_v63, %v3030_v4  ;;  %v3032_v15 = vsel %vm428_vm5, %v3030_v4, %v3031_v63 }
0x1835   :  { %v3034_v13 = vsel %vm428_vm5, 0.0, %v3033_v10  ;;  %v3233_v36 = vpop.permute.xlu0 %3232 }
0x1836   :  { %15860 = vmatprep.mubr.msk.f32.mxu1 %vm496_vm6, %v3034_v13 }
0x1837   :  { %15861 = vmatmul.mubr.msk.f32.vlgmr.msra.gmra.mrb[32].mxu1 %vm496_vm6, %v3032_v15  ;;  %v3255_v48 = vpop.permute.xlu1 %3254 }
0x1838   :  { %16713 = vmatpush3.bf16.msk.msra.mxu1 %vm18122_vm4, %v18209_v50  ;;  %15867 = vmatprep.mubr.msk.f32.mxu1 %vm496_vm6, %v3025_v62 }
0x1839   :  { %16728 = vmatprep.subr.msk.bf16.mxu1 %vm18122_vm4, %v18130_v30  ;;  %v3253_v52 = vpop.permute.xlu0 %3252 }
0x183f   :  { %15868 = vmatmul.mubr.msk.f32.vlgmr.msra.gmra.mrb[32].mxu1 %vm496_vm6, %v3027_v24 }
0x1840   :  { %16731 = vmatpush3.bf16.msk.msra.mxu1 %vm18122_vm4, %v18130_v30 }
0x1841   :  { %16734 = vmatprep.subr.msk.bf16.mxu1 %vm18122_vm4, %v18209_v50 }
0x1912   :  { %v15869_v16 = vpop.f32.mrb[32].mxu1 }
0x1913   :  { %v17317_v33 = vadd.f32 %v15869_v16, %v3021_v26  ;;  %v3195_v17 = vpop.f32.mrb[33].mxu1 }
0x1914   :  { %v17318_v18 = vadd.f32 %v3195_v17, %v3020_v38 }
0x1915   :  { %v14703_v19 = vmul.f32 -1.442695, %v17317_v33  ;;  %17722 = vtanh.f32 %v17317_v33 }
0x1916   :  { %v14702_v20 = vmul.f32 -1.442695, %v17318_v18  ;;  %17724 = vtanh.f32 %v17318_v18 }
0x1917   :  { %17726 = vpow2.f32 %v14703_v19 }
0x1918   :  { %17728 = vpow2.f32 %v14702_v20 }
0x191f   :  { %v17723_v22 = vpop.eup %17722 }
0x1920   :  { %v17725_v23 = vpop.eup %17724  ;;  %3224 = vrot.lane.b32.xlu1 %v17723_v22, %s17993_s17 }
0x1921   :  { %v17727_v25 = vpop.eup %17726  ;;  %3222 = vrot.lane.b32.xlu0 %v17725_v23, %s17993_s17 }
0x1922   :  { %v17729_v28 = vpop.eup %17728  ;;  %v3213_v31 = vadd.f32 1.0, %v17727_v25 }
0x1923   :  { %v3212_v61 = vadd.f32 1.0, %v17729_v28 }
0x1924   :  { %17730 = vrcp.f32 %v3213_v31 }
0x1925   :  { %17732 = vrcp.f32 %v3212_v61 }
0x192e   :  { %v17731_v8 = vpop.eup %17730 }
0x192f   :  { %v17733_v5 = vpop.eup %17732  ;;  %v3239_v42 = vmul.f32 %v17731_v8, %v3235_v35  ;;  %v3259_v1 = vmul.f32 %v17731_v8, %v3255_v48  ;;  %v3301_v48 = vld [vmem:[#allocation2 + $0xb8] sm:$0xff] }
0x1930   :  { %v3238_v45 = vmul.f32 %v17733_v5, %v3233_v36  ;;  %v3258_v59 = vmul.f32 %v17733_v5, %v3253_v52 }
0x1931   :  { %3244 = vrot.lane.b32.xlu1 %v3239_v42, %s17995_s19 }
0x1932   :  { %3242 = vrot.lane.b32.xlu0 %v3238_v45, %s17995_s19 }
0x1935   :  { %3264 = vrot.lane.b32.xlu1 %v3259_v1, %s17994_s18 }
0x1936   :  { %3262 = vrot.lane.b32.xlu0 %v3258_v59, %s17994_s18 }
0x1992   :  { %v3225_v60 = vpop.permute.xlu1 %3224 }
0x1993   :  { %v3223_v24 = vpop.permute.xlu0 %3222  ;;  %v3229_v63 = vmul.f32 %v17731_v8, %v3225_v60 }
0x1994   :  { %v3228_v10 = vmul.f32 %v17733_v5, %v3223_v24 }
0x19a3   :  { %v3245_v62 = vpop.permute.xlu1 %3244 }
0x19a4   :  { %v3243_v4 = vpop.permute.xlu0 %3242  ;;  %v3249_v13 = vadd.f32 %v3245_v62, %v3229_v63 }
0x19a5   :  { %v3248_v15 = vadd.f32 %v3243_v4, %v3228_v10 }
0x19a7   :  { %v3265_v26 = vpop.permute.xlu1 %3264 }
0x19a8   :  { %v18868_v16 = vadd.f32 %v3265_v26, %v3249_v13  ;;  %v3263_v33 = vpop.permute.xlu0 %3262 }
0x19a9   :  { %v3268_v38 = vadd.f32 %v3263_v33, %v3248_v15 }
0x19aa   :  { %17734 = vtanh.f32 %v18868_v16  ;;  %v21276_v61 = vrot.slane %v18868_v16, 6 }
0x19ab   :  { %17736 = vtanh.f32 %v3268_v38  ;;  %v18877_v23 = vsel %vm3292_vm14, %v3268_v38, %v18814_v41 }
0x19ac   :  { %v18888_v31 = vrot.slane %v18877_v23, 6 }
0x19ae   :  { %v3318_v41 = vsel %vm428_vm5, %v18888_v31, %v21276_v61 }
0x19b4   :  { %v17735_v17 = vpop.eup %17734 }
0x19b5   :  { %v17737_v18 = vpop.eup %17736  ;;  %3276 = vrot.lane.b32.xlu1 %v17735_v17, %s17997_s1 }
0x19b6   :  { %3274 = vrot.lane.b32.xlu0 %v17737_v18, %s17997_s1 }
0x1a27   :  { %v3277_v19 = vpop.permute.xlu1 %3276 }
0x1a28   :  { %v18874_v20 = vmul.f32 %v17731_v8, %v3277_v19  ;;  %v3275_v22 = vpop.permute.xlu0 %3274 }
0x1a29   :  { %v18879_v25 = vmul.f32 %v17733_v5, %v3275_v22 }
0x1a2a   :  { %3306 = vrot.lane.b32.xlu1 %v18874_v20, %s17999_s23 }
0x1a2b   :  { %v18885_v28 = vsel %vm3292_vm14, %v18879_v25, %v18825_v57 }
0x1a2c   :  { %3304 = vrot.lane.b32.xlu0 %v18885_v28, %s17999_s23 }
0x1a2e   :  { %3534 = vrot.lane.b32.xlu1 %v18868_v16, %s18000_s28 }
0x1a30   :  { %3514 = vrot.lane.b32.xlu0 %v3318_v41, %s18001_s3 }
0x1a9c   :  { %v3307_v57 = vpop.permute.xlu1 %3306 }
0x1a9d   :  { %v3311_v36 = vrot.slane %v3307_v57, 6 }
0x1a9e   :  { %v3305_v35 = vpop.permute.xlu0 %3304 }
0x1a9f   :  { %v3310_v8 = vrot.slane %v3305_v35, 6 }
0x1aa0   :  { %v3535_v10 = vpop.permute.xlu1 %3534 }
0x1aa1   :  { %v3313_v5 = vsel %vm428_vm5, %v3311_v36, %v3310_v8  ;;  %v3312_v45 = vsel %vm428_vm5, %v3310_v8, %v3311_v36 }
0x1aa2   :  { %v3314_v42 = vsel %vm428_vm5, 0.0, %v3313_v5  ;;  %v3515_v13 = vpop.permute.xlu0 %3514 }
0x1aa3   :  { %15874 = vmatprep.mubr.msk.f32.mxu0 %vm496_vm6, %v3314_v42 }
0x1aa4   :  { %15875 = vmatmul.mubr.msk.f32.vlgmr.msra.gmra.mrb[18].mxu0 %vm496_vm6, %v3312_v45 }
0x1aa5   :  { %16725 = vmatpush3.bf16.msk.msra.mxu0 %vm18122_vm4, %v18209_v50  ;;  %15881 = vmatprep.mubr.msk.f32.mxu0 %vm496_vm6, %v3305_v35 }
0x1aa6   :  { %16740 = vmatprep.subr.msk.bf16.mxu0 %vm18122_vm4, %v18130_v30 }
0x1aac   :  { %15882 = vmatmul.mubr.msk.f32.vlgmr.msra.gmra.mrb[18].mxu0 %vm496_vm6, %v3307_v57 }
0x1aad   :  { %16743 = vmatpush3.bf16.msk.msra.mxu0 %vm18122_vm4, %v18130_v30 }
0x1aae   :  { %16746 = vmatprep.subr.msk.bf16.mxu0 %vm18122_vm4, %v18209_v50 }
0x1b7f   :  { %v15883_v52 = vpop.f32.mrb[18].mxu0 }
0x1b80   :  { %v17319_v1 = vadd.f32 %v15883_v52, %v3301_v48  ;;  %v18923_v59 = vpop.f32.mrb[19].mxu0 }
0x1b82   :  { %v14711_v60 = vmul.f32 -1.442695, %v17319_v1  ;;  %17738 = vtanh.f32 %v17319_v1 }
0x1b84   :  { %17740 = vpow2.f32 %v14711_v60 }
0x1b8c   :  { %v17739_v24 = vpop.eup %17738 }
0x1b8d   :  { %3504 = vrot.lane.b32.xlu0 %v17739_v24, %s17993_s17  ;;  %v3581_v24 = vld [vmem:[#allocation2 + $0xc8] sm:$0xff] }
0x1b8e   :  { %v17741_v62 = vpop.eup %17740 }
0x1b8f   :  { %v3493_v63 = vadd.f32 1.0, %v17741_v62 }
0x1b91   :  { %17742 = vrcp.f32 %v3493_v63 }
0x1b9b   :  { %v17743_v4 = vpop.eup %17742 }
0x1b9c   :  { %v3519_v15 = vmul.f32 %v17743_v4, %v3515_v13  ;;  %v3539_v26 = vmul.f32 %v17743_v4, %v3535_v10 }
0x1b9e   :  { %3524 = vrot.lane.b32.xlu1 %v3519_v15, %s17995_s19  ;;  %3544 = vrot.lane.b32.xlu0 %v3539_v26, %s17994_s18 }
0x1ba2   :  { %3584 = vrot.lane.b32.xlu0 %v18885_v28, %s17999_s23 }
0x1bff   :  { %v3505_v33 = vpop.permute.xlu0 %3504 }
0x1c00   :  { %v3509_v38 = vmul.f32 %v17743_v4, %v3505_v33 }
0x1c10   :  { %v3525_v17 = vpop.permute.xlu1 %3524  ;;  %v3545_v19 = vpop.permute.xlu0 %3544 }
0x1c11   :  { %v3529_v18 = vadd.f32 %v3525_v17, %v3509_v38 }
0x1c13   :  { %v18930_v22 = vadd.f32 %v3545_v19, %v3529_v18 }
0x1c14   :  { %v3585_v5 = vpop.permute.xlu0 %3584 }
0x1c15   :  { %17744 = vtanh.f32 %v18930_v22  ;;  %v3597_v41 = vrot.slane %v18930_v22, 6  ;;  %v3590_v45 = vrot.slane %v3585_v5, 6 }
0x1c17   :  { %v3598_v57 = vsel %vm428_vm5, %v18888_v31, %v3597_v41 }
0x1c18   :  { %3794 = vrot.lane.b32.xlu0 %v3598_v57, %s18001_s3 }
0x1c1f   :  { %v17745_v35 = vpop.eup %17744 }
0x1c20   :  { %3556 = vrot.lane.b32.xlu1 %v17745_v35, %s17997_s1 }
0x1c92   :  { %v3557_v36 = vpop.permute.xlu1 %3556 }
0x1c93   :  { %v18941_v8 = vmul.f32 %v17743_v4, %v3557_v36 }
0x1c95   :  { %3586 = vrot.lane.b32.xlu1 %v18941_v8, %s17999_s23 }
0x1c99   :  { %3814 = vrot.lane.b32.xlu1 %v18930_v22, %s18000_s28 }
0x1d07   :  { %v3587_v42 = vpop.permute.xlu1 %3586 }
0x1d08   :  { %v3591_v48 = vrot.slane %v3587_v42, 6 }
0x1d0a   :  { %v3593_v52 = vsel %vm428_vm5, %v3591_v48, %v3590_v45  ;;  %v3592_v60 = vsel %vm428_vm5, %v3590_v45, %v3591_v48 }
0x1d0b   :  { %v3594_v1 = vsel %vm428_vm5, 0.0, %v3593_v52  ;;  %v3815_v38 = vpop.permute.xlu1 %3814 }
0x1d0c   :  { %15888 = vmatprep.mubr.msk.f32.mxu1 %vm496_vm6, %v3594_v1 }
0x1d0d   :  { %15889 = vmatmul.mubr.msk.f32.vlgmr.msra.gmra.mrb[34].mxu1 %vm496_vm6, %v3592_v60 }
0x1d0e   :  { %16737 = vmatpush3.bf16.msk.msra.mxu1 %vm18122_vm4, %v18209_v50  ;;  %15895 = vmatprep.mubr.msk.f32.mxu1 %vm496_vm6, %v3585_v5 }
0x1d0f   :  { %16752 = vmatprep.subr.msk.bf16.mxu1 %vm18122_vm4, %v18130_v30 }
0x1d15   :  { %15896 = vmatmul.mubr.msk.f32.vlgmr.msra.gmra.mrb[34].mxu1 %vm496_vm6, %v3587_v42 }
0x1d16   :  { %16755 = vmatpush3.bf16.msk.msra.mxu1 %vm18122_vm4, %v18130_v30  ;;  %v3795_v30 = vpop.permute.xlu0 %3794 }
0x1d17   :  { %16758 = vmatprep.subr.msk.bf16.mxu1 %vm18122_vm4, %v18209_v50 }
0x1de8   :  { %v15897_v62 = vpop.f32.mrb[34].mxu1 }
0x1de9   :  { %v17321_v63 = vadd.f32 %v15897_v62, %v3581_v24  ;;  %v18969_v4 = vpop.f32.mrb[35].mxu1 }
0x1deb   :  { %v14719_v10 = vmul.f32 -1.442695, %v17321_v63  ;;  %17746 = vtanh.f32 %v17321_v63 }
0x1ded   :  { %17748 = vpow2.f32 %v14719_v10 }
0x1df5   :  { %v17747_v13 = vpop.eup %17746 }
0x1df6   :  { %3784 = vrot.lane.b32.xlu0 %v17747_v13, %s17993_s17 }
0x1df7   :  { %v17749_v15 = vpop.eup %17748 }
0x1df8   :  { %v3773_v26 = vadd.f32 1.0, %v17749_v15 }
0x1dfa   :  { %17750 = vrcp.f32 %v3773_v26 }
0x1e04   :  { %v17751_v33 = vpop.eup %17750 }
0x1e05   :  { %v3799_v17 = vmul.f32 %v17751_v33, %v3795_v30  ;;  %v3819_v18 = vmul.f32 %v17751_v33, %v3815_v38  ;;  %v18002_v38 = vmov 0.0|0.0  }
0x1e07   :  { %3804 = vrot.lane.b32.xlu1 %v3799_v17, %s17995_s19  ;;  %3824 = vrot.lane.b32.xlu0 %v3819_v18, %s17994_s18  ;;  %v4420_v17 = vld [vmem:[%s21266_s5] sm:$0xff]  ;;  %v4421_v18 = vld [vmem:[%s21266_s5 + $0x8] sm:$0x3] }
0x1e0b   :  { %3864 = vrot.lane.b32.xlu0 %v18885_v28, %s17999_s23 }
0x1e0f   :  { %490 = vrot.lane.b32.xlu0 %v18225_v54, %s17999_s23 }
0x1e13   :  { %1058 = vrot.lane.b32.xlu0 %v18387_v56, %s17999_s23 }
0x1e68   :  { %v3785_v19 = vpop.permute.xlu0 %3784 }
0x1e69   :  { %v3789_v57 = vmul.f32 %v17751_v33, %v3785_v19  ;;  %v19026_v19 = vpack.c.bf16 %v4421_v18, %v4420_v17 }
0x1e79   :  { %v3825_v35 = vpop.permute.xlu0 %3824  ;;  %v3805_v36 = vpop.permute.xlu1 %3804 }
0x1e7a   :  { %v3809_v5 = vadd.f32 %v3805_v36, %v3789_v57  ;;  %v14739_v57 = vld [vmem:[%s21266_s5 + $0x10] sm:$0xff] }
0x1e7c   :  { %v3829_v42 = vadd.f32 %v3825_v35, %v3809_v5  ;;  %v14740_v35 = vld [vmem:[%s21266_s5 + $0x18] sm:$0x3] }
0x1e7d   :  { %v3865_v45 = vpop.permute.xlu0 %3864  ;;  %v19040_v36 = vpack.c.bf16 %v14740_v35, %v14739_v57  ;;  %v19087_v35 = vld [vmem:[%s21269_s8] ss:$0 sm:$0xff] }
0x1e7e   :  { %17752 = vtanh.f32 %v3829_v42  ;;  %v18982_v48 = vsel %vm3853_vm15, %v3829_v42, %v18930_v22  ;;  %v3870_v13 = vrot.slane %v3865_v45, 6  ;;  %v14743_v42 = vld [vmem:[%s21266_s5 + $0x20] sm:$0xff]  ;;  %v17297_v22 = vadd.f32 %v18299_v39, %v508_v46 }
0x1e7f   :  { %4094 = vrot.lane.b32.xlu0 %v18982_v48, %s18000_s28  ;;  %v21275_v62 = vrot.slane %v18982_v48, 6 }
0x1e81   :  { %v491_v54 = vpop.permute.xlu0 %490  ;;  %v3878_v63 = vsel %vm428_vm5, %v18888_v31, %v21275_v62 }
0x1e82   :  { %497 = vst.msk [vmem:[#allocation3] sm:$0xff] %vm496_vm6, %v491_v54 }
0x1e85   :  { %v1059_v56 = vpop.permute.xlu0 %1058 }
0x1e86   :  { %1064 = vst.msk [vmem:[#allocation3 + $0x20] sm:$0xff] %vm496_vm6, %v1059_v56 }
0x1e88   :  { %v17753_v52 = vpop.eup %17752 }
0x1e89   :  { %3836 = vrot.lane.b32.xlu1 %v17753_v52, %s17997_s1  ;;  %v4419_v5 = vld [vmem:[#allocation3] sm:$0x3] }
0x1e8a   :  { %v14747_v52 = vld [vmem:[%s21266_s5 + $0x30] sm:$0xff] }
0x1efb   :  { %v3837_v1 = vpop.permute.xlu1 %3836 }
0x1efc   :  { %v18989_v60 = vmul.f32 %v17751_v33, %v3837_v1  ;;  %v14748_v1 = vld [vmem:[%s21266_s5 + $0x38] sm:$0x3] }
0x1efe   :  { %v18993_v24 = vsel %vm3853_vm15, %v18989_v60, %v18941_v8 }
0x1eff   :  { %3866 = vrot.lane.b32.xlu1 %v18993_v24, %s17999_s23 }
0x1f03   :  { %778 = vrot.lane.b32.xlu1 %v18322_v6, %s17999_s23 }
0x1f07   :  { %4074 = vrot.lane.b32.xlu1 %v3878_v63, %s18001_s3  ;;  %v19071_v63 = vpack.c.bf16 %v14748_v1, %v14747_v52 }
0x1f71   :  { %v3867_v10 = vpop.permute.xlu1 %3866 }
0x1f72   :  { %v3871_v15 = vrot.slane %v3867_v10, 6 }
0x1f74   :  { %v3873_v26 = vsel %vm428_vm5, %v3871_v15, %v3870_v13  ;;  %v3872_v6 = vsel %vm428_vm5, %v3870_v13, %v3871_v15  ;;  %v4667_v13 = vld [vmem:[#allocation3 + $0x22] sm:$0x3]  ;;  %v3861_v15 = vld [vmem:[#allocation2 + $0xd8] sm:$0xff] }
0x1f75   :  { %v779_v33 = vpop.permute.xlu1 %778  ;;  %v3874_v30 = vsel %vm428_vm5, 0.0, %v3873_v26 }
0x1f76   :  { %784 = vst.msk [vmem:[#allocation3 + $0x10] sm:$0xff] %vm496_vm6, %v779_v33  ;;  %15902 = vmatprep.mubr.msk.f32.mxu0 %vm496_vm6, %v3874_v30 }
0x1f77   :  { %15903 = vmatmul.mubr.msk.f32.vlgmr.msra.gmra.mrb[20].mxu0 %vm496_vm6, %v3872_v6 }
0x1f78   :  { %16749 = vmatpush3.bf16.msk.msra.mxu0 %vm18122_vm4, %v18209_v50  ;;  %15909 = vmatprep.mubr.msk.f32.mxu0 %vm496_vm6, %v3865_v45  ;;  %v14744_v45 = vld [vmem:[%s21266_s5 + $0x28] sm:$0x3] }
0x1f79   :  { %16762 = vmatprep.subr.bf16.mxu0 %v18002_v38  ;;  %v19056_v54 = vpack.c.bf16 %v14744_v45, %v14743_v42  ;;  %v4075_v45 = vpop.permute.xlu1 %4074 }
0x1f7d   :  { %v4505_v56 = vld [vmem:[#allocation3 + $0x10] sm:$0x3] }
0x1f7f   :  { %15910 = vmatmul.mubr.msk.f32.vlgmr.msra.gmra.mrb[20].mxu0 %vm496_vm6, %v3867_v10  ;;  %v4586_v10 = vld [vmem:[#allocation3 + $0x12] sm:$0x3] }
0x1f80   :  { %16765 = vmatpush3.bf16.msk.msra.mxu0 %vm18122_vm4, %v19026_v19  ;;  %15930 = vmatprep.mubr.msk.f32.mxu0 %vm18003_vm0, %v17998_v37 }
0x1f81   :  { %16766 = vmatprep.subr.bf16.mxu0 %v18002_v38 }
0x1f83   :  { %15931 = vmatmul.mubr.msk.f32.vlgmr.msra.gmra.mrb[22].mxu0 %vm496_vm6, %v4419_v5  ;;  %v4095_v5 = vpop.permute.xlu0 %4094 }
0x1f84   :  { %16769 = vmatpush3.bf16.msk.msra.mxu0 %vm18122_vm4, %v19040_v36  ;;  %15937 = vmatprep.mubr.msk.f32.mxu0 %vm18003_vm0, %v17998_v37 }
0x1f85   :  { %16770 = vmatprep.subr.bf16.mxu0 %v18002_v38 }
0x1f8b   :  { %15938 = vmatmul.mubr.msk.f32.vlgmr.msra.gmra.mrb[22].mxu0 %vm496_vm6, %v4505_v56 }
0x1f8c   :  { %16773 = vmatpush3.bf16.msk.msra.mxu0 %vm18122_vm4, %v19056_v54  ;;  %15944 = vmatprep.mubr.msk.f32.mxu0 %vm18003_vm0, %v17998_v37 }
0x1f8d   :  { %16774 = vmatprep.subr.bf16.mxu0 %v18002_v38 }
0x1f93   :  { %15945 = vmatmul.mubr.msk.f32.vlgmr.msra.gmra.mrb[22].mxu0 %vm496_vm6, %v4586_v10 }
0x1f94   :  { %16777 = vmatpush3.bf16.msk.msra.mxu0 %vm18122_vm4, %v19071_v63  ;;  %15951 = vmatprep.mubr.msk.f32.mxu0 %vm18003_vm0, %v17998_v37 }
0x1f9b   :  { %15952 = vmatmul.mubr.msk.f32.vlgmr.msra.gmra.mrb[22].mxu0 %vm496_vm6, %v4667_v13 }
0x1f9c   :  { %5297 = vmatprep.mubr.f32.mxu0 %v17998_v37 }
0x2052   :  { %v15911_v26 = vpop.f32.mrb[20].mxu0 }
0x2053   :  { %v17323_v33 = vadd.f32 %v15911_v26, %v3861_v15  ;;  %v19081_v30 = vpop.f32.mrb[21].mxu0 }
0x2055   :  { %v14727_v6 = vmul.f32 -1.442695, %v17323_v33  ;;  %17754 = vtanh.f32 %v17323_v33 }
0x2057   :  { %17756 = vpow2.f32 %v14727_v6 }
0x205f   :  { %v17755_v17 = vpop.eup %17754 }
0x2060   :  { %4064 = vrot.lane.b32.xlu1 %v17755_v17, %s17993_s17 }
0x2061   :  { %v17757_v18 = vpop.eup %17756 }
0x2062   :  { %v4053_v57 = vadd.f32 1.0, %v17757_v18 }
0x2064   :  { %17758 = vrcp.f32 %v4053_v57 }
0x206e   :  { %v17759_v42 = vpop.eup %17758  ;;  %v4743_v56 = vpop.f32.mrb[22].mxu0 }
0x206f   :  { %v17327_v52 = vadd.f32 %v19087_v35, %v4743_v56  ;;  %v15953_v1 = vpop.f32.mrb[23].mxu0  ;;  %v4099_v10 = vmul.f32 %v17759_v42, %v4095_v5  ;;  %v4079_v13 = vmul.f32 %v17759_v42, %v4075_v45 }
0x2071   :  { %v14751_v15 = vmul.f32 -1.442695, %v17327_v52  ;;  %17760 = vtanh.f32 %v17327_v52  ;;  %4104 = vrot.lane.b32.xlu1 %v4099_v10, %s17994_s18  ;;  %4084 = vrot.lane.b32.xlu0 %v4079_v13, %s17995_s19 }
0x2073   :  { %17762 = vpow2.f32 %v14751_v15 }
0x207b   :  { %v17761_v26 = vpop.eup %17760 }
0x207c   :  { %4756 = vrot.lane.b32.xlu0 %v17761_v26, %s18004_s16 }
0x207d   :  { %v17763_v33 = vpop.eup %17762 }
0x207e   :  { %v4751_v6 = vadd.f32 1.0, %v17763_v33 }
0x2080   :  { %17764 = vrcp.f32 %v4751_v6 }
0x208a   :  { %v17765_v17 = vpop.eup %17764 }
0x208b   :  { %v4760_v18 = vmul.f32 0.0, %v17765_v17 }
0x208d   :  { %4762 = vrot.lane.b32.xlu1 %v4760_v18, %s17994_s18  ;;  %4766 = vrot.lane.b32.xlu0 %v4760_v18, %s17993_s17 }
0x20d2   :  { %v4065_v57 = vpop.permute.xlu1 %4064 }
0x20d3   :  { %v4069_v5 = vmul.f32 %v17759_v42, %v4065_v57 }
0x20e3   :  { %v4085_v45 = vpop.permute.xlu0 %4084  ;;  %v4105_v52 = vpop.permute.xlu1 %4104 }
0x20e4   :  { %v4089_v56 = vadd.f32 %v4085_v45, %v4069_v5 }
0x20e6   :  { %v19095_v1 = vadd.f32 %v4105_v52, %v4089_v56 }
0x20e8   :  { %17766 = vtanh.f32 %v19095_v1 }
0x20ee   :  { %v4757_v13 = vpop.permute.xlu0 %4756 }
0x20ef   :  { %v4759_v15 = vmul.f32 %v17765_v17, %v4757_v13 }
0x20f2   :  { %v17767_v10 = vpop.eup %17766 }
0x20f3   :  { %4116 = vrot.lane.b32.xlu1 %v17767_v10, %s17997_s1 }
0x20f7   :  { %4144 = vrot.lane.b32.xlu1 %v18885_v28, %s17999_s23 }
0x20fb   :  { %1338 = vrot.lane.b32.xlu1 %v18449_v43, %s17999_s23 }
0x20ff   :  { %v4763_v26 = vpop.permute.xlu1 %4762  ;;  %v4767_v6 = vpop.permute.xlu0 %4766 }
0x2100   :  { %v4765_v33 = vadd.f32 %v4763_v26, %v4759_v15 }
0x2102   :  { %v19103_v18 = vadd.f32 %v4767_v6, %v4765_v33  ;;  %v4788_v33 = vld [vmem:[#allocation3 + $0x20] sm:$0x3] }
0x2104   :  { %17768 = vtanh.f32 %v19103_v18 }
0x210e   :  { %v17769_v57 = vpop.eup %17768 }
0x210f   :  { %4772 = vrot.lane.b32.xlu0 %v17769_v57, %s18005_s20  ;;  %v4415_v57 = vld [vmem:[%s21268_s7] sm:$0xff] }
0x2165   :  { %v4117_v5 = vpop.permute.xlu1 %4116 }
0x2166   :  { %v19107_v45 = vmul.f32 %v17759_v42, %v4117_v5  ;;  %v4416_v5 = vld [vmem:[%s21268_s7 + $0x8] sm:$0xff] }
0x2168   :  { %v4137_v43 = vsel %vm4133_vm1, %v19107_v45, %v18993_v24 }
0x2169   :  { %4146 = vrot.lane.b32.xlu0 %v4137_v43, %s17999_s23  ;;  %v4145_v28 = vpop.permute.xlu1 %4144  ;;  %v19169_v43 = vpack.c.bf16 %v4416_v5, %v4415_v57 }
0x216a   :  { %v4150_v24 = vrot.slane %v4145_v28, 6 }
0x216d   :  { %1618 = vrot.lane.b32.xlu0 %v18510_v7, %s17999_s23  ;;  %v1339_v56 = vpop.permute.xlu1 %1338 }
0x216e   :  { %1344 = vst.msk [vmem:[#allocation3 + $0x30] sm:$0xff] %vm496_vm6, %v1339_v56  ;;  %v19179_v56 = vld [vmem:[%s21268_s7 + $0x10] sm:$0xf] }
0x2171   :  { %5188 = vrot.lane.b32.xlu0 %v19103_v18, %s18006_s21 }
0x2175   :  { %v4938_v6 = vld [vmem:[#allocation3 + $0x32] sm:$0x3] }
0x2181   :  { %v4773_v42 = vpop.permute.xlu0 %4772 }
0x2182   :  { %v4775_v52 = vmul.f32 %v17765_v17, %v4773_v42 }
0x2184   :  { %5089 = vrot.lane.b32.xlu1 %v4775_v52, %s18007_s22 }
0x21db   :  { %v4147_v10 = vpop.permute.xlu0 %4146 }
0x21dc   :  { %v4151_v13 = vrot.slane %v4147_v10, 6 }
0x21de   :  { %v4153_v15 = vsel %vm428_vm5, %v4151_v13, %v4150_v24  ;;  %v4152_v17 = vsel %vm428_vm5, %v4150_v24, %v4151_v13 }
0x21df   :  { %v1619_v26 = vpop.permute.xlu0 %1618  ;;  %v4154_v7 = vsel %vm428_vm5, 0.0, %v4153_v15 }
0x21e0   :  { %1624 = vst.msk [vmem:[#allocation3 + $0x40] sm:$0xff] %vm496_vm6, %v1619_v26  ;;  %15916 = vmatprep.mubr.msk.f32.mxu1 %vm496_vm6, %v4154_v7 }
0x21e1   :  { %15917 = vmatmul.mubr.msk.f32.vlgmr.msra.gmra.mrb[36].mxu1 %vm496_vm6, %v4152_v17 }
0x21e2   :  { %16761 = vmatpush3.bf16.msk.msra.mxu1 %vm18122_vm4, %v18209_v50  ;;  %15923 = vmatprep.mubr.msk.f32.mxu1 %vm496_vm6, %v4145_v28  ;;  %v4863_v50 = vld [vmem:[#allocation3 + $0x30] sm:$0x3] }
0x21e3   :  { %16778 = vmatprep.subr.bf16.mxu1 %v18002_v38  ;;  %v5189_v57 = vpop.permute.xlu0 %5188 }
0x21e7   :  { %v5013_v28 = vld [vmem:[#allocation3 + $0x42] sm:$0x3]  ;;  %v5529_v52 = vld [vmem:[#allocation3 + $0x40] sm:$0x3] }
0x21e9   :  { %15924 = vmatmul.mubr.msk.f32.vlgmr.msra.gmra.mrb[36].mxu1 %vm496_vm6, %v4147_v10 }
0x21ea   :  { %16781 = vmatpush3.bf16.msk.msra.mxu1 %vm18122_vm4, %v19026_v19  ;;  %15958 = vmatprep.mubr.msk.f32.mxu1 %vm18003_vm0, %v17998_v37 }
0x21eb   :  { %16782 = vmatprep.subr.bf16.mxu1 %v18002_v38 }
0x21ed   :  { %15959 = vmatmul.mubr.msk.f32.vlgmr.msra.gmra.mrb[38].mxu1 %vm496_vm6, %v4788_v33 }
0x21ee   :  { %16785 = vmatpush3.bf16.msk.msra.mxu1 %vm18122_vm4, %v19040_v36  ;;  %15965 = vmatprep.mubr.msk.f32.mxu1 %vm18003_vm0, %v17998_v37 }
0x21ef   :  { %16786 = vmatprep.subr.bf16.mxu1 %v18002_v38 }
0x21f5   :  { %15966 = vmatmul.mubr.msk.f32.vlgmr.msra.gmra.mrb[38].mxu1 %vm496_vm6, %v4863_v50 }
0x21f6   :  { %16789 = vmatpush3.bf16.msk.msra.mxu1 %vm18122_vm4, %v19056_v54  ;;  %15972 = vmatprep.mubr.msk.f32.mxu1 %vm18003_vm0, %v17998_v37  ;;  %v19184_v42 = vpop.permute.xlu1 %5089 }
0x21f7   :  { %16790 = vmatprep.subr.bf16.mxu1 %v18002_v38 }
0x21fd   :  { %15973 = vmatmul.mubr.msk.f32.vlgmr.msra.gmra.mrb[38].mxu1 %vm496_vm6, %v4938_v6 }
0x21fe   :  { %16793 = vmatpush3.bf16.msk.msra.mxu1 %vm18122_vm4, %v19071_v63  ;;  %15979 = vmatprep.mubr.msk.f32.mxu1 %vm18003_vm0, %v17998_v37 }
0x21ff   :  { %16794 = vmatprep.subr.bf16.mxu1 %v18002_v38 }
0x2205   :  { %15980 = vmatmul.mubr.msk.f32.vlgmr.msra.gmra.mrb[38].mxu1 %vm496_vm6, %v5013_v28 }
0x2206   :  { %16796 = vmatpush3.bf16.msra.mxu1 %v19169_v43  ;;  %15988 = vmatprep.mubr.msk.f32.mxu1 %vm18003_vm0, %v17998_v37 }
0x2207   :  { %15986 = vmatprep.subr.mxu1 %v17998_v37 }
0x220a   :  { %15987 = vmatpush3.msk.msra.mxu1 %vm5094_vm2, %v19179_v56 }
0x220b   :  { %16813 = vmatprep.subr.bf16.mxu1 %v18002_v38 }
0x220d   :  { %15989 = vmatmul.mubr.msk.f32.vlgmr.msra.gmra.mrb[38].mxu1 %vm5091_vm3, %v19184_v42 }
0x220e   :  { %16816 = vmatpush3.bf16.msk.msra.mxu1 %vm18122_vm4, %v19026_v19  ;;  %15995 = vmatprep.mubr.msk.f32.mxu1 %vm18003_vm0, %v17998_v37 }
0x220f   :  { %16817 = vmatprep.subr.bf16.mxu1 %v18002_v38 }
0x2211   :  { %15996 = vmatmul.mubr.msk.f32.vlgmr.msra.gmra.mrb[40].mxu1 %vm496_vm6, %v5529_v52 }
0x2212   :  { %16820 = vmatpush3.bf16.msk.msra.mxu1 %vm18122_vm4, %v19040_v36  ;;  %16002 = vmatprep.mubr.msk.f32.mxu1 %vm18003_vm0, %v17998_v37 }
0x2213   :  { %16821 = vmatprep.subr.bf16.mxu1 %v18002_v38 }
0x22bc   :  { %v19201_v10 = vpop.f32.mrb[36].mxu1 }
0x22bd   :  { %v19203_v24 = vpop.f32.mrb[37].mxu1 }
0x22e0   :  { %v5164_v13 = vpop.f32.mrb[38].mxu1 }
0x22e1   :  { %v17328_v15 = vadd.f32 %v19087_v35, %v5164_v13  ;;  %v15990_v26 = vpop.f32.mrb[39].mxu1 }
0x22e3   :  { %v14762_v7 = vmul.f32 -1.442695, %v17328_v15  ;;  %17770 = vtanh.f32 %v17328_v15 }
0x22e5   :  { %17772 = vpow2.f32 %v14762_v7 }
0x22ed   :  { %v17771_v17 = vpop.eup %17770 }
0x22ee   :  { %5177 = vrot.lane.b32.xlu1 %v17771_v17, %s18004_s16 }
0x22ef   :  { %v17773_v33 = vpop.eup %17772 }
0x22f0   :  { %v5172_v50 = vadd.f32 1.0, %v17773_v33 }
0x22f2   :  { %17774 = vrcp.f32 %v5172_v50 }
0x22fc   :  { %v17775_v6 = vpop.eup %17774 }
0x22fd   :  { %v5191_v5 = vmul.f32 %v17775_v6, %v5189_v57  ;;  %v5181_v28 = vmul.f32 0.0, %v17775_v6  ;;  %v14764_v57 = vld [vmem:[%s21270_s9 + $0x68] sm:$0xff] }
0x22ff   :  { %5193 = vrot.lane.b32.xlu1 %v5191_v5, %s17993_s17  ;;  %5183 = vrot.lane.b32.xlu0 %v5181_v28, %s17994_s18  ;;  %v14768_v5 = vld [vmem:[%s21270_s9 + $0x88] sm:$0xff] }
0x2300   :  { %v16797_v28 = vpack.c.bf16 %v14768_v5, %v14764_v57 }
0x2302   :  { %16798 = vmatprep.subr.bf16.mxu0 %v16797_v28 }
0x2303   :  { %1898 = vrot.lane.b32.xlu1 %v18579_v32, %s17999_s23 }
0x2360   :  { %v5178_v52 = vpop.permute.xlu1 %5177 }
0x2361   :  { %v5180_v13 = vmul.f32 %v17775_v6, %v5178_v52  ;;  %v14763_v52 = vld [vmem:[%s21270_s9 + $0x60] sm:$0xff] }
0x2371   :  { %v5194_v15 = vpop.permute.xlu1 %5193  ;;  %v5184_v26 = vpop.permute.xlu0 %5183 }
0x2372   :  { %v5186_v7 = vadd.f32 %v5184_v26, %v5180_v13  ;;  %v14767_v13 = vld [vmem:[%s21270_s9 + $0x80] sm:$0xff]  ;;  %v14772_v26 = vld [vmem:[%s21270_s9 + $0xa8] sm:$0xf] }
0x2374   :  { %v19211_v17 = vadd.f32 %v5194_v15, %v5186_v7  ;;  %v16799_v15 = vpack.c.bf16 %v14767_v13, %v14763_v52  ;;  %v14769_v13 = vld [vmem:[%s21270_s9 + $0x90] sm:$0xff] }
0x2375   :  { %v1899_v33 = vpop.permute.xlu1 %1898 }
0x2376   :  { %17776 = vtanh.f32 %v19211_v17  ;;  %1904 = vst.msk [vmem:[#allocation3 + $0x50] sm:$0xff] %vm496_vm6, %v1899_v33  ;;  %16800 = vmatpush1.bf16.msra.mxu0 %v16799_v15  ;;  %v14771_v33 = vld [vmem:[%s21270_s9 + $0xa0] sm:$0xf] }
0x2377   :  { %14775 = vmatprep.subr.msk.mxu0 %vm5094_vm2, %v14772_v26 }
0x237a   :  { %14776 = vmatpush1.msk.msra.mxu0 %vm5094_vm2, %v14771_v33  ;;  %v4777_v33 = vld [vmem:[%s21270_s9 + $0x8] sm:$0xff] }
0x237d   :  { %v5604_v50 = vld [vmem:[#allocation3 + $0x50] sm:$0x3]  ;;  %v5679_v7 = vld [vmem:[#allocation3 + $0x52] sm:$0x3] }
0x237e   :  { %16003 = vmatmul.mubr.msk.f32.vlgmr.msra.gmra.mrb[40].mxu1 %vm496_vm6, %v5604_v50  ;;  %v14766_v50 = vld [vmem:[%s21270_s9 + $0x78] sm:$0xff] }
0x237f   :  { %16824 = vmatpush3.bf16.msk.msra.mxu1 %vm18122_vm4, %v19056_v54  ;;  %16009 = vmatprep.mubr.msk.f32.mxu1 %vm18003_vm0, %v17998_v37 }
0x2380   :  { %v17777_v32 = vpop.eup %17776  ;;  %16825 = vmatprep.subr.bf16.mxu1 %v18002_v38 }
0x2381   :  { %5199 = vrot.lane.b32.xlu0 %v17777_v32, %s18005_s20  ;;  %v14770_v32 = vld [vmem:[%s21270_s9 + $0x98] sm:$0xff] }
0x2382   :  { %v16801_v57 = vpack.c.bf16 %v14770_v32, %v14766_v50  ;;  %v4781_v50 = vld [vmem:[%s21270_s9 + $0x28] sm:$0xff]  ;;  %v4776_v32 = vld [vmem:[%s21270_s9] sm:$0xff] }
0x2384   :  { %16802 = vmatprep.subr.bf16.mxu0 %v16801_v57  ;;  %v4780_v57 = vld [vmem:[%s21270_s9 + $0x20] sm:$0xff] }
0x2385   :  { %2178 = vrot.lane.b32.xlu0 %v18651_v55, %s17999_s23 }
0x2386   :  { %16010 = vmatmul.mubr.msk.f32.vlgmr.msra.gmra.mrb[40].mxu1 %vm496_vm6, %v5679_v7  ;;  %v14774_v7 = vld [vmem:[%s21270_s9 + $0xb8] sm:$0xf] }
0x2387   :  { %16828 = vmatpush3.bf16.msk.msra.mxu1 %vm18122_vm4, %v19071_v63  ;;  %16016 = vmatprep.mubr.msk.f32.mxu1 %vm18003_vm0, %v17998_v37 }
0x2388   :  { %16829 = vmatprep.subr.bf16.mxu1 %v18002_v38 }
0x2389   :  { %5919 = vrot.lane.b32.xlu0 %v19211_v17, %s18006_s21 }
0x23f3   :  { %v5200_v55 = vpop.permute.xlu0 %5199 }
0x23f4   :  { %v5202_v5 = vmul.f32 %v17775_v6, %v5200_v55  ;;  %v14765_v6 = vld [vmem:[%s21270_s9 + $0x70] sm:$0xff] }
0x23f5   :  { %v16803_v15 = vpack.c.bf16 %v14769_v13, %v14765_v6  ;;  %v14773_v55 = vld [vmem:[%s21270_s9 + $0xb0] sm:$0xf]  ;;  %v4785_v6 = vld [vmem:[%s21270_s9 + $0x48] sm:$0xf]  ;;  %v4779_v13 = vld [vmem:[%s21270_s9 + $0x18] sm:$0xff] }
0x23f6   :  { %5217 = vrot.lane.b32.xlu1 %v5202_v5, %s18007_s22  ;;  %v16805_v5 = vpack.c.bf16 %v4781_v50, %v4777_v33  ;;  %v4782_v33 = vld [vmem:[%s21270_s9 + $0x30] sm:$0xff]  ;;  %v4784_v50 = vld [vmem:[%s21270_s9 + $0x40] sm:$0xf] }
0x23f7   :  { %v2179_v28 = vpop.permute.xlu0 %2178 }
0x23f8   :  { %2184 = vst.msk [vmem:[#allocation3 + $0x60] sm:$0xff] %vm496_vm6, %v2179_v28 }
0x23ff   :  { %v5754_v52 = vld [vmem:[#allocation3 + $0x62] sm:$0x3]  ;;  %v6110_v28 = vld [vmem:[#allocation3 + $0x60] sm:$0x3] }
0x2400   :  { %16017 = vmatmul.mubr.msk.f32.vlgmr.msra.gmra.mrb[40].mxu1 %vm496_vm6, %v5754_v52  ;;  %v16807_v52 = vpack.c.bf16 %v4780_v57, %v4776_v32 }
0x2401   :  { %16831 = vmatpush3.bf16.msra.mxu1 %v19169_v43  ;;  %16025 = vmatprep.mubr.msk.f32.mxu1 %vm18003_vm0, %v17998_v37 }
0x2402   :  { %16023 = vmatprep.subr.mxu1 %v17998_v37 }
0x2405   :  { %16024 = vmatpush3.msk.msra.mxu1 %vm5094_vm2, %v19179_v56 }
0x2406   :  { %16840 = vmatprep.subr.bf16.mxu1 %v18002_v38 }
0x2468   :  { %v19276_v26 = vpop.permute.xlu1 %5217 }
0x2469   :  { %14777 = vmatmul.mubr.msk.f32.vlgmr.msra.gmra.mrb[24].mxu0 %vm5091_vm3, %v19276_v26  ;;  %16026 = vmatmul.mubr.msk.f32.vlgmr.msra.gmra.mrb[40].mxu1 %vm5091_vm3, %v19276_v26 }
0x246a   :  { %16804 = vmatpush1.bf16.msra.mxu0 %v16803_v15  ;;  %16843 = vmatpush3.bf16.msk.msra.mxu1 %vm18122_vm4, %v19026_v19  ;;  %v4783_v15 = vld [vmem:[%s21270_s9 + $0x38] sm:$0xff] }
0x246b   :  { %14778 = vmatprep.subr.msk.mxu0 %vm5094_vm2, %v14774_v7  ;;  %16032 = vmatprep.mubr.msk.f32.mxu1 %vm18003_vm0, %v17998_v37  ;;  %v4778_v7 = vld [vmem:[%s21270_s9 + $0x10] sm:$0xff]  ;;  %v16809_v32 = vpack.c.bf16 %v4783_v15, %v4779_v13 }
0x246c   :  { %5368 = vmatprep.mubr.f32.mxu0 %v17998_v37  ;;  %16844 = vmatprep.subr.bf16.mxu1 %v18002_v38  ;;  %v16811_v57 = vpack.c.bf16 %v4782_v33, %v4778_v7 }
0x246d   :  { %16033 = vmatmul.mubr.msk.f32.vlgmr.msra.gmra.mrb[42].mxu1 %vm496_vm6, %v6110_v28  ;;  %v4786_v28 = vld [vmem:[%s21270_s9 + $0x50] sm:$0xf] }
0x246e   :  { %14779 = vmatpush1.msk.msra.mxu0 %vm5094_vm2, %v14773_v55  ;;  %16847 = vmatpush3.bf16.msk.msra.mxu1 %vm18122_vm4, %v19040_v36  ;;  %v4787_v55 = vld [vmem:[%s21270_s9 + $0x58] sm:$0xf] }
0x246f   :  { %14780 = vmatmul.mubr.msk.f32.vlgmr.msra.gmra.mrb[26].mxu0 %vm5091_vm3, %v19276_v26  ;;  %16806 = vmatprep.subr.bf16.mxu0 %v16805_v5  ;;  %v6185_v5 = vld [vmem:[#allocation3 + $0x70] sm:$0x3] }
0x2470   :  { %16808 = vmatpush1.bf16.msra.mxu0 %v16807_v52  ;;  %5451 = vmatprep.mubr.f32.mxu0 %v17998_v37  ;;  %v6260_v52 = vld [vmem:[#allocation3 + $0x72] sm:$0x3] }
0x2471   :  { %14781 = vmatprep.subr.msk.mxu0 %vm5094_vm2, %v4785_v6  ;;  %16039 = vmatprep.mubr.msk.f32.mxu1 %vm18003_vm0, %v17998_v37 }
0x2472   :  { %16848 = vmatprep.subr.bf16.mxu1 %v18002_v38 }
0x2474   :  { %14782 = vmatpush1.msk.msra.mxu0 %vm5094_vm2, %v4784_v50 }
0x2475   :  { %14783 = vmatmul.mubr.msk.f32.vlgmr.msra.gmra.mrb[24].mxu0 %vm5091_vm3, %v19184_v42  ;;  %16810 = vmatprep.subr.bf16.mxu0 %v16809_v32 }
0x2476   :  { %16812 = vmatpush1.bf16.msra.mxu0 %v16811_v57  ;;  %16040 = vmatmul.mubr.msk.f32.vlgmr.msra.gmra.mrb[42].mxu1 %vm496_vm6, %v6185_v5 }
0x2477   :  { %14784 = vmatprep.subr.msk.mxu0 %vm5094_vm2, %v4787_v55  ;;  %5522 = vmatprep.mubr.f32.mxu0 %v17998_v37  ;;  %v5920_v55 = vpop.permute.xlu0 %5919 }
0x2478   :  { %16851 = vmatpush3.bf16.msk.msra.mxu1 %vm18122_vm4, %v19056_v54  ;;  %16046 = vmatprep.mubr.msk.f32.mxu1 %vm18003_vm0, %v17998_v37 }
0x2479   :  { %16852 = vmatprep.subr.bf16.mxu1 %v18002_v38 }
0x247a   :  { %14785 = vmatpush1.msk.msra.mxu0 %vm5094_vm2, %v4786_v28 }
0x247b   :  { %14786 = vmatmul.mubr.msk.f32.vlgmr.msra.gmra.mrb[26].mxu0 %vm5091_vm3, %v19184_v42 }
0x247c   :  { %6028 = vmatprep.mubr.f32.mxu0 %v17998_v37 }
0x247e   :  { %16047 = vmatmul.mubr.msk.f32.vlgmr.msra.gmra.mrb[42].mxu1 %vm496_vm6, %v6260_v52 }
0x247f   :  { %16855 = vmatpush3.bf16.msk.msra.mxu1 %vm18122_vm4, %v19071_v63  ;;  %16053 = vmatprep.mubr.msk.f32.mxu1 %vm18003_vm0, %v17998_v37 }
0x2480   :  { %16856 = vmatprep.subr.bf16.mxu1 %v18002_v38 }
0x253c   :  { %v5895_v6 = vpop.f32.mrb[40].mxu1 }
0x253d   :  { %v17329_v13 = vadd.f32 %v19087_v35, %v5895_v6  ;;  %v16027_v15 = vpop.f32.mrb[41].mxu1 }
0x253f   :  { %v14797_v7 = vmul.f32 -1.442695, %v17329_v13  ;;  %17778 = vtanh.f32 %v17329_v13 }
0x2541   :  { %17780 = vpow2.f32 %v14797_v7 }
0x2549   :  { %v17779_v33 = vpop.eup %17778 }
0x254a   :  { %5908 = vrot.lane.b32.xlu1 %v17779_v33, %s18004_s16 }
0x254b   :  { %v17781_v50 = vpop.eup %17780 }
0x254c   :  { %v5903_v32 = vadd.f32 1.0, %v17781_v50 }
0x254e   :  { %17782 = vrcp.f32 %v5903_v32  ;;  %v14799_v32 = vld [vmem:[%s21270_s9 + $0xc8] sm:$0xff] }
0x2558   :  { %v17783_v57 = vpop.eup %17782 }
0x2559   :  { %v5922_v5 = vmul.f32 %v17783_v57, %v5920_v55  ;;  %v5912_v28 = vmul.f32 0.0, %v17783_v57  ;;  %v14798_v55 = vld [vmem:[%s21270_s9 + $0xc0] sm:$0xff] }
0x255b   :  { %5924 = vrot.lane.b32.xlu1 %v5922_v5, %s17993_s17  ;;  %5914 = vrot.lane.b32.xlu0 %v5912_v28, %s17994_s18  ;;  %v14802_v28 = vld [vmem:[%s21270_s9 + $0xe0] sm:$0xff] }
0x255f   :  { %2722 = vrot.lane.b32.xlu1 %v18761_v14, %s17999_s23  ;;  %v14803_v14 = vld [vmem:[%s21270_s9 + $0xe8] sm:$0xff] }
0x2560   :  { %v16832_v5 = vpack.c.bf16 %v14803_v14, %v14799_v32 }
0x2562   :  { %16833 = vmatprep.subr.bf16.mxu0 %v16832_v5 }
0x25bc   :  { %v5909_v52 = vpop.permute.xlu1 %5908 }
0x25bd   :  { %v5911_v6 = vmul.f32 %v17783_v57, %v5909_v52  ;;  %v16834_v52 = vpack.c.bf16 %v14802_v28, %v14798_v55  ;;  %v14800_v28 = vld [vmem:[%s21270_s9 + $0xd0] sm:$0xff] }
0x25bf   :  { %16835 = vmatpush1.bf16.msra.mxu0 %v16834_v52  ;;  %v14804_v52 = vld [vmem:[%s21270_s9 + $0xf0] sm:$0xff] }
0x25cd   :  { %v5925_v13 = vpop.permute.xlu1 %5924  ;;  %v5915_v15 = vpop.permute.xlu0 %5914 }
0x25ce   :  { %v5917_v7 = vadd.f32 %v5915_v15, %v5911_v6  ;;  %v14807_v6 = vld [vmem:[%s21270_s9 + $0x108] sm:$0xf]  ;;  %v14805_v15 = vld [vmem:[%s21270_s9 + $0xf8] sm:$0xff] }
0x25cf   :  { %14810 = vmatprep.subr.msk.mxu0 %vm5094_vm2, %v14807_v6  ;;  %v16838_v6 = vpack.c.bf16 %v14804_v52, %v14800_v28  ;;  %v7499_v28 = vld [vmem:[#allocation3 + $0x66] sm:$0x3]  ;;  %v19482_v52 = vld [vmem:[%s21267_s6 + $0x10] sm:$0xf] }
0x25d0   :  { %v19373_v33 = vadd.f32 %v5925_v13, %v5917_v7  ;;  %v14801_v13 = vld [vmem:[%s21270_s9 + $0xd8] sm:$0xff]  ;;  %v14806_v7 = vld [vmem:[%s21270_s9 + $0x100] sm:$0xf] }
0x25d1   :  { %v2723_v50 = vpop.permute.xlu1 %2722  ;;  %14811 = vmatpush1.msk.msra.mxu0 %vm5094_vm2, %v14806_v7  ;;  %v7274_v7 = vld [vmem:[#allocation3 + $0x44] sm:$0x3] }
0x25d2   :  { %17784 = vtanh.f32 %v19373_v33  ;;  %2728 = vst.msk [vmem:[#allocation3 + $0x80] sm:$0xff] %vm496_vm6, %v2723_v50  ;;  %6500 = vrot.lane.b32.xlu1 %v19373_v33, %s18006_s21  ;;  %v16836_v50 = vpack.c.bf16 %v14805_v15, %v14801_v13  ;;  %v14809_v15 = vld [vmem:[%s21270_s9 + $0x118] sm:$0xf] }
0x25d4   :  { %16837 = vmatprep.subr.bf16.mxu0 %v16836_v50  ;;  %v7349_v50 = vld [vmem:[#allocation3 + $0x54] sm:$0x3] }
0x25d9   :  { %v6335_v32 = vld [vmem:[#allocation3 + $0x82] sm:$0x3] }
0x25da   :  { %16054 = vmatmul.mubr.msk.f32.vlgmr.msra.gmra.mrb[42].mxu1 %vm496_vm6, %v6335_v32  ;;  %v7424_v32 = vld [vmem:[#allocation3 + $0x56] sm:$0x3] }
0x25db   :  { %16858 = vmatpush3.bf16.msra.mxu1 %v19169_v43  ;;  %16062 = vmatprep.mubr.msk.f32.mxu1 %vm18003_vm0, %v17998_v37 }
0x25dc   :  { %v17785_v14 = vpop.eup %17784  ;;  %16060 = vmatprep.subr.mxu1 %v17998_v37 }
0x25dd   :  { %5930 = vrot.lane.b32.xlu0 %v17785_v14, %s18005_s20  ;;  %v4412_v14 = vld [vmem:[%s21267_s6] sm:$0xff] }
0x25df   :  { %16061 = vmatpush3.msk.msra.mxu1 %vm5094_vm2, %v19179_v56 }
0x25e0   :  { %16894 = vmatprep.subr.bf16.mxu1 %v18002_v38 }
0x264f   :  { %v5931_v55 = vpop.permute.xlu0 %5930 }
0x2650   :  { %v5933_v5 = vmul.f32 %v17783_v57, %v5931_v55  ;;  %v14808_v57 = vld [vmem:[%s21270_s9 + $0x110] sm:$0xf]  ;;  %v4413_v55 = vld [vmem:[%s21267_s6 + $0x8] sm:$0xff] }
0x2652   :  { %5948 = vrot.lane.b32.xlu0 %v5933_v5, %s18007_s22  ;;  %v19472_v5 = vpack.c.bf16 %v4413_v55, %v4412_v14  ;;  %v6501_v55 = vpop.permute.xlu1 %6500 }
0x26c4   :  { %v19421_v13 = vpop.permute.xlu0 %5948 }
0x26c5   :  { %14812 = vmatmul.mubr.msk.f32.vlgmr.msra.gmra.mrb[24].mxu0 %vm5091_vm3, %v19421_v13  ;;  %16063 = vmatmul.mubr.msk.f32.vlgmr.msra.gmra.mrb[42].mxu1 %vm5091_vm3, %v19421_v13 }
0x26c6   :  { %16839 = vmatpush1.bf16.msra.mxu0 %v16838_v6  ;;  %16897 = vmatpush3.bf16.msk.msra.mxu1 %vm18122_vm4, %v19026_v19 }
0x26c7   :  { %14813 = vmatprep.subr.msk.mxu0 %vm5094_vm2, %v14809_v15  ;;  %16106 = vmatprep.mubr.msk.f32.mxu1 %vm18003_vm0, %v17998_v37 }
0x26c8   :  { %6099 = vmatprep.mubr.f32.mxu0 %v17998_v37  ;;  %16898 = vmatprep.subr.bf16.mxu1 %v18002_v38 }
0x26c9   :  { %16107 = vmatmul.mubr.msk.f32.vlgmr.msra.gmra.mrb[44].mxu1 %vm496_vm6, %v7274_v7 }
0x26ca   :  { %14814 = vmatpush1.msk.msra.mxu0 %vm5094_vm2, %v14808_v57  ;;  %16901 = vmatpush3.bf16.msk.msra.mxu1 %vm18122_vm4, %v19040_v36 }
0x26cb   :  { %14815 = vmatmul.mubr.msk.f32.vlgmr.msra.gmra.mrb[26].mxu0 %vm5091_vm3, %v19421_v13  ;;  %16113 = vmatprep.mubr.msk.f32.mxu1 %vm18003_vm0, %v17998_v37 }
0x26cc   :  { %16902 = vmatprep.subr.bf16.mxu1 %v18002_v38  ;;  %6609 = vmatprep.mubr.f32.mxu0 %v17998_v37 }
0x26d1   :  { %16114 = vmatmul.mubr.msk.f32.vlgmr.msra.gmra.mrb[44].mxu1 %vm496_vm6, %v7349_v50 }
0x26d2   :  { %16905 = vmatpush3.bf16.msk.msra.mxu1 %vm18122_vm4, %v19056_v54  ;;  %16120 = vmatprep.mubr.msk.f32.mxu1 %vm18003_vm0, %v17998_v37 }
0x26d3   :  { %16906 = vmatprep.subr.bf16.mxu1 %v18002_v38 }
0x26d9   :  { %16121 = vmatmul.mubr.msk.f32.vlgmr.msra.gmra.mrb[44].mxu1 %vm496_vm6, %v7424_v32 }
0x26da   :  { %16909 = vmatpush3.bf16.msk.msra.mxu1 %vm18122_vm4, %v19071_v63  ;;  %16127 = vmatprep.mubr.msk.f32.mxu1 %vm18003_vm0, %v17998_v37 }
0x26db   :  { %16910 = vmatprep.subr.bf16.mxu1 %v18002_v38 }
0x26e1   :  { %16128 = vmatmul.mubr.msk.f32.vlgmr.msra.gmra.mrb[44].mxu1 %vm496_vm6, %v7499_v28 }
0x26e2   :  { %16912 = vmatpush3.bf16.msra.mxu1 %v19472_v5  ;;  %16136 = vmatprep.mubr.msk.f32.mxu1 %vm18003_vm0, %v17998_v37 }
0x26e3   :  { %16134 = vmatprep.subr.mxu1 %v17998_v37 }
0x26e6   :  { %16135 = vmatpush3.msk.msra.mxu1 %vm5094_vm2, %v19482_v52 }
0x26e7   :  { %16913 = vmatprep.subr.bf16.mxu1 %v18002_v38 }
0x26e9   :  { %16137 = vmatmul.mubr.msk.f32.vlgmr.msra.gmra.mrb[44].mxu1 %vm5091_vm3, %v19276_v26 }
0x26ea   :  { %16915 = vmatpush3.bf16.msra.mxu1 %v19169_v43  ;;  %16145 = vmatprep.mubr.msk.f32.mxu1 %vm18003_vm0, %v17998_v37 }
0x26eb   :  { %16143 = vmatprep.subr.mxu1 %v17998_v37 }
0x26ee   :  { %16144 = vmatpush3.msk.msra.mxu1 %vm5094_vm2, %v19179_v56 }
0x26ef   :  { %16924 = vmatprep.subr.bf16.mxu1 %v18002_v38 }
0x2798   :  { %v6476_v6 = vpop.f32.mrb[42].mxu1 }
0x2799   :  { %v17330_v15 = vadd.f32 %v19087_v35, %v6476_v6  ;;  %v16064_v57 = vpop.f32.mrb[43].mxu1 }
0x279b   :  { %v14826_v7 = vmul.f32 -1.442695, %v17330_v15  ;;  %17786 = vtanh.f32 %v17330_v15 }
0x279d   :  { %17788 = vpow2.f32 %v14826_v7 }
0x27a5   :  { %v17787_v26 = vpop.eup %17786 }
0x27a6   :  { %6489 = vrot.lane.b32.xlu0 %v17787_v26, %s18004_s16  ;;  %v14828_v26 = vld [vmem:[%s21270_s9 + $0x128] sm:$0xff] }
0x27a7   :  { %v17789_v50 = vpop.eup %17788 }
0x27a8   :  { %v6484_v32 = vadd.f32 1.0, %v17789_v50  ;;  %v14832_v50 = vld [vmem:[%s21270_s9 + $0x148] sm:$0xff] }
0x27aa   :  { %17790 = vrcp.f32 %v6484_v32 }
0x27b4   :  { %v17791_v14 = vpop.eup %17790 }
0x27b5   :  { %v6503_v28 = vmul.f32 %v17791_v14, %v6501_v55  ;;  %v6493_v62 = vmul.f32 0.0, %v17791_v14  ;;  %v14836_v55 = vld [vmem:[%s21270_s9 + $0x168] sm:$0xf] }
0x27b7   :  { %6505 = vrot.lane.b32.xlu0 %v6503_v28, %s17993_s17  ;;  %6495 = vrot.lane.b32.xlu1 %v6493_v62, %s17994_s18  ;;  %v14827_v62 = vld [vmem:[%s21270_s9 + $0x120] sm:$0xff]  ;;  %v14830_v28 = vld [vmem:[%s21270_s9 + $0x138] sm:$0xff] }
0x2818   :  { %v6490_v61 = vpop.permute.xlu0 %6489 }
0x2819   :  { %v6492_v6 = vmul.f32 %v17791_v14, %v6490_v61  ;;  %v16859_v61 = vpack.c.bf16 %v14832_v50, %v14828_v26 }
0x281b   :  { %16860 = vmatprep.subr.bf16.mxu0 %v16859_v61  ;;  %v14829_v61 = vld [vmem:[%s21270_s9 + $0x130] sm:$0xff] }
0x2829   :  { %v6496_v57 = vpop.permute.xlu1 %6495  ;;  %v6506_v15 = vpop.permute.xlu0 %6505 }
0x282a   :  { %v6498_v3 = vadd.f32 %v6496_v57, %v6492_v6  ;;  %v14834_v6 = vld [vmem:[%s21270_s9 + $0x158] sm:$0xff]  ;;  %v14835_v57 = vld [vmem:[%s21270_s9 + $0x160] sm:$0xf] }
0x282c   :  { %v19500_v7 = vadd.f32 %v6506_v15, %v6498_v3  ;;  %v14831_v3 = vld [vmem:[%s21270_s9 + $0x140] sm:$0xff]  ;;  %v16863_v15 = vpack.c.bf16 %v14834_v6, %v14830_v28  ;;  %v14838_v28 = vld [vmem:[%s21270_s9 + $0x178] sm:$0xf] }
0x282d   :  { %v16861_v32 = vpack.c.bf16 %v14831_v3, %v14827_v62  ;;  %v14833_v3 = vld [vmem:[%s21270_s9 + $0x150] sm:$0xff]  ;;  %v6766_v6 = vld [vmem:[#allocation3 + $0x34] sm:$0x3] }
0x282e   :  { %17792 = vtanh.f32 %v19500_v7 }
0x282f   :  { %16862 = vmatpush1.bf16.msra.mxu0 %v16861_v32  ;;  %v16865_v32 = vpack.c.bf16 %v14833_v3, %v14829_v61 }
0x2830   :  { %14839 = vmatprep.subr.msk.mxu0 %vm5094_vm2, %v14836_v55 }
0x2833   :  { %14840 = vmatpush1.msk.msra.mxu0 %vm5094_vm2, %v14835_v57  ;;  %v6841_v57 = vld [vmem:[#allocation3 + $0x36] sm:$0x3] }
0x2834   :  { %16864 = vmatprep.subr.bf16.mxu0 %v16863_v15  ;;  %v6916_v15 = vld [vmem:[#allocation3 + $0x46] sm:$0x3] }
0x2838   :  { %v17793_v26 = vpop.eup %17792 }
0x2839   :  { %6511 = vrot.lane.b32.xlu1 %v17793_v26, %s18005_s20 }
0x283d   :  { %7077 = vrot.lane.b32.xlu1 %v19103_v18, %s18000_s28  ;;  %v14837_v18 = vld [vmem:[%s21270_s9 + $0x170] sm:$0xf] }
0x28ab   :  { %v6512_v50 = vpop.permute.xlu1 %6511 }
0x28ac   :  { %v6514_v62 = vmul.f32 %v17791_v14, %v6512_v50  ;;  %v6691_v14 = vld [vmem:[#allocation3 + $0x24] sm:$0x3] }
0x28ae   :  { %6529 = vrot.lane.b32.xlu0 %v6514_v62, %s18007_s22 }
0x2920   :  { %v19539_v55 = vpop.permute.xlu0 %6529 }
0x2921   :  { %14841 = vmatmul.mubr.msk.f32.vlgmr.msra.gmra.mrb[24].mxu0 %vm5091_vm3, %v19539_v55 }
0x2922   :  { %16866 = vmatpush1.bf16.msra.mxu0 %v16865_v32  ;;  %6680 = vmatprep.mubr.f32.mxu0 %v17998_v37 }
0x2923   :  { %14842 = vmatprep.subr.msk.mxu0 %vm5094_vm2, %v14838_v28 }
0x2926   :  { %14843 = vmatpush1.msk.msra.mxu0 %vm5094_vm2, %v14837_v18 }
0x2927   :  { %14844 = vmatmul.mubr.msk.f32.vlgmr.msra.gmra.mrb[26].mxu0 %vm5091_vm3, %v19539_v55  ;;  %16867 = vmatprep.subr.bf16.mxu0 %v18002_v38 }
0x2928   :  { %16870 = vmatpush3.bf16.msk.msra.mxu0 %vm18122_vm4, %v19026_v19  ;;  %16069 = vmatprep.mubr.msk.f32.mxu0 %vm18003_vm0, %v17998_v37 }
0x2929   :  { %16871 = vmatprep.subr.bf16.mxu0 %v18002_v38 }
0x292b   :  { %16070 = vmatmul.mubr.msk.f32.vlgmr.msra.gmra.mrb[28].mxu0 %vm496_vm6, %v6691_v14  ;;  %v7078_v14 = vpop.permute.xlu1 %7077 }
0x292c   :  { %16874 = vmatpush3.bf16.msk.msra.mxu0 %vm18122_vm4, %v19040_v36  ;;  %16076 = vmatprep.mubr.msk.f32.mxu0 %vm18003_vm0, %v17998_v37 }
0x292d   :  { %16875 = vmatprep.subr.bf16.mxu0 %v18002_v38 }
0x2933   :  { %16077 = vmatmul.mubr.msk.f32.vlgmr.msra.gmra.mrb[28].mxu0 %vm496_vm6, %v6766_v6 }
0x2934   :  { %16878 = vmatpush3.bf16.msk.msra.mxu0 %vm18122_vm4, %v19056_v54  ;;  %16083 = vmatprep.mubr.msk.f32.mxu0 %vm18003_vm0, %v17998_v37 }
0x2935   :  { %16879 = vmatprep.subr.bf16.mxu0 %v18002_v38 }
0x293b   :  { %16084 = vmatmul.mubr.msk.f32.vlgmr.msra.gmra.mrb[28].mxu0 %vm496_vm6, %v6841_v57 }
0x293c   :  { %16882 = vmatpush3.bf16.msk.msra.mxu0 %vm18122_vm4, %v19071_v63  ;;  %16090 = vmatprep.mubr.msk.f32.mxu0 %vm18003_vm0, %v17998_v37 }
0x293d   :  { %16883 = vmatprep.subr.bf16.mxu0 %v18002_v38 }
0x2943   :  { %16091 = vmatmul.mubr.msk.f32.vlgmr.msra.gmra.mrb[28].mxu0 %vm496_vm6, %v6916_v15 }
0x2944   :  { %16885 = vmatpush3.bf16.msra.mxu0 %v19472_v5  ;;  %16099 = vmatprep.mubr.msk.f32.mxu0 %vm18003_vm0, %v17998_v37 }
0x2945   :  { %16097 = vmatprep.subr.mxu0 %v17998_v37 }
0x2948   :  { %16098 = vmatpush3.msk.msra.mxu0 %vm5094_vm2, %v19482_v52 }
0x294b   :  { %16100 = vmatmul.mubr.msk.f32.vlgmr.msra.gmra.mrb[28].mxu0 %vm5091_vm3, %v19184_v42 }
0x294c   :  { %7192 = vmatprep.mubr.f32.mxu0 %v17998_v37 }
0x2a1e   :  { %v7060_v26 = vpop.f32.mrb[28].mxu0 }
0x2a1f   :  { %v17331_v50 = vadd.f32 %v19087_v35, %v7060_v26  ;;  %v16101_v62 = vpop.f32.mrb[29].mxu0 }
0x2a21   :  { %v14855_v61 = vmul.f32 -1.442695, %v17331_v50  ;;  %17794 = vtanh.f32 %v17331_v50 }
0x2a23   :  { %17796 = vpow2.f32 %v14855_v61  ;;  %v14857_v61 = vld [vmem:[%s21270_s9 + $0x188] sm:$0xff] }
0x2a2b   :  { %v17795_v3 = vpop.eup %17794 }
0x2a2c   :  { %7073 = vrot.lane.b32.xlu0 %v17795_v3, %s18004_s16  ;;  %v14861_v3 = vld [vmem:[%s21270_s9 + $0x1a8] sm:$0xff] }
0x2a2d   :  { %v17797_v32 = vpop.eup %17796 }
0x2a2e   :  { %v7068_v28 = vadd.f32 1.0, %v17797_v32  ;;  %v14856_v32 = vld [vmem:[%s21270_s9 + $0x180] sm:$0xff] }
0x2a30   :  { %17798 = vrcp.f32 %v7068_v28  ;;  %v16886_v28 = vpack.c.bf16 %v14861_v3, %v14857_v61 }
0x2a32   :  { %16887 = vmatprep.subr.bf16.mxu0 %v16886_v28  ;;  %v14862_v28 = vld [vmem:[%s21270_s9 + $0x1b0] sm:$0xff] }
0x2a3a   :  { %v17799_v18 = vpop.eup %17798 }
0x2a3b   :  { %v7086_v6 = vmul.f32 0.0, %v17799_v18  ;;  %v7080_v57 = vmul.f32 %v17799_v18, %v7078_v14  ;;  %v14860_v14 = vld [vmem:[%s21270_s9 + $0x1a0] sm:$0xff] }
0x2a3d   :  { %7088 = vrot.lane.b32.xlu0 %v7086_v6, %s17993_s17  ;;  %7082 = vrot.lane.b32.xlu1 %v7080_v57, %s17994_s18  ;;  %v16888_v6 = vpack.c.bf16 %v14860_v14, %v14856_v32  ;;  %v14865_v57 = vld [vmem:[%s21270_s9 + $0x1c8] sm:$0xf]  ;;  %v14858_v32 = vld [vmem:[%s21270_s9 + $0x190] sm:$0xff] }
0x2a3e   :  { %v16892_v14 = vpack.c.bf16 %v14862_v28, %v14858_v32 }
0x2a3f   :  { %16889 = vmatpush1.bf16.msra.mxu0 %v16888_v6 }
0x2a40   :  { %14868 = vmatprep.subr.msk.mxu0 %vm5094_vm2, %v14865_v57  ;;  %v7929_v57 = vld [vmem:[#allocation3 + $0x64] sm:$0x3] }
0x2a9e   :  { %v7074_v42 = vpop.permute.xlu0 %7073 }
0x2a9f   :  { %v7076_v35 = vmul.f32 %v17799_v18, %v7074_v42  ;;  %v14859_v42 = vld [vmem:[%s21270_s9 + $0x198] sm:$0xff] }
0x2aaf   :  { %v7083_v15 = vpop.permute.xlu1 %7082  ;;  %v7089_v50 = vpop.permute.xlu0 %7088 }
0x2ab0   :  { %v7085_v26 = vadd.f32 %v7083_v15, %v7076_v35  ;;  %v14863_v35 = vld [vmem:[%s21270_s9 + $0x1b8] sm:$0xff]  ;;  %v14864_v15 = vld [vmem:[%s21270_s9 + $0x1c0] sm:$0xf] }
0x2ab1   :  { %14869 = vmatpush1.msk.msra.mxu0 %vm5094_vm2, %v14864_v15  ;;  %v8154_v15 = vld [vmem:[#allocation3 + $0x86] sm:$0x3] }
0x2ab2   :  { %v19596_v62 = vadd.f32 %v7089_v50, %v7085_v26  ;;  %v16890_v26 = vpack.c.bf16 %v14863_v35, %v14859_v42  ;;  %v8004_v42 = vld [vmem:[#allocation3 + $0x74] sm:$0x3]  ;;  %v8079_v35 = vld [vmem:[#allocation3 + $0x76] sm:$0x3] }
0x2ab4   :  { %17800 = vtanh.f32 %v19596_v62  ;;  %16891 = vmatprep.subr.bf16.mxu0 %v16890_v26 }
0x2abe   :  { %v17801_v50 = vpop.eup %17800 }
0x2abf   :  { %7094 = vrot.lane.b32.xlu1 %v17801_v50, %s18005_s20  ;;  %v19702_v50 = vld [vmem:[%s21269_s8] ss:$0 sm:$0xff] }
0x2ac3   :  { %7728 = vrot.lane.b32.xlu1 %v19211_v17, %s18000_s28  ;;  %v14867_v17 = vld [vmem:[%s21270_s9 + $0x1d8] sm:$0xf] }
0x2b31   :  { %v7095_v61 = vpop.permute.xlu1 %7094 }
0x2b32   :  { %v7097_v3 = vmul.f32 %v17799_v18, %v7095_v61  ;;  %v14866_v18 = vld [vmem:[%s21270_s9 + $0x1d0] sm:$0xf] }
0x2b34   :  { %7112 = vrot.lane.b32.xlu0 %v7097_v3, %s18007_s22 }
0x2b38   :  { %7738 = vrot.lane.b32.xlu0 %v19596_v62, %s18006_s21 }
0x2ba6   :  { %v19637_v6 = vpop.permute.xlu0 %7112 }
0x2ba7   :  { %14870 = vmatmul.mubr.msk.f32.vlgmr.msra.gmra.mrb[24].mxu0 %vm5091_vm3, %v19637_v6  ;;  %16146 = vmatmul.mubr.msk.f32.vlgmr.msra.gmra.mrb[44].mxu1 %vm5091_vm3, %v19637_v6 }
0x2ba8   :  { %16893 = vmatpush1.bf16.msra.mxu0 %v16892_v14  ;;  %16927 = vmatpush3.bf16.msk.msra.mxu1 %vm18122_vm4, %v19026_v19 }
0x2ba9   :  { %14871 = vmatprep.subr.msk.mxu0 %vm5094_vm2, %v14867_v17  ;;  %16152 = vmatprep.mubr.msk.f32.mxu1 %vm18003_vm0, %v17998_v37  ;;  %v7729_v17 = vpop.permute.xlu1 %7728 }
0x2baa   :  { %7263 = vmatprep.mubr.f32.mxu0 %v17998_v37  ;;  %16928 = vmatprep.subr.bf16.mxu1 %v18002_v38 }
0x2bab   :  { %16153 = vmatmul.mubr.msk.f32.vlgmr.msra.gmra.mrb[46].mxu1 %vm496_vm6, %v7929_v57 }
0x2bac   :  { %14872 = vmatpush1.msk.msra.mxu0 %vm5094_vm2, %v14866_v18  ;;  %16931 = vmatpush3.bf16.msk.msra.mxu1 %vm18122_vm4, %v19040_v36  ;;  %v7739_v18 = vpop.permute.xlu0 %7738 }
0x2bad   :  { %14873 = vmatmul.mubr.msk.f32.vlgmr.msra.gmra.mrb[26].mxu0 %vm5091_vm3, %v19637_v6  ;;  %16159 = vmatprep.mubr.msk.f32.mxu1 %vm18003_vm0, %v17998_v37 }
0x2bae   :  { %16932 = vmatprep.subr.bf16.mxu1 %v18002_v38  ;;  %7847 = vmatprep.mubr.f32.mxu0 %v17998_v37 }
0x2bb3   :  { %16160 = vmatmul.mubr.msk.f32.vlgmr.msra.gmra.mrb[46].mxu1 %vm496_vm6, %v8004_v42 }
0x2bb4   :  { %16935 = vmatpush3.bf16.msk.msra.mxu1 %vm18122_vm4, %v19056_v54  ;;  %16166 = vmatprep.mubr.msk.f32.mxu1 %vm18003_vm0, %v17998_v37 }
0x2bb5   :  { %16936 = vmatprep.subr.bf16.mxu1 %v18002_v38 }
0x2bbb   :  { %16167 = vmatmul.mubr.msk.f32.vlgmr.msra.gmra.mrb[46].mxu1 %vm496_vm6, %v8079_v35 }
0x2bbc   :  { %16939 = vmatpush3.bf16.msk.msra.mxu1 %vm18122_vm4, %v19071_v63  ;;  %16173 = vmatprep.mubr.msk.f32.mxu1 %vm18003_vm0, %v17998_v37 }
0x2bbd   :  { %16940 = vmatprep.subr.bf16.mxu1 %v18002_v38 }
0x2bc3   :  { %16174 = vmatmul.mubr.msk.f32.vlgmr.msra.gmra.mrb[46].mxu1 %vm496_vm6, %v8154_v15 }
0x2bc4   :  { %16942 = vmatpush3.bf16.msra.mxu1 %v19472_v5  ;;  %16182 = vmatprep.mubr.msk.f32.mxu1 %vm18003_vm0, %v17998_v37 }
0x2bc5   :  { %16180 = vmatprep.subr.mxu1 %v17998_v37 }
0x2bc8   :  { %16181 = vmatpush3.msk.msra.mxu1 %vm5094_vm2, %v19482_v52 }
0x2bc9   :  { %16943 = vmatprep.subr.bf16.mxu1 %v18002_v38 }
0x2bcb   :  { %16183 = vmatmul.mubr.msk.f32.vlgmr.msra.gmra.mrb[46].mxu1 %vm5091_vm3, %v19421_v13 }
0x2bcc   :  { %16945 = vmatpush3.bf16.msra.mxu1 %v19169_v43  ;;  %16191 = vmatprep.mubr.msk.f32.mxu1 %vm18003_vm0, %v17998_v37 }
0x2bcd   :  { %16189 = vmatprep.subr.mxu1 %v17998_v37 }
0x2bd0   :  { %16190 = vmatpush3.msk.msra.mxu1 %vm5094_vm2, %v19179_v56 }
0x2bd1   :  { %16984 = vmatprep.subr.bf16.mxu1 %v18002_v38 }
0x2c7a   :  { %v7711_v26 = vpop.f32.mrb[44].mxu1 }
0x2c7b   :  { %v17332_v13 = vadd.f32 %v19702_v50, %v7711_v26  ;;  %v16147_v61 = vpop.f32.mrb[45].mxu1 }
0x2c7d   :  { %v14886_v3 = vmul.f32 -1.442695, %v17332_v13  ;;  %17802 = vtanh.f32 %v17332_v13 }
0x2c7f   :  { %17804 = vpow2.f32 %v14886_v3 }
0x2c87   :  { %v17803_v32 = vpop.eup %17802 }
0x2c88   :  { %7724 = vrot.lane.b32.xlu1 %v17803_v32, %s18004_s16 }
0x2c89   :  { %v17805_v28 = vpop.eup %17804 }
0x2c8a   :  { %v7719_v14 = vadd.f32 1.0, %v17805_v28 }
0x2c8c   :  { %17806 = vrcp.f32 %v7719_v14 }
0x2c96   :  { %v17807_v56 = vpop.eup %17806 }
0x2c97   :  { %v7741_v57 = vmul.f32 %v17807_v56, %v7739_v18  ;;  %v7731_v42 = vmul.f32 %v17807_v56, %v7729_v17  ;;  %v14891_v17 = vld [vmem:[%s21270_s9 + $0x200] sm:$0xff] }
0x2c99   :  { %7743 = vrot.lane.b32.xlu1 %v7741_v57, %s17993_s17  ;;  %7733 = vrot.lane.b32.xlu0 %v7731_v42, %s17994_s18  ;;  %v14896_v57 = vld [vmem:[%s21270_s9 + $0x228] sm:$0xf]  ;;  %v14890_v42 = vld [vmem:[%s21270_s9 + $0x1f8] sm:$0xff] }
0x2c9d   :  { %1620 = vrot.lane.b32.xlu1 %v18508_v2, %s17999_s23  ;;  %v14888_v2 = vld [vmem:[%s21270_s9 + $0x1e8] sm:$0xff] }
0x2ca1   :  { %1900 = vrot.lane.b32.xlu1 %v18577_v29, %s17999_s23  ;;  %v14892_v29 = vld [vmem:[%s21270_s9 + $0x208] sm:$0xff] }
0x2ca2   :  { %v16916_v14 = vpack.c.bf16 %v14892_v29, %v14888_v2  ;;  %v14893_v2 = vld [vmem:[%s21270_s9 + $0x210] sm:$0xff] }
0x2ca4   :  { %16917 = vmatprep.subr.bf16.mxu0 %v16916_v14 }
0x2ca5   :  { %9623 = vrot.lane.b32.xlu1 %v19596_v62, %s18000_s28  ;;  %v14887_v62 = vld [vmem:[%s21270_s9 + $0x1e0] sm:$0xff] }
0x2ca6   :  { %v16918_v18 = vpack.c.bf16 %v14891_v17, %v14887_v62 }
0x2ca8   :  { %16919 = vmatpush1.bf16.msra.mxu0 %v16918_v18 }
0x2ca9   :  { %14899 = vmatprep.subr.msk.mxu0 %vm5094_vm2, %v14896_v57 }
0x2cfa   :  { %v7725_v35 = vpop.permute.xlu1 %7724 }
0x2cfb   :  { %v7727_v15 = vmul.f32 %v17807_v56, %v7725_v35  ;;  %v14894_v35 = vld [vmem:[%s21270_s9 + $0x218] sm:$0xff] }
0x2d0b   :  { %v7744_v26 = vpop.permute.xlu1 %7743  ;;  %v7734_v13 = vpop.permute.xlu0 %7733 }
0x2d0c   :  { %v7736_v61 = vadd.f32 %v7734_v13, %v7727_v15  ;;  %v14895_v15 = vld [vmem:[%s21270_s9 + $0x220] sm:$0xf] }
0x2d0d   :  { %14900 = vmatpush1.msk.msra.mxu0 %vm5094_vm2, %v14895_v15  ;;  %v9970_v15 = vld [vmem:[#allocation3 + $0x7a] sm:$0x3] }
0x2d0e   :  { %v19714_v3 = vadd.f32 %v7744_v26, %v7736_v61  ;;  %v16920_v26 = vpack.c.bf16 %v14894_v35, %v14890_v42 }
0x2d0f   :  { %v1621_v32 = vpop.permute.xlu1 %1620 }
0x2d10   :  { %17808 = vtanh.f32 %v19714_v3  ;;  %1625 = vst.msk [vmem:[#allocation3 + $0x48] sm:$0xff] %vm496_vm6, %v1621_v32  ;;  %16921 = vmatprep.subr.bf16.mxu0 %v16920_v26 }
0x2d13   :  { %v1901_v28 = vpop.permute.xlu1 %1900 }
0x2d14   :  { %1905 = vst.msk [vmem:[#allocation3 + $0x58] sm:$0xff] %vm496_vm6, %v1901_v28  ;;  %v14889_v28 = vld [vmem:[%s21270_s9 + $0x1f0] sm:$0xff] }
0x2d15   :  { %v16922_v29 = vpack.c.bf16 %v14893_v2, %v14889_v28 }
0x2d17   :  { %v9240_v17 = vld [vmem:[#allocation3 + $0x48] sm:$0x3] }
0x2d1a   :  { %v17809_v13 = vpop.eup %17808 }
0x2d1b   :  { %7749 = vrot.lane.b32.xlu0 %v17809_v13, %s18005_s20  ;;  %v9315_v18 = vld [vmem:[#allocation3 + $0x58] sm:$0x3]  ;;  %v9390_v57 = vld [vmem:[#allocation3 + $0x5a] sm:$0x3] }
0x2d8d   :  { %v7750_v61 = vpop.permute.xlu0 %7749 }
0x2d8e   :  { %v7752_v32 = vmul.f32 %v17807_v56, %v7750_v61  ;;  %v14898_v56 = vld [vmem:[%s21270_s9 + $0x238] sm:$0xf] }
0x2d90   :  { %7767 = vrot.lane.b32.xlu0 %v7752_v32, %s18007_s22 }
0x2d94   :  { %2180 = vrot.lane.b32.xlu0 %v18649_v11, %s17999_s23  ;;  %v14897_v11 = vld [vmem:[%s21270_s9 + $0x230] sm:$0xf] }
0x2e02   :  { %v19755_v62 = vpop.permute.xlu0 %7767 }
0x2e03   :  { %14901 = vmatmul.mubr.msk.f32.vlgmr.msra.gmra.mrb[24].mxu0 %vm5091_vm3, %v19755_v62  ;;  %16192 = vmatmul.mubr.msk.f32.vlgmr.msra.gmra.mrb[46].mxu1 %vm5091_vm3, %v19755_v62 }
0x2e04   :  { %16923 = vmatpush1.bf16.msra.mxu0 %v16922_v29  ;;  %16987 = vmatpush3.bf16.msk.msra.mxu1 %vm18122_vm4, %v19026_v19 }
0x2e05   :  { %14902 = vmatprep.subr.msk.mxu0 %vm5094_vm2, %v14898_v56  ;;  %16244 = vmatprep.mubr.msk.f32.mxu1 %vm18003_vm0, %v17998_v37 }
0x2e06   :  { %v2181_v14 = vpop.permute.xlu0 %2180  ;;  %7918 = vmatprep.mubr.f32.mxu0 %v17998_v37  ;;  %16988 = vmatprep.subr.bf16.mxu1 %v18002_v38 }
0x2e07   :  { %2185 = vst.msk [vmem:[#allocation3 + $0x68] sm:$0xff] %vm496_vm6, %v2181_v14  ;;  %16245 = vmatmul.mubr.msk.f32.vlgmr.msra.gmra.mrb[48].mxu1 %vm496_vm6, %v9240_v17  ;;  %v9624_v17 = vpop.permute.xlu1 %9623 }
0x2e08   :  { %14903 = vmatpush1.msk.msra.mxu0 %vm5094_vm2, %v14897_v11  ;;  %16991 = vmatpush3.bf16.msk.msra.mxu1 %vm18122_vm4, %v19040_v36 }
0x2e09   :  { %14904 = vmatmul.mubr.msk.f32.vlgmr.msra.gmra.mrb[26].mxu0 %vm5091_vm3, %v19755_v62  ;;  %16251 = vmatprep.mubr.msk.f32.mxu1 %vm18003_vm0, %v17998_v37 }
0x2e0a   :  { %16992 = vmatprep.subr.bf16.mxu1 %v18002_v38  ;;  %8502 = vmatprep.mubr.f32.mxu0 %v17998_v37 }
0x2e0e   :  { %v9465_v42 = vld [vmem:[#allocation3 + $0x6a] sm:$0x3]  ;;  %v9820_v35 = vld [vmem:[#allocation3 + $0x68] sm:$0x3] }
0x2e0f   :  { %16252 = vmatmul.mubr.msk.f32.vlgmr.msra.gmra.mrb[48].mxu1 %vm496_vm6, %v9315_v18 }
0x2e10   :  { %16995 = vmatpush3.bf16.msk.msra.mxu1 %vm18122_vm4, %v19056_v54  ;;  %16258 = vmatprep.mubr.msk.f32.mxu1 %vm18003_vm0, %v17998_v37 }
0x2e11   :  { %16996 = vmatprep.subr.bf16.mxu1 %v18002_v38 }
0x2e17   :  { %16259 = vmatmul.mubr.msk.f32.vlgmr.msra.gmra.mrb[48].mxu1 %vm496_vm6, %v9390_v57 }
0x2e18   :  { %16999 = vmatpush3.bf16.msk.msra.mxu1 %vm18122_vm4, %v19071_v63  ;;  %16265 = vmatprep.mubr.msk.f32.mxu1 %vm18003_vm0, %v17998_v37 }
0x2e19   :  { %17000 = vmatprep.subr.bf16.mxu1 %v18002_v38 }
0x2e1f   :  { %16266 = vmatmul.mubr.msk.f32.vlgmr.msra.gmra.mrb[48].mxu1 %vm496_vm6, %v9465_v42 }
0x2e20   :  { %17002 = vmatpush3.bf16.msra.mxu1 %v19472_v5  ;;  %16274 = vmatprep.mubr.msk.f32.mxu1 %vm18003_vm0, %v17998_v37 }
0x2e21   :  { %16272 = vmatprep.subr.mxu1 %v17998_v37 }
0x2e24   :  { %16273 = vmatpush3.msk.msra.mxu1 %vm5094_vm2, %v19482_v52 }
0x2e25   :  { %17011 = vmatprep.subr.bf16.mxu1 %v18002_v38 }
0x2e27   :  { %16275 = vmatmul.mubr.msk.f32.vlgmr.msra.gmra.mrb[48].mxu1 %vm5091_vm3, %v19637_v6  ;;  %v9895_v6 = vld [vmem:[#allocation3 + $0x78] sm:$0x3] }
0x2e28   :  { %17014 = vmatpush3.bf16.msk.msra.mxu1 %vm18122_vm4, %v19026_v19  ;;  %16281 = vmatprep.mubr.msk.f32.mxu1 %vm18003_vm0, %v17998_v37 }
0x2e29   :  { %17015 = vmatprep.subr.bf16.mxu1 %v18002_v38 }
0x2e2b   :  { %16282 = vmatmul.mubr.msk.f32.vlgmr.msra.gmra.mrb[50].mxu1 %vm496_vm6, %v9820_v35 }
0x2e2c   :  { %17018 = vmatpush3.bf16.msk.msra.mxu1 %vm18122_vm4, %v19040_v36  ;;  %16288 = vmatprep.mubr.msk.f32.mxu1 %vm18003_vm0, %v17998_v37 }
0x2e2d   :  { %17019 = vmatprep.subr.bf16.mxu1 %v18002_v38 }
0x2e33   :  { %16289 = vmatmul.mubr.msk.f32.vlgmr.msra.gmra.mrb[50].mxu1 %vm496_vm6, %v9895_v6 }
0x2e34   :  { %17022 = vmatpush3.bf16.msk.msra.mxu1 %vm18122_vm4, %v19056_v54  ;;  %16295 = vmatprep.mubr.msk.f32.mxu1 %vm18003_vm0, %v17998_v37 }
0x2e35   :  { %17023 = vmatprep.subr.bf16.mxu1 %v18002_v38 }
0x2e3b   :  { %16296 = vmatmul.mubr.msk.f32.vlgmr.msra.gmra.mrb[50].mxu1 %vm496_vm6, %v9970_v15 }
0x2e3c   :  { %17026 = vmatpush3.bf16.msk.msra.mxu1 %vm18122_vm4, %v19071_v63  ;;  %16302 = vmatprep.mubr.msk.f32.mxu1 %vm18003_vm0, %v17998_v37 }
0x2e3d   :  { %17027 = vmatprep.subr.bf16.mxu1 %v18002_v38 }
0x2ed6   :  { %v8366_v26 = vpop.f32.mrb[46].mxu1 }
0x2ed7   :  { %v16193_v13 = vpop.f32.mrb[47].mxu1  ;;  %v17333_v42 = vadd.f32 %v19702_v50, %v8366_v26 }
0x2efa   :  { %v9606_v61 = vpop.f32.mrb[48].mxu1 }
0x2efb   :  { %v17335_v32 = vadd.f32 %v19702_v50, %v9606_v61  ;;  %v16276_v28 = vpop.f32.mrb[49].mxu1 }
0x2efd   :  { %v14977_v2 = vmul.f32 -1.442695, %v17335_v32  ;;  %17810 = vtanh.f32 %v17335_v32 }
0x2eff   :  { %17812 = vpow2.f32 %v14977_v2  ;;  %v19872_v2 = vld [vmem:[%s21268_s7 + $0x10] sm:$0xf] }
0x2f07   :  { %v17811_v29 = vpop.eup %17810 }
0x2f08   :  { %9619 = vrot.lane.b32.xlu0 %v17811_v29, %s18004_s16  ;;  %v14917_v29 = vmul.f32 -1.442695, %v17333_v42 }
0x2f09   :  { %v17813_v56 = vpop.eup %17812 }
0x2f0a   :  { %v9614_v11 = vadd.f32 1.0, %v17813_v56 }
0x2f0c   :  { %17814 = vrcp.f32 %v9614_v11 }
0x2f0d   :  { %17816 = vtanh.f32 %v17333_v42 }
0x2f16   :  { %v17815_v14 = vpop.eup %17814 }
0x2f17   :  { %v9632_v18 = vmul.f32 0.0, %v17815_v14  ;;  %v9626_v57 = vmul.f32 %v17815_v14, %v9624_v17  ;;  %v17817_v35 = vpop.eup %17816 }
0x2f19   :  { %9634 = vrot.lane.b32.xlu0 %v9632_v18, %s17993_s17  ;;  %9628 = vrot.lane.b32.xlu1 %v9626_v57, %s17994_s18 }
0x2f1d   :  { %2724 = vrot.lane.b32.xlu0 %v18758_v9, %s17999_s23 }
0x2f21   :  { %8383 = vrot.lane.b32.xlu0 %v19373_v33, %s18000_s28 }
0x2f25   :  { %10274 = vrot.lane.b32.xlu0 %v19714_v3, %s18000_s28 }
0x2f29   :  { %8379 = vrot.lane.b32.xlu0 %v17817_v35, %s18004_s16 }
0x2f7a   :  { %v9620_v6 = vpop.permute.xlu0 %9619 }
0x2f7b   :  { %v9622_v15 = vmul.f32 %v17815_v14, %v9620_v6 }
0x2f8b   :  { %v9635_v13 = vpop.permute.xlu0 %9634  ;;  %v9629_v61 = vpop.permute.xlu1 %9628 }
0x2f8c   :  { %v9631_v32 = vadd.f32 %v9629_v61, %v9622_v15 }
0x2f8e   :  { %v19850_v28 = vadd.f32 %v9635_v13, %v9631_v32 }
0x2f8f   :  { %v2725_v26 = vpop.permute.xlu0 %2724 }
0x2f90   :  { %17818 = vtanh.f32 %v19850_v28  ;;  %2729 = vst.msk [vmem:[#allocation3 + $0x88] sm:$0xff] %vm496_vm6, %v2725_v26 }
0x2f91   :  { %17820 = vpow2.f32 %v14917_v29 }
0x2f93   :  { %v8384_v18 = vpop.permute.xlu0 %8383 }
0x2f97   :  { %v10045_v9 = vld [vmem:[#allocation3 + $0x8a] sm:$0x3]  ;;  %v10275_v26 = vpop.permute.xlu0 %10274 }
0x2f98   :  { %16303 = vmatmul.mubr.msk.f32.vlgmr.msra.gmra.mrb[50].mxu1 %vm496_vm6, %v10045_v9 }
0x2f99   :  { %17029 = vmatpush3.bf16.msra.mxu1 %v19472_v5  ;;  %16311 = vmatprep.mubr.msk.f32.mxu1 %vm18003_vm0, %v17998_v37 }
0x2f9a   :  { %v17819_v33 = vpop.eup %17818  ;;  %16309 = vmatprep.subr.mxu1 %v17998_v37 }
0x2f9b   :  { %9640 = vrot.lane.b32.xlu1 %v17819_v33, %s18005_s20  ;;  %v8380_v29 = vpop.permute.xlu0 %8379 }
0x2f9d   :  { %16310 = vmatpush3.msk.msra.mxu1 %vm5094_vm2, %v19482_v52 }
0x2f9e   :  { %17030 = vmatprep.subr.bf16.mxu1 %v18002_v38 }
0x2fa0   :  { %16312 = vmatmul.mubr.msk.f32.vlgmr.msra.gmra.mrb[50].mxu1 %vm5091_vm3, %v19755_v62  ;;  %v17821_v62 = vpop.eup %17820 }
0x2fa1   :  { %17032 = vmatpush3.bf16.msra.mxu1 %v19169_v43  ;;  %16320 = vmatprep.mubr.msk.f32.mxu1 %vm18003_vm0, %v17998_v37  ;;  %v8374_v56 = vadd.f32 1.0, %v17821_v62 }
0x2fa2   :  { %16318 = vmatprep.subr.mxu1 %v17998_v37 }
0x2fa3   :  { %17822 = vrcp.f32 %v8374_v56 }
0x2fa5   :  { %16319 = vmatpush3.msk.msra.mxu1 %vm5094_vm2, %v19872_v2 }
0x2fa6   :  { %17041 = vmatprep.subr.bf16.mxu1 %v18002_v38 }
0x2fad   :  { %v19882_v57 = vpop.eup %17822 }
0x2fae   :  { %v8386_v35 = vmul.f32 %v19882_v57, %v8384_v18 }
0x300d   :  { %v9641_v11 = vpop.permute.xlu1 %9640 }
0x300e   :  { %v9643_v17 = vmul.f32 %v17815_v14, %v9641_v11  ;;  %v10475_v14 = vld [vmem:[#allocation3 + $0x88] sm:$0x3]  ;;  %v8382_v11 = vmul.f32 %v19882_v57, %v8380_v29 }
0x3010   :  { %9658 = vrot.lane.b32.xlu1 %v9643_v17, %s18007_s22 }
0x3014   :  { %8393 = vrot.lane.b32.xlu1 %v19714_v3, %s18006_s21 }
0x3018   :  { %10284 = vrot.lane.b32.xlu1 %v19850_v28, %s18006_s21 }
0x301c   :  { %8388 = vrot.lane.b32.xlu1 %v8386_v35, %s17994_s18 }
0x3082   :  { %v19886_v42 = vpop.permute.xlu1 %9658 }
0x3083   :  { %16321 = vmatmul.mubr.msk.f32.vlgmr.msra.gmra.mrb[50].mxu1 %vm5091_vm3, %v19886_v42 }
0x3084   :  { %17044 = vmatpush3.bf16.msk.msra.mxu1 %vm18122_vm4, %v19026_v19  ;;  %16327 = vmatprep.mubr.msk.f32.mxu1 %vm18003_vm0, %v17998_v37 }
0x3085   :  { %17045 = vmatprep.subr.bf16.mxu1 %v18002_v38 }
0x3086   :  { %v8394_v3 = vpop.permute.xlu1 %8393 }
0x3087   :  { %v8396_v6 = vmul.f32 %v19882_v57, %v8394_v3  ;;  %16328 = vmatmul.mubr.msk.f32.vlgmr.msra.gmra.mrb[52].mxu1 %vm496_vm6, %v10475_v14 }
0x3088   :  { %17048 = vmatpush3.bf16.msk.msra.mxu1 %vm18122_vm4, %v19040_v36  ;;  %16334 = vmatprep.mubr.msk.f32.mxu1 %vm18003_vm0, %v17998_v37 }
0x3089   :  { %8398 = vrot.lane.b32.xlu0 %v8396_v6, %s17993_s17  ;;  %17049 = vmatprep.subr.bf16.mxu1 %v18002_v38 }
0x308a   :  { %v10285_v9 = vpop.permute.xlu1 %10284 }
0x308e   :  { %v8389_v56 = vpop.permute.xlu1 %8388 }
0x308f   :  { %v8391_v35 = vadd.f32 %v8389_v56, %v8382_v11  ;;  %v14925_v56 = vld [vmem:[%s21270_s9 + $0x278] sm:$0xff]  ;;  %v14926_v11 = vld [vmem:[%s21270_s9 + $0x280] sm:$0xf] }
0x30fb   :  { %v8399_v18 = vpop.permute.xlu0 %8398 }
0x30fc   :  { %v19908_v3 = vadd.f32 %v8399_v18, %v8391_v35 }
0x3156   :  { %v10257_v15 = vpop.f32.mrb[50].mxu1 }
0x3157   :  { %v17336_v13 = vadd.f32 %v19702_v50, %v10257_v15  ;;  %v16322_v61 = vpop.f32.mrb[51].mxu1 }
0x3158   :  { %v14919_v61 = vld [vmem:[%s21270_s9 + $0x248] sm:$0xff] }
0x3159   :  { %v15008_v32 = vmul.f32 -1.442695, %v17336_v13  ;;  %17824 = vtanh.f32 %v17336_v13 }
0x315b   :  { %17826 = vpow2.f32 %v15008_v32  ;;  %v14923_v32 = vld [vmem:[%s21270_s9 + $0x268] sm:$0xff] }
0x3163   :  { %v17825_v33 = vpop.eup %17824 }
0x3164   :  { %10270 = vrot.lane.b32.xlu1 %v17825_v33, %s18004_s16  ;;  %v14922_v33 = vld [vmem:[%s21270_s9 + $0x260] sm:$0xff] }
0x3165   :  { %v17827_v62 = vpop.eup %17826 }
0x3166   :  { %v10265_v17 = vadd.f32 1.0, %v17827_v62  ;;  %v14921_v62 = vld [vmem:[%s21270_s9 + $0x258] sm:$0xff] }
0x3168   :  { %17828 = vrcp.f32 %v10265_v17  ;;  %v16950_v17 = vpack.c.bf16 %v14925_v56, %v14921_v62  ;;  %v14929_v62 = vld [vmem:[%s21270_s9 + $0x298] sm:$0xf]  ;;  %v14928_v56 = vld [vmem:[%s21270_s9 + $0x290] sm:$0xf] }
0x3169   :  { %17830 = vtanh.f32 %v19908_v3 }
0x3172   :  { %v19911_v14 = vpop.eup %17828 }
0x3173   :  { %v10287_v6 = vmul.f32 %v19911_v14, %v10285_v9  ;;  %v10277_v15 = vmul.f32 %v19911_v14, %v10275_v26  ;;  %v17831_v13 = vpop.eup %17830  ;;  %v14918_v26 = vld [vmem:[%s21270_s9 + $0x240] sm:$0xff]  ;;  %v16946_v9 = vpack.c.bf16 %v14923_v32, %v14919_v61 }
0x3174   :  { %v16948_v29 = vpack.c.bf16 %v14922_v33, %v14918_v26 }
0x3175   :  { %10289 = vrot.lane.b32.xlu1 %v10287_v6, %s17993_s17  ;;  %10279 = vrot.lane.b32.xlu0 %v10277_v15, %s17994_s18 }
0x3176   :  { %16947 = vmatprep.subr.bf16.mxu0 %v16946_v9 }
0x3177   :  { %16949 = vmatpush1.bf16.msra.mxu0 %v16948_v29 }
0x3179   :  { %8404 = vrot.lane.b32.xlu0 %v17831_v13, %s18005_s20 }
0x317d   :  { %3006 = vrot.lane.b32.xlu0 %v18816_v44, %s17999_s23  ;;  %v14927_v44 = vld [vmem:[%s21270_s9 + $0x288] sm:$0xf] }
0x317e   :  { %14930 = vmatprep.subr.msk.mxu0 %vm5094_vm2, %v14927_v44 }
0x317f   :  { %14931 = vmatpush1.msk.msra.mxu0 %vm5094_vm2, %v14926_v11 }
0x3180   :  { %16951 = vmatprep.subr.bf16.mxu0 %v16950_v17 }
0x31d6   :  { %v10271_v18 = vpop.permute.xlu1 %10270 }
0x31d7   :  { %v10273_v35 = vmul.f32 %v19911_v14, %v10271_v18 }
0x31e7   :  { %v10280_v6 = vpop.permute.xlu0 %10279  ;;  %v10290_v13 = vpop.permute.xlu1 %10289 }
0x31e8   :  { %v10282_v15 = vadd.f32 %v10280_v6, %v10273_v35  ;;  %v8584_v6 = vld [vmem:[#allocation3 + $0x84] sm:$0x3] }
0x31ea   :  { %v19947_v61 = vadd.f32 %v10290_v13, %v10282_v15  ;;  %v11786_v13 = vld [vmem:[#allocation3 + $0x6c] sm:$0x3] }
0x31eb   :  { %v8405_v32 = vpop.permute.xlu0 %8404 }
0x31ec   :  { %17832 = vtanh.f32 %v19947_v61  ;;  %v8407_v26 = vmul.f32 %v19882_v57, %v8405_v32 }
0x31ee   :  { %8422 = vrot.lane.b32.xlu0 %v8407_v26, %s18007_s22  ;;  %v11861_v26 = vld [vmem:[#allocation3 + $0x7c] sm:$0x3] }
0x31ef   :  { %v3007_v9 = vpop.permute.xlu0 %3006 }
0x31f0   :  { %3011 = vst.msk [vmem:[#allocation3 + $0x98] sm:$0xff] %vm496_vm6, %v3007_v9 }
0x31f2   :  { %12169 = vrot.lane.b32.xlu0 %v19850_v28, %s18000_s28 }
0x31f6   :  { %v17833_v33 = vpop.eup %17832  ;;  %3284 = vrot.lane.b32.xlu0 %v18879_v25, %s17999_s23  ;;  %v14920_v25 = vld [vmem:[%s21270_s9 + $0x250] sm:$0xff] }
0x31f7   :  { %10295 = vrot.lane.b32.xlu1 %v17833_v33, %s18005_s20  ;;  %v10550_v29 = vld [vmem:[#allocation3 + $0x98] sm:$0x3]  ;;  %v10625_v28 = vld [vmem:[#allocation3 + $0x9a] sm:$0x3]  ;;  %v11936_v33 = vld [vmem:[#allocation3 + $0x7e] sm:$0x3] }
0x31f8   :  { %16335 = vmatmul.mubr.msk.f32.vlgmr.msra.gmra.mrb[52].mxu1 %vm496_vm6, %v10550_v29 }
0x31f9   :  { %17052 = vmatpush3.bf16.msk.msra.mxu1 %vm18122_vm4, %v19056_v54  ;;  %16341 = vmatprep.mubr.msk.f32.mxu1 %vm18003_vm0, %v17998_v37 }
0x31fa   :  { %17053 = vmatprep.subr.bf16.mxu1 %v18002_v38 }
0x31fb   :  { %3286 = vrot.lane.b32.xlu1 %v18874_v20, %s17999_s23  ;;  %v14924_v20 = vld [vmem:[%s21270_s9 + $0x270] sm:$0xff] }
0x31fc   :  { %v16952_v57 = vpack.c.bf16 %v14924_v20, %v14920_v25  ;;  %v20093_v25 = vld [vmem:[%s21267_s6 + $0x10] sm:$0xf]  ;;  %v12366_v20 = vld [vmem:[#allocation3 + $0x8c] sm:$0x3] }
0x3200   :  { %16342 = vmatmul.mubr.msk.f32.vlgmr.msra.gmra.mrb[52].mxu1 %vm496_vm6, %v10625_v28  ;;  %v12011_v28 = vld [vmem:[#allocation3 + $0x8e] sm:$0x3] }
0x3201   :  { %17056 = vmatpush3.bf16.msk.msra.mxu1 %vm18122_vm4, %v19071_v63  ;;  %16348 = vmatprep.mubr.msk.f32.mxu1 %vm18003_vm0, %v17998_v37 }
0x3202   :  { %17057 = vmatprep.subr.bf16.mxu1 %v18002_v38 }
0x3260   :  { %v19980_v44 = vpop.permute.xlu0 %8422 }
0x3261   :  { %14932 = vmatmul.mubr.msk.f32.vlgmr.msra.gmra.mrb[24].mxu0 %vm5091_vm3, %v19980_v44 }
0x3262   :  { %16953 = vmatpush1.bf16.msra.mxu0 %v16952_v57  ;;  %8573 = vmatprep.mubr.f32.mxu0 %v17998_v37  ;;  %v12516_v57 = vld [vmem:[#allocation3 + $0x9e] sm:$0x3] }
0x3263   :  { %14933 = vmatprep.subr.msk.mxu0 %vm5094_vm2, %v14929_v62 }
0x3264   :  { %v19992_v11 = vpop.permute.xlu0 %12169 }
0x3266   :  { %14934 = vmatpush1.msk.msra.mxu0 %vm5094_vm2, %v14928_v56 }
0x3267   :  { %14935 = vmatmul.mubr.msk.f32.vlgmr.msra.gmra.mrb[26].mxu0 %vm5091_vm3, %v19980_v44  ;;  %16954 = vmatprep.subr.bf16.mxu0 %v18002_v38 }
0x3268   :  { %16957 = vmatpush3.bf16.msk.msra.mxu0 %vm18122_vm4, %v19026_v19  ;;  %v3285_v17 = vpop.permute.xlu0 %3284  ;;  %16198 = vmatprep.mubr.msk.f32.mxu0 %vm18003_vm0, %v17998_v37 }
0x3269   :  { %3290 = vst.msk [vmem:[#allocation3 + $0xa0] sm:$0xff] %vm496_vm6, %v3285_v17  ;;  %v10296_v18 = vpop.permute.xlu1 %10295  ;;  %16958 = vmatprep.subr.bf16.mxu0 %v18002_v38 }
0x326a   :  { %v10298_v35 = vmul.f32 %v19911_v14, %v10296_v18 }
0x326b   :  { %16199 = vmatmul.mubr.msk.f32.vlgmr.msra.gmra.mrb[30].mxu0 %vm496_vm6, %v8584_v6 }
0x326c   :  { %10313 = vrot.lane.b32.xlu1 %v10298_v35, %s18007_s22  ;;  %16961 = vmatpush3.bf16.msk.msra.mxu0 %vm18122_vm4, %v19040_v36 }
0x326d   :  { %v3287_v15 = vpop.permute.xlu1 %3286  ;;  %16205 = vmatprep.mubr.msk.f32.mxu0 %vm18003_vm0, %v17998_v37  ;;  %16962 = vmatprep.subr.bf16.mxu0 %v18002_v38 }
0x326e   :  { %3291 = vst.msk [vmem:[#allocation3 + $0xa8] sm:$0xff] %vm496_vm6, %v3287_v15 }
0x3270   :  { %3004 = vrot.lane.b32.xlu1 %v18819_v47, %s17999_s23  ;;  %v8809_v29 = vld [vmem:[#allocation3 + $0xa6] sm:$0x3] }
0x3275   :  { %v10700_v14 = vld [vmem:[#allocation3 + $0xaa] sm:$0x3] }
0x3276   :  { %16349 = vmatmul.mubr.msk.f32.vlgmr.msra.gmra.mrb[52].mxu1 %vm496_vm6, %v10700_v14 }
0x3277   :  { %17059 = vmatpush3.bf16.msra.mxu1 %v19472_v5  ;;  %16357 = vmatprep.mubr.msk.f32.mxu1 %vm18003_vm0, %v17998_v37 }
0x3278   :  { %16355 = vmatprep.subr.mxu1 %v17998_v37 }
0x327b   :  { %16356 = vmatpush3.msk.msra.mxu1 %vm5094_vm2, %v19482_v52 }
0x327c   :  { %17060 = vmatprep.subr.bf16.mxu1 %v18002_v38 }
0x327e   :  { %16358 = vmatmul.mubr.msk.f32.vlgmr.msra.gmra.mrb[52].mxu1 %vm5091_vm3, %v19980_v44 }
0x327f   :  { %17062 = vmatpush3.bf16.msra.mxu1 %v19169_v43  ;;  %16366 = vmatprep.mubr.msk.f32.mxu1 %vm18003_vm0, %v17998_v37 }
0x3280   :  { %16364 = vmatprep.subr.mxu1 %v17998_v37 }
0x3283   :  { %16365 = vmatpush3.msk.msra.mxu1 %vm5094_vm2, %v19872_v2 }
0x3284   :  { %17101 = vmatprep.subr.bf16.mxu1 %v18002_v38 }
0x32de   :  { %v20034_v47 = vpop.permute.xlu1 %10313 }
0x32df   :  { %16367 = vmatmul.mubr.msk.f32.vlgmr.msra.gmra.mrb[52].mxu1 %vm5091_vm3, %v20034_v47 }
0x32e0   :  { %17104 = vmatpush3.bf16.msk.msra.mxu1 %vm18122_vm4, %v19026_v19  ;;  %16419 = vmatprep.mubr.msk.f32.mxu1 %vm18003_vm0, %v17998_v37 }
0x32e1   :  { %17105 = vmatprep.subr.bf16.mxu1 %v18002_v38 }
0x32e2   :  { %v3005_v52 = vpop.permute.xlu1 %3004 }
0x32e3   :  { %3010 = vst.msk [vmem:[#allocation3 + $0x90] sm:$0xff] %vm496_vm6, %v3005_v52  ;;  %16420 = vmatmul.mubr.msk.f32.vlgmr.msra.gmra.mrb[54].mxu1 %vm496_vm6, %v11786_v13 }
0x32e4   :  { %17108 = vmatpush3.bf16.msk.msra.mxu1 %vm18122_vm4, %v19040_v36  ;;  %16426 = vmatprep.mubr.msk.f32.mxu1 %vm18003_vm0, %v17998_v37 }
0x32e5   :  { %17109 = vmatprep.subr.bf16.mxu1 %v18002_v38 }
0x32ea   :  { %v8659_v32 = vld [vmem:[#allocation3 + $0x94] sm:$0x3]  ;;  %v8734_v9 = vld [vmem:[#allocation3 + $0x96] sm:$0x3] }
0x32eb   :  { %16206 = vmatmul.mubr.msk.f32.vlgmr.msra.gmra.mrb[30].mxu0 %vm496_vm6, %v8659_v32  ;;  %16427 = vmatmul.mubr.msk.f32.vlgmr.msra.gmra.mrb[54].mxu1 %vm496_vm6, %v11861_v26 }
0x32ec   :  { %17112 = vmatpush3.bf16.msk.msra.mxu1 %vm18122_vm4, %v19056_v54  ;;  %16965 = vmatpush3.bf16.msk.msra.mxu0 %vm18122_vm4, %v19056_v54 }
0x32ed   :  { %16212 = vmatprep.mubr.msk.f32.mxu0 %vm18003_vm0, %v17998_v37  ;;  %16433 = vmatprep.mubr.msk.f32.mxu1 %vm18003_vm0, %v17998_v37 }
0x32ee   :  { %17113 = vmatprep.subr.bf16.mxu1 %v18002_v38  ;;  %16966 = vmatprep.subr.bf16.mxu0 %v18002_v38 }
0x32f3   :  { %16213 = vmatmul.mubr.msk.f32.vlgmr.msra.gmra.mrb[30].mxu0 %vm496_vm6, %v8734_v9  ;;  %16434 = vmatmul.mubr.msk.f32.vlgmr.msra.gmra.mrb[54].mxu1 %vm496_vm6, %v11936_v33 }
0x32f4   :  { %17116 = vmatpush3.bf16.msk.msra.mxu1 %vm18122_vm4, %v19071_v63  ;;  %16969 = vmatpush3.bf16.msk.msra.mxu0 %vm18122_vm4, %v19071_v63 }
0x32f5   :  { %16219 = vmatprep.mubr.msk.f32.mxu0 %vm18003_vm0, %v17998_v37  ;;  %16440 = vmatprep.mubr.msk.f32.mxu1 %vm18003_vm0, %v17998_v37 }
0x32f6   :  { %17117 = vmatprep.subr.bf16.mxu1 %v18002_v38  ;;  %16970 = vmatprep.subr.bf16.mxu0 %v18002_v38 }
0x32fb   :  { %16220 = vmatmul.mubr.msk.f32.vlgmr.msra.gmra.mrb[30].mxu0 %vm496_vm6, %v8809_v29  ;;  %16441 = vmatmul.mubr.msk.f32.vlgmr.msra.gmra.mrb[54].mxu1 %vm496_vm6, %v12011_v28 }
0x32fc   :  { %17119 = vmatpush3.bf16.msra.mxu1 %v19472_v5  ;;  %16972 = vmatpush3.bf16.msra.mxu0 %v19472_v5 }
0x32fd   :  { %16447 = vmatprep.subr.mxu1 %v17998_v37  ;;  %16226 = vmatprep.subr.mxu0 %v17998_v37 }
0x32fe   :  { %16228 = vmatprep.mubr.msk.f32.mxu0 %vm18003_vm0, %v17998_v37  ;;  %16449 = vmatprep.mubr.msk.f32.mxu1 %vm18003_vm0, %v17998_v37 }
0x3300   :  { %16448 = vmatpush3.msk.msra.mxu1 %vm5094_vm2, %v20093_v25  ;;  %16227 = vmatpush3.msk.msra.mxu0 %vm5094_vm2, %v20093_v25 }
0x3301   :  { %17128 = vmatprep.subr.bf16.mxu1 %v18002_v38  ;;  %16973 = vmatprep.subr.bf16.mxu0 %v18002_v38 }
0x3303   :  { %16229 = vmatmul.mubr.msk.f32.vlgmr.msra.gmra.mrb[30].mxu0 %vm5091_vm3, %v19539_v55  ;;  %16450 = vmatmul.mubr.msk.f32.vlgmr.msra.gmra.mrb[54].mxu1 %vm5091_vm3, %v19886_v42  ;;  %v12441_v55 = vld [vmem:[#allocation3 + $0x9c] sm:$0x3] }
0x3304   :  { %17131 = vmatpush3.bf16.msk.msra.mxu1 %vm18122_vm4, %v19026_v19  ;;  %16975 = vmatpush3.bf16.msra.mxu0 %v19169_v43 }
0x3305   :  { %16456 = vmatprep.mubr.msk.f32.mxu1 %vm18003_vm0, %v17998_v37  ;;  %16235 = vmatprep.subr.mxu0 %v17998_v37 }
0x3306   :  { %16237 = vmatprep.mubr.msk.f32.mxu0 %vm18003_vm0, %v17998_v37  ;;  %17132 = vmatprep.subr.bf16.mxu1 %v18002_v38 }
0x3307   :  { %16457 = vmatmul.mubr.msk.f32.vlgmr.msra.gmra.mrb[56].mxu1 %vm496_vm6, %v12366_v20 }
0x3308   :  { %16236 = vmatpush3.msk.msra.mxu0 %vm5094_vm2, %v19872_v2  ;;  %17135 = vmatpush3.bf16.msk.msra.mxu1 %vm18122_vm4, %v19040_v36 }
0x3309   :  { %16463 = vmatprep.mubr.msk.f32.mxu1 %vm18003_vm0, %v17998_v37  ;;  %17136 = vmatprep.subr.bf16.mxu1 %v18002_v38 }
0x330b   :  { %16238 = vmatmul.mubr.msk.f32.vlgmr.msra.gmra.mrb[30].mxu0 %vm5091_vm3, %v19980_v44  ;;  %v12591_v44 = vld [vmem:[#allocation3 + $0xae] sm:$0x3] }
0x330c   :  { %9158 = vmatprep.mubr.f32.mxu0 %v17998_v37 }
0x330f   :  { %16464 = vmatmul.mubr.msk.f32.vlgmr.msra.gmra.mrb[56].mxu1 %vm496_vm6, %v12441_v55 }
0x3310   :  { %17139 = vmatpush3.bf16.msk.msra.mxu1 %vm18122_vm4, %v19056_v54  ;;  %16470 = vmatprep.mubr.msk.f32.mxu1 %vm18003_vm0, %v17998_v37 }
0x3311   :  { %17140 = vmatprep.subr.bf16.mxu1 %v18002_v38 }
0x3317   :  { %16471 = vmatmul.mubr.msk.f32.vlgmr.msra.gmra.mrb[56].mxu1 %vm496_vm6, %v12516_v57 }
0x3318   :  { %17143 = vmatpush3.bf16.msk.msra.mxu1 %vm18122_vm4, %v19071_v63  ;;  %16477 = vmatprep.mubr.msk.f32.mxu1 %vm18003_vm0, %v17998_v37 }
0x3319   :  { %17144 = vmatprep.subr.bf16.mxu1 %v18002_v38 }
0x331f   :  { %16478 = vmatmul.mubr.msk.f32.vlgmr.msra.gmra.mrb[56].mxu1 %vm496_vm6, %v12591_v44 }
0x3320   :  { %17146 = vmatpush3.bf16.msra.mxu1 %v19472_v5  ;;  %16486 = vmatprep.mubr.msk.f32.mxu1 %vm18003_vm0, %v17998_v37 }
0x3321   :  { %16484 = vmatprep.subr.mxu1 %v17998_v37 }
0x3324   :  { %16485 = vmatpush3.msk.msra.mxu1 %vm5094_vm2, %v20093_v25 }
0x3325   :  { %17147 = vmatprep.subr.bf16.mxu1 %v18002_v38 }
0x3327   :  { %16487 = vmatmul.mubr.msk.f32.vlgmr.msra.gmra.mrb[56].mxu1 %vm5091_vm3, %v20034_v47 }
0x3328   :  { %17149 = vmatpush3.bf16.msra.mxu1 %v19169_v43  ;;  %16495 = vmatprep.mubr.msk.f32.mxu1 %vm18003_vm0, %v17998_v37 }
0x3329   :  { %16493 = vmatprep.subr.mxu1 %v17998_v37 }
0x332c   :  { %16494 = vmatpush3.msk.msra.mxu1 %vm5094_vm2, %v19872_v2 }
0x332d   :  { %17158 = vmatprep.subr.bf16.mxu1 %v18002_v38 }
0x33b2   :  { %v10912_v62 = vpop.f32.mrb[52].mxu1 }
0x33b3   :  { %v16368_v56 = vpop.f32.mrb[53].mxu1 }
0x33d6   :  { %v12152_v17 = vpop.f32.mrb[54].mxu1 }
0x33d7   :  { %v17339_v18 = vadd.f32 %v19702_v50, %v12152_v17  ;;  %v16451_v35 = vpop.f32.mrb[55].mxu1 }
0x33d9   :  { %v15099_v6 = vmul.f32 -1.442695, %v17339_v18  ;;  %17834 = vtanh.f32 %v17339_v18 }
0x33db   :  { %17836 = vpow2.f32 %v15099_v6 }
0x33de   :  { %v9021_v15 = vpop.f32.mrb[30].mxu0 }
0x33df   :  { %v16239_v14 = vpop.f32.mrb[31].mxu0  ;;  %v17334_v56 = vadd.f32 %v19702_v50, %v9021_v15  ;;  %v17337_v15 = vadd.f32 %v19702_v50, %v10912_v62 }
0x33e1   :  { %v14948_v18 = vmul.f32 -1.442695, %v17334_v56 }
0x33e3   :  { %v17835_v52 = vpop.eup %17834 }
0x33e4   :  { %12165 = vrot.lane.b32.xlu1 %v17835_v52, %s18004_s16 }
0x33e5   :  { %v17837_v13 = vpop.eup %17836 }
0x33e6   :  { %v12160_v32 = vadd.f32 1.0, %v17837_v13 }
0x33e8   :  { %17838 = vrcp.f32 %v12160_v32 }
0x33f2   :  { %v17839_v26 = vpop.eup %17838 }
0x33f3   :  { %v12178_v9 = vmul.f32 0.0, %v17839_v26  ;;  %v12172_v33 = vmul.f32 %v17839_v26, %v19992_v11 }
0x33f5   :  { %12180 = vrot.lane.b32.xlu1 %v12178_v9, %s17993_s17  ;;  %12174 = vrot.lane.b32.xlu0 %v12172_v33, %s17994_s18  ;;  %v15039_v9 = vmul.f32 -1.442695, %v17337_v15 }
0x3456   :  { %v12166_v29 = vpop.permute.xlu1 %12165 }
0x3457   :  { %v12168_v28 = vmul.f32 %v17839_v26, %v12166_v29 }
0x3467   :  { %v12175_v20 = vpop.permute.xlu0 %12174  ;;  %v12181_v57 = vpop.permute.xlu1 %12180 }
0x3468   :  { %v12177_v55 = vadd.f32 %v12175_v20, %v12168_v28  ;;  %v13021_v28 = vld [vmem:[#allocation3 + $0xac] sm:$0x3] }
0x346a   :  { %v12183_v44 = vadd.f32 %v12181_v57, %v12177_v55 }
0x346c   :  { %17840 = vtanh.f32 %v12183_v44 }
0x346d   :  { %17842 = vtanh.f32 %v17334_v56 }
0x346e   :  { %17844 = vpow2.f32 %v14948_v18 }
0x3476   :  { %v17841_v17 = vpop.eup %17840 }
0x3477   :  { %12186 = vrot.lane.b32.xlu0 %v17841_v17, %s18005_s20  ;;  %v17843_v11 = vpop.eup %17842 }
0x3478   :  { %v17845_v35 = vpop.eup %17844 }
0x3479   :  { %v9029_v6 = vadd.f32 1.0, %v17845_v35 }
0x347b   :  { %9039 = vrot.lane.b32.xlu0 %v19500_v7, %s18000_s28  ;;  %17846 = vrcp.f32 %v9029_v6 }
0x347c   :  { %17848 = vtanh.f32 %v17337_v15 }
0x347d   :  { %17850 = vpow2.f32 %v15039_v9 }
0x347f   :  { %10929 = vrot.lane.b32.xlu0 %v19908_v3, %s18000_s28 }
0x3483   :  { %9034 = vrot.lane.b32.xlu0 %v17843_v11, %s18004_s16 }
0x3485   :  { %v20176_v13 = vpop.eup %17846 }
0x34e9   :  { %v12187_v14 = vpop.permute.xlu0 %12186 }
0x34ea   :  { %v12189_v52 = vmul.f32 %v17839_v26, %v12187_v14  ;;  %v17849_v26 = vpop.eup %17848 }
0x34eb   :  { %v17851_v62 = vpop.eup %17850 }
0x34ec   :  { %12204 = vrot.lane.b32.xlu1 %v12189_v52, %s18007_s22  ;;  %v10920_v33 = vadd.f32 1.0, %v17851_v62 }
0x34ed   :  { %v9040_v7 = vpop.permute.xlu0 %9039 }
0x34ee   :  { %v9042_v32 = vmul.f32 %v20176_v13, %v9040_v7  ;;  %17852 = vrcp.f32 %v10920_v33 }
0x34f0   :  { %9049 = vrot.lane.b32.xlu1 %v19908_v3, %s18006_s21 }
0x34f1   :  { %v10930_v55 = vpop.permute.xlu0 %10929 }
0x34f4   :  { %10939 = vrot.lane.b32.xlu1 %v19947_v61, %s18006_s21 }
0x34f5   :  { %v9035_v18 = vpop.permute.xlu0 %9034 }
0x34f6   :  { %v9037_v6 = vmul.f32 %v20176_v13, %v9035_v18  ;;  %v14950_v18 = vld [vmem:[%s21270_s9 + $0x2a8] sm:$0xff] }
0x34f8   :  { %9044 = vrot.lane.b32.xlu1 %v9042_v32, %s17994_s18  ;;  %v20200_v57 = vpop.eup %17852 }
0x34f9   :  { %v10932_v17 = vmul.f32 %v20200_v57, %v10930_v55 }
0x34fc   :  { %10925 = vrot.lane.b32.xlu1 %v17849_v26, %s18004_s16 }
0x355e   :  { %v20181_v3 = vpop.permute.xlu1 %12204 }
0x355f   :  { %16496 = vmatmul.mubr.msk.f32.vlgmr.msra.gmra.mrb[56].mxu1 %vm5091_vm3, %v20181_v3 }
0x3560   :  { %17161 = vmatpush3.bf16.msk.msra.mxu1 %vm18122_vm4, %v19026_v19  ;;  %16502 = vmatprep.mubr.msk.f32.mxu1 %vm18003_vm0, %v17998_v37 }
0x3561   :  { %17162 = vmatprep.subr.bf16.mxu1 %v18002_v38 }
0x3562   :  { %v9050_v29 = vpop.permute.xlu1 %9049 }
0x3563   :  { %v9052_v20 = vmul.f32 %v20176_v13, %v9050_v29  ;;  %16503 = vmatmul.mubr.msk.f32.vlgmr.msra.gmra.mrb[58].mxu1 %vm496_vm6, %v13021_v28 }
0x3564   :  { %17165 = vmatpush3.bf16.msk.msra.mxu1 %vm18122_vm4, %v19040_v36  ;;  %16509 = vmatprep.mubr.msk.f32.mxu1 %vm18003_vm0, %v17998_v37 }
0x3565   :  { %9054 = vrot.lane.b32.xlu0 %v9052_v20, %s17993_s17  ;;  %17166 = vmatprep.subr.bf16.mxu1 %v18002_v38 }
0x3566   :  { %v10940_v56 = vpop.permute.xlu1 %10939 }
0x3567   :  { %v10942_v11 = vmul.f32 %v20200_v57, %v10940_v56 }
0x3569   :  { %10944 = vrot.lane.b32.xlu1 %v10942_v11, %s17993_s17  ;;  %10934 = vrot.lane.b32.xlu0 %v10932_v17, %s17994_s18 }
0x356a   :  { %v9045_v35 = vpop.permute.xlu1 %9044 }
0x356b   :  { %v9047_v14 = vadd.f32 %v9045_v35, %v9037_v6  ;;  %v14954_v35 = vld [vmem:[%s21270_s9 + $0x2c8] sm:$0xff] }
0x356c   :  { %v16976_v6 = vpack.c.bf16 %v14954_v35, %v14950_v18 }
0x356d   :  { %12830 = vrot.lane.b32.xlu1 %v12183_v44, %s18006_s21  ;;  %12820 = vrot.lane.b32.xlu0 %v19947_v61, %s18000_s28 }
0x356e   :  { %v10926_v52 = vpop.permute.xlu1 %10925  ;;  %16977 = vmatprep.subr.bf16.mxu0 %v16976_v6 }
0x356f   :  { %v10928_v32 = vmul.f32 %v20200_v57, %v10926_v52 }
0x35d7   :  { %v9055_v15 = vpop.permute.xlu0 %9054 }
0x35d8   :  { %v20210_v7 = vadd.f32 %v9055_v15, %v9047_v14  ;;  %v14953_v14 = vld [vmem:[%s21270_s9 + $0x2c0] sm:$0xff]  ;;  %v14958_v15 = vld [vmem:[%s21270_s9 + $0x2e8] sm:$0xf] }
0x35da   :  { %17854 = vtanh.f32 %v20210_v7 }
0x35db   :  { %v10935_v26 = vpop.permute.xlu0 %10934  ;;  %v10945_v62 = vpop.permute.xlu1 %10944 }
0x35dc   :  { %v10937_v9 = vadd.f32 %v10935_v26, %v10928_v32  ;;  %v14952_v32 = vld [vmem:[%s21270_s9 + $0x2b8] sm:$0xff]  ;;  %v14957_v26 = vld [vmem:[%s21270_s9 + $0x2e0] sm:$0xf] }
0x35de   :  { %v20214_v44 = vadd.f32 %v10945_v62, %v10937_v9  ;;  %v14956_v9 = vld [vmem:[%s21270_s9 + $0x2d8] sm:$0xff] }
0x35df   :  { %v16980_v62 = vpack.c.bf16 %v14956_v9, %v14952_v32  ;;  %v14979_v32 = vld [vmem:[%s21270_s9 + $0x308] sm:$0xff]  ;;  %v14978_v9 = vld [vmem:[%s21270_s9 + $0x300] sm:$0xff] }
0x35e0   :  { %17856 = vtanh.f32 %v20214_v44 }
0x35e4   :  { %v17855_v61 = vpop.eup %17854 }
0x35e5   :  { %9060 = vrot.lane.b32.xlu0 %v17855_v61, %s18005_s20 }
0x35ea   :  { %v17857_v33 = vpop.eup %17856 }
0x35eb   :  { %10950 = vrot.lane.b32.xlu1 %v17857_v33, %s18005_s20  ;;  %v12831_v33 = vpop.permute.xlu1 %12830 }
0x3632   :  { %v12803_v29 = vpop.f32.mrb[56].mxu1 }
0x3633   :  { %v17340_v28 = vadd.f32 %v19702_v50, %v12803_v29  ;;  %v16497_v20 = vpop.f32.mrb[57].mxu1  ;;  %v14949_v50 = vld [vmem:[%s21270_s9 + $0x2a0] sm:$0xff]  ;;  %v12821_v29 = vpop.permute.xlu0 %12820 }
0x3634   :  { %v16978_v52 = vpack.c.bf16 %v14953_v14, %v14949_v50 }
0x3635   :  { %v15130_v55 = vmul.f32 -1.442695, %v17340_v28  ;;  %17858 = vtanh.f32 %v17340_v28 }
0x3636   :  { %16979 = vmatpush1.bf16.msra.mxu0 %v16978_v52 }
0x3637   :  { %17860 = vpow2.f32 %v15130_v55  ;;  %14961 = vmatprep.subr.msk.mxu0 %vm5094_vm2, %v14958_v15  ;;  %v14960_v15 = vld [vmem:[%s21270_s9 + $0x2f8] sm:$0xf] }
0x363a   :  { %14962 = vmatpush1.msk.msra.mxu0 %vm5094_vm2, %v14957_v26  ;;  %v14983_v26 = vld [vmem:[%s21270_s9 + $0x328] sm:$0xff] }
0x363b   :  { %16981 = vmatprep.subr.bf16.mxu0 %v16980_v62  ;;  %v14982_v62 = vld [vmem:[%s21270_s9 + $0x320] sm:$0xff] }
0x363f   :  { %v17859_v56 = vpop.eup %17858 }
0x3640   :  { %12816 = vrot.lane.b32.xlu0 %v17859_v56, %s18004_s16 }
0x3641   :  { %v17861_v17 = vpop.eup %17860 }
0x3642   :  { %v12811_v11 = vadd.f32 1.0, %v17861_v17 }
0x3644   :  { %17862 = vrcp.f32 %v12811_v11 }
0x364e   :  { %v20247_v61 = vpop.eup %17862 }
0x364f   :  { %v12833_v28 = vmul.f32 %v20247_v61, %v12831_v33  ;;  %v12823_v20 = vmul.f32 %v20247_v61, %v12821_v29  ;;  %v14959_v33 = vld [vmem:[%s21270_s9 + $0x2f0] sm:$0xf]  ;;  %v17003_v29 = vpack.c.bf16 %v14983_v26, %v14979_v32  ;;  %v15010_v32 = vld [vmem:[%s21270_s9 + $0x368] sm:$0xff] }
0x3650   :  { %v15014_v26 = vld [vmem:[%s21270_s9 + $0x388] sm:$0xff] }
0x3651   :  { %12835 = vrot.lane.b32.xlu0 %v12833_v28, %s17993_s17  ;;  %12825 = vrot.lane.b32.xlu1 %v12823_v20, %s17994_s18  ;;  %v17005_v20 = vpack.c.bf16 %v14982_v62, %v14978_v9  ;;  %v15009_v9 = vld [vmem:[%s21270_s9 + $0x360] sm:$0xff]  ;;  %v14988_v62 = vld [vmem:[%s21270_s9 + $0x350] sm:$0xf] }
0x3657   :  { %v9061_v55 = vpop.permute.xlu0 %9060 }
0x3658   :  { %v9063_v56 = vmul.f32 %v20176_v13, %v9061_v55 }
0x365a   :  { %9078 = vrot.lane.b32.xlu1 %v9063_v56, %s18007_s22 }
0x365d   :  { %v10951_v17 = vpop.permute.xlu1 %10950 }
0x365e   :  { %v10953_v11 = vmul.f32 %v20200_v57, %v10951_v17  ;;  %3566 = vrot.lane.b32.xlu1 %v18941_v8, %s17999_s23  ;;  %v14951_v57 = vld [vmem:[%s21270_s9 + $0x2b0] sm:$0xff]  ;;  %v14987_v17 = vld [vmem:[%s21270_s9 + $0x348] sm:$0xf] }
0x365f   :  { %v14955_v8 = vld [vmem:[%s21270_s9 + $0x2d0] sm:$0xff] }
0x3660   :  { %10968 = vrot.lane.b32.xlu0 %v10953_v11, %s18007_s22  ;;  %v16982_v52 = vpack.c.bf16 %v14955_v8, %v14951_v57  ;;  %v14981_v11 = vld [vmem:[%s21270_s9 + $0x318] sm:$0xff] }
0x3664   :  { %3846 = vrot.lane.b32.xlu0 %v18989_v60, %s17999_s23 }
0x36b2   :  { %v12817_v18 = vpop.permute.xlu0 %12816 }
0x36b3   :  { %v12819_v35 = vmul.f32 %v20247_v61, %v12817_v18  ;;  %v14985_v18 = vld [vmem:[%s21270_s9 + $0x338] sm:$0xff] }
0x36c3   :  { %v12826_v6 = vpop.permute.xlu1 %12825  ;;  %v12836_v14 = vpop.permute.xlu0 %12835 }
0x36c4   :  { %v12828_v50 = vadd.f32 %v12826_v6, %v12819_v35  ;;  %v14980_v35 = vld [vmem:[%s21270_s9 + $0x310] sm:$0xff] }
0x36c5   :  { %v14984_v6 = vld [vmem:[%s21270_s9 + $0x330] sm:$0xff] }
0x36c6   :  { %v20262_v13 = vadd.f32 %v12836_v14, %v12828_v50  ;;  %v14986_v50 = vld [vmem:[%s21270_s9 + $0x340] sm:$0xf]  ;;  %v17007_v14 = vpack.c.bf16 %v14985_v18, %v14981_v11  ;;  %v17009_v8 = vpack.c.bf16 %v14984_v6, %v14980_v35  ;;  %v15015_v11 = vld [vmem:[%s21270_s9 + $0x390] sm:$0xff] }
0x36c7   :  { %v15017_v35 = vld [vmem:[%s21270_s9 + $0x3a0] sm:$0xf] }
0x36c8   :  { %17864 = vtanh.f32 %v20262_v13 }
0x36cc   :  { %v20271_v60 = vpop.permute.xlu1 %9078 }
0x36cd   :  { %14963 = vmatmul.mubr.msk.f32.vlgmr.msra.gmra.mrb[24].mxu0 %vm5091_vm3, %v20271_v60 }
0x36ce   :  { %16983 = vmatpush1.bf16.msra.mxu0 %v16982_v52  ;;  %9229 = vmatprep.mubr.f32.mxu0 %v17998_v37  ;;  %v14989_v52 = vld [vmem:[%s21270_s9 + $0x358] sm:$0xf] }
0x36cf   :  { %14964 = vmatprep.subr.msk.mxu0 %vm5094_vm2, %v14960_v15 }
0x36d0   :  { %v3567_v28 = vpop.permute.xlu1 %3566 }
0x36d1   :  { %3571 = vst.msk [vmem:[#allocation3 + $0xb8] sm:$0xff] %vm496_vm6, %v3567_v28  ;;  %v15018_v28 = vld [vmem:[%s21270_s9 + $0x3a8] sm:$0xf] }
0x36d2   :  { %v17865_v55 = vpop.eup %17864  ;;  %14965 = vmatpush1.msk.msra.mxu0 %vm5094_vm2, %v14959_v33  ;;  %v20297_v56 = vpop.permute.xlu0 %10968  ;;  %v17033_v33 = vpack.c.bf16 %v15014_v26, %v15010_v32 }
0x36d3   :  { %14966 = vmatmul.mubr.msk.f32.vlgmr.msra.gmra.mrb[26].mxu0 %vm5091_vm3, %v20271_v60  ;;  %17004 = vmatprep.subr.bf16.mxu0 %v17003_v29 }
0x36d4   :  { %17006 = vmatpush1.bf16.msra.mxu0 %v17005_v20  ;;  %12841 = vrot.lane.b32.xlu1 %v17865_v55, %s18005_s20  ;;  %v15012_v20 = vld [vmem:[%s21270_s9 + $0x378] sm:$0xff] }
0x36d5   :  { %14990 = vmatprep.subr.msk.mxu0 %vm5094_vm2, %v14987_v17  ;;  %9738 = vmatprep.mubr.f32.mxu0 %v17998_v37  ;;  %v15016_v55 = vld [vmem:[%s21270_s9 + $0x398] sm:$0xff]  ;;  %v15011_v17 = vld [vmem:[%s21270_s9 + $0x370] sm:$0xff] }
0x36d6   :  { %v3847_v57 = vpop.permute.xlu0 %3846  ;;  %v17039_v6 = vpack.c.bf16 %v15015_v11, %v15011_v17  ;;  %v15051_v17 = vld [vmem:[%s21270_s9 + $0x418] sm:$0xf]  ;;  %v15050_v11 = vld [vmem:[%s21270_s9 + $0x410] sm:$0xf] }
0x36d7   :  { %3851 = vst.msk [vmem:[#allocation3 + $0xc8] sm:$0xff] %vm496_vm6, %v3847_v57  ;;  %v15045_v57 = vld [vmem:[%s21270_s9 + $0x3e8] sm:$0xff] }
0x36d8   :  { %14991 = vmatpush1.msk.msra.mxu0 %vm5094_vm2, %v14986_v50  ;;  %11585 = vrot.lane.b32.xlu1 %v20210_v7, %s18000_s28  ;;  %v13096_v15 = vld [vmem:[#allocation3 + $0xbc] sm:$0x3]  ;;  %v15013_v7 = vld [vmem:[%s21270_s9 + $0x380] sm:$0xff]  ;;  %v13171_v18 = vld [vmem:[#allocation3 + $0xbe] sm:$0x3] }
0x36d9   :  { %14992 = vmatmul.mubr.msk.f32.vlgmr.msra.gmra.mrb[24].mxu0 %vm5091_vm3, %v19886_v42  ;;  %17008 = vmatprep.subr.bf16.mxu0 %v17007_v14  ;;  %v17035_v29 = vpack.c.bf16 %v15013_v7, %v15009_v9  ;;  %v15020_v50 = vld [vmem:[%s21270_s9 + $0x3b8] sm:$0xf]  ;;  %v15041_v14 = vld [vmem:[%s21270_s9 + $0x3c8] sm:$0xff] }
0x36da   :  { %17010 = vmatpush1.bf16.msra.mxu0 %v17009_v8  ;;  %16510 = vmatmul.mubr.msk.f32.vlgmr.msra.gmra.mrb[58].mxu1 %vm496_vm6, %v13096_v15  ;;  %v15040_v8 = vld [vmem:[%s21270_s9 + $0x3c0] sm:$0xff]  ;;  %v15019_v15 = vld [vmem:[%s21270_s9 + $0x3b0] sm:$0xf]  ;;  %v17063_v32 = vpack.c.bf16 %v15045_v57, %v15041_v14  ;;  %v15049_v7 = vld [vmem:[%s21270_s9 + $0x408] sm:$0xf] }
0x36db   :  { %14993 = vmatprep.subr.msk.mxu0 %vm5094_vm2, %v14989_v52  ;;  %9809 = vmatprep.mubr.f32.mxu0 %v17998_v37  ;;  %v15044_v52 = vld [vmem:[%s21270_s9 + $0x3e0] sm:$0xff] }
0x36dc   :  { %13475 = vrot.lane.b32.xlu1 %v20214_v44, %s18000_s28  ;;  %17169 = vmatpush3.bf16.msk.msra.mxu1 %vm18122_vm4, %v19056_v54  ;;  %v17065_v26 = vpack.c.bf16 %v15044_v52, %v15040_v8 }
0x36dd   :  { %16516 = vmatprep.mubr.msk.f32.mxu1 %vm18003_vm0, %v17998_v37  ;;  %17170 = vmatprep.subr.bf16.mxu1 %v18002_v38 }
0x36de   :  { %14994 = vmatpush1.msk.msra.mxu0 %vm5094_vm2, %v14988_v62  ;;  %v13246_v9 = vld [vmem:[#allocation3 + $0xce] sm:$0x3] }
0x36df   :  { %14995 = vmatmul.mubr.msk.f32.vlgmr.msra.gmra.mrb[26].mxu0 %vm5091_vm3, %v19886_v42  ;;  %17034 = vmatprep.subr.bf16.mxu0 %v17033_v33  ;;  %v17037_v42 = vpack.c.bf16 %v15016_v55, %v15012_v20  ;;  %v15043_v62 = vld [vmem:[%s21270_s9 + $0x3d8] sm:$0xff]  ;;  %v15048_v20 = vld [vmem:[%s21270_s9 + $0x400] sm:$0xf] }
0x36e0   :  { %17036 = vmatpush1.bf16.msra.mxu0 %v17035_v29  ;;  %10393 = vmatprep.mubr.f32.mxu0 %v17998_v37  ;;  %v15047_v33 = vld [vmem:[%s21270_s9 + $0x3f8] sm:$0xff]  ;;  %v15042_v29 = vld [vmem:[%s21270_s9 + $0x3d0] sm:$0xff] }
0x36e1   :  { %15021 = vmatprep.subr.msk.mxu0 %vm5094_vm2, %v15018_v28  ;;  %v15046_v28 = vld [vmem:[%s21270_s9 + $0x3f0] sm:$0xff] }
0x36e2   :  { %16517 = vmatmul.mubr.msk.f32.vlgmr.msra.gmra.mrb[58].mxu1 %vm496_vm6, %v13171_v18  ;;  %v17069_v55 = vpack.c.bf16 %v15046_v28, %v15042_v29  ;;  %v11130_v18 = vld [vmem:[#allocation3 + $0xa8] sm:$0x3] }
0x36e3   :  { %17173 = vmatpush3.bf16.msk.msra.mxu1 %vm18122_vm4, %v19071_v63  ;;  %16523 = vmatprep.mubr.msk.f32.mxu1 %vm18003_vm0, %v17998_v37 }
0x36e4   :  { %15022 = vmatpush1.msk.msra.mxu0 %vm5094_vm2, %v15017_v35  ;;  %17174 = vmatprep.subr.bf16.mxu1 %v18002_v38  ;;  %v11205_v35 = vld [vmem:[#allocation3 + $0xb8] sm:$0x3] }
0x36e5   :  { %15023 = vmatmul.mubr.msk.f32.vlgmr.msra.gmra.mrb[24].mxu0 %vm5091_vm3, %v20034_v47  ;;  %17038 = vmatprep.subr.bf16.mxu0 %v17037_v42  ;;  %v11355_v42 = vld [vmem:[#allocation3 + $0xca] sm:$0x3] }
0x36e6   :  { %17040 = vmatpush1.bf16.msra.mxu0 %v17039_v6  ;;  %10464 = vmatprep.mubr.f32.mxu0 %v17998_v37  ;;  %v20508_v6 = vld [vmem:[%s21268_s7 + $0x10] sm:$0xf] }
0x36e7   :  { %15024 = vmatprep.subr.msk.mxu0 %vm5094_vm2, %v15020_v50 }
0x36ea   :  { %15025 = vmatpush1.msk.msra.mxu0 %vm5094_vm2, %v15019_v15  ;;  %16524 = vmatmul.mubr.msk.f32.vlgmr.msra.gmra.mrb[58].mxu1 %vm496_vm6, %v13246_v9 }
0x36eb   :  { %15026 = vmatmul.mubr.msk.f32.vlgmr.msra.gmra.mrb[26].mxu0 %vm5091_vm3, %v20034_v47  ;;  %17064 = vmatprep.subr.bf16.mxu0 %v17063_v32  ;;  %v17067_v47 = vpack.c.bf16 %v15047_v33, %v15043_v62  ;;  %v4141_v33 = vld [vmem:[#allocation2 + $0xe8] sm:$0xff] }
0x36ec   :  { %17066 = vmatpush1.bf16.msra.mxu0 %v17065_v26  ;;  %17176 = vmatpush3.bf16.msra.mxu1 %v19472_v5  ;;  %v17325_v29 = vadd.f32 %v19201_v10, %v4141_v33 }
0x36ed   :  { %15052 = vmatprep.subr.msk.mxu0 %vm5094_vm2, %v15049_v7  ;;  %11048 = vmatprep.mubr.f32.mxu0 %v17998_v37 }
0x36ee   :  { %16530 = vmatprep.subr.mxu1 %v17998_v37  ;;  %16532 = vmatprep.mubr.msk.f32.mxu1 %vm18003_vm0, %v17998_v37  ;;  %v14735_v28 = vmul.f32 -1.442695, %v17325_v29 }
0x36f0   :  { %15053 = vmatpush1.msk.msra.mxu0 %vm5094_vm2, %v15048_v20  ;;  %16531 = vmatpush3.msk.msra.mxu1 %vm5094_vm2, %v20093_v25 }
0x36f1   :  { %15054 = vmatmul.mubr.msk.f32.vlgmr.msra.gmra.mrb[24].mxu0 %vm5091_vm3, %v20297_v56  ;;  %17068 = vmatprep.subr.bf16.mxu0 %v17067_v47 }
0x36f2   :  { %17070 = vmatpush1.bf16.msra.mxu0 %v17069_v55  ;;  %16533 = vmatmul.mubr.msk.f32.vlgmr.msra.gmra.mrb[58].mxu1 %vm5091_vm3, %v20297_v56 }
0x36f3   :  { %15055 = vmatprep.subr.msk.mxu0 %vm5094_vm2, %v15051_v17  ;;  %11119 = vmatprep.mubr.f32.mxu0 %v17998_v37 }
0x36f4   :  { %17177 = vmatprep.subr.bf16.mxu1 %v18002_v38  ;;  %16541 = vmatprep.mubr.msk.f32.mxu1 %vm18003_vm0, %v17998_v37 }
0x36f5   :  { %17179 = vmatpush3.bf16.msra.mxu1 %v19169_v43 }
0x36f6   :  { %15056 = vmatpush1.msk.msra.mxu0 %vm5094_vm2, %v15050_v11  ;;  %16539 = vmatprep.subr.mxu1 %v17998_v37 }
0x36f7   :  { %15057 = vmatmul.mubr.msk.f32.vlgmr.msra.gmra.mrb[26].mxu0 %vm5091_vm3, %v20297_v56  ;;  %17071 = vmatprep.subr.bf16.mxu0 %v18002_v38 }
0x36f8   :  { %17074 = vmatpush3.bf16.msk.msra.mxu0 %vm18122_vm4, %v19026_v19  ;;  %16373 = vmatprep.mubr.msk.f32.mxu0 %vm18003_vm0, %v17998_v37 }
0x36f9   :  { %17075 = vmatprep.subr.bf16.mxu0 %v18002_v38  ;;  %16540 = vmatpush3.msk.msra.mxu1 %vm5094_vm2, %v19872_v2  ;;  %v11280_v2 = vld [vmem:[#allocation3 + $0xba] sm:$0x3] }
0x36fb   :  { %16374 = vmatmul.mubr.msk.f32.vlgmr.msra.gmra.mrb[32].mxu0 %vm496_vm6, %v11130_v18 }
0x36fc   :  { %17078 = vmatpush3.bf16.msk.msra.mxu0 %vm18122_vm4, %v19040_v36  ;;  %16380 = vmatprep.mubr.msk.f32.mxu0 %vm18003_vm0, %v17998_v37 }
0x36fd   :  { %17079 = vmatprep.subr.bf16.mxu0 %v18002_v38 }
0x3703   :  { %16381 = vmatmul.mubr.msk.f32.vlgmr.msra.gmra.mrb[32].mxu0 %vm496_vm6, %v11205_v35 }
0x3704   :  { %17082 = vmatpush3.bf16.msk.msra.mxu0 %vm18122_vm4, %v19056_v54  ;;  %16387 = vmatprep.mubr.msk.f32.mxu0 %vm18003_vm0, %v17998_v37 }
0x3705   :  { %17083 = vmatprep.subr.bf16.mxu0 %v18002_v38 }
0x370b   :  { %16388 = vmatmul.mubr.msk.f32.vlgmr.msra.gmra.mrb[32].mxu0 %vm496_vm6, %v11280_v2 }
0x370c   :  { %17086 = vmatpush3.bf16.msk.msra.mxu0 %vm18122_vm4, %v19071_v63  ;;  %16394 = vmatprep.mubr.msk.f32.mxu0 %vm18003_vm0, %v17998_v37 }
0x370d   :  { %17087 = vmatprep.subr.bf16.mxu0 %v18002_v38 }
0x3713   :  { %16395 = vmatmul.mubr.msk.f32.vlgmr.msra.gmra.mrb[32].mxu0 %vm496_vm6, %v11355_v42 }
0x3714   :  { %17089 = vmatpush3.bf16.msra.mxu0 %v19472_v5  ;;  %16403 = vmatprep.mubr.msk.f32.mxu0 %vm18003_vm0, %v17998_v37 }
0x3715   :  { %16401 = vmatprep.subr.mxu0 %v17998_v37 }
0x3718   :  { %16402 = vmatpush3.msk.msra.mxu0 %vm5094_vm2, %v20093_v25 }
0x3719   :  { %17090 = vmatprep.subr.bf16.mxu0 %v18002_v38 }
0x371b   :  { %16404 = vmatmul.mubr.msk.f32.vlgmr.msra.gmra.mrb[32].mxu0 %vm5091_vm3, %v20271_v60 }
0x371c   :  { %17092 = vmatpush3.bf16.msra.mxu0 %v19169_v43  ;;  %16412 = vmatprep.mubr.msk.f32.mxu0 %vm18003_vm0, %v17998_v37 }
0x371d   :  { %16410 = vmatprep.subr.mxu0 %v17998_v37 }
0x3720   :  { %16411 = vmatpush3.msk.msra.mxu0 %vm5094_vm2, %v20508_v6 }
0x3723   :  { %16413 = vmatmul.mubr.msk.f32.vlgmr.msra.gmra.mrb[32].mxu0 %vm5091_vm3, %v20297_v56  ;;  %v20528_v56 = vld [vmem:[%s21269_s8] ss:$0 sm:$0xff] }
0x3724   :  { %11704 = vmatprep.mubr.f32.mxu0 %v17998_v37 }
0x3746   :  { %v12842_v25 = vpop.permute.xlu1 %12841 }
0x3747   :  { %v12844_v60 = vmul.f32 %v20247_v61, %v12842_v25 }
0x3749   :  { %12859 = vrot.lane.b32.xlu0 %v12844_v60, %s18007_s22 }
0x374d   :  { %11595 = vrot.lane.b32.xlu0 %v20214_v44, %s18006_s21  ;;  %v20535_v44 = vsel %vm4133_vm1, %v19095_v1, %v18982_v48  ;;  %v11586_v1 = vpop.permute.xlu1 %11585 }
0x374e   :  { %v4157_v52 = vrot.slane %v20535_v44, 6 }
0x3750   :  { %v4158_v26 = vsel %vm428_vm5, %v18888_v31, %v4157_v52 }
0x3751   :  { %13485 = vrot.lane.b32.xlu0 %v20262_v13, %s18006_s21  ;;  %v13476_v35 = vpop.permute.xlu1 %13475 }
0x37bb   :  { %v20521_v50 = vpop.permute.xlu0 %12859 }
0x37bc   :  { %16542 = vmatmul.mubr.msk.f32.vlgmr.msra.gmra.mrb[58].mxu1 %vm5091_vm3, %v20521_v50 }
0x37bf   :  { %v11596_v7 = vpop.permute.xlu0 %11595 }
0x37c3   :  { %v13486_v11 = vpop.permute.xlu0 %13485 }
0x37f6   :  { %v11567_v14 = vpop.f32.mrb[32].mxu0 }
0x37f7   :  { %v17338_v61 = vadd.f32 %v20528_v56, %v11567_v14  ;;  %v16414_v57 = vpop.f32.mrb[33].mxu0 }
0x37f9   :  { %v15070_v8 = vmul.f32 -1.442695, %v17338_v61  ;;  %17866 = vtanh.f32 %v17338_v61 }
0x37fb   :  { %17868 = vpow2.f32 %v15070_v8 }
0x3803   :  { %v17867_v13 = vpop.eup %17866 }
0x3804   :  { %11580 = vrot.lane.b32.xlu1 %v17867_v13, %s18004_s16 }
0x3805   :  { %v17869_v15 = vpop.eup %17868 }
0x3806   :  { %v11575_v32 = vadd.f32 1.0, %v17869_v15 }
0x3808   :  { %17870 = vrcp.f32 %v11575_v32  ;;  %4354 = vrot.lane.b32.xlu1 %v4158_v26, %s18001_s3 }
0x380c   :  { %4374 = vrot.lane.b32.xlu1 %v20535_v44, %s18000_s28 }
0x3812   :  { %v20547_v58 = vpop.eup %17870 }
0x3813   :  { %v11588_v9 = vmul.f32 %v20547_v58, %v11586_v1  ;;  %v11598_v62 = vmul.f32 %v20547_v58, %v11596_v7 }
0x3815   :  { %11590 = vrot.lane.b32.xlu0 %v11588_v9, %s17994_s18 }
0x3819   :  { %11600 = vrot.lane.b32.xlu0 %v11598_v62, %s17993_s17 }
0x3876   :  { %v11581_v14 = vpop.permute.xlu1 %11580 }
0x3877   :  { %v11583_v61 = vmul.f32 %v20547_v58, %v11581_v14 }
0x387a   :  { %v4355_v32 = vpop.permute.xlu1 %4354 }
0x387e   :  { %v4375_v33 = vpop.permute.xlu1 %4374 }
0x3887   :  { %v11591_v25 = vpop.permute.xlu0 %11590 }
0x3888   :  { %v11593_v8 = vadd.f32 %v11591_v25, %v11583_v61  ;;  %v15079_v25 = vld [vmem:[%s21270_s9 + $0x460] sm:$0xf] }
0x388b   :  { %v11601_v57 = vpop.permute.xlu0 %11600 }
0x388c   :  { %v11603_v13 = vadd.f32 %v11601_v57, %v11593_v8 }
0x388f   :  { %v13458_v20 = vpop.f32.mrb[58].mxu1 }
0x3890   :  { %v17341_v47 = vadd.f32 %v20528_v56, %v13458_v20  ;;  %v16543_v55 = vpop.f32.mrb[59].mxu1  ;;  %v15072_v20 = vld [vmem:[%s21270_s9 + $0x428] sm:$0xff] }
0x3891   :  { %v15071_v55 = vld [vmem:[%s21270_s9 + $0x420] sm:$0xff] }
0x3892   :  { %v15161_v17 = vmul.f32 -1.442695, %v17341_v47  ;;  %17872 = vtanh.f32 %v17341_v47  ;;  %v15076_v47 = vld [vmem:[%s21270_s9 + $0x448] sm:$0xff] }
0x3893   :  { %17874 = vpow2.f32 %v14735_v28 }
0x3894   :  { %17876 = vpow2.f32 %v15161_v17  ;;  %v17093_v17 = vpack.c.bf16 %v15076_v47, %v15072_v20 }
0x3896   :  { %17094 = vmatprep.subr.bf16.mxu0 %v17093_v17  ;;  %v15073_v17 = vld [vmem:[%s21270_s9 + $0x430] sm:$0xff] }
0x389c   :  { %v17873_v18 = vpop.eup %17872 }
0x389d   :  { %v17875_v2 = vpop.eup %17874  ;;  %13471 = vrot.lane.b32.xlu0 %v17873_v18, %s18004_s16 }
0x389e   :  { %v17877_v42 = vpop.eup %17876  ;;  %v4333_v10 = vadd.f32 1.0, %v17875_v2  ;;  %v15074_v2 = vld [vmem:[%s21270_s9 + $0x438] sm:$0xff] }
0x389f   :  { %v13466_v60 = vadd.f32 1.0, %v17877_v42  ;;  %v15078_v42 = vld [vmem:[%s21270_s9 + $0x458] sm:$0xff] }
0x38a1   :  { %17878 = vrcp.f32 %v13466_v60  ;;  %v17097_v60 = vpack.c.bf16 %v15078_v42, %v15074_v2  ;;  %v15100_v2 = vld [vmem:[%s21270_s9 + $0x480] sm:$0xff] }
0x38a2   :  { %17880 = vrcp.f32 %v4333_v10  ;;  %v15104_v42 = vld [vmem:[%s21270_s9 + $0x4a0] sm:$0xff] }
0x38a3   :  { %17882 = vtanh.f32 %v17325_v29 }
0x38a4   :  { %17884 = vtanh.f32 %v11603_v13 }
0x38ab   :  { %v20557_v15 = vpop.eup %17878 }
0x38ac   :  { %v13488_v26 = vmul.f32 %v20557_v15, %v13486_v11  ;;  %v13478_v1 = vmul.f32 %v20557_v15, %v13476_v35  ;;  %v20563_v9 = vpop.eup %17880  ;;  %v15075_v11 = vld [vmem:[%s21270_s9 + $0x440] sm:$0xff]  ;;  %v15080_v35 = vld [vmem:[%s21270_s9 + $0x468] sm:$0xf] }
0x38ad   :  { %v4359_v7 = vmul.f32 %v20563_v9, %v4355_v32  ;;  %v17883_v62 = vpop.eup %17882  ;;  %v4379_v29 = vmul.f32 %v20563_v9, %v4375_v33  ;;  %v17095_v18 = vpack.c.bf16 %v15075_v11, %v15071_v55 }
0x38ae   :  { %13490 = vrot.lane.b32.xlu0 %v13488_v26, %s17993_s17  ;;  %13480 = vrot.lane.b32.xlu1 %v13478_v1, %s17994_s18  ;;  %v17885_v28 = vpop.eup %17884 }
0x38af   :  { %17096 = vmatpush1.bf16.msra.mxu0 %v17095_v18 }
0x38b0   :  { %15083 = vmatprep.subr.msk.mxu0 %vm5094_vm2, %v15080_v35  ;;  %v15082_v35 = vld [vmem:[%s21270_s9 + $0x478] sm:$0xf] }
0x38b2   :  { %4364 = vrot.lane.b32.xlu0 %v4359_v7, %s17995_s19  ;;  %4344 = vrot.lane.b32.xlu1 %v17883_v62, %s17993_s17 }
0x38b3   :  { %15084 = vmatpush1.msk.msra.mxu0 %vm5094_vm2, %v15079_v25  ;;  %v15081_v25 = vld [vmem:[%s21270_s9 + $0x470] sm:$0xf] }
0x38b4   :  { %17098 = vmatprep.subr.bf16.mxu0 %v17097_v60 }
0x38b6   :  { %11606 = vrot.lane.b32.xlu0 %v17885_v28, %s18005_s20  ;;  %4384 = vrot.lane.b32.xlu1 %v4379_v29, %s17994_s18 }
0x390f   :  { %v13472_v14 = vpop.permute.xlu0 %13471 }
0x3910   :  { %v13474_v10 = vmul.f32 %v20557_v15, %v13472_v14  ;;  %v17122_v14 = vpack.c.bf16 %v15104_v42, %v15100_v2  ;;  %v15134_v2 = vld [vmem:[%s21270_s9 + $0x4f8] sm:$0xff] }
0x3911   :  { %v15138_v42 = vld [vmem:[%s21270_s9 + $0x518] sm:$0xff] }
0x3920   :  { %v13491_v61 = vpop.permute.xlu0 %13490  ;;  %v13481_v57 = vpop.permute.xlu1 %13480 }
0x3921   :  { %v13483_v8 = vadd.f32 %v13481_v57, %v13474_v10  ;;  %v15109_v57 = vld [vmem:[%s21270_s9 + $0x4c8] sm:$0xf] }
0x3923   :  { %v20598_v32 = vadd.f32 %v13491_v61, %v13483_v8  ;;  %v15103_v8 = vld [vmem:[%s21270_s9 + $0x498] sm:$0xff] }
0x3924   :  { %v4365_v26 = vpop.permute.xlu0 %4364  ;;  %v4345_v1 = vpop.permute.xlu1 %4344 }
0x3925   :  { %17886 = vtanh.f32 %v20598_v32  ;;  %v4349_v7 = vmul.f32 %v20563_v9, %v4345_v1  ;;  %v15106_v1 = vld [vmem:[%s21270_s9 + $0x4b0] sm:$0xff] }
0x3927   :  { %v4369_v62 = vadd.f32 %v4365_v26, %v4349_v7  ;;  %v15107_v26 = vld [vmem:[%s21270_s9 + $0x4b8] sm:$0xff]  ;;  %v15108_v7 = vld [vmem:[%s21270_s9 + $0x4c0] sm:$0xf] }
0x3928   :  { %v11607_v33 = vpop.permute.xlu0 %11606  ;;  %v4385_v29 = vpop.permute.xlu1 %4384 }
0x3929   :  { %v11609_v28 = vmul.f32 %v20547_v58, %v11607_v33  ;;  %v4389_v20 = vadd.f32 %v4385_v29, %v4369_v62  ;;  %v15077_v58 = vld [vmem:[%s21270_s9 + $0x450] sm:$0xff]  ;;  %v17124_v62 = vpack.c.bf16 %v15107_v26, %v15103_v8  ;;  %v15162_v8 = vld [vmem:[%s21270_s9 + $0x540] sm:$0xff] }
0x392a   :  { %v17099_v11 = vpack.c.bf16 %v15077_v58, %v15073_v17  ;;  %v15135_v17 = vld [vmem:[%s21270_s9 + $0x500] sm:$0xff] }
0x392b   :  { %17888 = vtanh.f32 %v4389_v20  ;;  %11624 = vrot.lane.b32.xlu0 %v11609_v28, %s18007_s22  ;;  %v15111_v20 = vld [vmem:[%s21270_s9 + $0x4d8] sm:$0xf]  ;;  %v15166_v26 = vld [vmem:[%s21270_s9 + $0x560] sm:$0xff] }
0x392f   :  { %v17887_v47 = vpop.eup %17886 }
0x3930   :  { %13496 = vrot.lane.b32.xlu1 %v17887_v47, %s18005_s20  ;;  %v15132_v47 = vld [vmem:[%s21270_s9 + $0x4e8] sm:$0xff] }
0x3935   :  { %v17889_v55 = vpop.eup %17888 }
0x3936   :  { %4396 = vrot.lane.b32.xlu1 %v17889_v55, %s17997_s1  ;;  %v15136_v55 = vld [vmem:[%s21270_s9 + $0x508] sm:$0xff] }
0x393a   :  { %4126 = vrot.lane.b32.xlu1 %v19107_v45, %s17999_s23  ;;  %v15101_v45 = vld [vmem:[%s21270_s9 + $0x488] sm:$0xff] }
0x393e   :  { %14131 = vrot.lane.b32.xlu1 %v11603_v13, %s18000_s28  ;;  %v15105_v13 = vld [vmem:[%s21270_s9 + $0x4a8] sm:$0xff] }
0x393f   :  { %v17120_v60 = vpack.c.bf16 %v15105_v13, %v15101_v45  ;;  %v15140_v13 = vld [vmem:[%s21270_s9 + $0x528] sm:$0xf] }
0x399d   :  { %v20615_v18 = vpop.permute.xlu0 %11624 }
0x399e   :  { %15085 = vmatmul.mubr.msk.f32.vlgmr.msra.gmra.mrb[24].mxu0 %vm5091_vm3, %v20615_v18 }
0x399f   :  { %17100 = vmatpush1.bf16.msra.mxu0 %v17099_v11  ;;  %11775 = vmatprep.mubr.f32.mxu0 %v17998_v37  ;;  %v15110_v11 = vld [vmem:[%s21270_s9 + $0x4d0] sm:$0xf] }
0x39a0   :  { %15086 = vmatprep.subr.msk.mxu0 %vm5094_vm2, %v15082_v35  ;;  %v17150_v35 = vpack.c.bf16 %v15136_v55, %v15132_v47  ;;  %v15164_v47 = vld [vmem:[%s21270_s9 + $0x550] sm:$0xff] }
0x39a2   :  { %v13497_v10 = vpop.permute.xlu1 %13496 }
0x39a3   :  { %15087 = vmatpush1.msk.msra.mxu0 %vm5094_vm2, %v15081_v25  ;;  %v13499_v61 = vmul.f32 %v20557_v15, %v13497_v10  ;;  %v15102_v15 = vld [vmem:[%s21270_s9 + $0x490] sm:$0xff]  ;;  %v15142_v10 = vld [vmem:[%s21270_s9 + $0x538] sm:$0xf] }
0x39a4   :  { %15088 = vmatmul.mubr.msk.f32.vlgmr.msra.gmra.mrb[26].mxu0 %vm5091_vm3, %v20615_v18  ;;  %17121 = vmatprep.subr.bf16.mxu0 %v17120_v60  ;;  %v17126_v33 = vpack.c.bf16 %v15106_v1, %v15102_v15  ;;  %v15137_v25 = vld [vmem:[%s21270_s9 + $0x510] sm:$0xff]  ;;  %v15139_v60 = vld [vmem:[%s21270_s9 + $0x520] sm:$0xf] }
0x39a5   :  { %17123 = vmatpush1.bf16.msra.mxu0 %v17122_v14  ;;  %13514 = vrot.lane.b32.xlu0 %v13499_v61, %s18007_s22  ;;  %v17154_v14 = vpack.c.bf16 %v15138_v42, %v15134_v2  ;;  %v15163_v61 = vld [vmem:[%s21270_s9 + $0x548] sm:$0xff]  ;;  %v15141_v15 = vld [vmem:[%s21270_s9 + $0x530] sm:$0xf] }
0x39a6   :  { %15112 = vmatprep.subr.msk.mxu0 %vm5094_vm2, %v15109_v57  ;;  %12284 = vmatprep.mubr.f32.mxu0 %v17998_v37  ;;  %v15167_v57 = vld [vmem:[%s21270_s9 + $0x568] sm:$0xff] }
0x39a7   :  { %v17180_v1 = vpack.c.bf16 %v15167_v57, %v15163_v61 }
0x39a8   :  { %v4397_v29 = vpop.permute.xlu1 %4396 }
0x39a9   :  { %15113 = vmatpush1.msk.msra.mxu0 %vm5094_vm2, %v15108_v7  ;;  %v4401_v28 = vmul.f32 %v20563_v9, %v4397_v29  ;;  %v15131_v9 = vld [vmem:[%s21270_s9 + $0x4e0] sm:$0xff]  ;;  %v17182_v7 = vpack.c.bf16 %v15166_v26, %v15162_v8  ;;  %v15169_v29 = vld [vmem:[%s21270_s9 + $0x578] sm:$0xff]  ;;  %v525_v26 = vsel %vm428_vm5, %v523_v51, %v18219_v53  ;;  %v4159_v51 = vsel %vm428_vm5, %v4157_v52, %v18888_v31 }
0x39aa   :  { %15114 = vmatmul.mubr.msk.f32.vlgmr.msra.gmra.mrb[24].mxu0 %vm5091_vm3, %v20181_v3  ;;  %17125 = vmatprep.subr.bf16.mxu0 %v17124_v62  ;;  %v17152_v45 = vpack.c.bf16 %v15135_v17, %v15131_v9  ;;  %v15171_v62 = vld [vmem:[%s21270_s9 + $0x588] sm:$0xf]  ;;  %v15173_v17 = vld [vmem:[%s21270_s9 + $0x598] sm:$0xf]  ;;  %v4140_v52 = vld [vmem:[#allocation2 + $0xe0] sm:$0xff] }
0x39ab   :  { %17127 = vmatpush1.bf16.msra.mxu0 %v17126_v33  ;;  %4406 = vrot.lane.b32.xlu0 %v4401_v28, %s17999_s23  ;;  %v15165_v33 = vld [vmem:[%s21270_s9 + $0x558] sm:$0xff]  ;;  %v15170_v28 = vld [vmem:[%s21270_s9 + $0x580] sm:$0xf]  ;;  %v17326_v39 = vadd.f32 %v19203_v24, %v4140_v52 }
0x39ac   :  { %v4127_v58 = vpop.permute.xlu1 %4126  ;;  %15115 = vmatprep.subr.msk.mxu0 %vm5094_vm2, %v15111_v20  ;;  %12355 = vmatprep.mubr.f32.mxu0 %v17998_v37  ;;  %v17184_v20 = vpack.c.bf16 %v15169_v29, %v15165_v33  ;;  %v15198_v29 = vld [vmem:[%s21270_s9 + $0x5c8] sm:$0xff]  ;;  %v15197_v24 = vld [vmem:[%s21270_s9 + $0x5c0] sm:$0xff] }
0x39ad   :  { %4131 = vst.msk [vmem:[#allocation3 + $0xd8] sm:$0xff] %vm496_vm6, %v4127_v58  ;;  %v15172_v58 = vld [vmem:[%s21270_s9 + $0x590] sm:$0xf] }
0x39af   :  { %15116 = vmatpush1.msk.msra.mxu0 %vm5094_vm2, %v15110_v11  ;;  %14141 = vrot.lane.b32.xlu0 %v20598_v32, %s18006_s21  ;;  %v15133_v32 = vld [vmem:[%s21270_s9 + $0x4f0] sm:$0xff] }
0x39b0   :  { %15117 = vmatmul.mubr.msk.f32.vlgmr.msra.gmra.mrb[26].mxu0 %vm5091_vm3, %v20181_v3  ;;  %17151 = vmatprep.subr.bf16.mxu0 %v17150_v35  ;;  %v17156_v3 = vpack.c.bf16 %v15137_v25, %v15133_v32  ;;  %v13676_v35 = vld [vmem:[#allocation3 + $0xcc] sm:$0x3] }
0x39b1   :  { %17153 = vmatpush1.bf16.msra.mxu0 %v17152_v45  ;;  %12939 = vmatprep.mubr.f32.mxu0 %v17998_v37 }
0x39b2   :  { %15143 = vmatprep.subr.msk.mxu0 %vm5094_vm2, %v15140_v13 }
0x39b4   :  { %v13751_v45 = vld [vmem:[#allocation3 + $0xdc] sm:$0x3] }
0x39b5   :  { %15144 = vmatpush1.msk.msra.mxu0 %vm5094_vm2, %v15139_v60 }
0x39b6   :  { %15145 = vmatmul.mubr.msk.f32.vlgmr.msra.gmra.mrb[24].mxu0 %vm5091_vm3, %v20521_v50  ;;  %17155 = vmatprep.subr.bf16.mxu0 %v17154_v14 }
0x39b7   :  { %17157 = vmatpush1.bf16.msra.mxu0 %v17156_v3  ;;  %13010 = vmatprep.mubr.f32.mxu0 %v17998_v37 }
0x39b8   :  { %15146 = vmatprep.subr.msk.mxu0 %vm5094_vm2, %v15142_v10 }
0x39bb   :  { %15147 = vmatpush1.msk.msra.mxu0 %vm5094_vm2, %v15141_v15  ;;  %v1092_v15 = vsel %vm428_vm5, %v1090_v49, %v18219_v53  ;;  %v4160_v49 = vsel %vm428_vm5, 0.0, %v4159_v51 }
0x39bc   :  { %15148 = vmatmul.mubr.msk.f32.vlgmr.msra.gmra.mrb[26].mxu0 %vm5091_vm3, %v20521_v50  ;;  %17181 = vmatprep.subr.bf16.mxu0 %v17180_v1  ;;  %v15168_v50 = vld [vmem:[%s21270_s9 + $0x570] sm:$0xff]  ;;  %v3599_v1 = vsel %vm428_vm5, %v3597_v41, %v18888_v31  ;;  %v1075_v41 = vld [vmem:[#allocation2 + $0x38] sm:$0xff] }
0x39bd   :  { %17183 = vmatpush1.bf16.msra.mxu0 %v17182_v7  ;;  %13594 = vmatprep.mubr.f32.mxu0 %v17998_v37  ;;  %v17186_v55 = vpack.c.bf16 %v15168_v50, %v15164_v47  ;;  %v3600_v40 = vsel %vm428_vm5, 0.0, %v3599_v1  ;;  %v17301_v7 = vadd.f32 %v18426_v12, %v1075_v41  ;;  %v15194_v12 = vld [vmem:[%s21270_s9 + $0x5a8] sm:$0xff]  ;;  %v21282_v1 = vrot.slane %v18982_v48, 6 }
0x39be   :  { %15174 = vmatprep.subr.msk.mxu0 %vm5094_vm2, %v15171_v62  ;;  %v3580_v62 = vld [vmem:[#allocation2 + $0xc0] sm:$0xff]  ;;  %v15202_v50 = vld [vmem:[%s21270_s9 + $0x5e8] sm:$0xf] }
0x39bf   :  { %v17322_v44 = vadd.f32 %v18969_v4, %v3580_v62  ;;  %v15193_v4 = vld [vmem:[%s21270_s9 + $0x5a0] sm:$0xff]  ;;  %v795_v48 = vld [vmem:[#allocation2 + $0x28] sm:$0xff]  ;;  %v3300_v62 = vld [vmem:[#allocation2 + $0xb0] sm:$0xff] }
0x39c0   :  { %v17212_v47 = vpack.c.bf16 %v15197_v24, %v15193_v4  ;;  %v17320_v52 = vadd.f32 %v18923_v59, %v3300_v62  ;;  %v14394_v62 = vld [vmem:[%s21272_s11 + $0x120] sm:$0xff] }
0x39c1   :  { %15175 = vmatpush1.msk.msra.mxu0 %vm5094_vm2, %v15170_v28  ;;  %v17210_v28 = vpack.c.bf16 %v15198_v29, %v15194_v12 }
0x39c2   :  { %17185 = vmatprep.subr.bf16.mxu0 %v17184_v20  ;;  %v14710_v24 = vmul.f32 -1.442695, %v17320_v52 }
0x3a17   :  { %v13515_v9 = vpop.permute.xlu0 %13514 }
0x3a18   :  { %15176 = vmatmul.mubr.msk.f32.vlgmr.msra.gmra.mrb[24].mxu0 %vm5091_vm3, %v13515_v9 }
0x3a19   :  { %17187 = vmatpush1.bf16.msra.mxu0 %v17186_v55  ;;  %13665 = vmatprep.mubr.f32.mxu0 %v17998_v37  ;;  %v15196_v55 = vld [vmem:[%s21270_s9 + $0x5b8] sm:$0xff] }
0x3a1a   :  { %15177 = vmatprep.subr.msk.mxu0 %vm5094_vm2, %v15173_v17  ;;  %v15201_v17 = vld [vmem:[%s21270_s9 + $0x5e0] sm:$0xf] }
0x3a1d   :  { %15178 = vmatpush1.msk.msra.mxu0 %vm5094_vm2, %v15172_v58  ;;  %v4407_v11 = vpop.permute.xlu0 %4406 }
0x3a1e   :  { %15179 = vmatmul.mubr.msk.f32.vlgmr.msra.gmra.mrb[26].mxu0 %vm5091_vm3, %v13515_v9  ;;  %17188 = vmatprep.subr.bf16.mxu0 %v18002_v38  ;;  %4411 = vst.msk [vmem:[#allocation3 + $0xe8] sm:$0xff] %vm496_vm6, %v4407_v11 }
0x3a1f   :  { %17191 = vmatpush3.bf16.msk.msra.mxu0 %vm18122_vm4, %v19026_v19  ;;  %16548 = vmatprep.mubr.msk.f32.mxu0 %vm18003_vm0, %v17998_v37  ;;  %v13826_v19 = vld [vmem:[#allocation3 + $0xde] sm:$0x3] }
0x3a20   :  { %17192 = vmatprep.subr.bf16.mxu0 %v18002_v38 }
0x3a21   :  { %v14142_v32 = vpop.permute.xlu0 %14141 }
0x3a22   :  { %16549 = vmatmul.mubr.msk.f32.vlgmr.msra.gmra.mrb[34].mxu0 %vm496_vm6, %v13676_v35 }
0x3a23   :  { %17195 = vmatpush3.bf16.msk.msra.mxu0 %vm18122_vm4, %v19040_v36  ;;  %16555 = vmatprep.mubr.msk.f32.mxu0 %vm18003_vm0, %v17998_v37 }
0x3a24   :  { %17196 = vmatprep.subr.bf16.mxu0 %v18002_v38 }
0x3a25   :  { %v13901_v36 = vld [vmem:[#allocation3 + $0xee] sm:$0x3] }
0x3a2a   :  { %16556 = vmatmul.mubr.msk.f32.vlgmr.msra.gmra.mrb[34].mxu0 %vm496_vm6, %v13751_v45  ;;  %v14631_v45 = vmul.f32 -1.442695, %v17297_v22 }
0x3a2b   :  { %17199 = vmatpush3.bf16.msk.msra.mxu0 %vm18122_vm4, %v19056_v54  ;;  %16562 = vmatprep.mubr.msk.f32.mxu0 %vm18003_vm0, %v17998_v37 }
0x3a2c   :  { %17200 = vmatprep.subr.bf16.mxu0 %v18002_v38 }
0x3a32   :  { %16563 = vmatmul.mubr.msk.f32.vlgmr.msra.gmra.mrb[34].mxu0 %vm496_vm6, %v13826_v19  ;;  %v14647_v19 = vmul.f32 -1.442695, %v17301_v7 }
0x3a33   :  { %17203 = vmatpush3.bf16.msk.msra.mxu0 %vm18122_vm4, %v19071_v63  ;;  %16569 = vmatprep.mubr.msk.f32.mxu0 %vm18003_vm0, %v17998_v37  ;;  %vm14428_vm4 = vcmask 949248  }
0x3a34   :  { %17204 = vmatprep.subr.bf16.mxu0 %v18002_v38 }
0x3a3a   :  { %16570 = vmatmul.mubr.msk.f32.vlgmr.msra.gmra.mrb[34].mxu0 %vm496_vm6, %v13901_v36  ;;  %v14718_v36 = vmul.f32 -1.442695, %v17322_v44 }
0x3a3b   :  { %17206 = vmatpush3.bf16.msra.mxu0 %v19472_v5  ;;  %16578 = vmatprep.mubr.msk.f32.mxu0 %vm18003_vm0, %v17998_v37 }
0x3a3c   :  { %16576 = vmatprep.subr.mxu0 %v17998_v37 }
0x3a3f   :  { %16577 = vmatpush3.msk.msra.mxu0 %vm5094_vm2, %v17968_v27  ;;  %v14734_v27 = vmul.f32 -1.442695, %v17326_v39 }
0x3a40   :  { %17207 = vmatprep.subr.bf16.mxu0 %v18002_v38 }
0x3a42   :  { %16579 = vmatmul.mubr.msk.f32.vlgmr.msra.gmra.mrb[34].mxu0 %vm5091_vm3, %v20615_v18 }
0x3a43   :  { %17209 = vmatpush3.bf16.msra.mxu0 %v19169_v43  ;;  %16587 = vmatprep.mubr.msk.f32.mxu0 %vm18003_vm0, %v17998_v37 }
0x3a44   :  { %16585 = vmatprep.subr.mxu0 %v17998_v37 }
0x3a47   :  { %16586 = vmatpush3.msk.msra.mxu0 %vm5094_vm2, %v20508_v6  ;;  %v14132_v6 = vpop.permute.xlu1 %14131 }
0x3a48   :  { %17211 = vmatprep.subr.bf16.mxu0 %v17210_v28 }
0x3a4a   :  { %16588 = vmatmul.mubr.msk.f32.vlgmr.msra.gmra.mrb[34].mxu0 %vm5091_vm3, %v13515_v9  ;;  %v15200_v9 = vld [vmem:[%s21270_s9 + $0x5d8] sm:$0xff] }
0x3a4b   :  { %14250 = vmatprep.mubr.f32.mxu0 %v17998_v37  ;;  %17213 = vmatpush1.bf16.msra.mxu0 %v17212_v47  ;;  %v17214_v58 = vpack.c.bf16 %v15200_v9, %v15196_v55 }
0x3a4c   :  { %15205 = vmatprep.subr.msk.mxu0 %vm5094_vm2, %v15202_v50 }
0x3a4f   :  { %15206 = vmatpush1.msk.msra.mxu0 %vm5094_vm2, %v15201_v17 }
0x3a50   :  { %17215 = vmatprep.subr.bf16.mxu0 %v17214_v58  ;;  %v15195_v58 = vld [vmem:[%s21270_s9 + $0x5b0] sm:$0xff] }
0x3b1d   :  { %v14113_v54 = vpop.f32.mrb[34].mxu0 }
0x3b1e   :  { %v17342_v63 = vadd.f32 %v20528_v56, %v14113_v54  ;;  %v16589_v5 = vpop.f32.mrb[35].mxu0 }
0x3b20   :  { %v15192_v13 = vmul.f32 -1.442695, %v17342_v63  ;;  %17890 = vtanh.f32 %v17342_v63 }
0x3b22   :  { %17892 = vpow2.f32 %v15192_v13 }
0x3b2a   :  { %v17891_v43 = vpop.eup %17890 }
0x3b2b   :  { %14126 = vrot.lane.b32.xlu1 %v17891_v43, %s18004_s16 }
0x3b2c   :  { %v17893_v18 = vpop.eup %17892 }
0x3b2d   :  { %v14121_v2 = vadd.f32 1.0, %v17893_v18 }
0x3b2f   :  { %17894 = vrcp.f32 %v14121_v2 }
0x3b39   :  { %v20824_v42 = vpop.eup %17894 }
0x3b3a   :  { %v14144_v25 = vmul.f32 %v20824_v42, %v14142_v32  ;;  %v14134_v60 = vmul.f32 %v20824_v42, %v14132_v6 }
0x3b3c   :  { %14146 = vrot.lane.b32.xlu1 %v14144_v25, %s17993_s17  ;;  %14136 = vrot.lane.b32.xlu0 %v14134_v60, %s17994_s18 }
0x3b9d   :  { %v14127_v56 = vpop.permute.xlu1 %14126 }
0x3b9e   :  { %v14129_v14 = vmul.f32 %v20824_v42, %v14127_v56 }
0x3bae   :  { %v14137_v3 = vpop.permute.xlu0 %14136  ;;  %v14147_v61 = vpop.permute.xlu1 %14146 }
0x3baf   :  { %v14139_v10 = vadd.f32 %v14137_v3, %v14129_v14  ;;  %v21280_v3 = vrot.slane %v18309_v0, 6 }
0x3bb1   :  { %v14149_v57 = vadd.f32 %v14147_v61, %v14139_v10  ;;  %v812_v10 = vsel %vm428_vm5, %v21280_v3, %v18219_v53  ;;  %v431_v61 = vld [vmem:[#allocation2 + $0x8] sm:$0xff] }
0x3bb2   :  { %v14623_v0 = vmul.f32 -1.442695, %v431_v61 }
0x3bb3   :  { %17896 = vtanh.f32 %v14149_v57 }
0x3bb4   :  { %17898 = vtanh.f32 %v17297_v22 }
0x3bb5   :  { %17900 = vtanh.f32 %v17301_v7 }
0x3bb6   :  { %17902 = vtanh.f32 %v17322_v44 }
0x3bb7   :  { %17904 = vtanh.f32 %v17326_v39  ;;  %v3860_v39 = vld [vmem:[#allocation2 + $0xd0] sm:$0xff] }
0x3bb8   :  { %17906 = vpow2.f32 %v14631_v45  ;;  %v17324_v12 = vadd.f32 %v19081_v30, %v3860_v39  ;;  %v14375_v39 = vld [vmem:[%s21272_s11 + $0x88] sm:$0xff] }
0x3bb9   :  { %17908 = vpow2.f32 %v14647_v19 }
0x3bba   :  { %17910 = vpow2.f32 %v14718_v36  ;;  %v15204_v36 = vld [vmem:[%s21270_s9 + $0x5f8] sm:$0xf] }
0x3bbb   :  { %17912 = vpow2.f32 %v14734_v27  ;;  %v15203_v27 = vld [vmem:[%s21270_s9 + $0x5f0] sm:$0xf] }
0x3bbd   :  { %v17897_v8 = vpop.eup %17896 }
0x3bbe   :  { %14152 = vrot.lane.b32.xlu0 %v17897_v8, %s18005_s20  ;;  %v17899_v33 = vpop.eup %17898  ;;  %s18008_s20 = smov [#allocation4]  }
0x3bbf   :  { %v17901_v20 = vpop.eup %17900  ;;  %s14583_s14 = sshll.u32 %s18008_s20, 4  ;;  %s14584_s14 = int_to_ptr.vmem [resolvable:$true] %s14583_s14 }
0x3bc0   :  { %v17903_v11 = vpop.eup %17902  ;;  %p17974_p1 = scmp.lt.s32.totalorder %s14584_s14, %s14584_s14 }
0x3bc1   :  { %v17905_v35 = vpop.eup %17904 }
0x3bc2   :  { %728 = vrot.lane.b32.xlu0 %v525_v26, %s18001_s3  ;;  %v17907_v54 = vpop.eup %17906 }
0x3bc3   :  { %v707_v63 = vadd.f32 1.0, %v17907_v54  ;;  %v17909_v5 = vpop.eup %17908 }
0x3bc4   :  { %v1267_v13 = vadd.f32 1.0, %v17909_v5  ;;  %v17911_v43 = vpop.eup %17910 }
0x3bc5   :  { %17914 = vrcp.f32 %v707_v63  ;;  %v3772_v18 = vadd.f32 1.0, %v17911_v43  ;;  %v17913_v2 = vpop.eup %17912 }
0x3bc6   :  { %1288 = vrot.lane.b32.xlu0 %v1092_v15, %s18001_s3  ;;  %17916 = vrcp.f32 %v1267_v13  ;;  %v4332_v25 = vadd.f32 1.0, %v17913_v2 }
0x3bc7   :  { %17918 = vrcp.f32 %v3772_v18 }
0x3bc8   :  { %17920 = vrcp.f32 %v4332_v25 }
0x3bc9   :  { %17922 = vpow2.f32 %v14623_v0 }
0x3bca   :  { %3792 = vrot.lane.b32.xlu0 %v3600_v40, %s18001_s3  ;;  %17924 = vtanh.f32 %v431_v61 }
0x3bce   :  { %4352 = vrot.lane.b32.xlu0 %v4160_v49, %s18001_s3 }
0x3bcf   :  { %v20902_v60 = vpop.eup %17914 }
0x3bd0   :  { %v20917_v8 = vpop.eup %17916 }
0x3bd1   :  { %v20929_v40 = vpop.eup %17918 }
0x3bd2   :  { %1308 = vrot.lane.b32.xlu0 %v17998_v37, %s18000_s28  ;;  %v20936_v22 = vpop.eup %17920 }
0x3bd3   :  { %v17923_v44 = vpop.eup %17922 }
0x3bd4   :  { %v17925_v29 = vpop.eup %17924 }
0x3bd6   :  { %3812 = vrot.lane.b32.xlu0 %v18877_v23, %s18000_s28 }
0x3bda   :  { %4372 = vrot.lane.b32.xlu0 %v18877_v23, %s18000_s28 }
0x3bde   :  { %718 = vrot.lane.b32.xlu0 %v17899_v33, %s17993_s17  ;;  %v439_v33 = vadd.f32 1.0, %v17923_v44  ;;  %v14395_v44 = vld [vmem:[%s21272_s11 + $0x128] sm:$0xff] }
0x3be2   :  { %1278 = vrot.lane.b32.xlu0 %v17901_v20, %s17993_s17  ;;  %v14726_v20 = vmul.f32 -1.442695, %v17324_v12 }
0x3be6   :  { %3782 = vrot.lane.b32.xlu0 %v17903_v11, %s17993_s17  ;;  %v15199_v11 = vld [vmem:[%s21270_s9 + $0x5d0] sm:$0xff] }
0x3be7   :  { %v17216_v45 = vpack.c.bf16 %v15199_v11, %v15195_v58  ;;  %v14398_v11 = vld [vmem:[%s21272_s11 + $0x140] sm:$0xff] }
0x3bea   :  { %4342 = vrot.lane.b32.xlu0 %v17905_v35, %s17993_s17 }
0x3c30   :  { %v14153_v6 = vpop.permute.xlu0 %14152 }
0x3c31   :  { %v14155_v32 = vmul.f32 %v20824_v42, %v14153_v6  ;;  %v21281_v42 = vrot.slane %v18868_v16, 6  ;;  %v3879_v16 = vsel %vm428_vm5, %v21282_v1, %v18888_v31 }
0x3c32   :  { %v3880_v49 = vsel %vm428_vm5, 0.0, %v3879_v16 }
0x3c33   :  { %14170 = vrot.lane.b32.xlu1 %v14155_v32, %s18007_s22  ;;  %v3319_v57 = vsel %vm428_vm5, %v21281_v42, %v18888_v31  ;;  %v17299_v31 = vadd.f32 %v18364_v21, %v795_v48  ;;  %v14392_v48 = vld [vmem:[%s21272_s11 + $0x110] sm:$0xff] }
0x3c34   :  { %v729_v56 = vpop.permute.xlu0 %728  ;;  %v3320_v53 = vsel %vm428_vm5, 0.0, %v3319_v57  ;;  %vm14575_vm5 = vcmask 74752  }
0x3c35   :  { %v733_v14 = vmul.f32 %v20902_v60, %v729_v56  ;;  %17926 = vtanh.f32 %v17299_v31  ;;  %v14639_v30 = vmul.f32 -1.442695, %v17299_v31 }
0x3c36   :  { %17928 = vtanh.f32 %v17320_v52  ;;  %v14374_v52 = vld [vmem:[%s21272_s11 + $0x80] sm:$0xff] }
0x3c37   :  { %1008 = vrot.lane.b32.xlu1 %v812_v10, %s18001_s3  ;;  %738 = vrot.lane.b32.xlu0 %v733_v14, %s17995_s19  ;;  %17930 = vrcp.f32 %v439_v33  ;;  %v17218_v33 = vpack.c.bf16 %v14375_v39, %v14374_v52 }
0x3c38   :  { %v1289_v26 = vpop.permute.xlu0 %1288  ;;  %17932 = vtanh.f32 %v17324_v12  ;;  %v14358_v12 = vld [vmem:[%s21272_s11] sm:$0xff] }
0x3c39   :  { %v1293_v15 = vmul.f32 %v20917_v8, %v1289_v26  ;;  %17934 = vpow2.f32 %v14639_v30  ;;  %v14397_v30 = vld [vmem:[%s21272_s11 + $0x138] sm:$0xff]  ;;  %17219 = vmatprep.subr.bf16.mxu1 %v17218_v33  ;;  %v14370_v33 = vld [vmem:[%s21272_s11 + $0x60] sm:$0xff] }
0x3c3a   :  { %17936 = vpow2.f32 %v14710_v24 }
0x3c3b   :  { %3512 = vrot.lane.b32.xlu1 %v3320_v53, %s18001_s3  ;;  %1298 = vrot.lane.b32.xlu0 %v1293_v15, %s17995_s19  ;;  %17938 = vpow2.f32 %v14726_v20 }
0x3c3c   :  { %v3793_v51 = vpop.permute.xlu0 %3792 }
0x3c3d   :  { %v3798_v46 = vmul.f32 %v20929_v40, %v3793_v51 }
0x3c3f   :  { %4072 = vrot.lane.b32.xlu1 %v3880_v49, %s18001_s3  ;;  %3802 = vrot.lane.b32.xlu0 %v3798_v46, %s17995_s19  ;;  %v17927_v21 = vpop.eup %17926  ;;  %v14390_v46 = vld [vmem:[%s21272_s11 + $0x100] sm:$0xff]  ;;  %v14391_v49 = vld [vmem:[%s21272_s11 + $0x108] sm:$0xff] }
0x3c40   :  { %v4353_v41 = vpop.permute.xlu0 %4352  ;;  %v17929_v4 = vpop.eup %17928 }
0x3c41   :  { %v4358_v7 = vmul.f32 %v20936_v22, %v4353_v41  ;;  %v20952_v59 = vpop.eup %17930  ;;  %v17251_v41 = vpack.c.bf16 %v14391_v49, %v14390_v46  ;;  %v14404_v46 = vld [vmem:[%s21272_s11 + $0x170] sm:$0xff] }
0x3c42   :  { %v17933_v28 = vpop.eup %17932 }
0x3c43   :  { %17590 = vrot.lane.b32.xlu1 %v17998_v37, %s18000_s28  ;;  %4362 = vrot.lane.b32.xlu0 %v4358_v7, %s17995_s19  ;;  %v17935_v47 = vpop.eup %17934  ;;  %v14393_v7 = vld [vmem:[%s21272_s11 + $0x118] sm:$0xff] }
0x3c44   :  { %v987_v50 = vadd.f32 1.0, %v17935_v47  ;;  %v17937_v55 = vpop.eup %17936  ;;  %v1309_v25 = vpop.permute.xlu0 %1308  ;;  %v17254_v31 = vpack.c.bf16 %v14393_v7, %v14392_v48  ;;  %v14360_v47 = vld [vmem:[%s21272_s11 + $0x10] sm:$0xff]  ;;  %v14369_v48 = vld [vmem:[%s21272_s11 + $0x58] sm:$0xff] }
0x3c45   :  { %v3492_v9 = vadd.f32 1.0, %v17937_v55  ;;  %v17939_v17 = vpop.eup %17938  ;;  %v1313_v26 = vmul.f32 %v20917_v8, %v1309_v25  ;;  %v14378_v55 = vld [vmem:[%s21272_s11 + $0xa0] sm:$0xff]  ;;  %v14365_v25 = vld [vmem:[%s21272_s11 + $0x38] sm:$0xff] }
0x3c46   :  { %17940 = vrcp.f32 %v987_v50  ;;  %v4052_v35 = vadd.f32 1.0, %v17939_v17  ;;  %v14361_v50 = vld [vmem:[%s21272_s11 + $0x18] sm:$0xff] }
0x3c47   :  { %3532 = vrot.lane.b32.xlu1 %v18877_v23, %s18000_s28  ;;  %17942 = vrcp.f32 %v3492_v9  ;;  %v14379_v9 = vld [vmem:[%s21272_s11 + $0xa8] sm:$0xff]  ;;  %v17224_v17 = vpack.c.bf16 %v14361_v50, %v14360_v47  ;;  %v14405_v7 = vld [vmem:[%s21272_s11 + $0x178] sm:$0xff] }
0x3c48   :  { %17944 = vrcp.f32 %v4052_v35  ;;  %v3813_v57 = vpop.permute.xlu0 %3812  ;;  %v17226_v35 = vpack.c.bf16 %v14379_v9, %v14378_v55  ;;  %v17272_v52 = vpack.c.bf16 %v14405_v7, %v14404_v46  ;;  %v14411_v47 = vld [vmem:[%s21272_s11 + $0x1a8] sm:$0xff]  ;;  %v14412_v55 = vld [vmem:[%s21272_s11 + $0x1b0] sm:$0xff]  ;;  %v14413_v9 = vld [vmem:[%s21272_s11 + $0x1b8] sm:$0xff] }
0x3c49   :  { %v3818_v53 = vmul.f32 %v20929_v40, %v3813_v57 }
0x3c4b   :  { %4092 = vrot.lane.b32.xlu1 %v18877_v23, %s18000_s28  ;;  %v457_v23 = vmul.f32 0.0, %v20952_v59 }
0x3c4c   :  { %v4373_v1 = vpop.permute.xlu0 %4372 }
0x3c4d   :  { %v4378_v51 = vmul.f32 %v20936_v22, %v4373_v1  ;;  %v14385_v1 = vld [vmem:[%s21272_s11 + $0xd8] sm:$0xff] }
0x3c4f   :  { %450 = vrot.lane.b32.xlu1 %v17925_v29, %s17993_s17  ;;  %v17257_v29 = vpack.c.bf16 %v14395_v44, %v14394_v62  ;;  %v14387_v62 = vld [vmem:[%s21272_s11 + $0xe8] sm:$0xff] }
0x3c50   :  { %v20972_v54 = vpop.eup %17940 }
0x3c51   :  { %v20978_v13 = vpop.eup %17942 }
0x3c52   :  { %v20983_v2 = vpop.eup %17944 }
0x3c53   :  { %998 = vrot.lane.b32.xlu1 %v17927_v21, %s17993_s17  ;;  %v14359_v21 = vld [vmem:[%s21272_s11 + $0x8] sm:$0xff] }
0x3c54   :  { %v17220_v24 = vpack.c.bf16 %v14359_v21, %v14358_v12  ;;  %v14371_v12 = vld [vmem:[%s21272_s11 + $0x68] sm:$0xff] }
0x3c55   :  { %v14407_v21 = vld [vmem:[%s21272_s11 + $0x188] sm:$0xff] }
0x3c56   :  { %17221 = vmatpush3.bf16.msra.mxu1 %v17220_v24 }
0x3c57   :  { %3502 = vrot.lane.b32.xlu1 %v17929_v4, %s17993_s17  ;;  %v14376_v4 = vld [vmem:[%s21272_s11 + $0x90] sm:$0xff] }
0x3c5b   :  { %4062 = vrot.lane.b32.xlu1 %v17933_v28, %s17993_s17  ;;  %v14377_v28 = vld [vmem:[%s21272_s11 + $0x98] sm:$0xff] }
0x3c5c   :  { %v17222_v20 = vpack.c.bf16 %v14377_v28, %v14376_v4  ;;  %v17244_v4 = vpack.c.bf16 %v14371_v12, %v14370_v33 }
0x3c5e   :  { %17223 = vmatprep.subr.bf16.mxu1 %v17222_v20  ;;  %v14410_v20 = vld [vmem:[%s21272_s11 + $0x1a0] sm:$0xff] }
0x3c5f   :  { %462 = vrot.lane.b32.xlu1 %v457_v23, %s17995_s19  ;;  %17225 = vmatpush3.bf16.msra.mxu1 %v17224_v17  ;;  %v17281_v50 = vpack.c.bf16 %v14411_v47, %v14410_v20  ;;  %v17284_v17 = vpack.c.bf16 %v14413_v9, %v14412_v55 }
0x3c60   :  { %17227 = vmatprep.subr.bf16.mxu1 %v17226_v35 }
0x3ca5   :  { %v14171_v19 = vpop.permute.xlu1 %14170 }
0x3ca6   :  { %15207 = vmatmul.mubr.msk.f32.vlgmr.msra.gmra.mrb[24].mxu0 %vm5091_vm3, %v14171_v19 }
0x3ca7   :  { %17217 = vmatpush1.bf16.msra.mxu0 %v17216_v45  ;;  %14321 = vmatprep.mubr.f32.mxu0 %v17998_v37  ;;  %v14362_v45 = vld [vmem:[%s21272_s11 + $0x20] sm:$0xff] }
0x3ca8   :  { %15208 = vmatprep.subr.msk.mxu0 %vm5094_vm2, %v15204_v36  ;;  %v14399_v36 = vld [vmem:[%s21272_s11 + $0x148] sm:$0xff] }
0x3ca9   :  { %v1009_v63 = vpop.permute.xlu1 %1008 }
0x3caa   :  { %v1013_v5 = vmul.f32 %v20972_v54, %v1009_v63  ;;  %v14381_v63 = vld [vmem:[%s21272_s11 + $0xb8] sm:$0xff] }
0x3cab   :  { %15209 = vmatpush1.msk.msra.mxu0 %vm5094_vm2, %v15203_v27  ;;  %v14380_v27 = vld [vmem:[%s21272_s11 + $0xb0] sm:$0xff] }
0x3cac   :  { %15210 = vmatmul.mubr.msk.f32.vlgmr.msra.gmra.mrb[26].mxu0 %vm5091_vm3, %v14171_v19  ;;  %1018 = vrot.lane.b32.xlu1 %v1013_v5, %s17995_s19  ;;  %v14363_v19 = vld [vmem:[%s21272_s11 + $0x28] sm:$0xff] }
0x3cad   :  { %v3513_v43 = vpop.permute.xlu1 %3512  ;;  %17250 = vmatprep.subr.bf16.mxu0 %v18002_v38  ;;  %v17228_v5 = vpack.c.bf16 %v14363_v19, %v14362_v45  ;;  %v14388_v45 = vld [vmem:[%s21272_s11 + $0xf0] sm:$0xff]  ;;  %v14389_v19 = vld [vmem:[%s21272_s11 + $0xf8] sm:$0xff] }
0x3cae   :  { %v3518_v18 = vmul.f32 %v20978_v13, %v3513_v43  ;;  %17252 = vmatpush1.bf16.msra.mxu0 %v17251_v41  ;;  %v17263_v43 = vpack.c.bf16 %v14399_v36, %v14398_v11  ;;  %v14368_v41 = vld [vmem:[%s21272_s11 + $0x50] sm:$0xff]  ;;  %v14415_v11 = vld [vmem:[%s21272_s11 + $0x1c8] sm:$0xff]  ;;  %v17246_v36 = vpack.c.bf16 %v14389_v19, %v14388_v45 }
0x3caf   :  { %17253 = vmatprep.subr.bf16.mxu0 %v18002_v38  ;;  %17229 = vmatpush3.bf16.msra.mxu1 %v17228_v5  ;;  %v17240_v44 = vpack.c.bf16 %v14369_v48, %v14368_v41  ;;  %v14372_v5 = vld [vmem:[%s21272_s11 + $0x70] sm:$0xff] }
0x3cb0   :  { %3522 = vrot.lane.b32.xlu1 %v3518_v18, %s17995_s19  ;;  %v14400_v18 = vld [vmem:[%s21272_s11 + $0x150] sm:$0xff] }
0x3cb1   :  { %v4073_v6 = vpop.permute.xlu1 %4072 }
0x3cb2   :  { %v4078_v32 = vmul.f32 %v20983_v2, %v4073_v6  ;;  %17255 = vmatpush1.bf16.msra.mxu0 %v17254_v31  ;;  %v17230_v6 = vpack.c.bf16 %v14381_v63, %v14380_v27  ;;  %v14386_v31 = vld [vmem:[%s21272_s11 + $0xe0] sm:$0xff]  ;;  %v14416_v27 = vld [vmem:[%s21272_s11 + $0x1d0] sm:$0xff]  ;;  %v14417_v63 = vld [vmem:[%s21272_s11 + $0x1d8] sm:$0xff] }
0x3cb3   :  { %17256 = vmatprep.subr.bf16.mxu0 %v18002_v38  ;;  %v17242_v39 = vpack.c.bf16 %v14387_v62, %v14386_v31 }
0x3cb4   :  { %4082 = vrot.lane.b32.xlu1 %v4078_v32, %s17995_s19  ;;  %v14364_v32 = vld [vmem:[%s21272_s11 + $0x30] sm:$0xff]  ;;  %17231 = vmatprep.subr.bf16.mxu1 %v17230_v6 }
0x3cb5   :  { %v17591_v56 = vpop.permute.xlu1 %17590 }
0x3cb6   :  { %v17593_v14 = vunpack.i.h.bf16 %v17591_v56  ;;  %v17592_v3 = vunpack.i.l.bf16 %v17591_v56  ;;  %17258 = vmatpush1.bf16.msra.mxu0 %v17257_v29  ;;  %v14401_v56 = vld [vmem:[%s21272_s11 + $0x158] sm:$0xff]  ;;  %v14406_v29 = vld [vmem:[%s21272_s11 + $0x180] sm:$0xff] }
0x3cb7   :  { %17259 = vmatprep.subr.bf16.mxu0 %v18002_v38  ;;  %v17275_v28 = vpack.c.bf16 %v14407_v21, %v14406_v29 }
0x3cb8   :  { %v753_v10 = vmul.f32 %v20902_v60, %v17592_v3  ;;  %470 = vrot.lane.b32.xlu1 %v457_v23, %s17994_s18  ;;  %v1033_v42 = vmul.f32 %v20972_v54, %v17593_v14  ;;  %v14396_v23 = vld [vmem:[%s21272_s11 + $0x130] sm:$0xff]  ;;  %v14382_v14 = vld [vmem:[%s21272_s11 + $0xc0] sm:$0xff]  ;;  %v14383_v3 = vld [vmem:[%s21272_s11 + $0xc8] sm:$0xff] }
0x3cb9   :  { %v3533_v61 = vpop.permute.xlu1 %3532  ;;  %v17260_v58 = vpack.c.bf16 %v14397_v30, %v14396_v23  ;;  %v17234_v57 = vpack.c.bf16 %v14383_v3, %v14382_v14  ;;  %v14408_v23 = vld [vmem:[%s21272_s11 + $0x190] sm:$0xff]  ;;  %v14409_v30 = vld [vmem:[%s21272_s11 + $0x198] sm:$0xff]  ;;  %v719_v14 = vpop.permute.xlu0 %718 }
0x3cba   :  { %758 = vrot.lane.b32.xlu0 %v753_v10, %s17994_s18  ;;  %v3538_v15 = vmul.f32 %v20978_v13, %v3533_v61  ;;  %v17232_v10 = vpack.c.bf16 %v14365_v25, %v14364_v32  ;;  %v17266_v61 = vpack.c.bf16 %v14401_v56, %v14400_v18  ;;  %v17278_v24 = vpack.c.bf16 %v14409_v30, %v14408_v23  ;;  %v14373_v18 = vld [vmem:[%s21272_s11 + $0x78] sm:$0xff]  ;;  %v14418_v32 = vld [vmem:[%s21272_s11 + $0x1e0] sm:$0xff]  ;;  %v14419_v25 = vld [vmem:[%s21272_s11 + $0x1e8] sm:$0xff] }
0x3cbb   :  { %17261 = vmatpush1.bf16.msra.mxu0 %v17260_v58  ;;  %v14414_v58 = vld [vmem:[%s21272_s11 + $0x1c0] sm:$0xff]  ;;  %v17248_v6 = vpack.c.bf16 %v14373_v18, %v14372_v5  ;;  %v17293_v56 = vpack.c.bf16 %v14419_v25, %v14418_v32  ;;  %v14420_v3 = vld [vmem:[%s21272_s11 + $0x1f0] sm:$0xf]  ;;  %v723_v48 = vmul.f32 %v20902_v60, %v719_v14 }
0x3cbc   :  { %1038 = vrot.lane.b32.xlu1 %v1033_v42, %s17994_s18  ;;  %17262 = vmatprep.subr.bf16.mxu0 %v18002_v38  ;;  %v14402_v42 = vld [vmem:[%s21272_s11 + $0x160] sm:$0xff]  ;;  %v17287_v35 = vpack.c.bf16 %v14415_v11, %v14414_v58 }
0x3cbd   :  { %v4093_v0 = vpop.permute.xlu1 %4092  ;;  %17233 = vmatpush3.bf16.msra.mxu1 %v17232_v10 }
0x3cbe   :  { %1318 = vrot.lane.b32.xlu0 %v1313_v26, %s17994_s18  ;;  %v4098_v16 = vmul.f32 %v20983_v2, %v4093_v0  ;;  %v14366_v26 = vld [vmem:[%s21272_s11 + $0x40] sm:$0xff]  ;;  %v14403_v0 = vld [vmem:[%s21272_s11 + $0x168] sm:$0xff]  ;;  %17235 = vmatprep.subr.bf16.mxu1 %v17234_v57 }
0x3cbf   :  { %17264 = vmatpush1.bf16.msra.mxu0 %v17263_v43  ;;  %v17290_v43 = vpack.c.bf16 %v14417_v63, %v14416_v27 }
0x3cc0   :  { %3542 = vrot.lane.b32.xlu1 %v3538_v15, %s17994_s18  ;;  %v14367_v15 = vld [vmem:[%s21272_s11 + $0x48] sm:$0xff]  ;;  %17265 = vmatprep.subr.bf16.mxu0 %v18002_v38 }
0x3cc1   :  { %v451_v10 = vpop.permute.xlu1 %450 }
0x3cc2   :  { %3822 = vrot.lane.b32.xlu0 %v3818_v53, %s17994_s18  ;;  %v14384_v53 = vld [vmem:[%s21272_s11 + $0xd0] sm:$0xff] }
0x3cc3   :  { %17267 = vmatpush1.bf16.msra.mxu0 %v17266_v61  ;;  %v17238_v49 = vpack.c.bf16 %v14385_v1, %v14384_v53  ;;  %v1279_v61 = vpop.permute.xlu0 %1278 }
0x3cc4   :  { %4102 = vrot.lane.b32.xlu1 %v4098_v16, %s17994_s18  ;;  %v17236_v16 = vpack.c.bf16 %v14367_v15, %v14366_v26  ;;  %17268 = vmatprep.subr.bf16.mxu0 %v18002_v38  ;;  %v1283_v33 = vmul.f32 %v20917_v8, %v1279_v61  ;;  %v14332_v61 = vld [vmem:[%s21271_s10] sm:$0xf] }
0x3cc6   :  { %4382 = vrot.lane.b32.xlu0 %v4378_v51, %s17994_s18  ;;  %v17269_v51 = vpack.c.bf16 %v14403_v0, %v14402_v42  ;;  %17237 = vmatpush3.bf16.msra.mxu1 %v17236_v16  ;;  %v999_v42 = vpop.permute.xlu1 %998 }
0x3cc7   :  { %17239 = vmatprep.subr.bf16.mxu1 %v17238_v49  ;;  %v3783_v57 = vpop.permute.xlu0 %3782  ;;  %v455_v49 = vmul.f32 %v20952_v59, %v451_v10  ;;  %v14340_v10 = vsub.s32 1, %v18146_v34 }
0x3cc8   :  { %17270 = vmatpush1.bf16.msra.mxu0 %v17269_v51 }
0x3cc9   :  { %17271 = vmatprep.subr.bf16.mxu0 %v18002_v38 }
0x3cca   :  { %17241 = vmatpush3.bf16.msra.mxu1 %v17240_v44  ;;  %v3503_v26 = vpop.permute.xlu1 %3502  ;;  %v1003_v44 = vmul.f32 %v20972_v54, %v999_v42  ;;  %v14336_v42 = vsub.s32 0, %v18146_v34 }
0x3ccb   :  { %17243 = vmatprep.subr.bf16.mxu1 %v17242_v39  ;;  %v4343_v15 = vpop.permute.xlu0 %4342 }
0x3ccc   :  { %17273 = vmatpush1.bf16.msra.mxu0 %v17272_v52  ;;  %v4348_v11 = vmul.f32 %v20936_v22, %v4343_v15 }
0x3ccd   :  { %17274 = vmatprep.subr.bf16.mxu0 %v18002_v38 }
0x3cce   :  { %17245 = vmatpush3.bf16.msra.mxu1 %v17244_v4  ;;  %v4063_v0 = vpop.permute.xlu1 %4062 }
0x3ccf   :  { %17247 = vmatprep.subr.bf16.mxu1 %v17246_v36  ;;  %v739_v53 = vpop.permute.xlu0 %738  ;;  %v4068_v9 = vmul.f32 %v20983_v2, %v4063_v0  ;;  %v14348_v0 = vsub.s32 3, %v18146_v34 }
0x3cd0   :  { %17276 = vmatpush1.bf16.msra.mxu0 %v17275_v28  ;;  %v743_v62 = vadd.f32 %v739_v53, %v723_v48  ;;  %v3508_v28 = vmul.f32 %v20978_v13, %v3503_v26  ;;  %v14337_v26 = vrot.slane %v14332_v61, %v14336_v42 }
0x3cd1   :  { %17277 = vmatprep.subr.bf16.mxu0 %v18002_v38 }
0x3cd2   :  { %17249 = vmatpush3.bf16.msra.mxu1 %v17248_v6 }
0x3cd3   :  { %v1299_v1 = vpop.permute.xlu0 %1298 }
0x3cd4   :  { %17279 = vmatpush1.bf16.msra.mxu0 %v17278_v24  ;;  %v1303_v4 = vadd.f32 %v1299_v1, %v1283_v33  ;;  %v3788_v24 = vmul.f32 %v20929_v40, %v3783_v57  ;;  %v14341_v57 = vrot.slane %v14332_v61, %v14340_v10 }
0x3cd5   :  { %17280 = vmatprep.subr.bf16.mxu0 %v18002_v38 }
0x3cd7   :  { %v3803_v51 = vpop.permute.xlu0 %3802 }
0x3cd8   :  { %17282 = vmatpush1.bf16.msra.mxu0 %v17281_v50  ;;  %v3808_v55 = vadd.f32 %v3803_v51, %v3788_v24  ;;  %v14349_v51 = vrot.slane %v14332_v61, %v14348_v0 }
0x3cd9   :  { %17283 = vmatprep.subr.bf16.mxu0 %v18002_v38 }
0x3cdb   :  { %v4363_v41 = vpop.permute.xlu0 %4362 }
0x3cdc   :  { %17285 = vmatpush1.bf16.msra.mxu0 %v17284_v17  ;;  %v4368_v27 = vadd.f32 %v4363_v41, %v4348_v11 }
0x3cdd   :  { %17286 = vmatprep.subr.bf16.mxu0 %v18002_v38 }
0x3ce0   :  { %17288 = vmatpush1.bf16.msra.mxu0 %v17287_v35 }
0x3ce1   :  { %17289 = vmatprep.subr.bf16.mxu0 %v18002_v38 }
0x3ce4   :  { %17291 = vmatpush1.bf16.msra.mxu0 %v17290_v43 }
0x3ce5   :  { %17292 = vmatprep.subr.bf16.mxu0 %v18002_v38  ;;  %v463_v38 = vpop.permute.xlu1 %462 }
0x3ce6   :  { %v467_v7 = vadd.f32 %v463_v38, %v455_v49  ;;  %v14344_v38 = vsub.s32 2, %v18146_v34 }
0x3ce8   :  { %17294 = vmatpush1.bf16.msra.mxu0 %v17293_v56 }
0x3ce9   :  { %14565 = vmatprep.subr.mxu0 %v17998_v37 }
0x3cec   :  { %15212 = vmatpush1.msk.msra.mxu0 %vm5094_vm2, %v14420_v3 }
0x3d1e   :  { %v1019_v16 = vpop.permute.xlu1 %1018 }
0x3d1f   :  { %v1023_v12 = vadd.f32 %v1019_v16, %v1003_v44 }
0x3d22   :  { %v3523_v46 = vpop.permute.xlu1 %3522 }
0x3d23   :  { %v3528_v20 = vadd.f32 %v3523_v46, %v3508_v28  ;;  %v14345_v46 = vrot.slane %v14332_v61, %v14344_v38 }
0x3d26   :  { %v4083_v37 = vpop.permute.xlu1 %4082 }
0x3d27   :  { %v4088_v35 = vadd.f32 %v4083_v37, %v4068_v9 }
0x3d2a   :  { %v471_v31 = vpop.permute.xlu1 %470 }
0x3d2b   :  { %v475_v52 = vadd.f32 %v471_v31, %v467_v7 }
0x3d2c   :  { %v759_v39 = vpop.permute.xlu0 %758 }
0x3d2d   :  { %17946 = vtanh.f32 %v475_v52  ;;  %v763_v29 = vadd.f32 %v759_v39, %v743_v62 }
0x3d2e   :  { %v1039_v21 = vpop.permute.xlu1 %1038 }
0x3d2f   :  { %17948 = vtanh.f32 %v763_v29  ;;  %v1043_v23 = vadd.f32 %v1039_v21, %v1023_v12 }
0x3d30   :  { %v1319_v30 = vpop.permute.xlu0 %1318 }
0x3d31   :  { %17950 = vtanh.f32 %v1043_v23  ;;  %v1323_v47 = vadd.f32 %v1319_v30, %v1303_v4 }
0x3d32   :  { %v3543_v50 = vpop.permute.xlu1 %3542 }
0x3d33   :  { %17952 = vtanh.f32 %v1323_v47  ;;  %v3548_v17 = vadd.f32 %v3543_v50, %v3528_v20 }
0x3d34   :  { %v3823_v58 = vpop.permute.xlu0 %3822 }
0x3d35   :  { %17954 = vtanh.f32 %v3548_v17  ;;  %v3828_v45 = vadd.f32 %v3823_v58, %v3808_v55 }
0x3d36   :  { %v4103_v19 = vpop.permute.xlu1 %4102 }
0x3d37   :  { %v17947_v36 = vpop.eup %17946  ;;  %17956 = vtanh.f32 %v3828_v45  ;;  %v4108_v63 = vadd.f32 %v4103_v19, %v4088_v35 }
0x3d38   :  { %482 = vrot.lane.b32.xlu1 %v17947_v36, %s17997_s1  ;;  %v4383_v5 = vpop.permute.xlu0 %4382 }
0x3d39   :  { %v17949_v43 = vpop.eup %17948  ;;  %17958 = vtanh.f32 %v4108_v63  ;;  %v4388_v18 = vadd.f32 %v4383_v5, %v4368_v27 }
0x3d3a   :  { %770 = vrot.lane.b32.xlu0 %v17949_v43, %s17997_s1 }
0x3d3b   :  { %v17951_v6 = vpop.eup %17950  ;;  %17960 = vtanh.f32 %v4388_v18 }
0x3d3c   :  { %1050 = vrot.lane.b32.xlu1 %v17951_v6, %s17997_s1 }
0x3d3d   :  { %v17953_v32 = vpop.eup %17952 }
0x3d3e   :  { %1330 = vrot.lane.b32.xlu0 %v17953_v32, %s17997_s1 }
0x3d3f   :  { %v17955_v25 = vpop.eup %17954 }
0x3d40   :  { %3554 = vrot.lane.b32.xlu1 %v17955_v25, %s17997_s1 }
0x3d41   :  { %v17957_v56 = vpop.eup %17956 }
0x3d42   :  { %3834 = vrot.lane.b32.xlu0 %v17957_v56, %s17997_s1 }
0x3d43   :  { %v17959_v14 = vpop.eup %17958 }
0x3d44   :  { %4114 = vrot.lane.b32.xlu1 %v17959_v14, %s17997_s1 }
0x3d45   :  { %v17961_v3 = vpop.eup %17960 }
0x3d46   :  { %4394 = vrot.lane.b32.xlu0 %v17961_v3, %s17997_s1 }
0x3d79   :  { %v14252_v15 = vpop.f32.mrb[24].mxu0 }
0x3d7a   :  { %v14254_v53 = vpop.f32.mrb[25].mxu0  ;;  %v14354_v16 = vadd.f32 %v14337_v26, %v14252_v15 }
0x3d7b   :  { %v14355_v1 = vadd.f32 %v14341_v57, %v14254_v53 }
0x3d7d   :  { %14499 = vmatprep.mubr.f32.mxu1 %v14355_v1 }
0x3d7e   :  { %14500 = vmatmul.mubr.f32.vlgmr.msra.gmra.mrb[60].mxu1 %v14354_v16 }
0x3d7f   :  { %v14323_v37 = vpop.f32.mrb[26].mxu0 }
0x3d80   :  { %v14325_v49 = vpop.f32.mrb[27].mxu0  ;;  %v14356_v48 = vadd.f32 %v14345_v46, %v14323_v37 }
0x3d81   :  { %v14357_v41 = vadd.f32 %v14349_v51, %v14325_v49 }
0x3d83   :  { %15213 = vmatprep.mubr.msk.f32.mxu0 %vm14428_vm4, %v14357_v41 }
0x3d84   :  { %14570 = vmatmul.mubr.f32.vlgmr.msra.gmra.mrb[36].mxu0 %v14356_v48 }
0x3daa   :  { %v483_v7 = vpop.permute.xlu1 %482 }
0x3dab   :  { %v487_v31 = vmul.f32 %v20952_v59, %v483_v7 }
0x3dac   :  { %v771_v62 = vpop.permute.xlu0 %770 }
0x3dad   :  { %v775_v44 = vmul.f32 %v20902_v60, %v771_v62  ;;  %492 = vrot.lane.b32.xlu1 %v487_v31, %s17999_s23 }
0x3dae   :  { %v1051_v34 = vpop.permute.xlu1 %1050 }
0x3daf   :  { %v1055_v52 = vmul.f32 %v20972_v54, %v1051_v34  ;;  %780 = vrot.lane.b32.xlu0 %v775_v44, %s17999_s23 }
0x3db0   :  { %v1331_v39 = vpop.permute.xlu0 %1330 }
0x3db1   :  { %v1335_v33 = vmul.f32 %v20917_v8, %v1331_v39  ;;  %1060 = vrot.lane.b32.xlu1 %v1055_v52, %s17999_s23 }
0x3db2   :  { %v3555_v12 = vpop.permute.xlu1 %3554 }
0x3db3   :  { %v3560_v29 = vmul.f32 %v20978_v13, %v3555_v12  ;;  %1340 = vrot.lane.b32.xlu0 %v1335_v33, %s17999_s23 }
0x3db4   :  { %v3835_v59 = vpop.permute.xlu0 %3834 }
0x3db5   :  { %v3840_v60 = vmul.f32 %v20929_v40, %v3835_v59  ;;  %3564 = vrot.lane.b32.xlu1 %v3560_v29, %s17999_s23 }
0x3db6   :  { %v4115_v21 = vpop.permute.xlu1 %4114 }
0x3db7   :  { %v4120_v54 = vmul.f32 %v20983_v2, %v4115_v21  ;;  %3844 = vrot.lane.b32.xlu0 %v3840_v60, %s17999_s23  ;;  %v15211_v2 = vld [vmem:[%s21273_s12] ss:$0 sm:$0xff] }
0x3db8   :  { %v4395_v4 = vpop.permute.xlu0 %4394 }
0x3db9   :  { %v4400_v8 = vmul.f32 %v20936_v22, %v4395_v4  ;;  %4124 = vrot.lane.b32.xlu1 %v4120_v54, %s17999_s23 }
0x3dbb   :  { %4404 = vrot.lane.b32.xlu0 %v4400_v8, %s17999_s23  ;;  %s17969_s23 = scalar_lea.vmem %s14584_s14, 32 }
0x3dbc   :  { %p17970_p0 = scmp.ne.s32.totalorder %s14584_s14, %s17969_s23  ;;  %p17975_p2 = scmp.lt.s32.totalorder %s17969_s23, %s17969_s23 }
0x3dbe   :  { %p17976_p3 = por %p17975_p2, %p17974_p1 }
0x3dc0   :  { %p17977_p4 = pnand %p17976_p3, %p17970_p0 }
0x3e1f   :  { %v493_v13 = vpop.permute.xlu1 %492 }
0x3e21   :  { %v781_v28 = vpop.permute.xlu0 %780 }
0x3e23   :  { %v1061_v23 = vpop.permute.xlu1 %1060 }
0x3e25   :  { %v1341_v30 = vpop.permute.xlu0 %1340 }
0x3e27   :  { %v3565_v24 = vpop.permute.xlu1 %3564 }
0x3e29   :  { %v3845_v40 = vpop.permute.xlu0 %3844 }
0x3e2b   :  { %v4125_v20 = vpop.permute.xlu1 %4124 }
0x3e2d   :  { %v4405_v47 = vpop.permute.xlu0 %4404 }
0x3e51   :  { %v15678_v50 = vpop.f32.mrb[60].mxu1 }
0x3e52   :  { %v15679_v55 = vpop.f32.mrb[61].mxu1 }
0x3e53   :  { %v15680_v9 = vadd.f32 %v15679_v55, %v15678_v50 }
0x3e55   :  { %v14502_v22 = vadd.f32 %v15680_v9, %v15211_v2 }
0x3e57   :  { %v14571_v17 = vpop.f32.mrb[36].mxu0 }
0x3e58   :  { %v14572_v58 = vadd.f32 %v14571_v17, %v14502_v22  ;;  %v14573_v11 = vpop.f32.mrb[37].mxu0 }
0x3e5a   :  { %14576 = vst.msk [vmem:[#allocation4] sm:$0x3] %vm14575_vm5, %v14572_v58 }
0x3e5b   :  { %17980 = shalt.err (!%p17977_p4)
}
0x3e5c   :  { %s17981_s12 = scalar_lea.hbm %s21274_s13, 32 }
0x3e5d   :  { %p17982_p5 = scmp.ne.s32.totalorder %s21274_s13, %s17981_s12  ;;  %p17985_p6 = scmp.lt.u32.totalorder %s17981_s12, %s21274_s13 }
0x3e5f   :  { %p17987_p7 = pnand %p17985_p6, %p17982_p5 }
0x3e61   :  { %17990 = shalt.err (!%p17987_p7)
}
0x3e62   :  { %14586 = dma.vmem_to_hbm [thread:$0]  %s14584_s14, 32, %s21274_s13, [#allocation5]  }
0x3e63   :  { %17991 = dma.done.wait [#allocation5], 32  }
0x3e64   :  { %17992 = vsyncadd [#allocation5], 4294967264 }
0x3e65   :  { %14590 = vsyncpa [#allocation5], 1 }

</bundles_post_ra>
